<compile_context>
chip_gen: v6e
topology: v6e:2x2x1
jax: 0.10.0
libtpu: 0.0.40
codegen_flags: <defaults>
</compile_context>

<pallas_src>
import functools
import math

import numpy as np

import jax
import jax.numpy as jnp
from jax.experimental import pallas as pl
from jax.experimental.pallas import tpu as pltpu

LAYERS = [1, 1, 1]
STRIDES = [1, 2, 2, 2]
KERNEL3 = [0, 0, 0, 0]
NUM_CLASSES = 10
EXPANSION = 4  # BagNet Bottleneck expansion
LANE = 128


def _round_up(v, m):
    return (v + m - 1) // m * m


# --------------------------------------------------------------------------
# Fused Pallas kernel: the entire network for one batch *chunk* per grid step.
# --------------------------------------------------------------------------
def _bagnet_kernel(p_ref, w12_ref,
                   l1wc_ref, l1w2_ref, l1w3_ref,
                   s2_ref, l2wc_ref, l2w2_ref, l2w3_ref,
                   s3_ref, l3wc_hbm, l3w2_hbm, l3w3_hbm,
                   fcw_ref, fcb_ref,
                   o_ref,
                   l3wc_v, l3w2_v, l3w3_v, dma_sem,
                   *, chunk, rows3):
    f32, bf16 = jnp.float32, jnp.bfloat16

    # Manual prefetch of the layer-3 weights: start HBM->VMEM DMAs at kernel
    # entry so they overlap stem/layer1/layer2 compute; wait just before
    # layer 3.  Only grid step 0 copies (the VMEM scratch persists).
    l3_copies = (
        pltpu.make_async_copy(l3wc_hbm, l3wc_v, dma_sem.at[0]),
        pltpu.make_async_copy(l3w2_hbm, l3w2_v, dma_sem.at[1]),
        pltpu.make_async_copy(l3w3_hbm, l3w3_v, dma_sem.at[2]),
    )
    first_step = pl.program_id(0) == 0

    @pl.when(first_step)
    def _start_l3_prefetch():
        for cp in l3_copies:
            cp.start()

    def mm(a, w):
        # bf16 MXU operands, f32 accumulation; epilogues stay in f32.
        return jnp.dot(a.astype(bf16), w, preferred_element_type=f32)

    def relu(v):
        return jnp.maximum(v, 0.0)

    def bottleneck(x, wc, w2, w3, planes, sel=None):
        # Bottleneck (all 1x1 convs here; BN == identity at init, eval mode).
        # Stride-2 (conv2 + downsample) is realised as an exact 0/1
        # block-diagonal row selection (commutes with 1x1 conv + ReLU), in
        # bf16 since both downstream matmuls cast to bf16 anyway.
        if sel is not None:
            x = jnp.dot(sel, x.astype(bf16), preferred_element_type=f32)
        hr = mm(x, wc)                           # fused [downsample | conv1]
        r = hr[:, :planes * EXPANSION]           # residual (downsample) path
        h = relu(hr[:, planes * EXPANSION:])     # conv1 + ReLU
        h = relu(mm(h, w2))                      # conv2 (stride folded) + ReLU
        return relu(mm(h, w3) + r)               # conv3 + residual + ReLU

    # Stem: conv1 (1x1) folded into conv2 (3x3 VALID), then ReLU.  Rows are the
    # whole per-step batch chunk flattened into the matmul M dimension.
    a = relu(jnp.dot(p_ref[0], w12_ref[...], preferred_element_type=f32))

    a = bottleneck(a, l1wc_ref[...], l1w2_ref[...], l1w3_ref[...], 64)
    a = bottleneck(a, l2wc_ref[...], l2w2_ref[...], l2w3_ref[...], 128,
                   s2_ref[...])

    @pl.when(first_step)
    def _wait_l3_prefetch():
        for cp in l3_copies:
            cp.wait()

    a = bottleneck(a, l3wc_v[...], l3w2_v[...], l3w3_v[...], 256, s3_ref[...])

    # Global average pool per sample (samples are contiguous rows3-row blocks):
    # build the tiny averaging matrix in-kernel from iota (no operand DMA).
    samp = jax.lax.broadcasted_iota(jnp.int32, (chunk, chunk * rows3), 0)
    row = jax.lax.broadcasted_iota(jnp.int32, (chunk, chunk * rows3), 1)
    in_block = (row >= samp * rows3) & (row < samp * rows3 + rows3)
    poolm = jnp.where(in_block, 1.0 / rows3, 0.0)
    pooled = jnp.dot(poolm, a, preferred_element_type=f32)          # (chunk, 1024)

    # fc (weights/bias lane-padded to 128 so the store is unmasked).
    logits = mm(pooled, fcw_ref[...]) + fcb_ref[...]                # (chunk, 128)
    o_ref[...] = logits.astype(o_ref.dtype)


# --------------------------------------------------------------------------
# Wrapper: tiny operand prep (raw-input-sized) + the single pallas_call.
# --------------------------------------------------------------------------
def _sel_indices(h, w, stride):
    """Row-major indices kept by [::stride, ::stride] on an h x w grid."""
    ho = (h - 1) // stride + 1
    wo = (w - 1) // stride + 1
    idx = [(i * stride) * w + (j * stride) for i in range(ho) for j in range(wo)]
    return idx, ho, wo


def _block_diag_select(chunk, idx, in_rows_per_sample, in_rows_padded):
    """0/1 block-diagonal selection matrix over `chunk` contiguous samples."""
    r = len(idx)
    s = np.zeros((_round_up(chunk * r, 8), in_rows_padded), np.float32)
    for b in range(chunk):
        for k, src in enumerate(idx):
            s[b * r + k, b * in_rows_per_sample + src] = 1.0
    return s


def forward_pallas(x_nchw, params, *, chunk_size=8):
    """Fused Pallas forward pass (eval mode, BN folded as identity)."""
    # Default-config specialisation checks (all static).
    assert STRIDES[0] == 1
    for lname in ("layer1", "layer2", "layer3"):
        assert len(params[lname]) == 1
        blk = params[lname][0]
        assert blk["w2"].ndim == 2 and "wd" in blk   # kernel3 == 0 everywhere
    # TODO(synk): kernel3 > 0 (3x3 in-block convs), multi-block layers and the
    # patch_size sliding-window loop are not implemented in the fused kernel.

    n, cin, hi, wi = x_nchw.shape
    hp = jax.lax.Precision.HIGHEST
    bf16 = jnp.bfloat16

    # Batch folding: `chunk` samples per grid step share the matmul M dim.
    chunk = max(1, min(n, chunk_size))
    n_chunks = -(-n // chunk)
    n_pad = n_chunks * chunk

    x = jnp.transpose(x_nchw, (0, 2, 3, 1)).astype(jnp.float32)        # NHWC

    # Fold conv1 (1x1, 3->64) into conv2 (3x3 VALID): no nonlinearity between.
    w12 = jnp.einsum("cm,yxmo->yxco", params["conv1"], params["conv2"],
                     precision=hp).reshape(9 * cin, -1)                # (27, 64)

    # im2col of the *raw* 3-channel input on the VALID 3x3 grid (tiny); the
    # chunk's rows are flattened together, padded to sublane multiples.
    gh0, gw0 = hi - 2, wi - 2
    taps = [x[:, dy:dy + gh0, dx:dx + gw0, :]
            for dy in range(3) for dx in range(3)]
    patches = jnp.concatenate(taps, axis=-1).reshape(n, gh0 * gw0, 9 * cin)
    patches = jnp.pad(patches, ((0, n_pad - n), (0, 0), (0, 0)))
    rows0 = gh0 * gw0
    m0 = chunk * rows0
    m0p = _round_up(m0, 8)
    kc = _round_up(9 * cin, 8)
    patches = patches.reshape(n_chunks, m0, 9 * cin)
    patches = jnp.pad(patches,
                      ((0, 0), (0, m0p - m0), (0, kc - 9 * cin))).astype(bf16)
    w12 = jnp.pad(w12, ((0, kc - 9 * cin), (0, 0))).astype(bf16)

    # Exact 0/1 block-diagonal stride-2 row-selection matrices (bf16 is exact
    # for 0/1; padded rows are zero and never re-selected downstream).
    idx2, gh1, gw1 = _sel_indices(gh0, gw0, STRIDES[1])
    s2_np = _block_diag_select(chunk, idx2, rows0, m0p)
    idx3, gh2, gw2 = _sel_indices(gh1, gw1, STRIDES[2])
    s3_np = _block_diag_select(chunk, idx3, len(idx2), s2_np.shape[0])
    rows3 = len(idx3)                        # 16 for a 16x16 input
    assert s3_np.shape[0] == chunk * rows3, (
        "per-sample pooled rows must tile the sublane dim for this input size")

    def bf(a):
        return jnp.asarray(a).astype(bf16)

    l1, l2, l3 = params["layer1"][0], params["layer2"][0], params["layer3"][0]
    # Merge [downsample | conv1]: they share the LHS and the K dimension.
    wcat = lambda blk: jnp.concatenate([blk["wd"], blk["w1"]], axis=1)

    fcw = jnp.pad(params["fc_w"], ((0, 0), (0, LANE - NUM_CLASSES)))
    fcb = jnp.pad(params["fc_b"], ((0, 0), (0, LANE - NUM_CLASSES)))

    operands = [
        patches, w12,
        bf(wcat(l1)), bf(l1["w2"]), bf(l1["w3"]),
        bf(s2_np), bf(wcat(l2)), bf(l2["w2"]), bf(l2["w3"]),
        bf(s3_np), bf(wcat(l3)), bf(l3["w2"]), bf(l3["w3"]),
        bf(fcw), fcb.astype(jnp.float32),
    ]

    def const_spec(a):
        nd = a.ndim
        return pl.BlockSpec(a.shape, lambda c: (0,) * nd)

    any_spec = pl.BlockSpec(memory_space=pl.ANY)
    in_specs = [pl.BlockSpec((1,) + patches.shape[1:], lambda c: (c, 0, 0))]
    in_specs += [const_spec(a) for a in operands[1:10]]
    in_specs += [any_spec, any_spec, any_spec]          # layer3: manual DMA
    in_specs += [const_spec(a) for a in operands[13:]]

    kernel = functools.partial(_bagnet_kernel, chunk=chunk, rows3=rows3)

    out = pl.pallas_call(
        kernel,
        out_shape=jax.ShapeDtypeStruct((n_pad, LANE), jnp.float32),
        grid=(n_chunks,),
        in_specs=in_specs,
        out_specs=pl.BlockSpec((chunk, LANE), lambda c: (c, 0)),
        scratch_shapes=[
            pltpu.VMEM(operands[10].shape, bf16),       # l3 [wd | w1]
            pltpu.VMEM(operands[11].shape, bf16),       # l3 w2
            pltpu.VMEM(operands[12].shape, bf16),       # l3 w3
            pltpu.SemaphoreType.DMA((3,)),
        ],
        compiler_params=pltpu.CompilerParams(
            dimension_semantics=("parallel",),
            vmem_limit_bytes=32 * 1024 * 1024),
    )(*operands)
    return out[:n, :NUM_CLASSES]


# --------------------------------------------------------------------------
# Pure-JAX float32 reference (mirrors the module op-by-op; eval-mode BN = id).
# --------------------------------------------------------------------------
def forward_reference(x_nchw, params):
    hp = jax.lax.Precision.HIGHEST

    def mm(a, w):  # 1x1 conv == matmul over the channel axis
        return jnp.einsum("nhwc,co->nhwo", a, w, precision=hp,
                          preferred_element_type=jnp.float32)

    x = jnp.transpose(x_nchw, (0, 2, 3, 1)).astype(jnp.float32)
    x = mm(x, params["conv1"])                               # conv1
    n, h, w, _ = x.shape
    ho, wo = h - 2, w - 2
    y = jnp.zeros((n, ho, wo, params["conv2"].shape[-1]), jnp.float32)
    for dy in range(3):                                      # conv2 (3x3 VALID)
        for dx in range(3):
            y = y + mm(x[:, dy:dy + ho, dx:dx + wo, :], params["conv2"][dy, dx])
    x = jnp.maximum(y, 0.0)                                  # ReLU

    def bottleneck(x, p, stride):
        h1 = jnp.maximum(mm(x, p["w1"]), 0.0)
        if stride > 1:
            h1 = h1[:, ::stride, ::stride, :]
        h2 = jnp.maximum(mm(h1, p["w2"]), 0.0)
        r = x[:, ::stride, ::stride, :] if stride > 1 else x
        if "wd" in p:
            r = mm(r, p["wd"])
        return jnp.maximum(mm(h2, p["w3"]) + r, 0.0)

    for li, stride in zip((1, 2, 3), STRIDES[:3]):
        for bi, blk in enumerate(params[f"layer{li}"]):
            x = bottleneck(x, blk, stride if bi == 0 else 1)

    pooled = jnp.mean(x, axis=(1, 2))                        # global avg pool
    return jnp.dot(pooled, params["fc_w"], precision=hp,
                   preferred_element_type=jnp.float32) + params["fc_b"]


# --------------------------------------------------------------------------
# Deterministic parameter init (matches the module's init distributions)
# --------------------------------------------------------------------------
def _conv_init(key, kh, kw, cin, cout):
    std = math.sqrt(2.0 / (kh * kw * cout))
    w = jax.random.normal(key, (kh, kw, cin, cout), jnp.float32) * std
    return w[0, 0] if (kh == 1 and kw == 1) else w


def init_params(key):
    keys = iter(jax.random.split(key, 64))
    p = {
        "conv1": _conv_init(next(keys), 1, 1, 3, 64),
        "conv2": _conv_init(next(keys), 3, 3, 64, 64),
    }
    inplanes = 64
    for li, (planes, nblocks, stride, k3) in enumerate(
            zip((64, 128, 256), LAYERS, STRIDES[:3], KERNEL3[:3]), start=1):
        blocks = []
        for bi in range(nblocks):
            ksz = 1 if k3 <= bi else 3
            s = stride if bi == 0 else 1
            blk = {
                "w1": _conv_init(next(keys), 1, 1, inplanes, planes),
                "w2": _conv_init(next(keys), ksz, ksz, planes, planes),
                "w3": _conv_init(next(keys), 1, 1, planes, planes * EXPANSION),
            }
            if bi == 0 and (s != 1 or inplanes != planes * EXPANSION):
                blk["wd"] = _conv_init(next(keys), 1, 1, inplanes,
                                       planes * EXPANSION)
            if bi == 0:
                inplanes = planes * EXPANSION
            blocks.append(blk)
        p[f"layer{li}"] = blocks
    fan_in = 256 * EXPANSION
    bound = 1.0 / math.sqrt(fan_in)
    p["fc_w"] = jax.random.uniform(next(keys), (fan_in, NUM_CLASSES),
                                   jnp.float32, -bound, bound)
    p["fc_b"] = jax.random.uniform(next(keys), (1, NUM_CLASSES),
                                   jnp.float32, -bound, bound)
    return p


if __name__ == "__main__":
    key = jax.random.PRNGKey(0)
    pkey, xkey = jax.random.split(key)
    params = init_params(pkey)
    x = jax.random.normal(xkey, (2, 3, 16, 16), jnp.float32)   # NCHW like PyTorch

    fwd = jax.jit(forward_pallas)
    out = jax.block_until_ready(fwd(x, params))

    ref = jax.jit(forward_reference)(x, params)                # f32 reference
    assert out.shape == (2, NUM_CLASSES), out.shape
    assert jnp.allclose(out, ref, atol=2e-2, rtol=2e-2), (out, ref)
    print("KERNEL_OK")
</pallas_src>

<mosaic_0001>
module attributes {stable_mosaic.version = 11 : i64} {
  func.func @_bagnet_kernel(%arg0: i32, %arg1: memref<1x392x32xbf16, #tpu.memory_space<vmem>>, %arg2: memref<32x64xbf16, #tpu.memory_space<vmem>>, %arg3: memref<64x320xbf16, #tpu.memory_space<vmem>>, %arg4: memref<64x64xbf16, #tpu.memory_space<vmem>>, %arg5: memref<64x256xbf16, #tpu.memory_space<vmem>>, %arg6: memref<104x392xbf16, #tpu.memory_space<vmem>>, %arg7: memref<256x640xbf16, #tpu.memory_space<vmem>>, %arg8: memref<128x128xbf16, #tpu.memory_space<vmem>>, %arg9: memref<128x512xbf16, #tpu.memory_space<vmem>>, %arg10: memref<32x104xbf16, #tpu.memory_space<vmem>>, %arg11: memref<512x1280xbf16, #tpu.memory_space<any>>, %arg12: memref<256x256xbf16, #tpu.memory_space<any>>, %arg13: memref<256x1024xbf16, #tpu.memory_space<any>>, %arg14: memref<1024x128xbf16, #tpu.memory_space<vmem>>, %arg15: memref<1x128xf32, #tpu.memory_space<vmem>>, %arg16: memref<2x128xf32, #tpu.memory_space<vmem>>, %arg17: memref<512x1280xbf16, #tpu.memory_space<vmem>>, %arg18: memref<256x256xbf16, #tpu.memory_space<vmem>>, %arg19: memref<256x1024xbf16, #tpu.memory_space<vmem>>, %arg20: memref<3x!tpu.dma_semaphore, #tpu.memory_space<semaphore_mem>>) attributes {dimension_semantics = [#tpu.dimension_semantics<parallel>], iteration_bounds = array<i64: 1>, scalar_prefetch = 0 : i64, scratch_operands = 4 : i64, tpu.core_type = #tpu.core_type<tc>, window_params = [{transform_indices = @transform_0, window_bounds = array<i64: 1, 392, 32>}, {pipeline_mode = #tpu.pipeline_mode<synchronous>, transform_indices = @transform_1, window_bounds = array<i64: 32, 64>}, {pipeline_mode = #tpu.pipeline_mode<synchronous>, transform_indices = @transform_2, window_bounds = array<i64: 64, 320>}, {pipeline_mode = #tpu.pipeline_mode<synchronous>, transform_indices = @transform_3, window_bounds = array<i64: 64, 64>}, {pipeline_mode = #tpu.pipeline_mode<synchronous>, transform_indices = @transform_4, window_bounds = array<i64: 64, 256>}, {pipeline_mode = #tpu.pipeline_mode<synchronous>, transform_indices = @transform_5, window_bounds = array<i64: 104, 392>}, {pipeline_mode = #tpu.pipeline_mode<synchronous>, transform_indices = @transform_6, window_bounds = array<i64: 256, 640>}, {pipeline_mode = #tpu.pipeline_mode<synchronous>, transform_indices = @transform_7, window_bounds = array<i64: 128, 128>}, {pipeline_mode = #tpu.pipeline_mode<synchronous>, transform_indices = @transform_8, window_bounds = array<i64: 128, 512>}, {pipeline_mode = #tpu.pipeline_mode<synchronous>, transform_indices = @transform_9, window_bounds = array<i64: 32, 104>}, {}, {}, {}, {pipeline_mode = #tpu.pipeline_mode<synchronous>, transform_indices = @transform_13, window_bounds = array<i64: 1024, 128>}, {pipeline_mode = #tpu.pipeline_mode<synchronous>, transform_indices = @transform_14, window_bounds = array<i64: 1, 128>}, {transform_indices = @transform_15, window_bounds = array<i64: 2, 128>}]} {
    %c0_i32 = arith.constant 0 : i32
    %0 = arith.cmpi eq, %arg0, %c0_i32 : i32
    %1 = arith.extui %0 : i1 to i32
    %c0_i32_0 = arith.constant 0 : i32
    %c1_i32 = arith.constant 1 : i32
    %c2_i32 = arith.constant 2 : i32
    %c0_i32_1 = arith.constant 0 : i32
    %2 = arith.cmpi ne, %1, %c0_i32_1 : i32
    scf.if %2 {
      %93 = tpu.memref_slice %arg20[%c0_i32_0] : memref<3x!tpu.dma_semaphore, #tpu.memory_space<semaphore_mem>> -> memref<1x!tpu.dma_semaphore, #tpu.memory_space<semaphore_mem>>
      %94 = tpu.memref_squeeze %93 : memref<1x!tpu.dma_semaphore, #tpu.memory_space<semaphore_mem>> -> memref<!tpu.dma_semaphore, #tpu.memory_space<semaphore_mem>>
      tpu.enqueue_dma source(%arg11 : memref<512x1280xbf16, #tpu.memory_space<any>>) target(%arg17 : memref<512x1280xbf16, #tpu.memory_space<vmem>>) target_semaphore(%94 : memref<!tpu.dma_semaphore, #tpu.memory_space<semaphore_mem>>)
      %95 = tpu.memref_slice %arg20[%c1_i32] : memref<3x!tpu.dma_semaphore, #tpu.memory_space<semaphore_mem>> -> memref<1x!tpu.dma_semaphore, #tpu.memory_space<semaphore_mem>>
      %96 = tpu.memref_squeeze %95 : memref<1x!tpu.dma_semaphore, #tpu.memory_space<semaphore_mem>> -> memref<!tpu.dma_semaphore, #tpu.memory_space<semaphore_mem>>
      tpu.enqueue_dma source(%arg12 : memref<256x256xbf16, #tpu.memory_space<any>>) target(%arg18 : memref<256x256xbf16, #tpu.memory_space<vmem>>) target_semaphore(%96 : memref<!tpu.dma_semaphore, #tpu.memory_space<semaphore_mem>>)
      %97 = tpu.memref_slice %arg20[%c2_i32] : memref<3x!tpu.dma_semaphore, #tpu.memory_space<semaphore_mem>> -> memref<1x!tpu.dma_semaphore, #tpu.memory_space<semaphore_mem>>
      %98 = tpu.memref_squeeze %97 : memref<1x!tpu.dma_semaphore, #tpu.memory_space<semaphore_mem>> -> memref<!tpu.dma_semaphore, #tpu.memory_space<semaphore_mem>>
      tpu.enqueue_dma source(%arg13 : memref<256x1024xbf16, #tpu.memory_space<any>>) target(%arg19 : memref<256x1024xbf16, #tpu.memory_space<vmem>>) target_semaphore(%98 : memref<!tpu.dma_semaphore, #tpu.memory_space<semaphore_mem>>)
    } else {
    }
    %c0 = arith.constant 0 : index
    %c0_2 = arith.constant 0 : index
    %c0_3 = arith.constant 0 : index
    %3 = vector.load %arg1[%c0, %c0_2, %c0_3] : memref<1x392x32xbf16, #tpu.memory_space<vmem>>, vector<1x392x32xbf16>
    %4 = vector.shape_cast %3 : vector<1x392x32xbf16> to vector<392x32xbf16>
    %c0_4 = arith.constant 0 : index
    %c0_5 = arith.constant 0 : index
    %5 = vector.load %arg2[%c0_4, %c0_5] : memref<32x64xbf16, #tpu.memory_space<vmem>>, vector<32x64xbf16>
    %cst = arith.constant dense<0.000000e+00> : vector<392x64xf32>
    %6 = tpu.matmul %4, %5, %cst {dimension_numbers = #tpu.dot_dimension_numbers<[1], [0], [0], [1], [0, 0, 1, 1], [], []>} : vector<392x32xbf16>, vector<32x64xbf16>, vector<392x64xf32> -> vector<392x64xf32>
    %cst_6 = arith.constant 0.000000e+00 : f32
    %7 = vector.broadcast %cst_6 : f32 to vector<392x64xf32>
    %8 = arith.maximumf %6, %7 : vector<392x64xf32>
    %c0_7 = arith.constant 0 : index
    %c0_8 = arith.constant 0 : index
    %9 = vector.load %arg3[%c0_7, %c0_8] : memref<64x320xbf16, #tpu.memory_space<vmem>>, vector<64x320xbf16>
    %c0_9 = arith.constant 0 : index
    %c0_10 = arith.constant 0 : index
    %10 = vector.load %arg4[%c0_9, %c0_10] : memref<64x64xbf16, #tpu.memory_space<vmem>>, vector<64x64xbf16>
    %c0_11 = arith.constant 0 : index
    %c0_12 = arith.constant 0 : index
    %11 = vector.load %arg5[%c0_11, %c0_12] : memref<64x256xbf16, #tpu.memory_space<vmem>>, vector<64x256xbf16>
    %12 = arith.truncf %8 : vector<392x64xf32> to vector<392x64xbf16>
    %cst_13 = arith.constant dense<0.000000e+00> : vector<392x320xf32>
    %13 = tpu.matmul %12, %9, %cst_13 {dimension_numbers = #tpu.dot_dimension_numbers<[1], [0], [0], [1], [0, 0, 1, 1], [], []>} : vector<392x64xbf16>, vector<64x320xbf16>, vector<392x320xf32> -> vector<392x320xf32>
    %14 = vector.extract_strided_slice %13 {offsets = [0, 0], sizes = [392, 256], strides = [1, 1]} : vector<392x320xf32> to vector<392x256xf32>
    %15 = vector.extract_strided_slice %13 {offsets = [0, 256], sizes = [392, 64], strides = [1, 1]} : vector<392x320xf32> to vector<392x64xf32>
    %cst_14 = arith.constant 0.000000e+00 : f32
    %16 = vector.broadcast %cst_14 : f32 to vector<392x64xf32>
    %17 = arith.maximumf %15, %16 : vector<392x64xf32>
    %18 = arith.truncf %17 : vector<392x64xf32> to vector<392x64xbf16>
    %cst_15 = arith.constant dense<0.000000e+00> : vector<392x64xf32>
    %19 = tpu.matmul %18, %10, %cst_15 {dimension_numbers = #tpu.dot_dimension_numbers<[1], [0], [0], [1], [0, 0, 1, 1], [], []>} : vector<392x64xbf16>, vector<64x64xbf16>, vector<392x64xf32> -> vector<392x64xf32>
    %cst_16 = arith.constant 0.000000e+00 : f32
    %20 = vector.broadcast %cst_16 : f32 to vector<392x64xf32>
    %21 = arith.maximumf %19, %20 : vector<392x64xf32>
    %22 = arith.truncf %21 : vector<392x64xf32> to vector<392x64xbf16>
    %cst_17 = arith.constant dense<0.000000e+00> : vector<392x256xf32>
    %23 = tpu.matmul %22, %11, %cst_17 {dimension_numbers = #tpu.dot_dimension_numbers<[1], [0], [0], [1], [0, 0, 1, 1], [], []>} : vector<392x64xbf16>, vector<64x256xbf16>, vector<392x256xf32> -> vector<392x256xf32>
    %24 = arith.addf %23, %14 : vector<392x256xf32>
    %cst_18 = arith.constant 0.000000e+00 : f32
    %25 = vector.broadcast %cst_18 : f32 to vector<392x256xf32>
    %26 = arith.maximumf %24, %25 : vector<392x256xf32>
    %c0_19 = arith.constant 0 : index
    %c0_20 = arith.constant 0 : index
    %27 = vector.load %arg7[%c0_19, %c0_20] : memref<256x640xbf16, #tpu.memory_space<vmem>>, vector<256x640xbf16>
    %c0_21 = arith.constant 0 : index
    %c0_22 = arith.constant 0 : index
    %28 = vector.load %arg8[%c0_21, %c0_22] : memref<128x128xbf16, #tpu.memory_space<vmem>>, vector<128x128xbf16>
    %c0_23 = arith.constant 0 : index
    %c0_24 = arith.constant 0 : index
    %29 = vector.load %arg9[%c0_23, %c0_24] : memref<128x512xbf16, #tpu.memory_space<vmem>>, vector<128x512xbf16>
    %c0_25 = arith.constant 0 : index
    %c0_26 = arith.constant 0 : index
    %30 = vector.load %arg6[%c0_25, %c0_26] : memref<104x392xbf16, #tpu.memory_space<vmem>>, vector<104x392xbf16>
    %31 = arith.truncf %26 : vector<392x256xf32> to vector<392x256xbf16>
    %cst_27 = arith.constant dense<0.000000e+00> : vector<104x256xf32>
    %32 = tpu.matmul %30, %31, %cst_27 {dimension_numbers = #tpu.dot_dimension_numbers<[1], [0], [0], [1], [0, 0, 1, 1], [], []>} : vector<104x392xbf16>, vector<392x256xbf16>, vector<104x256xf32> -> vector<104x256xf32>
    %33 = arith.truncf %32 : vector<104x256xf32> to vector<104x256xbf16>
    %cst_28 = arith.constant dense<0.000000e+00> : vector<104x640xf32>
    %34 = tpu.matmul %33, %27, %cst_28 {dimension_numbers = #tpu.dot_dimension_numbers<[1], [0], [0], [1], [0, 0, 1, 1], [], []>} : vector<104x256xbf16>, vector<256x640xbf16>, vector<104x640xf32> -> vector<104x640xf32>
    %35 = vector.extract_strided_slice %34 {offsets = [0, 0], sizes = [104, 512], strides = [1, 1]} : vector<104x640xf32> to vector<104x512xf32>
    %36 = vector.extract_strided_slice %34 {offsets = [0, 512], sizes = [104, 128], strides = [1, 1]} : vector<104x640xf32> to vector<104x128xf32>
    %cst_29 = arith.constant 0.000000e+00 : f32
    %37 = vector.broadcast %cst_29 : f32 to vector<104x128xf32>
    %38 = arith.maximumf %36, %37 : vector<104x128xf32>
    %39 = arith.truncf %38 : vector<104x128xf32> to vector<104x128xbf16>
    %cst_30 = arith.constant dense<0.000000e+00> : vector<104x128xf32>
    %40 = tpu.matmul %39, %28, %cst_30 {dimension_numbers = #tpu.dot_dimension_numbers<[1], [0], [0], [1], [0, 0, 1, 1], [], []>} : vector<104x128xbf16>, vector<128x128xbf16>, vector<104x128xf32> -> vector<104x128xf32>
    %cst_31 = arith.constant 0.000000e+00 : f32
    %41 = vector.broadcast %cst_31 : f32 to vector<104x128xf32>
    %42 = arith.maximumf %40, %41 : vector<104x128xf32>
    %43 = arith.truncf %42 : vector<104x128xf32> to vector<104x128xbf16>
    %cst_32 = arith.constant dense<0.000000e+00> : vector<104x512xf32>
    %44 = tpu.matmul %43, %29, %cst_32 {dimension_numbers = #tpu.dot_dimension_numbers<[1], [0], [0], [1], [0, 0, 1, 1], [], []>} : vector<104x128xbf16>, vector<128x512xbf16>, vector<104x512xf32> -> vector<104x512xf32>
    %45 = arith.addf %44, %35 : vector<104x512xf32>
    %cst_33 = arith.constant 0.000000e+00 : f32
    %46 = vector.broadcast %cst_33 : f32 to vector<104x512xf32>
    %47 = arith.maximumf %45, %46 : vector<104x512xf32>
    %48 = arith.extui %0 : i1 to i32
    %c0_i32_34 = arith.constant 0 : i32
    %c1_i32_35 = arith.constant 1 : i32
    %c2_i32_36 = arith.constant 2 : i32
    %c0_i32_37 = arith.constant 0 : i32
    %49 = arith.cmpi ne, %48, %c0_i32_37 : i32
    scf.if %49 {
      %93 = tpu.memref_slice %arg20[%c0_i32_34] : memref<3x!tpu.dma_semaphore, #tpu.memory_space<semaphore_mem>> -> memref<1x!tpu.dma_semaphore, #tpu.memory_space<semaphore_mem>>
      %94 = tpu.memref_squeeze %93 : memref<1x!tpu.dma_semaphore, #tpu.memory_space<semaphore_mem>> -> memref<!tpu.dma_semaphore, #tpu.memory_space<semaphore_mem>>
      tpu.wait_dma2 semaphore(%94 : memref<!tpu.dma_semaphore, #tpu.memory_space<semaphore_mem>>) src(%arg11 : memref<512x1280xbf16, #tpu.memory_space<any>>) dst(%arg17 : memref<512x1280xbf16, #tpu.memory_space<vmem>>)
      %95 = tpu.memref_slice %arg20[%c1_i32_35] : memref<3x!tpu.dma_semaphore, #tpu.memory_space<semaphore_mem>> -> memref<1x!tpu.dma_semaphore, #tpu.memory_space<semaphore_mem>>
      %96 = tpu.memref_squeeze %95 : memref<1x!tpu.dma_semaphore, #tpu.memory_space<semaphore_mem>> -> memref<!tpu.dma_semaphore, #tpu.memory_space<semaphore_mem>>
      tpu.wait_dma2 semaphore(%96 : memref<!tpu.dma_semaphore, #tpu.memory_space<semaphore_mem>>) src(%arg12 : memref<256x256xbf16, #tpu.memory_space<any>>) dst(%arg18 : memref<256x256xbf16, #tpu.memory_space<vmem>>)
      %97 = tpu.memref_slice %arg20[%c2_i32_36] : memref<3x!tpu.dma_semaphore, #tpu.memory_space<semaphore_mem>> -> memref<1x!tpu.dma_semaphore, #tpu.memory_space<semaphore_mem>>
      %98 = tpu.memref_squeeze %97 : memref<1x!tpu.dma_semaphore, #tpu.memory_space<semaphore_mem>> -> memref<!tpu.dma_semaphore, #tpu.memory_space<semaphore_mem>>
      tpu.wait_dma2 semaphore(%98 : memref<!tpu.dma_semaphore, #tpu.memory_space<semaphore_mem>>) src(%arg13 : memref<256x1024xbf16, #tpu.memory_space<any>>) dst(%arg19 : memref<256x1024xbf16, #tpu.memory_space<vmem>>)
    } else {
    }
    %c0_38 = arith.constant 0 : index
    %c0_39 = arith.constant 0 : index
    %50 = vector.load %arg17[%c0_38, %c0_39] : memref<512x1280xbf16, #tpu.memory_space<vmem>>, vector<512x1280xbf16>
    %c0_40 = arith.constant 0 : index
    %c0_41 = arith.constant 0 : index
    %51 = vector.load %arg18[%c0_40, %c0_41] : memref<256x256xbf16, #tpu.memory_space<vmem>>, vector<256x256xbf16>
    %c0_42 = arith.constant 0 : index
    %c0_43 = arith.constant 0 : index
    %52 = vector.load %arg19[%c0_42, %c0_43] : memref<256x1024xbf16, #tpu.memory_space<vmem>>, vector<256x1024xbf16>
    %c0_44 = arith.constant 0 : index
    %c0_45 = arith.constant 0 : index
    %53 = vector.load %arg10[%c0_44, %c0_45] : memref<32x104xbf16, #tpu.memory_space<vmem>>, vector<32x104xbf16>
    %54 = arith.truncf %47 : vector<104x512xf32> to vector<104x512xbf16>
    %cst_46 = arith.constant dense<0.000000e+00> : vector<32x512xf32>
    %55 = tpu.matmul %53, %54, %cst_46 {dimension_numbers = #tpu.dot_dimension_numbers<[1], [0], [0], [1], [0, 0, 1, 1], [], []>} : vector<32x104xbf16>, vector<104x512xbf16>, vector<32x512xf32> -> vector<32x512xf32>
    %56 = arith.truncf %55 : vector<32x512xf32> to vector<32x512xbf16>
    %cst_47 = arith.constant dense<0.000000e+00> : vector<32x1280xf32>
    %57 = tpu.matmul %56, %50, %cst_47 {dimension_numbers = #tpu.dot_dimension_numbers<[1], [0], [0], [1], [0, 0, 1, 1], [], []>} : vector<32x512xbf16>, vector<512x1280xbf16>, vector<32x1280xf32> -> vector<32x1280xf32>
    %58 = vector.extract_strided_slice %57 {offsets = [0, 0], sizes = [32, 1024], strides = [1, 1]} : vector<32x1280xf32> to vector<32x1024xf32>
    %59 = vector.extract_strided_slice %57 {offsets = [0, 1024], sizes = [32, 256], strides = [1, 1]} : vector<32x1280xf32> to vector<32x256xf32>
    %cst_48 = arith.constant 0.000000e+00 : f32
    %60 = vector.broadcast %cst_48 : f32 to vector<32x256xf32>
    %61 = arith.maximumf %59, %60 : vector<32x256xf32>
    %62 = arith.truncf %61 : vector<32x256xf32> to vector<32x256xbf16>
    %cst_49 = arith.constant dense<0.000000e+00> : vector<32x256xf32>
    %63 = tpu.matmul %62, %51, %cst_49 {dimension_numbers = #tpu.dot_dimension_numbers<[1], [0], [0], [1], [0, 0, 1, 1], [], []>} : vector<32x256xbf16>, vector<256x256xbf16>, vector<32x256xf32> -> vector<32x256xf32>
    %cst_50 = arith.constant 0.000000e+00 : f32
    %64 = vector.broadcast %cst_50 : f32 to vector<32x256xf32>
    %65 = arith.maximumf %63, %64 : vector<32x256xf32>
    %66 = arith.truncf %65 : vector<32x256xf32> to vector<32x256xbf16>
    %cst_51 = arith.constant dense<0.000000e+00> : vector<32x1024xf32>
    %67 = tpu.matmul %66, %52, %cst_51 {dimension_numbers = #tpu.dot_dimension_numbers<[1], [0], [0], [1], [0, 0, 1, 1], [], []>} : vector<32x256xbf16>, vector<256x1024xbf16>, vector<32x1024xf32> -> vector<32x1024xf32>
    %68 = arith.addf %67, %58 : vector<32x1024xf32>
    %cst_52 = arith.constant 0.000000e+00 : f32
    %69 = vector.broadcast %cst_52 : f32 to vector<32x1024xf32>
    %70 = arith.maximumf %68, %69 : vector<32x1024xf32>
    %71 = tpu.iota {dimensions = array<i32: 0>} : vector<2x32xi32>
    %72 = tpu.iota {dimensions = array<i32: 1>} : vector<2x32xi32>
    %c16_i32 = arith.constant 16 : i32
    %73 = vector.broadcast %c16_i32 : i32 to vector<2x32xi32>
    %74 = arith.muli %71, %73 : vector<2x32xi32>
    %75 = arith.cmpi sge, %72, %74 : vector<2x32xi32>
    %c16_i32_53 = arith.constant 16 : i32
    %76 = vector.broadcast %c16_i32_53 : i32 to vector<2x32xi32>
    %77 = arith.muli %71, %76 : vector<2x32xi32>
    %c16_i32_54 = arith.constant 16 : i32
    %78 = vector.broadcast %c16_i32_54 : i32 to vector<2x32xi32>
    %79 = arith.addi %77, %78 : vector<2x32xi32>
    %80 = arith.cmpi slt, %72, %79 : vector<2x32xi32>
    %81 = arith.andi %75, %80 : vector<2x32xi1>
    %cst_55 = arith.constant 6.250000e-02 : f32
    %cst_56 = arith.constant 0.000000e+00 : f32
    %82 = vector.broadcast %cst_55 : f32 to vector<2x32xf32>
    %83 = vector.broadcast %cst_56 : f32 to vector<2x32xf32>
    %84 = arith.select %81, %82, %83 : vector<2x32xi1>, vector<2x32xf32>
    %cst_57 = arith.constant dense<0.000000e+00> : vector<2x1024xf32>
    %85 = tpu.matmul %84, %70, %cst_57 {dimension_numbers = #tpu.dot_dimension_numbers<[1], [0], [0], [1], [0, 0, 1, 1], [], []>} : vector<2x32xf32>, vector<32x1024xf32>, vector<2x1024xf32> -> vector<2x1024xf32>
    %c0_58 = arith.constant 0 : index
    %c0_59 = arith.constant 0 : index
    %86 = vector.load %arg14[%c0_58, %c0_59] : memref<1024x128xbf16, #tpu.memory_space<vmem>>, vector<1024x128xbf16>
    %87 = arith.truncf %85 : vector<2x1024xf32> to vector<2x1024xbf16>
    %cst_60 = arith.constant dense<0.000000e+00> : vector<2x128xf32>
    %88 = tpu.matmul %87, %86, %cst_60 {dimension_numbers = #tpu.dot_dimension_numbers<[1], [0], [0], [1], [0, 0, 1, 1], [], []>} : vector<2x1024xbf16>, vector<1024x128xbf16>, vector<2x128xf32> -> vector<2x128xf32>
    %c0_61 = arith.constant 0 : index
    %c0_62 = arith.constant 0 : index
    %89 = vector.load %arg15[%c0_61, %c0_62] : memref<1x128xf32, #tpu.memory_space<vmem>>, vector<1x128xf32>
    %90 = vector.broadcast %89 : vector<1x128xf32> to vector<2x128xf32>
    %91 = arith.addf %88, %90 : vector<2x128xf32>
    %c0_63 = arith.constant 0 : index
    %c0_64 = arith.constant 0 : index
    %92 = vector.load %arg16[%c0_63, %c0_64] : memref<2x128xf32, #tpu.memory_space<vmem>>, vector<2x128xf32>
    tpu.vector_store %arg16[%c0_63, %c0_64], %91 {strides = array<i32>} : memref<2x128xf32, #tpu.memory_space<vmem>>, vector<2x128xf32>,
    return
  }
  func.func @transform_0(%arg0: i32) -> (i32, i32, i32) {
    %c0_i32 = arith.constant 0 : i32
    %c0_i32_0 = arith.constant 0 : i32
    %c0_i32_1 = arith.constant 0 : i32
    return %arg0, %c0_i32, %c0_i32_0 : i32, i32, i32
  }
  func.func @transform_1(%arg0: i32) -> (i32, i32) {
    %c0_i32 = arith.constant 0 : i32
    %c0_i32_0 = arith.constant 0 : i32
    %c0_i32_1 = arith.constant 0 : i32
    return %c0_i32, %c0_i32_0 : i32, i32
  }
  func.func @transform_2(%arg0: i32) -> (i32, i32) {
    %c0_i32 = arith.constant 0 : i32
    %c0_i32_0 = arith.constant 0 : i32
    %c0_i32_1 = arith.constant 0 : i32
    return %c0_i32, %c0_i32_0 : i32, i32
  }
  func.func @transform_3(%arg0: i32) -> (i32, i32) {
    %c0_i32 = arith.constant 0 : i32
    %c0_i32_0 = arith.constant 0 : i32
    %c0_i32_1 = arith.constant 0 : i32
    return %c0_i32, %c0_i32_0 : i32, i32
  }
  func.func @transform_4(%arg0: i32) -> (i32, i32) {
    %c0_i32 = arith.constant 0 : i32
    %c0_i32_0 = arith.constant 0 : i32
    %c0_i32_1 = arith.constant 0 : i32
    return %c0_i32, %c0_i32_0 : i32, i32
  }
  func.func @transform_5(%arg0: i32) -> (i32, i32) {
    %c0_i32 = arith.constant 0 : i32
    %c0_i32_0 = arith.constant 0 : i32
    %c0_i32_1 = arith.constant 0 : i32
    return %c0_i32, %c0_i32_0 : i32, i32
  }
  func.func @transform_6(%arg0: i32) -> (i32, i32) {
    %c0_i32 = arith.constant 0 : i32
    %c0_i32_0 = arith.constant 0 : i32
    %c0_i32_1 = arith.constant 0 : i32
    return %c0_i32, %c0_i32_0 : i32, i32
  }
  func.func @transform_7(%arg0: i32) -> (i32, i32) {
    %c0_i32 = arith.constant 0 : i32
    %c0_i32_0 = arith.constant 0 : i32
    %c0_i32_1 = arith.constant 0 : i32
    return %c0_i32, %c0_i32_0 : i32, i32
  }
  func.func @transform_8(%arg0: i32) -> (i32, i32) {
    %c0_i32 = arith.constant 0 : i32
    %c0_i32_0 = arith.constant 0 : i32
    %c0_i32_1 = arith.constant 0 : i32
    return %c0_i32, %c0_i32_0 : i32, i32
  }
  func.func @transform_9(%arg0: i32) -> (i32, i32) {
    %c0_i32 = arith.constant 0 : i32
    %c0_i32_0 = arith.constant 0 : i32
    %c0_i32_1 = arith.constant 0 : i32
    return %c0_i32, %c0_i32_0 : i32, i32
  }
  func.func @transform_13(%arg0: i32) -> (i32, i32) {
    %c0_i32 = arith.constant 0 : i32
    %c0_i32_0 = arith.constant 0 : i32
    %c0_i32_1 = arith.constant 0 : i32
    return %c0_i32, %c0_i32_0 : i32, i32
  }
  func.func @transform_14(%arg0: i32) -> (i32, i32) {
    %c0_i32 = arith.constant 0 : i32
    %c0_i32_0 = arith.constant 0 : i32
    %c0_i32_1 = arith.constant 0 : i32
    return %c0_i32, %c0_i32_0 : i32, i32
  }
  func.func @transform_15(%arg0: i32) -> (i32, i32) {
    %c0_i32 = arith.constant 0 : i32
    %c0_i32_0 = arith.constant 0 : i32
    return %arg0, %c0_i32 : i32, i32
  }
}

</mosaic_0001>

<bundles_post_ra>
// kernel: forward_pallas.1
= control target key start
LH: loop header
LB: loop body
LE: loop exit
PB: predicated region body
PF: predicated region fallthrough
CT: control target
= control target key end

     0   :  { %20 = vsyncpa [#allocation7], 0  ;;  %s17826_s0 = inlined_call_operand.vmem [shape: bf16[1,392,32], index: 0, kind: input, shape index: {}]   ;;  %s17827_s1 = inlined_call_operand.vmem [shape: bf16[32,64], index: 1, kind: input, shape index: {}]   ;;  %s17828_s2 = inlined_call_operand.vmem [shape: bf16[64,320], index: 2, kind: input, shape index: {}]   ;;  %s17829_s3 = inlined_call_operand.vmem [shape: bf16[64,64], index: 3, kind: input, shape index: {}]   ;;  %s17830_s4 = inlined_call_operand.vmem [shape: bf16[64,256], index: 4, kind: input, shape index: {}]   ;;  %s17831_s5 = inlined_call_operand.vmem [shape: bf16[104,392], index: 5, kind: input, shape index: {}]   ;;  %s17832_s6 = inlined_call_operand.vmem [shape: bf16[256,640], index: 6, kind: input, shape index: {}]   ;;  %s17833_s7 = inlined_call_operand.vmem [shape: bf16[128,128], index: 7, kind: input, shape index: {}]   ;;  %s17834_s8 = inlined_call_operand.vmem [shape: bf16[128,512], index: 8, kind: input, shape index: {}]   ;;  %s17835_s9 = inlined_call_operand.vmem [shape: bf16[32,104], index: 9, kind: input, shape index: {}]   ;;  %s17836_s10 = inlined_call_operand.vmem [shape: bf16[512,1280], index: 10, kind: input, shape index: {}]   ;;  %s17837_s11 = inlined_call_operand.vmem [shape: bf16[256,256], index: 11, kind: input, shape index: {}]   ;;  %s17838_s12 = inlined_call_operand.vmem [shape: bf16[256,1024], index: 12, kind: input, shape index: {}]   ;;  %s17839_s13 = inlined_call_operand.vmem [shape: bf16[1024,128], index: 13, kind: input, shape index: {}]   ;;  %s17840_s14 = inlined_call_operand.vmem [shape: f32[1,128], index: 14, kind: input, shape index: {}]   ;;  %s17841_s15 = inlined_call_operand.hbm [shape: f32[2,128], index: 15, kind: output, shape index: {}]  }
   0x1   :  { %v12170_v0 = vld [vmem:[%s17836_s10] sm:$0xff]  ;;  %v12175_v1 = vld [vmem:[%s17836_s10 + $0x8] sm:$0xff]  ;;  %v12180_v2 = vld [vmem:[%s17836_s10 + $0x10] sm:$0xff] }
   0x2   :  { %18334 = vst [vmem:[#allocation15_spill] sm:$0xff] %v12170_v0  ;;  %18335 = vst [vmem:[#allocation16_spill] sm:$0xff] %v12175_v1  ;;  %v12185_v3 = vld [vmem:[%s17836_s10 + $0x18] sm:$0xff]  ;;  %v12190_v4 = vld [vmem:[%s17836_s10 + $0x20] sm:$0xff] }
   0x3   :  { %18336 = vst [vmem:[#allocation17_spill] sm:$0xff] %v12180_v2  ;;  %18337 = vst [vmem:[#allocation18_spill] sm:$0xff] %v12185_v3  ;;  %v12195_v5 = vld [vmem:[%s17836_s10 + $0x28] sm:$0xff]  ;;  %v12200_v6 = vld [vmem:[%s17836_s10 + $0x30] sm:$0xff] }
   0x4   :  { %18338 = vst [vmem:[#allocation19_spill] sm:$0xff] %v12190_v4  ;;  %18339 = vst [vmem:[#allocation20_spill] sm:$0xff] %v12195_v5  ;;  %v12205_v7 = vld [vmem:[%s17836_s10 + $0x38] sm:$0xff]  ;;  %v12210_v8 = vld [vmem:[%s17836_s10 + $0x40] sm:$0xff] }
   0x5   :  { %18340 = vst [vmem:[#allocation21_spill] sm:$0xff] %v12200_v6  ;;  %18341 = vst [vmem:[#allocation22_spill] sm:$0xff] %v12205_v7  ;;  %v12215_v9 = vld [vmem:[%s17836_s10 + $0x48] sm:$0xff]  ;;  %v12220_v10 = vld [vmem:[%s17836_s10 + $0x50] sm:$0xff] }
   0x6   :  { %18342 = vst [vmem:[#allocation23_spill] sm:$0xff] %v12210_v8  ;;  %18343 = vst [vmem:[#allocation24_spill] sm:$0xff] %v12215_v9  ;;  %v12225_v11 = vld [vmem:[%s17836_s10 + $0x58] sm:$0xff]  ;;  %v12230_v12 = vld [vmem:[%s17836_s10 + $0x60] sm:$0xff] }
   0x7   :  { %18344 = vst [vmem:[#allocation25_spill] sm:$0xff] %v12220_v10  ;;  %18345 = vst [vmem:[#allocation26_spill] sm:$0xff] %v12225_v11  ;;  %v12235_v13 = vld [vmem:[%s17836_s10 + $0x68] sm:$0xff]  ;;  %v12240_v14 = vld [vmem:[%s17836_s10 + $0x70] sm:$0xff] }
   0x8   :  { %18346 = vst [vmem:[#allocation27_spill] sm:$0xff] %v12230_v12  ;;  %18347 = vst [vmem:[#allocation28_spill] sm:$0xff] %v12235_v13  ;;  %v12245_v15 = vld [vmem:[%s17836_s10 + $0x78] sm:$0xff]  ;;  %v12250_v16 = vld [vmem:[%s17836_s10 + $0x80] sm:$0xff] }
   0x9   :  { %18348 = vst [vmem:[#allocation29_spill] sm:$0xff] %v12240_v14  ;;  %18349 = vst [vmem:[#allocation30_spill] sm:$0xff] %v12245_v15  ;;  %v12255_v17 = vld [vmem:[%s17836_s10 + $0x88] sm:$0xff]  ;;  %v12260_v18 = vld [vmem:[%s17836_s10 + $0x90] sm:$0xff] }
   0xa   :  { %18350 = vst [vmem:[#allocation31_spill] sm:$0xff] %v12250_v16  ;;  %18351 = vst [vmem:[#allocation32_spill] sm:$0xff] %v12255_v17  ;;  %v12265_v19 = vld [vmem:[%s17836_s10 + $0x98] sm:$0xff]  ;;  %v12270_v20 = vld [vmem:[%s17836_s10 + $0xa0] sm:$0xff] }
   0xb   :  { %18352 = vst [vmem:[#allocation33_spill] sm:$0xff] %v12260_v18  ;;  %18353 = vst [vmem:[#allocation34_spill] sm:$0xff] %v12265_v19  ;;  %v12275_v21 = vld [vmem:[%s17836_s10 + $0xa8] sm:$0xff]  ;;  %v12280_v22 = vld [vmem:[%s17836_s10 + $0xb0] sm:$0xff] }
   0xc   :  { %18354 = vst [vmem:[#allocation35_spill] sm:$0xff] %v12270_v20  ;;  %18355 = vst [vmem:[#allocation36_spill] sm:$0xff] %v12275_v21  ;;  %v12285_v23 = vld [vmem:[%s17836_s10 + $0xb8] sm:$0xff]  ;;  %v12290_v24 = vld [vmem:[%s17836_s10 + $0xc0] sm:$0xff] }
   0xd   :  { %18356 = vst [vmem:[#allocation37_spill] sm:$0xff] %v12280_v22  ;;  %18357 = vst [vmem:[#allocation38_spill] sm:$0xff] %v12285_v23  ;;  %v12295_v25 = vld [vmem:[%s17836_s10 + $0xc8] sm:$0xff]  ;;  %v12300_v26 = vld [vmem:[%s17836_s10 + $0xd0] sm:$0xff] }
   0xe   :  { %18358 = vst [vmem:[#allocation39_spill] sm:$0xff] %v12290_v24  ;;  %18359 = vst [vmem:[#allocation40_spill] sm:$0xff] %v12295_v25  ;;  %v12305_v27 = vld [vmem:[%s17836_s10 + $0xd8] sm:$0xff]  ;;  %v12310_v28 = vld [vmem:[%s17836_s10 + $0xe0] sm:$0xff] }
   0xf   :  { %18360 = vst [vmem:[#allocation41_spill] sm:$0xff] %v12300_v26  ;;  %18361 = vst [vmem:[#allocation42_spill] sm:$0xff] %v12305_v27  ;;  %v12315_v29 = vld [vmem:[%s17836_s10 + $0xe8] sm:$0xff]  ;;  %v12320_v30 = vld [vmem:[%s17836_s10 + $0xf0] sm:$0xff] }
  0x10   :  { %18362 = vst [vmem:[#allocation43_spill] sm:$0xff] %v12310_v28  ;;  %18363 = vst [vmem:[#allocation44_spill] sm:$0xff] %v12315_v29  ;;  %v12325_v31 = vld [vmem:[%s17836_s10 + $0xf8] sm:$0xff]  ;;  %v12330_v32 = vld [vmem:[%s17836_s10 + $0x100] sm:$0xff] }
  0x11   :  { %18364 = vst [vmem:[#allocation45_spill] sm:$0xff] %v12320_v30  ;;  %18365 = vst [vmem:[#allocation46_spill] sm:$0xff] %v12325_v31  ;;  %v12335_v33 = vld [vmem:[%s17836_s10 + $0x108] sm:$0xff]  ;;  %v12340_v34 = vld [vmem:[%s17836_s10 + $0x110] sm:$0xff] }
  0x12   :  { %18366 = vst [vmem:[#allocation47_spill] sm:$0xff] %v12330_v32  ;;  %18367 = vst [vmem:[#allocation48_spill] sm:$0xff] %v12335_v33  ;;  %v12345_v35 = vld [vmem:[%s17836_s10 + $0x118] sm:$0xff]  ;;  %v12350_v36 = vld [vmem:[%s17836_s10 + $0x120] sm:$0xff] }
  0x13   :  { %18368 = vst [vmem:[#allocation49_spill] sm:$0xff] %v12340_v34  ;;  %18369 = vst [vmem:[#allocation50_spill] sm:$0xff] %v12345_v35  ;;  %v12355_v37 = vld [vmem:[%s17836_s10 + $0x128] sm:$0xff]  ;;  %v12360_v38 = vld [vmem:[%s17836_s10 + $0x130] sm:$0xff] }
  0x14   :  { %18370 = vst [vmem:[#allocation51_spill] sm:$0xff] %v12350_v36  ;;  %18371 = vst [vmem:[#allocation52_spill] sm:$0xff] %v12355_v37  ;;  %v12365_v39 = vld [vmem:[%s17836_s10 + $0x138] sm:$0xff]  ;;  %v12370_v40 = vld [vmem:[%s17836_s10 + $0x140] sm:$0xff] }
  0x15   :  { %18372 = vst [vmem:[#allocation53_spill] sm:$0xff] %v12360_v38  ;;  %18373 = vst [vmem:[#allocation54_spill] sm:$0xff] %v12365_v39  ;;  %v12375_v41 = vld [vmem:[%s17836_s10 + $0x148] sm:$0xff]  ;;  %v12380_v42 = vld [vmem:[%s17836_s10 + $0x150] sm:$0xff] }
  0x16   :  { %18374 = vst [vmem:[#allocation55_spill] sm:$0xff] %v12370_v40  ;;  %18375 = vst [vmem:[#allocation56_spill] sm:$0xff] %v12375_v41  ;;  %v12385_v43 = vld [vmem:[%s17836_s10 + $0x158] sm:$0xff]  ;;  %v12390_v44 = vld [vmem:[%s17836_s10 + $0x160] sm:$0xff] }
  0x17   :  { %18376 = vst [vmem:[#allocation57_spill] sm:$0xff] %v12380_v42  ;;  %18377 = vst [vmem:[#allocation58_spill] sm:$0xff] %v12385_v43  ;;  %v12395_v45 = vld [vmem:[%s17836_s10 + $0x168] sm:$0xff]  ;;  %v12400_v46 = vld [vmem:[%s17836_s10 + $0x170] sm:$0xff] }
  0x18   :  { %18378 = vst [vmem:[#allocation59_spill] sm:$0xff] %v12390_v44  ;;  %18379 = vst [vmem:[#allocation60_spill] sm:$0xff] %v12395_v45  ;;  %v12405_v47 = vld [vmem:[%s17836_s10 + $0x178] sm:$0xff]  ;;  %v12410_v48 = vld [vmem:[%s17836_s10 + $0x180] sm:$0xff] }
  0x19   :  { %18380 = vst [vmem:[#allocation61_spill] sm:$0xff] %v12400_v46  ;;  %18381 = vst [vmem:[#allocation62_spill] sm:$0xff] %v12405_v47  ;;  %v12415_v49 = vld [vmem:[%s17836_s10 + $0x188] sm:$0xff]  ;;  %v12420_v50 = vld [vmem:[%s17836_s10 + $0x190] sm:$0xff] }
  0x1a   :  { %18382 = vst [vmem:[#allocation63_spill] sm:$0xff] %v12410_v48  ;;  %18383 = vst [vmem:[#allocation64_spill] sm:$0xff] %v12415_v49  ;;  %v12425_v51 = vld [vmem:[%s17836_s10 + $0x198] sm:$0xff]  ;;  %v12430_v52 = vld [vmem:[%s17836_s10 + $0x1a0] sm:$0xff] }
  0x1b   :  { %18384 = vst [vmem:[#allocation65_spill] sm:$0xff] %v12420_v50  ;;  %18385 = vst [vmem:[#allocation66_spill] sm:$0xff] %v12425_v51  ;;  %v12435_v53 = vld [vmem:[%s17836_s10 + $0x1a8] sm:$0xff]  ;;  %v12440_v54 = vld [vmem:[%s17836_s10 + $0x1b0] sm:$0xff] }
  0x1c   :  { %18386 = vst [vmem:[#allocation67_spill] sm:$0xff] %v12430_v52  ;;  %18387 = vst [vmem:[#allocation68_spill] sm:$0xff] %v12435_v53  ;;  %v12445_v55 = vld [vmem:[%s17836_s10 + $0x1b8] sm:$0xff]  ;;  %v12450_v56 = vld [vmem:[%s17836_s10 + $0x1c0] sm:$0xff] }
  0x1d   :  { %18388 = vst [vmem:[#allocation69_spill] sm:$0xff] %v12440_v54  ;;  %18389 = vst [vmem:[#allocation70_spill] sm:$0xff] %v12445_v55  ;;  %v12455_v57 = vld [vmem:[%s17836_s10 + $0x1c8] sm:$0xff]  ;;  %v12460_v58 = vld [vmem:[%s17836_s10 + $0x1d0] sm:$0xff] }
  0x1e   :  { %18390 = vst [vmem:[#allocation71_spill] sm:$0xff] %v12450_v56  ;;  %18391 = vst [vmem:[#allocation72_spill] sm:$0xff] %v12455_v57  ;;  %v12465_v59 = vld [vmem:[%s17836_s10 + $0x1d8] sm:$0xff]  ;;  %v12470_v60 = vld [vmem:[%s17836_s10 + $0x1e0] sm:$0xff] }
  0x1f   :  { %18392 = vst [vmem:[#allocation73_spill] sm:$0xff] %v12460_v58  ;;  %18393 = vst [vmem:[#allocation74_spill] sm:$0xff] %v12465_v59  ;;  %v12475_v61 = vld [vmem:[%s17836_s10 + $0x1e8] sm:$0xff]  ;;  %v12480_v62 = vld [vmem:[%s17836_s10 + $0x1f0] sm:$0xff] }
  0x20   :  { %18394 = vst [vmem:[#allocation75_spill] sm:$0xff] %v12470_v60  ;;  %18395 = vst [vmem:[#allocation76_spill] sm:$0xff] %v12475_v61  ;;  %v12485_v63 = vld [vmem:[%s17836_s10 + $0x1f8] sm:$0xff]  ;;  %v12490_v4 = vld [vmem:[%s17836_s10 + $0x200] sm:$0xff] }
  0x21   :  { %18396 = vst [vmem:[#allocation77_spill] sm:$0xff] %v12480_v62  ;;  %18397 = vst [vmem:[#allocation78_spill] sm:$0xff] %v12485_v63  ;;  %v12495_v9 = vld [vmem:[%s17836_s10 + $0x208] sm:$0xff]  ;;  %v12500_v14 = vld [vmem:[%s17836_s10 + $0x210] sm:$0xff] }
  0x22   :  { %18398 = vst [vmem:[#allocation79_spill] sm:$0xff] %v12490_v4  ;;  %18399 = vst [vmem:[#allocation80_spill] sm:$0xff] %v12495_v9  ;;  %v12505_v19 = vld [vmem:[%s17836_s10 + $0x218] sm:$0xff]  ;;  %v12510_v24 = vld [vmem:[%s17836_s10 + $0x220] sm:$0xff] }
  0x23   :  { %18400 = vst [vmem:[#allocation81_spill] sm:$0xff] %v12500_v14  ;;  %18401 = vst [vmem:[#allocation82_spill] sm:$0xff] %v12505_v19  ;;  %v12515_v29 = vld [vmem:[%s17836_s10 + $0x228] sm:$0xff]  ;;  %v12520_v34 = vld [vmem:[%s17836_s10 + $0x230] sm:$0xff] }
  0x24   :  { %18402 = vst [vmem:[#allocation83_spill] sm:$0xff] %v12510_v24  ;;  %18403 = vst [vmem:[#allocation84_spill] sm:$0xff] %v12515_v29  ;;  %v12525_v39 = vld [vmem:[%s17836_s10 + $0x238] sm:$0xff]  ;;  %v12530_v44 = vld [vmem:[%s17836_s10 + $0x240] sm:$0xff] }
  0x25   :  { %18404 = vst [vmem:[#allocation85_spill] sm:$0xff] %v12520_v34  ;;  %18405 = vst [vmem:[#allocation86_spill] sm:$0xff] %v12525_v39  ;;  %v12535_v49 = vld [vmem:[%s17836_s10 + $0x248] sm:$0xff]  ;;  %v12540_v54 = vld [vmem:[%s17836_s10 + $0x250] sm:$0xff] }
  0x26   :  { %18406 = vst [vmem:[#allocation87_spill] sm:$0xff] %v12530_v44  ;;  %18407 = vst [vmem:[#allocation88_spill] sm:$0xff] %v12535_v49  ;;  %v12545_v59 = vld [vmem:[%s17836_s10 + $0x258] sm:$0xff]  ;;  %v12550_v4 = vld [vmem:[%s17836_s10 + $0x260] sm:$0xff] }
  0x27   :  { %18408 = vst [vmem:[#allocation89_spill] sm:$0xff] %v12540_v54  ;;  %18409 = vst [vmem:[#allocation90_spill] sm:$0xff] %v12545_v59  ;;  %v12555_v29 = vld [vmem:[%s17836_s10 + $0x268] sm:$0xff]  ;;  %v12560_v3 = vld [vmem:[%s17836_s10 + $0x270] sm:$0xff] }
  0x28   :  { %18410 = vst [vmem:[#allocation91_spill] sm:$0xff] %v12550_v4  ;;  %18411 = vst [vmem:[#allocation92_spill] sm:$0xff] %v12555_v29  ;;  %v12565_v54 = vld [vmem:[%s17836_s10 + $0x278] sm:$0xff]  ;;  %v12570_v8 = vld [vmem:[%s17836_s10 + $0x280] sm:$0xff] }
  0x29   :  { %18412 = vst [vmem:[#allocation93_spill] sm:$0xff] %v12560_v3  ;;  %18413 = vst [vmem:[#allocation94_spill] sm:$0xff] %v12565_v54  ;;  %v12575_v13 = vld [vmem:[%s17836_s10 + $0x288] sm:$0xff]  ;;  %v12580_v18 = vld [vmem:[%s17836_s10 + $0x290] sm:$0xff] }
  0x2a   :  { %18414 = vst [vmem:[#allocation95_spill] sm:$0xff] %v12570_v8  ;;  %18415 = vst [vmem:[#allocation96_spill] sm:$0xff] %v12575_v13  ;;  %v12585_v23 = vld [vmem:[%s17836_s10 + $0x298] sm:$0xff]  ;;  %v12590_v54 = vld [vmem:[%s17836_s10 + $0x2a0] sm:$0xff] }
  0x2b   :  { %18416 = vst [vmem:[#allocation97_spill] sm:$0xff] %v12580_v18  ;;  %18417 = vst [vmem:[#allocation98_spill] sm:$0xff] %v12585_v23  ;;  %v12595_v28 = vld [vmem:[%s17836_s10 + $0x2a8] sm:$0xff]  ;;  %v12600_v33 = vld [vmem:[%s17836_s10 + $0x2b0] sm:$0xff] }
  0x2c   :  { %18418 = vst [vmem:[#allocation99_spill] sm:$0xff] %v12590_v54  ;;  %18419 = vst [vmem:[#allocation100_spill] sm:$0xff] %v12595_v28  ;;  %v12605_v38 = vld [vmem:[%s17836_s10 + $0x2b8] sm:$0xff]  ;;  %v12610_v23 = vld [vmem:[%s17836_s10 + $0x2c0] sm:$0xff] }
  0x2d   :  { %18420 = vst [vmem:[#allocation101_spill] sm:$0xff] %v12600_v33  ;;  %18421 = vst [vmem:[#allocation102_spill] sm:$0xff] %v12605_v38  ;;  %v12615_v54 = vld [vmem:[%s17836_s10 + $0x2c8] sm:$0xff]  ;;  %v12620_v43 = vld [vmem:[%s17836_s10 + $0x2d0] sm:$0xff] }
  0x2e   :  { %18422 = vst [vmem:[#allocation103_spill] sm:$0xff] %v12610_v23  ;;  %18423 = vst [vmem:[#allocation104_spill] sm:$0xff] %v12615_v54  ;;  %v12625_v48 = vld [vmem:[%s17836_s10 + $0x2d8] sm:$0xff]  ;;  %v12630_v53 = vld [vmem:[%s17836_s10 + $0x2e0] sm:$0xff] }
  0x2f   :  { %18424 = vst [vmem:[#allocation105_spill] sm:$0xff] %v12620_v43  ;;  %18425 = vst [vmem:[#allocation106_spill] sm:$0xff] %v12625_v48  ;;  %v12635_v23 = vld [vmem:[%s17836_s10 + $0x2e8] sm:$0xff]  ;;  %v12640_v54 = vld [vmem:[%s17836_s10 + $0x2f0] sm:$0xff] }
  0x30   :  { %18426 = vst [vmem:[#allocation107_spill] sm:$0xff] %v12630_v53  ;;  %18427 = vst [vmem:[#allocation108_spill] sm:$0xff] %v12635_v23  ;;  %v12645_v58 = vld [vmem:[%s17836_s10 + $0x2f8] sm:$0xff]  ;;  %v12650_v63 = vld [vmem:[%s17836_s10 + $0x300] sm:$0xff] }
  0x31   :  { %18428 = vst [vmem:[#allocation109_spill] sm:$0xff] %v12640_v54  ;;  %18429 = vst [vmem:[#allocation110_spill] sm:$0xff] %v12645_v58  ;;  %v12655_v24 = vld [vmem:[%s17836_s10 + $0x308] sm:$0xff]  ;;  %v12660_v23 = vld [vmem:[%s17836_s10 + $0x310] sm:$0xff] }
  0x32   :  { %18430 = vst [vmem:[#allocation111_spill] sm:$0xff] %v12650_v63  ;;  %18431 = vst [vmem:[#allocation112_spill] sm:$0xff] %v12655_v24  ;;  %v12665_v54 = vld [vmem:[%s17836_s10 + $0x318] sm:$0xff]  ;;  %v12670_v49 = vld [vmem:[%s17836_s10 + $0x320] sm:$0xff] }
  0x33   :  { %18432 = vst [vmem:[#allocation113_spill] sm:$0xff] %v12660_v23  ;;  %18433 = vst [vmem:[#allocation114_spill] sm:$0xff] %v12665_v54  ;;  %v12675_v3 = vld [vmem:[%s17836_s10 + $0x328] sm:$0xff]  ;;  %v12680_v18 = vld [vmem:[%s17836_s10 + $0x330] sm:$0xff] }
  0x34   :  { %18434 = vst [vmem:[#allocation115_spill] sm:$0xff] %v12670_v49  ;;  %18435 = vst [vmem:[#allocation116_spill] sm:$0xff] %v12675_v3  ;;  %v12685_v23 = vld [vmem:[%s17836_s10 + $0x338] sm:$0xff]  ;;  %v12690_v54 = vld [vmem:[%s17836_s10 + $0x340] sm:$0xff] }
  0x35   :  { %18436 = vst [vmem:[#allocation117_spill] sm:$0xff] %v12680_v18  ;;  %18437 = vst [vmem:[#allocation118_spill] sm:$0xff] %v12685_v23  ;;  %v12695_v38 = vld [vmem:[%s17836_s10 + $0x348] sm:$0xff]  ;;  %v12700_v53 = vld [vmem:[%s17836_s10 + $0x350] sm:$0xff] }
  0x36   :  { %18438 = vst [vmem:[#allocation119_spill] sm:$0xff] %v12690_v54  ;;  %18439 = vst [vmem:[#allocation120_spill] sm:$0xff] %v12695_v38  ;;  %v12705_v24 = vld [vmem:[%s17836_s10 + $0x358] sm:$0xff]  ;;  %v12710_v23 = vld [vmem:[%s17836_s10 + $0x360] sm:$0xff] }
  0x37   :  { %18440 = vst [vmem:[#allocation121_spill] sm:$0xff] %v12700_v53  ;;  %18441 = vst [vmem:[#allocation122_spill] sm:$0xff] %v12705_v24  ;;  %v12715_v54 = vld [vmem:[%s17836_s10 + $0x368] sm:$0xff]  ;;  %v12720_v18 = vld [vmem:[%s17836_s10 + $0x370] sm:$0xff] }
  0x38   :  { %18442 = vst [vmem:[#allocation123_spill] sm:$0xff] %v12710_v23  ;;  %18443 = vst [vmem:[#allocation124_spill] sm:$0xff] %v12715_v54  ;;  %v12725_v2 = vld [vmem:[%s17836_s10 + $0x378] sm:$0xff]  ;;  %v12730_v24 = vld [vmem:[%s17836_s10 + $0x380] sm:$0xff] }
  0x39   :  { %18444 = vst [vmem:[#allocation125_spill] sm:$0xff] %v12720_v18  ;;  %18445 = vst [vmem:[#allocation126_spill] sm:$0xff] %v12725_v2  ;;  %v12735_v23 = vld [vmem:[%s17836_s10 + $0x388] sm:$0xff]  ;;  %v12740_v54 = vld [vmem:[%s17836_s10 + $0x390] sm:$0xff] }
  0x3a   :  { %18446 = vst [vmem:[#allocation127_spill] sm:$0xff] %v12730_v24  ;;  %18447 = vst [vmem:[#allocation128_spill] sm:$0xff] %v12735_v23  ;;  %v12745_v7 = vld [vmem:[%s17836_s10 + $0x398] sm:$0xff]  ;;  %v12750_v12 = vld [vmem:[%s17836_s10 + $0x3a0] sm:$0xff] }
  0x3b   :  { %18448 = vst [vmem:[#allocation129_spill] sm:$0xff] %v12740_v54  ;;  %18449 = vst [vmem:[#allocation130_spill] sm:$0xff] %v12745_v7  ;;  %v12755_v24 = vld [vmem:[%s17836_s10 + $0x3a8] sm:$0xff]  ;;  %v12760_v23 = vld [vmem:[%s17836_s10 + $0x3b0] sm:$0xff] }
  0x3c   :  { %18450 = vst [vmem:[#allocation131_spill] sm:$0xff] %v12750_v12  ;;  %18451 = vst [vmem:[#allocation132_spill] sm:$0xff] %v12755_v24  ;;  %v12765_v54 = vld [vmem:[%s17836_s10 + $0x3b8] sm:$0xff]  ;;  %v12770_v17 = vld [vmem:[%s17836_s10 + $0x3c0] sm:$0xff] }
  0x3d   :  { %18452 = vst [vmem:[#allocation133_spill] sm:$0xff] %v12760_v23  ;;  %18453 = vst [vmem:[#allocation134_spill] sm:$0xff] %v12765_v54  ;;  %v12775_v22 = vld [vmem:[%s17836_s10 + $0x3c8] sm:$0xff]  ;;  %v12780_v24 = vld [vmem:[%s17836_s10 + $0x3d0] sm:$0xff] }
  0x3e   :  { %18454 = vst [vmem:[#allocation135_spill] sm:$0xff] %v12770_v17  ;;  %18455 = vst [vmem:[#allocation136_spill] sm:$0xff] %v12775_v22  ;;  %v12785_v23 = vld [vmem:[%s17836_s10 + $0x3d8] sm:$0xff]  ;;  %v12790_v54 = vld [vmem:[%s17836_s10 + $0x3e0] sm:$0xff] }
  0x3f   :  { %18456 = vst [vmem:[#allocation137_spill] sm:$0xff] %v12780_v24  ;;  %18457 = vst [vmem:[#allocation138_spill] sm:$0xff] %v12785_v23  ;;  %v12795_v27 = vld [vmem:[%s17836_s10 + $0x3e8] sm:$0xff]  ;;  %v12800_v32 = vld [vmem:[%s17836_s10 + $0x3f0] sm:$0xff] }
  0x40   :  { %18458 = vst [vmem:[#allocation139_spill] sm:$0xff] %v12790_v54  ;;  %18459 = vst [vmem:[#allocation140_spill] sm:$0xff] %v12795_v27  ;;  %v12805_v24 = vld [vmem:[%s17836_s10 + $0x3f8] sm:$0xff]  ;;  %v12810_v23 = vld [vmem:[%s17836_s10 + $0x400] sm:$0xff] }
  0x41   :  { %18460 = vst [vmem:[#allocation141_spill] sm:$0xff] %v12800_v32  ;;  %18461 = vst [vmem:[#allocation142_spill] sm:$0xff] %v12805_v24  ;;  %v12815_v54 = vld [vmem:[%s17836_s10 + $0x408] sm:$0xff]  ;;  %v12820_v37 = vld [vmem:[%s17836_s10 + $0x410] sm:$0xff] }
  0x42   :  { %18462 = vst [vmem:[#allocation143_spill] sm:$0xff] %v12810_v23  ;;  %18463 = vst [vmem:[#allocation144_spill] sm:$0xff] %v12815_v54  ;;  %v12825_v42 = vld [vmem:[%s17836_s10 + $0x418] sm:$0xff]  ;;  %v12830_v24 = vld [vmem:[%s17836_s10 + $0x420] sm:$0xff] }
  0x43   :  { %18464 = vst [vmem:[#allocation145_spill] sm:$0xff] %v12820_v37  ;;  %18465 = vst [vmem:[#allocation146_spill] sm:$0xff] %v12825_v42  ;;  %v12835_v23 = vld [vmem:[%s17836_s10 + $0x428] sm:$0xff]  ;;  %v12840_v54 = vld [vmem:[%s17836_s10 + $0x430] sm:$0xff] }
  0x44   :  { %18466 = vst [vmem:[#allocation147_spill] sm:$0xff] %v12830_v24  ;;  %18467 = vst [vmem:[#allocation148_spill] sm:$0xff] %v12835_v23  ;;  %v12845_v47 = vld [vmem:[%s17836_s10 + $0x438] sm:$0xff]  ;;  %v12850_v52 = vld [vmem:[%s17836_s10 + $0x440] sm:$0xff] }
  0x45   :  { %18468 = vst [vmem:[#allocation149_spill] sm:$0xff] %v12840_v54  ;;  %18469 = vst [vmem:[#allocation150_spill] sm:$0xff] %v12845_v47  ;;  %v12855_v24 = vld [vmem:[%s17836_s10 + $0x448] sm:$0xff]  ;;  %v12860_v23 = vld [vmem:[%s17836_s10 + $0x450] sm:$0xff] }
  0x46   :  { %18470 = vst [vmem:[#allocation151_spill] sm:$0xff] %v12850_v52  ;;  %18471 = vst [vmem:[#allocation152_spill] sm:$0xff] %v12855_v24  ;;  %v12865_v54 = vld [vmem:[%s17836_s10 + $0x458] sm:$0xff]  ;;  %v12870_v57 = vld [vmem:[%s17836_s10 + $0x460] sm:$0xff] }
  0x47   :  { %18472 = vst [vmem:[#allocation153_spill] sm:$0xff] %v12860_v23  ;;  %18473 = vst [vmem:[#allocation154_spill] sm:$0xff] %v12865_v54  ;;  %v12875_v62 = vld [vmem:[%s17836_s10 + $0x468] sm:$0xff]  ;;  %v12880_v24 = vld [vmem:[%s17836_s10 + $0x470] sm:$0xff] }
  0x48   :  { %18474 = vst [vmem:[#allocation155_spill] sm:$0xff] %v12870_v57  ;;  %18475 = vst [vmem:[#allocation156_spill] sm:$0xff] %v12875_v62  ;;  %v12885_v23 = vld [vmem:[%s17836_s10 + $0x478] sm:$0xff]  ;;  %v12890_v54 = vld [vmem:[%s17836_s10 + $0x480] sm:$0xff] }
  0x49   :  { %18476 = vst [vmem:[#allocation157_spill] sm:$0xff] %v12880_v24  ;;  %18477 = vst [vmem:[#allocation158_spill] sm:$0xff] %v12885_v23  ;;  %v12895_v19 = vld [vmem:[%s17836_s10 + $0x488] sm:$0xff]  ;;  %v12900_v44 = vld [vmem:[%s17836_s10 + $0x490] sm:$0xff] }
  0x4a   :  { %18478 = vst [vmem:[#allocation159_spill] sm:$0xff] %v12890_v54  ;;  %18479 = vst [vmem:[#allocation160_spill] sm:$0xff] %v12895_v19  ;;  %v12905_v24 = vld [vmem:[%s17836_s10 + $0x498] sm:$0xff]  ;;  %v12910_v23 = vld [vmem:[%s17836_s10 + $0x4a0] sm:$0xff] }
  0x4b   :  { %18480 = vst [vmem:[#allocation161_spill] sm:$0xff] %v12900_v44  ;;  %18481 = vst [vmem:[#allocation162_spill] sm:$0xff] %v12905_v24  ;;  %v12915_v54 = vld [vmem:[%s17836_s10 + $0x4a8] sm:$0xff]  ;;  %v12920_v29 = vld [vmem:[%s17836_s10 + $0x4b0] sm:$0xff] }
  0x4c   :  { %18482 = vst [vmem:[#allocation163_spill] sm:$0xff] %v12910_v23  ;;  %18483 = vst [vmem:[#allocation164_spill] sm:$0xff] %v12915_v54  ;;  %v12925_v13 = vld [vmem:[%s17836_s10 + $0x4b8] sm:$0xff]  ;;  %v12930_v24 = vld [vmem:[%s17836_s10 + $0x4c0] sm:$0xff] }
  0x4d   :  { %18484 = vst [vmem:[#allocation165_spill] sm:$0xff] %v12920_v29  ;;  %18485 = vst [vmem:[#allocation166_spill] sm:$0xff] %v12925_v13  ;;  %v12935_v23 = vld [vmem:[%s17836_s10 + $0x4c8] sm:$0xff]  ;;  %v12940_v54 = vld [vmem:[%s17836_s10 + $0x4d0] sm:$0xff] }
  0x4e   :  { %18486 = vst [vmem:[#allocation167_spill] sm:$0xff] %v12930_v24  ;;  %18487 = vst [vmem:[#allocation168_spill] sm:$0xff] %v12935_v23  ;;  %v12945_v33 = vld [vmem:[%s17836_s10 + $0x4d8] sm:$0xff]  ;;  %v12950_v48 = vld [vmem:[%s17836_s10 + $0x4e0] sm:$0xff] }
  0x4f   :  { %18488 = vst [vmem:[#allocation169_spill] sm:$0xff] %v12940_v54  ;;  %18489 = vst [vmem:[#allocation170_spill] sm:$0xff] %v12945_v33  ;;  %v12955_v24 = vld [vmem:[%s17836_s10 + $0x4e8] sm:$0xff]  ;;  %v12960_v23 = vld [vmem:[%s17836_s10 + $0x4f0] sm:$0xff] }
  0x50   :  { %18490 = vst [vmem:[#allocation171_spill] sm:$0xff] %v12950_v48  ;;  %18491 = vst [vmem:[#allocation172_spill] sm:$0xff] %v12955_v24  ;;  %v12965_v54 = vld [vmem:[%s17836_s10 + $0x4f8] sm:$0xff]  ;;  %v12970_v63 = vld [vmem:[%s17836_s10 + $0x500] sm:$0xff] }
  0x51   :  { %18492 = vst [vmem:[#allocation173_spill] sm:$0xff] %v12960_v23  ;;  %18493 = vst [vmem:[#allocation174_spill] sm:$0xff] %v12965_v54  ;;  %v12975_v3 = vld [vmem:[%s17836_s10 + $0x508] sm:$0xff]  ;;  %v12980_v24 = vld [vmem:[%s17836_s10 + $0x510] sm:$0xff] }
  0x52   :  { %18494 = vst [vmem:[#allocation175_spill] sm:$0xff] %v12970_v63  ;;  %18495 = vst [vmem:[#allocation176_spill] sm:$0xff] %v12975_v3  ;;  %v12985_v23 = vld [vmem:[%s17836_s10 + $0x518] sm:$0xff]  ;;  %v12990_v54 = vld [vmem:[%s17836_s10 + $0x520] sm:$0xff] }
  0x53   :  { %18496 = vst [vmem:[#allocation177_spill] sm:$0xff] %v12980_v24  ;;  %18497 = vst [vmem:[#allocation178_spill] sm:$0xff] %v12985_v23  ;;  %v12995_v53 = vld [vmem:[%s17836_s10 + $0x528] sm:$0xff]  ;;  %v13000_v3 = vld [vmem:[%s17836_s10 + $0x530] sm:$0xff] }
  0x54   :  { %18498 = vst [vmem:[#allocation179_spill] sm:$0xff] %v12990_v54  ;;  %18499 = vst [vmem:[#allocation180_spill] sm:$0xff] %v12995_v53  ;;  %v13005_v24 = vld [vmem:[%s17836_s10 + $0x538] sm:$0xff]  ;;  %v13010_v23 = vld [vmem:[%s17836_s10 + $0x540] sm:$0xff] }
  0x55   :  { %18500 = vst [vmem:[#allocation181_spill] sm:$0xff] %v13000_v3  ;;  %18501 = vst [vmem:[#allocation182_spill] sm:$0xff] %v13005_v24  ;;  %v13015_v54 = vld [vmem:[%s17836_s10 + $0x548] sm:$0xff]  ;;  %v13020_v2 = vld [vmem:[%s17836_s10 + $0x550] sm:$0xff] }
  0x56   :  { %18502 = vst [vmem:[#allocation183_spill] sm:$0xff] %v13010_v23  ;;  %18503 = vst [vmem:[#allocation184_spill] sm:$0xff] %v13015_v54  ;;  %v13025_v3 = vld [vmem:[%s17836_s10 + $0x558] sm:$0xff]  ;;  %v13030_v24 = vld [vmem:[%s17836_s10 + $0x560] sm:$0xff] }
  0x57   :  { %18504 = vst [vmem:[#allocation185_spill] sm:$0xff] %v13020_v2  ;;  %18505 = vst [vmem:[#allocation186_spill] sm:$0xff] %v13025_v3  ;;  %v13035_v23 = vld [vmem:[%s17836_s10 + $0x568] sm:$0xff]  ;;  %v13040_v54 = vld [vmem:[%s17836_s10 + $0x570] sm:$0xff] }
  0x58   :  { %18506 = vst [vmem:[#allocation187_spill] sm:$0xff] %v13030_v24  ;;  %18507 = vst [vmem:[#allocation188_spill] sm:$0xff] %v13035_v23  ;;  %v13045_v12 = vld [vmem:[%s17836_s10 + $0x578] sm:$0xff]  ;;  %v13050_v3 = vld [vmem:[%s17836_s10 + $0x580] sm:$0xff] }
  0x59   :  { %18508 = vst [vmem:[#allocation189_spill] sm:$0xff] %v13040_v54  ;;  %18509 = vst [vmem:[#allocation190_spill] sm:$0xff] %v13045_v12  ;;  %v13055_v24 = vld [vmem:[%s17836_s10 + $0x588] sm:$0xff]  ;;  %v13060_v23 = vld [vmem:[%s17836_s10 + $0x590] sm:$0xff] }
  0x5a   :  { %18510 = vst [vmem:[#allocation191_spill] sm:$0xff] %v13050_v3  ;;  %18511 = vst [vmem:[#allocation192_spill] sm:$0xff] %v13055_v24  ;;  %v13065_v54 = vld [vmem:[%s17836_s10 + $0x598] sm:$0xff]  ;;  %v13070_v22 = vld [vmem:[%s17836_s10 + $0x5a0] sm:$0xff] }
  0x5b   :  { %18512 = vst [vmem:[#allocation193_spill] sm:$0xff] %v13060_v23  ;;  %18513 = vst [vmem:[#allocation194_spill] sm:$0xff] %v13065_v54  ;;  %v13075_v3 = vld [vmem:[%s17836_s10 + $0x5a8] sm:$0xff]  ;;  %v13080_v24 = vld [vmem:[%s17836_s10 + $0x5b0] sm:$0xff] }
  0x5c   :  { %18514 = vst [vmem:[#allocation195_spill] sm:$0xff] %v13070_v22  ;;  %18515 = vst [vmem:[#allocation196_spill] sm:$0xff] %v13075_v3  ;;  %v13085_v23 = vld [vmem:[%s17836_s10 + $0x5b8] sm:$0xff]  ;;  %v13090_v54 = vld [vmem:[%s17836_s10 + $0x5c0] sm:$0xff] }
  0x5d   :  { %18516 = vst [vmem:[#allocation197_spill] sm:$0xff] %v13080_v24  ;;  %18517 = vst [vmem:[#allocation198_spill] sm:$0xff] %v13085_v23  ;;  %v13095_v32 = vld [vmem:[%s17836_s10 + $0x5c8] sm:$0xff]  ;;  %v13100_v3 = vld [vmem:[%s17836_s10 + $0x5d0] sm:$0xff] }
  0x5e   :  { %18518 = vst [vmem:[#allocation199_spill] sm:$0xff] %v13090_v54  ;;  %18519 = vst [vmem:[#allocation200_spill] sm:$0xff] %v13095_v32  ;;  %v13105_v24 = vld [vmem:[%s17836_s10 + $0x5d8] sm:$0xff]  ;;  %v13110_v23 = vld [vmem:[%s17836_s10 + $0x5e0] sm:$0xff] }
  0x5f   :  { %18520 = vst [vmem:[#allocation201_spill] sm:$0xff] %v13100_v3  ;;  %18521 = vst [vmem:[#allocation202_spill] sm:$0xff] %v13105_v24  ;;  %v13115_v54 = vld [vmem:[%s17836_s10 + $0x5e8] sm:$0xff]  ;;  %v13120_v42 = vld [vmem:[%s17836_s10 + $0x5f0] sm:$0xff] }
  0x60   :  { %18522 = vst [vmem:[#allocation203_spill] sm:$0xff] %v13110_v23  ;;  %18523 = vst [vmem:[#allocation204_spill] sm:$0xff] %v13115_v54  ;;  %v13125_v3 = vld [vmem:[%s17836_s10 + $0x5f8] sm:$0xff]  ;;  %v13130_v24 = vld [vmem:[%s17836_s10 + $0x600] sm:$0xff] }
  0x61   :  { %18524 = vst [vmem:[#allocation205_spill] sm:$0xff] %v13120_v42  ;;  %18525 = vst [vmem:[#allocation206_spill] sm:$0xff] %v13125_v3  ;;  %v13135_v23 = vld [vmem:[%s17836_s10 + $0x608] sm:$0xff]  ;;  %v13140_v54 = vld [vmem:[%s17836_s10 + $0x610] sm:$0xff] }
  0x62   :  { %18526 = vst [vmem:[#allocation207_spill] sm:$0xff] %v13130_v24  ;;  %18527 = vst [vmem:[#allocation208_spill] sm:$0xff] %v13135_v23  ;;  %v13145_v52 = vld [vmem:[%s17836_s10 + $0x618] sm:$0xff]  ;;  %v13150_v3 = vld [vmem:[%s17836_s10 + $0x620] sm:$0xff] }
  0x63   :  { %18528 = vst [vmem:[#allocation209_spill] sm:$0xff] %v13140_v54  ;;  %18529 = vst [vmem:[#allocation210_spill] sm:$0xff] %v13145_v52  ;;  %v13155_v24 = vld [vmem:[%s17836_s10 + $0x628] sm:$0xff]  ;;  %v13160_v23 = vld [vmem:[%s17836_s10 + $0x630] sm:$0xff] }
  0x64   :  { %18530 = vst [vmem:[#allocation211_spill] sm:$0xff] %v13150_v3  ;;  %18531 = vst [vmem:[#allocation212_spill] sm:$0xff] %v13155_v24  ;;  %v13165_v54 = vld [vmem:[%s17836_s10 + $0x638] sm:$0xff]  ;;  %v13170_v62 = vld [vmem:[%s17836_s10 + $0x640] sm:$0xff] }
  0x65   :  { %18532 = vst [vmem:[#allocation213_spill] sm:$0xff] %v13160_v23  ;;  %18533 = vst [vmem:[#allocation214_spill] sm:$0xff] %v13165_v54  ;;  %v13175_v3 = vld [vmem:[%s17836_s10 + $0x648] sm:$0xff]  ;;  %v13180_v24 = vld [vmem:[%s17836_s10 + $0x650] sm:$0xff] }
  0x66   :  { %18534 = vst [vmem:[#allocation215_spill] sm:$0xff] %v13170_v62  ;;  %18535 = vst [vmem:[#allocation216_spill] sm:$0xff] %v13175_v3  ;;  %v13185_v23 = vld [vmem:[%s17836_s10 + $0x658] sm:$0xff]  ;;  %v13190_v54 = vld [vmem:[%s17836_s10 + $0x660] sm:$0xff] }
  0x67   :  { %18536 = vst [vmem:[#allocation217_spill] sm:$0xff] %v13180_v24  ;;  %18537 = vst [vmem:[#allocation218_spill] sm:$0xff] %v13185_v23  ;;  %v13195_v44 = vld [vmem:[%s17836_s10 + $0x668] sm:$0xff]  ;;  %v13200_v3 = vld [vmem:[%s17836_s10 + $0x670] sm:$0xff] }
  0x68   :  { %18538 = vst [vmem:[#allocation219_spill] sm:$0xff] %v13190_v54  ;;  %18539 = vst [vmem:[#allocation220_spill] sm:$0xff] %v13195_v44  ;;  %v13205_v24 = vld [vmem:[%s17836_s10 + $0x678] sm:$0xff]  ;;  %v13210_v23 = vld [vmem:[%s17836_s10 + $0x680] sm:$0xff] }
  0x69   :  { %18540 = vst [vmem:[#allocation221_spill] sm:$0xff] %v13200_v3  ;;  %18541 = vst [vmem:[#allocation222_spill] sm:$0xff] %v13205_v24  ;;  %v13215_v54 = vld [vmem:[%s17836_s10 + $0x688] sm:$0xff]  ;;  %v13220_v13 = vld [vmem:[%s17836_s10 + $0x690] sm:$0xff] }
  0x6a   :  { %18542 = vst [vmem:[#allocation223_spill] sm:$0xff] %v13210_v23  ;;  %18543 = vst [vmem:[#allocation224_spill] sm:$0xff] %v13215_v54  ;;  %v13225_v3 = vld [vmem:[%s17836_s10 + $0x698] sm:$0xff]  ;;  %v13230_v24 = vld [vmem:[%s17836_s10 + $0x6a0] sm:$0xff] }
  0x6b   :  { %18544 = vst [vmem:[#allocation225_spill] sm:$0xff] %v13220_v13  ;;  %18545 = vst [vmem:[#allocation226_spill] sm:$0xff] %v13225_v3  ;;  %v13235_v23 = vld [vmem:[%s17836_s10 + $0x6a8] sm:$0xff]  ;;  %v13240_v54 = vld [vmem:[%s17836_s10 + $0x6b0] sm:$0xff] }
  0x6c   :  { %18546 = vst [vmem:[#allocation227_spill] sm:$0xff] %v13230_v24  ;;  %18547 = vst [vmem:[#allocation228_spill] sm:$0xff] %v13235_v23  ;;  %v13245_v48 = vld [vmem:[%s17836_s10 + $0x6b8] sm:$0xff]  ;;  %v13250_v3 = vld [vmem:[%s17836_s10 + $0x6c0] sm:$0xff] }
  0x6d   :  { %18548 = vst [vmem:[#allocation229_spill] sm:$0xff] %v13240_v54  ;;  %18549 = vst [vmem:[#allocation230_spill] sm:$0xff] %v13245_v48  ;;  %v13255_v24 = vld [vmem:[%s17836_s10 + $0x6c8] sm:$0xff]  ;;  %v13260_v23 = vld [vmem:[%s17836_s10 + $0x6d0] sm:$0xff] }
  0x6e   :  { %18550 = vst [vmem:[#allocation231_spill] sm:$0xff] %v13250_v3  ;;  %18551 = vst [vmem:[#allocation232_spill] sm:$0xff] %v13255_v24  ;;  %v13265_v54 = vld [vmem:[%s17836_s10 + $0x6d8] sm:$0xff]  ;;  %v13270_v1 = vld [vmem:[%s17836_s10 + $0x6e0] sm:$0xff] }
  0x6f   :  { %18552 = vst [vmem:[#allocation233_spill] sm:$0xff] %v13260_v23  ;;  %18553 = vst [vmem:[#allocation234_spill] sm:$0xff] %v13265_v54  ;;  %v13275_v3 = vld [vmem:[%s17836_s10 + $0x6e8] sm:$0xff]  ;;  %v13280_v24 = vld [vmem:[%s17836_s10 + $0x6f0] sm:$0xff] }
  0x70   :  { %18554 = vst [vmem:[#allocation235_spill] sm:$0xff] %v13270_v1  ;;  %18555 = vst [vmem:[#allocation236_spill] sm:$0xff] %v13275_v3  ;;  %v13285_v23 = vld [vmem:[%s17836_s10 + $0x6f8] sm:$0xff]  ;;  %v13290_v54 = vld [vmem:[%s17836_s10 + $0x700] sm:$0xff] }
  0x71   :  { %18556 = vst [vmem:[#allocation237_spill] sm:$0xff] %v13280_v24  ;;  %18557 = vst [vmem:[#allocation238_spill] sm:$0xff] %v13285_v23  ;;  %v13295_v6 = vld [vmem:[%s17836_s10 + $0x708] sm:$0xff]  ;;  %v13300_v3 = vld [vmem:[%s17836_s10 + $0x710] sm:$0xff] }
  0x72   :  { %18558 = vst [vmem:[#allocation239_spill] sm:$0xff] %v13290_v54  ;;  %18559 = vst [vmem:[#allocation240_spill] sm:$0xff] %v13295_v6  ;;  %v13305_v24 = vld [vmem:[%s17836_s10 + $0x718] sm:$0xff]  ;;  %v13310_v23 = vld [vmem:[%s17836_s10 + $0x720] sm:$0xff] }
  0x73   :  { %18560 = vst [vmem:[#allocation241_spill] sm:$0xff] %v13300_v3  ;;  %18561 = vst [vmem:[#allocation242_spill] sm:$0xff] %v13305_v24  ;;  %v13315_v54 = vld [vmem:[%s17836_s10 + $0x728] sm:$0xff]  ;;  %v13320_v11 = vld [vmem:[%s17836_s10 + $0x730] sm:$0xff] }
  0x74   :  { %18562 = vst [vmem:[#allocation243_spill] sm:$0xff] %v13310_v23  ;;  %18563 = vst [vmem:[#allocation244_spill] sm:$0xff] %v13315_v54  ;;  %v13325_v3 = vld [vmem:[%s17836_s10 + $0x738] sm:$0xff]  ;;  %v13330_v24 = vld [vmem:[%s17836_s10 + $0x740] sm:$0xff] }
  0x75   :  { %18564 = vst [vmem:[#allocation245_spill] sm:$0xff] %v13320_v11  ;;  %18565 = vst [vmem:[#allocation246_spill] sm:$0xff] %v13325_v3  ;;  %v13335_v23 = vld [vmem:[%s17836_s10 + $0x748] sm:$0xff]  ;;  %v13340_v54 = vld [vmem:[%s17836_s10 + $0x750] sm:$0xff] }
  0x76   :  { %18566 = vst [vmem:[#allocation247_spill] sm:$0xff] %v13330_v24  ;;  %18567 = vst [vmem:[#allocation248_spill] sm:$0xff] %v13335_v23  ;;  %v13345_v16 = vld [vmem:[%s17836_s10 + $0x758] sm:$0xff]  ;;  %v13350_v21 = vld [vmem:[%s17836_s10 + $0x760] sm:$0xff] }
  0x77   :  { %18568 = vst [vmem:[#allocation249_spill] sm:$0xff] %v13340_v54  ;;  %18569 = vst [vmem:[#allocation250_spill] sm:$0xff] %v13345_v16  ;;  %v13355_v24 = vld [vmem:[%s17836_s10 + $0x768] sm:$0xff]  ;;  %v13360_v23 = vld [vmem:[%s17836_s10 + $0x770] sm:$0xff] }
  0x78   :  { %18570 = vst [vmem:[#allocation251_spill] sm:$0xff] %v13350_v21  ;;  %18571 = vst [vmem:[#allocation252_spill] sm:$0xff] %v13355_v24  ;;  %v13365_v54 = vld [vmem:[%s17836_s10 + $0x778] sm:$0xff]  ;;  %v13370_v26 = vld [vmem:[%s17836_s10 + $0x780] sm:$0xff] }
  0x79   :  { %18572 = vst [vmem:[#allocation253_spill] sm:$0xff] %v13360_v23  ;;  %18573 = vst [vmem:[#allocation254_spill] sm:$0xff] %v13365_v54  ;;  %v13375_v31 = vld [vmem:[%s17836_s10 + $0x788] sm:$0xff]  ;;  %v13380_v24 = vld [vmem:[%s17836_s10 + $0x790] sm:$0xff] }
  0x7a   :  { %18574 = vst [vmem:[#allocation255_spill] sm:$0xff] %v13370_v26  ;;  %18575 = vst [vmem:[#allocation256_spill] sm:$0xff] %v13375_v31  ;;  %v13385_v23 = vld [vmem:[%s17836_s10 + $0x798] sm:$0xff]  ;;  %v13390_v54 = vld [vmem:[%s17836_s10 + $0x7a0] sm:$0xff] }
  0x7b   :  { %18576 = vst [vmem:[#allocation257_spill] sm:$0xff] %v13380_v24  ;;  %18577 = vst [vmem:[#allocation258_spill] sm:$0xff] %v13385_v23  ;;  %v13395_v36 = vld [vmem:[%s17836_s10 + $0x7a8] sm:$0xff]  ;;  %v13400_v31 = vld [vmem:[%s17836_s10 + $0x7b0] sm:$0xff] }
  0x7c   :  { %18578 = vst [vmem:[#allocation259_spill] sm:$0xff] %v13390_v54  ;;  %18579 = vst [vmem:[#allocation260_spill] sm:$0xff] %v13395_v36  ;;  %v13405_v24 = vld [vmem:[%s17836_s10 + $0x7b8] sm:$0xff]  ;;  %v13410_v23 = vld [vmem:[%s17836_s10 + $0x7c0] sm:$0xff] }
  0x7d   :  { %18580 = vst [vmem:[#allocation261_spill] sm:$0xff] %v13400_v31  ;;  %18581 = vst [vmem:[#allocation262_spill] sm:$0xff] %v13405_v24  ;;  %v13415_v54 = vld [vmem:[%s17836_s10 + $0x7c8] sm:$0xff]  ;;  %v13420_v41 = vld [vmem:[%s17836_s10 + $0x7d0] sm:$0xff] }
  0x7e   :  { %18582 = vst [vmem:[#allocation263_spill] sm:$0xff] %v13410_v23  ;;  %18583 = vst [vmem:[#allocation264_spill] sm:$0xff] %v13415_v54  ;;  %v13425_v31 = vld [vmem:[%s17836_s10 + $0x7d8] sm:$0xff]  ;;  %v13430_v24 = vld [vmem:[%s17836_s10 + $0x7e0] sm:$0xff] }
  0x7f   :  { %18584 = vst [vmem:[#allocation265_spill] sm:$0xff] %v13420_v41  ;;  %18585 = vst [vmem:[#allocation266_spill] sm:$0xff] %v13425_v31  ;;  %v13435_v23 = vld [vmem:[%s17836_s10 + $0x7e8] sm:$0xff]  ;;  %v13440_v54 = vld [vmem:[%s17836_s10 + $0x7f0] sm:$0xff] }
  0x80   :  { %18586 = vst [vmem:[#allocation267_spill] sm:$0xff] %v13430_v24  ;;  %18587 = vst [vmem:[#allocation268_spill] sm:$0xff] %v13435_v23  ;;  %v13445_v46 = vld [vmem:[%s17836_s10 + $0x7f8] sm:$0xff]  ;;  %v13450_v31 = vld [vmem:[%s17836_s10 + $0x800] sm:$0xff] }
  0x81   :  { %18588 = vst [vmem:[#allocation269_spill] sm:$0xff] %v13440_v54  ;;  %18589 = vst [vmem:[#allocation270_spill] sm:$0xff] %v13445_v46  ;;  %v13455_v24 = vld [vmem:[%s17836_s10 + $0x808] sm:$0xff]  ;;  %v13460_v23 = vld [vmem:[%s17836_s10 + $0x810] sm:$0xff] }
  0x82   :  { %18590 = vst [vmem:[#allocation271_spill] sm:$0xff] %v13450_v31  ;;  %18591 = vst [vmem:[#allocation272_spill] sm:$0xff] %v13455_v24  ;;  %v13465_v54 = vld [vmem:[%s17836_s10 + $0x818] sm:$0xff]  ;;  %v13470_v51 = vld [vmem:[%s17836_s10 + $0x820] sm:$0xff] }
  0x83   :  { %18592 = vst [vmem:[#allocation273_spill] sm:$0xff] %v13460_v23  ;;  %18593 = vst [vmem:[#allocation274_spill] sm:$0xff] %v13465_v54  ;;  %v13475_v31 = vld [vmem:[%s17836_s10 + $0x828] sm:$0xff]  ;;  %v13480_v24 = vld [vmem:[%s17836_s10 + $0x830] sm:$0xff] }
  0x84   :  { %18594 = vst [vmem:[#allocation275_spill] sm:$0xff] %v13470_v51  ;;  %18595 = vst [vmem:[#allocation276_spill] sm:$0xff] %v13475_v31  ;;  %v13485_v23 = vld [vmem:[%s17836_s10 + $0x838] sm:$0xff]  ;;  %v13490_v54 = vld [vmem:[%s17836_s10 + $0x840] sm:$0xff] }
  0x85   :  { %18596 = vst [vmem:[#allocation277_spill] sm:$0xff] %v13480_v24  ;;  %18597 = vst [vmem:[#allocation278_spill] sm:$0xff] %v13485_v23  ;;  %v13495_v56 = vld [vmem:[%s17836_s10 + $0x848] sm:$0xff]  ;;  %v13500_v31 = vld [vmem:[%s17836_s10 + $0x850] sm:$0xff] }
  0x86   :  { %18598 = vst [vmem:[#allocation279_spill] sm:$0xff] %v13490_v54  ;;  %18599 = vst [vmem:[#allocation280_spill] sm:$0xff] %v13495_v56  ;;  %v13505_v24 = vld [vmem:[%s17836_s10 + $0x858] sm:$0xff]  ;;  %v13510_v23 = vld [vmem:[%s17836_s10 + $0x860] sm:$0xff] }
  0x87   :  { %18600 = vst [vmem:[#allocation281_spill] sm:$0xff] %v13500_v31  ;;  %18601 = vst [vmem:[#allocation282_spill] sm:$0xff] %v13505_v24  ;;  %v13515_v54 = vld [vmem:[%s17836_s10 + $0x868] sm:$0xff]  ;;  %v13520_v61 = vld [vmem:[%s17836_s10 + $0x870] sm:$0xff] }
  0x88   :  { %18602 = vst [vmem:[#allocation283_spill] sm:$0xff] %v13510_v23  ;;  %18603 = vst [vmem:[#allocation284_spill] sm:$0xff] %v13515_v54  ;;  %v13525_v31 = vld [vmem:[%s17836_s10 + $0x878] sm:$0xff]  ;;  %v13530_v24 = vld [vmem:[%s17836_s10 + $0x880] sm:$0xff] }
  0x89   :  { %18604 = vst [vmem:[#allocation285_spill] sm:$0xff] %v13520_v61  ;;  %18605 = vst [vmem:[#allocation286_spill] sm:$0xff] %v13525_v31  ;;  %v13535_v23 = vld [vmem:[%s17836_s10 + $0x888] sm:$0xff]  ;;  %v13540_v54 = vld [vmem:[%s17836_s10 + $0x890] sm:$0xff] }
  0x8a   :  { %18606 = vst [vmem:[#allocation287_spill] sm:$0xff] %v13530_v24  ;;  %18607 = vst [vmem:[#allocation288_spill] sm:$0xff] %v13535_v23  ;;  %v13545_v14 = vld [vmem:[%s17836_s10 + $0x898] sm:$0xff]  ;;  %v13550_v31 = vld [vmem:[%s17836_s10 + $0x8a0] sm:$0xff] }
  0x8b   :  { %18608 = vst [vmem:[#allocation289_spill] sm:$0xff] %v13540_v54  ;;  %18609 = vst [vmem:[#allocation290_spill] sm:$0xff] %v13545_v14  ;;  %v13555_v24 = vld [vmem:[%s17836_s10 + $0x8a8] sm:$0xff]  ;;  %v13560_v23 = vld [vmem:[%s17836_s10 + $0x8b0] sm:$0xff] }
  0x8c   :  { %18610 = vst [vmem:[#allocation291_spill] sm:$0xff] %v13550_v31  ;;  %18611 = vst [vmem:[#allocation292_spill] sm:$0xff] %v13555_v24  ;;  %v13565_v54 = vld [vmem:[%s17836_s10 + $0x8b8] sm:$0xff]  ;;  %v13570_v3 = vld [vmem:[%s17836_s10 + $0x8c0] sm:$0xff] }
  0x8d   :  { %18612 = vst [vmem:[#allocation293_spill] sm:$0xff] %v13560_v23  ;;  %18613 = vst [vmem:[#allocation294_spill] sm:$0xff] %v13565_v54  ;;  %v13575_v31 = vld [vmem:[%s17836_s10 + $0x8c8] sm:$0xff]  ;;  %v13580_v24 = vld [vmem:[%s17836_s10 + $0x8d0] sm:$0xff] }
  0x8e   :  { %18614 = vst [vmem:[#allocation295_spill] sm:$0xff] %v13570_v3  ;;  %18615 = vst [vmem:[#allocation296_spill] sm:$0xff] %v13575_v31  ;;  %v13585_v23 = vld [vmem:[%s17836_s10 + $0x8d8] sm:$0xff]  ;;  %v13590_v54 = vld [vmem:[%s17836_s10 + $0x8e0] sm:$0xff] }
  0x8f   :  { %18616 = vst [vmem:[#allocation297_spill] sm:$0xff] %v13580_v24  ;;  %18617 = vst [vmem:[#allocation298_spill] sm:$0xff] %v13585_v23  ;;  %v13595_v21 = vld [vmem:[%s17836_s10 + $0x8e8] sm:$0xff]  ;;  %v13600_v31 = vld [vmem:[%s17836_s10 + $0x8f0] sm:$0xff] }
  0x90   :  { %18618 = vst [vmem:[#allocation299_spill] sm:$0xff] %v13590_v54  ;;  %18619 = vst [vmem:[#allocation300_spill] sm:$0xff] %v13595_v21  ;;  %v13605_v24 = vld [vmem:[%s17836_s10 + $0x8f8] sm:$0xff]  ;;  %v13610_v23 = vld [vmem:[%s17836_s10 + $0x900] sm:$0xff] }
  0x91   :  { %18620 = vst [vmem:[#allocation301_spill] sm:$0xff] %v13600_v31  ;;  %18621 = vst [vmem:[#allocation302_spill] sm:$0xff] %v13605_v24  ;;  %v13615_v54 = vld [vmem:[%s17836_s10 + $0x908] sm:$0xff]  ;;  %v13620_v26 = vld [vmem:[%s17836_s10 + $0x910] sm:$0xff] }
  0x92   :  { %18622 = vst [vmem:[#allocation303_spill] sm:$0xff] %v13610_v23  ;;  %18623 = vst [vmem:[#allocation304_spill] sm:$0xff] %v13615_v54  ;;  %v13625_v31 = vld [vmem:[%s17836_s10 + $0x918] sm:$0xff]  ;;  %v13630_v24 = vld [vmem:[%s17836_s10 + $0x920] sm:$0xff] }
  0x93   :  { %18624 = vst [vmem:[#allocation305_spill] sm:$0xff] %v13620_v26  ;;  %18625 = vst [vmem:[#allocation306_spill] sm:$0xff] %v13625_v31  ;;  %v13635_v23 = vld [vmem:[%s17836_s10 + $0x928] sm:$0xff]  ;;  %v13640_v54 = vld [vmem:[%s17836_s10 + $0x930] sm:$0xff] }
  0x94   :  { %18626 = vst [vmem:[#allocation307_spill] sm:$0xff] %v13630_v24  ;;  %18627 = vst [vmem:[#allocation308_spill] sm:$0xff] %v13635_v23  ;;  %v13645_v36 = vld [vmem:[%s17836_s10 + $0x938] sm:$0xff]  ;;  %v13650_v31 = vld [vmem:[%s17836_s10 + $0x940] sm:$0xff] }
  0x95   :  { %18628 = vst [vmem:[#allocation309_spill] sm:$0xff] %v13640_v54  ;;  %18629 = vst [vmem:[#allocation310_spill] sm:$0xff] %v13645_v36  ;;  %v13655_v24 = vld [vmem:[%s17836_s10 + $0x948] sm:$0xff]  ;;  %v13660_v23 = vld [vmem:[%s17836_s10 + $0x950] sm:$0xff] }
  0x96   :  { %18630 = vst [vmem:[#allocation311_spill] sm:$0xff] %v13650_v31  ;;  %18631 = vst [vmem:[#allocation312_spill] sm:$0xff] %v13655_v24  ;;  %v13665_v54 = vld [vmem:[%s17836_s10 + $0x958] sm:$0xff]  ;;  %v13670_v41 = vld [vmem:[%s17836_s10 + $0x960] sm:$0xff] }
  0x97   :  { %18632 = vst [vmem:[#allocation313_spill] sm:$0xff] %v13660_v23  ;;  %18633 = vst [vmem:[#allocation314_spill] sm:$0xff] %v13665_v54  ;;  %v13675_v31 = vld [vmem:[%s17836_s10 + $0x968] sm:$0xff]  ;;  %v13680_v24 = vld [vmem:[%s17836_s10 + $0x970] sm:$0xff] }
  0x98   :  { %18634 = vst [vmem:[#allocation315_spill] sm:$0xff] %v13670_v41  ;;  %18635 = vst [vmem:[#allocation316_spill] sm:$0xff] %v13675_v31  ;;  %v13685_v23 = vld [vmem:[%s17836_s10 + $0x978] sm:$0xff]  ;;  %v13690_v54 = vld [vmem:[%s17836_s10 + $0x980] sm:$0xff] }
  0x99   :  { %18636 = vst [vmem:[#allocation317_spill] sm:$0xff] %v13680_v24  ;;  %18637 = vst [vmem:[#allocation318_spill] sm:$0xff] %v13685_v23  ;;  %v13695_v46 = vld [vmem:[%s17836_s10 + $0x988] sm:$0xff]  ;;  %v13700_v31 = vld [vmem:[%s17836_s10 + $0x990] sm:$0xff] }
  0x9a   :  { %18638 = vst [vmem:[#allocation319_spill] sm:$0xff] %v13690_v54  ;;  %18639 = vst [vmem:[#allocation320_spill] sm:$0xff] %v13695_v46  ;;  %v13705_v24 = vld [vmem:[%s17836_s10 + $0x998] sm:$0xff]  ;;  %v13710_v23 = vld [vmem:[%s17836_s10 + $0x9a0] sm:$0xff] }
  0x9b   :  { %18640 = vst [vmem:[#allocation321_spill] sm:$0xff] %v13700_v31  ;;  %18641 = vst [vmem:[#allocation322_spill] sm:$0xff] %v13705_v24  ;;  %v13715_v54 = vld [vmem:[%s17836_s10 + $0x9a8] sm:$0xff]  ;;  %v13720_v51 = vld [vmem:[%s17836_s10 + $0x9b0] sm:$0xff] }
  0x9c   :  { %18642 = vst [vmem:[#allocation323_spill] sm:$0xff] %v13710_v23  ;;  %18643 = vst [vmem:[#allocation324_spill] sm:$0xff] %v13715_v54  ;;  %v13725_v31 = vld [vmem:[%s17836_s10 + $0x9b8] sm:$0xff]  ;;  %v13730_v24 = vld [vmem:[%s17836_s10 + $0x9c0] sm:$0xff] }
  0x9d   :  { %18644 = vst [vmem:[#allocation325_spill] sm:$0xff] %v13720_v51  ;;  %18645 = vst [vmem:[#allocation326_spill] sm:$0xff] %v13725_v31  ;;  %v13735_v23 = vld [vmem:[%s17836_s10 + $0x9c8] sm:$0xff]  ;;  %v13740_v54 = vld [vmem:[%s17836_s10 + $0x9d0] sm:$0xff] }
  0x9e   :  { %18646 = vst [vmem:[#allocation327_spill] sm:$0xff] %v13730_v24  ;;  %18647 = vst [vmem:[#allocation328_spill] sm:$0xff] %v13735_v23  ;;  %v13745_v56 = vld [vmem:[%s17836_s10 + $0x9d8] sm:$0xff]  ;;  %v13750_v31 = vld [vmem:[%s17836_s10 + $0x9e0] sm:$0xff] }
  0x9f   :  { %18648 = vst [vmem:[#allocation329_spill] sm:$0xff] %v13740_v54  ;;  %18649 = vst [vmem:[#allocation330_spill] sm:$0xff] %v13745_v56  ;;  %v13755_v24 = vld [vmem:[%s17836_s10 + $0x9e8] sm:$0xff]  ;;  %v13760_v23 = vld [vmem:[%s17836_s10 + $0x9f0] sm:$0xff] }
  0xa0   :  { %18650 = vst [vmem:[#allocation331_spill] sm:$0xff] %v13750_v31  ;;  %18651 = vst [vmem:[#allocation332_spill] sm:$0xff] %v13755_v24  ;;  %v13765_v54 = vld [vmem:[%s17836_s10 + $0x9f8] sm:$0xff] }
  0xa1   :  { %18652 = vst [vmem:[#allocation333_spill] sm:$0xff] %v13760_v23  ;;  %18653 = vst [vmem:[#allocation334_spill] sm:$0xff] %v13765_v54 }
  0xa2   :  { %730 = vsyncadd [#allocation5], 40960  ;;  %v13770_v31 = vld [vmem:[%s17837_s11] sm:$0xff]  ;;  %v13775_v24 = vld [vmem:[%s17837_s11 + $0x8] sm:$0xff] }
  0xa3   :  { %18654 = vst [vmem:[#allocation335_spill] sm:$0xff] %v13770_v31  ;;  %18655 = vst [vmem:[#allocation336_spill] sm:$0xff] %v13775_v24  ;;  %v13780_v23 = vld [vmem:[%s17837_s11 + $0x10] sm:$0xff]  ;;  %v13785_v54 = vld [vmem:[%s17837_s11 + $0x18] sm:$0xff] }
  0xa4   :  { %18656 = vst [vmem:[#allocation337_spill] sm:$0xff] %v13780_v23  ;;  %18657 = vst [vmem:[#allocation338_spill] sm:$0xff] %v13785_v54  ;;  %v13790_v61 = vld [vmem:[%s17837_s11 + $0x20] sm:$0xff]  ;;  %v13795_v31 = vld [vmem:[%s17837_s11 + $0x28] sm:$0xff] }
  0xa5   :  { %18658 = vst [vmem:[#allocation339_spill] sm:$0xff] %v13790_v61  ;;  %18659 = vst [vmem:[#allocation340_spill] sm:$0xff] %v13795_v31  ;;  %v13800_v24 = vld [vmem:[%s17837_s11 + $0x30] sm:$0xff]  ;;  %v13805_v23 = vld [vmem:[%s17837_s11 + $0x38] sm:$0xff] }
  0xa6   :  { %18660 = vst [vmem:[#allocation341_spill] sm:$0xff] %v13800_v24  ;;  %18661 = vst [vmem:[#allocation342_spill] sm:$0xff] %v13805_v23  ;;  %v13810_v54 = vld [vmem:[%s17837_s11 + $0x40] sm:$0xff]  ;;  %v13815_v61 = vld [vmem:[%s17837_s11 + $0x48] sm:$0xff] }
  0xa7   :  { %18662 = vst [vmem:[#allocation343_spill] sm:$0xff] %v13810_v54  ;;  %18663 = vst [vmem:[#allocation344_spill] sm:$0xff] %v13815_v61  ;;  %v13820_v31 = vld [vmem:[%s17837_s11 + $0x50] sm:$0xff]  ;;  %v13825_v24 = vld [vmem:[%s17837_s11 + $0x58] sm:$0xff] }
  0xa8   :  { %18664 = vst [vmem:[#allocation345_spill] sm:$0xff] %v13820_v31  ;;  %18665 = vst [vmem:[#allocation346_spill] sm:$0xff] %v13825_v24  ;;  %v13830_v23 = vld [vmem:[%s17837_s11 + $0x60] sm:$0xff]  ;;  %v13835_v54 = vld [vmem:[%s17837_s11 + $0x68] sm:$0xff] }
  0xa9   :  { %18666 = vst [vmem:[#allocation347_spill] sm:$0xff] %v13830_v23  ;;  %18667 = vst [vmem:[#allocation348_spill] sm:$0xff] %v13835_v54  ;;  %v13840_v61 = vld [vmem:[%s17837_s11 + $0x70] sm:$0xff]  ;;  %v13845_v31 = vld [vmem:[%s17837_s11 + $0x78] sm:$0xff] }
  0xaa   :  { %18668 = vst [vmem:[#allocation349_spill] sm:$0xff] %v13840_v61  ;;  %18669 = vst [vmem:[#allocation350_spill] sm:$0xff] %v13845_v31  ;;  %v13850_v24 = vld [vmem:[%s17837_s11 + $0x80] sm:$0xff]  ;;  %v13855_v23 = vld [vmem:[%s17837_s11 + $0x88] sm:$0xff] }
  0xab   :  { %18670 = vst [vmem:[#allocation351_spill] sm:$0xff] %v13850_v24  ;;  %18671 = vst [vmem:[#allocation352_spill] sm:$0xff] %v13855_v23  ;;  %v13860_v54 = vld [vmem:[%s17837_s11 + $0x90] sm:$0xff]  ;;  %v13865_v61 = vld [vmem:[%s17837_s11 + $0x98] sm:$0xff] }
  0xac   :  { %18672 = vst [vmem:[#allocation353_spill] sm:$0xff] %v13860_v54  ;;  %18673 = vst [vmem:[#allocation354_spill] sm:$0xff] %v13865_v61  ;;  %v13870_v31 = vld [vmem:[%s17837_s11 + $0xa0] sm:$0xff]  ;;  %v13875_v24 = vld [vmem:[%s17837_s11 + $0xa8] sm:$0xff] }
  0xad   :  { %18674 = vst [vmem:[#allocation355_spill] sm:$0xff] %v13870_v31  ;;  %18675 = vst [vmem:[#allocation356_spill] sm:$0xff] %v13875_v24  ;;  %v13880_v23 = vld [vmem:[%s17837_s11 + $0xb0] sm:$0xff]  ;;  %v13885_v54 = vld [vmem:[%s17837_s11 + $0xb8] sm:$0xff] }
  0xae   :  { %18676 = vst [vmem:[#allocation357_spill] sm:$0xff] %v13880_v23  ;;  %18677 = vst [vmem:[#allocation358_spill] sm:$0xff] %v13885_v54  ;;  %v13890_v61 = vld [vmem:[%s17837_s11 + $0xc0] sm:$0xff]  ;;  %v13895_v31 = vld [vmem:[%s17837_s11 + $0xc8] sm:$0xff] }
  0xaf   :  { %18678 = vst [vmem:[#allocation359_spill] sm:$0xff] %v13890_v61  ;;  %18679 = vst [vmem:[#allocation360_spill] sm:$0xff] %v13895_v31  ;;  %v13900_v24 = vld [vmem:[%s17837_s11 + $0xd0] sm:$0xff]  ;;  %v13905_v23 = vld [vmem:[%s17837_s11 + $0xd8] sm:$0xff] }
  0xb0   :  { %18680 = vst [vmem:[#allocation361_spill] sm:$0xff] %v13900_v24  ;;  %18681 = vst [vmem:[#allocation362_spill] sm:$0xff] %v13905_v23  ;;  %v13910_v54 = vld [vmem:[%s17837_s11 + $0xe0] sm:$0xff]  ;;  %v13915_v61 = vld [vmem:[%s17837_s11 + $0xe8] sm:$0xff] }
  0xb1   :  { %18682 = vst [vmem:[#allocation363_spill] sm:$0xff] %v13910_v54  ;;  %18683 = vst [vmem:[#allocation364_spill] sm:$0xff] %v13915_v61  ;;  %v13920_v31 = vld [vmem:[%s17837_s11 + $0xf0] sm:$0xff]  ;;  %v13925_v24 = vld [vmem:[%s17837_s11 + $0xf8] sm:$0xff] }
  0xb2   :  { %18684 = vst [vmem:[#allocation365_spill] sm:$0xff] %v13920_v31  ;;  %18685 = vst [vmem:[#allocation366_spill] sm:$0xff] %v13925_v24 }
  0xb3   :  { %836 = vsyncadd [#allocation5 + $0x1], 4096  ;;  %v13930_v23 = vld [vmem:[%s17838_s12] sm:$0xff]  ;;  %v13935_v54 = vld [vmem:[%s17838_s12 + $0x8] sm:$0xff] }
  0xb4   :  { %18686 = vst [vmem:[#allocation367_spill] sm:$0xff] %v13930_v23  ;;  %18687 = vst [vmem:[#allocation368_spill] sm:$0xff] %v13935_v54  ;;  %v13940_v61 = vld [vmem:[%s17838_s12 + $0x10] sm:$0xff]  ;;  %v13945_v31 = vld [vmem:[%s17838_s12 + $0x18] sm:$0xff] }
  0xb5   :  { %18688 = vst [vmem:[#allocation369_spill] sm:$0xff] %v13940_v61  ;;  %18689 = vst [vmem:[#allocation370_spill] sm:$0xff] %v13945_v31  ;;  %v13950_v24 = vld [vmem:[%s17838_s12 + $0x20] sm:$0xff]  ;;  %v13955_v23 = vld [vmem:[%s17838_s12 + $0x28] sm:$0xff] }
  0xb6   :  { %18690 = vst [vmem:[#allocation371_spill] sm:$0xff] %v13950_v24  ;;  %18691 = vst [vmem:[#allocation372_spill] sm:$0xff] %v13955_v23  ;;  %v13960_v54 = vld [vmem:[%s17838_s12 + $0x30] sm:$0xff]  ;;  %v13965_v61 = vld [vmem:[%s17838_s12 + $0x38] sm:$0xff] }
  0xb7   :  { %18692 = vst [vmem:[#allocation373_spill] sm:$0xff] %v13960_v54  ;;  %18693 = vst [vmem:[#allocation374_spill] sm:$0xff] %v13965_v61  ;;  %v13970_v31 = vld [vmem:[%s17838_s12 + $0x40] sm:$0xff]  ;;  %v13975_v24 = vld [vmem:[%s17838_s12 + $0x48] sm:$0xff] }
  0xb8   :  { %18694 = vst [vmem:[#allocation375_spill] sm:$0xff] %v13970_v31  ;;  %18695 = vst [vmem:[#allocation376_spill] sm:$0xff] %v13975_v24  ;;  %v13980_v23 = vld [vmem:[%s17838_s12 + $0x50] sm:$0xff]  ;;  %v13985_v54 = vld [vmem:[%s17838_s12 + $0x58] sm:$0xff] }
  0xb9   :  { %18696 = vst [vmem:[#allocation377_spill] sm:$0xff] %v13980_v23  ;;  %18697 = vst [vmem:[#allocation378_spill] sm:$0xff] %v13985_v54  ;;  %v13990_v61 = vld [vmem:[%s17838_s12 + $0x60] sm:$0xff]  ;;  %v13995_v31 = vld [vmem:[%s17838_s12 + $0x68] sm:$0xff] }
  0xba   :  { %18698 = vst [vmem:[#allocation379_spill] sm:$0xff] %v13990_v61  ;;  %18699 = vst [vmem:[#allocation380_spill] sm:$0xff] %v13995_v31  ;;  %v14000_v24 = vld [vmem:[%s17838_s12 + $0x70] sm:$0xff]  ;;  %v14005_v23 = vld [vmem:[%s17838_s12 + $0x78] sm:$0xff] }
  0xbb   :  { %18700 = vst [vmem:[#allocation381_spill] sm:$0xff] %v14000_v24  ;;  %18701 = vst [vmem:[#allocation382_spill] sm:$0xff] %v14005_v23  ;;  %v14010_v54 = vld [vmem:[%s17838_s12 + $0x80] sm:$0xff]  ;;  %v14015_v61 = vld [vmem:[%s17838_s12 + $0x88] sm:$0xff] }
  0xbc   :  { %18702 = vst [vmem:[#allocation383_spill] sm:$0xff] %v14010_v54  ;;  %18703 = vst [vmem:[#allocation384_spill] sm:$0xff] %v14015_v61  ;;  %v14020_v31 = vld [vmem:[%s17838_s12 + $0x90] sm:$0xff]  ;;  %v14025_v24 = vld [vmem:[%s17838_s12 + $0x98] sm:$0xff] }
  0xbd   :  { %18704 = vst [vmem:[#allocation385_spill] sm:$0xff] %v14020_v31  ;;  %18705 = vst [vmem:[#allocation386_spill] sm:$0xff] %v14025_v24  ;;  %v14030_v23 = vld [vmem:[%s17838_s12 + $0xa0] sm:$0xff]  ;;  %v14035_v54 = vld [vmem:[%s17838_s12 + $0xa8] sm:$0xff] }
  0xbe   :  { %18706 = vst [vmem:[#allocation387_spill] sm:$0xff] %v14030_v23  ;;  %18707 = vst [vmem:[#allocation388_spill] sm:$0xff] %v14035_v54  ;;  %v14040_v61 = vld [vmem:[%s17838_s12 + $0xb0] sm:$0xff]  ;;  %v14045_v31 = vld [vmem:[%s17838_s12 + $0xb8] sm:$0xff] }
  0xbf   :  { %18708 = vst [vmem:[#allocation389_spill] sm:$0xff] %v14040_v61  ;;  %18709 = vst [vmem:[#allocation390_spill] sm:$0xff] %v14045_v31  ;;  %v14050_v24 = vld [vmem:[%s17838_s12 + $0xc0] sm:$0xff]  ;;  %v14055_v23 = vld [vmem:[%s17838_s12 + $0xc8] sm:$0xff] }
  0xc0   :  { %18710 = vst [vmem:[#allocation391_spill] sm:$0xff] %v14050_v24  ;;  %18711 = vst [vmem:[#allocation392_spill] sm:$0xff] %v14055_v23  ;;  %v14060_v54 = vld [vmem:[%s17838_s12 + $0xd0] sm:$0xff]  ;;  %v14065_v61 = vld [vmem:[%s17838_s12 + $0xd8] sm:$0xff] }
  0xc1   :  { %18712 = vst [vmem:[#allocation393_spill] sm:$0xff] %v14060_v54  ;;  %18713 = vst [vmem:[#allocation394_spill] sm:$0xff] %v14065_v61  ;;  %v14070_v31 = vld [vmem:[%s17838_s12 + $0xe0] sm:$0xff]  ;;  %v14075_v24 = vld [vmem:[%s17838_s12 + $0xe8] sm:$0xff] }
  0xc2   :  { %18714 = vst [vmem:[#allocation395_spill] sm:$0xff] %v14070_v31  ;;  %18715 = vst [vmem:[#allocation396_spill] sm:$0xff] %v14075_v24  ;;  %v14080_v23 = vld [vmem:[%s17838_s12 + $0xf0] sm:$0xff]  ;;  %v14085_v54 = vld [vmem:[%s17838_s12 + $0xf8] sm:$0xff] }
  0xc3   :  { %18716 = vst [vmem:[#allocation397_spill] sm:$0xff] %v14080_v23  ;;  %18717 = vst [vmem:[#allocation398_spill] sm:$0xff] %v14085_v54  ;;  %v14090_v61 = vld [vmem:[%s17838_s12 + $0x100] sm:$0xff]  ;;  %v14095_v31 = vld [vmem:[%s17838_s12 + $0x108] sm:$0xff] }
  0xc4   :  { %18718 = vst [vmem:[#allocation399_spill] sm:$0xff] %v14090_v61  ;;  %18719 = vst [vmem:[#allocation400_spill] sm:$0xff] %v14095_v31  ;;  %v14100_v24 = vld [vmem:[%s17838_s12 + $0x110] sm:$0xff]  ;;  %v14105_v23 = vld [vmem:[%s17838_s12 + $0x118] sm:$0xff] }
  0xc5   :  { %18720 = vst [vmem:[#allocation401_spill] sm:$0xff] %v14100_v24  ;;  %18721 = vst [vmem:[#allocation402_spill] sm:$0xff] %v14105_v23  ;;  %v14110_v54 = vld [vmem:[%s17838_s12 + $0x120] sm:$0xff]  ;;  %v14115_v61 = vld [vmem:[%s17838_s12 + $0x128] sm:$0xff] }
  0xc6   :  { %18722 = vst [vmem:[#allocation403_spill] sm:$0xff] %v14110_v54  ;;  %18723 = vst [vmem:[#allocation404_spill] sm:$0xff] %v14115_v61  ;;  %v14120_v31 = vld [vmem:[%s17838_s12 + $0x130] sm:$0xff]  ;;  %v14125_v24 = vld [vmem:[%s17838_s12 + $0x138] sm:$0xff] }
  0xc7   :  { %18724 = vst [vmem:[#allocation405_spill] sm:$0xff] %v14120_v31  ;;  %18725 = vst [vmem:[#allocation406_spill] sm:$0xff] %v14125_v24  ;;  %v14130_v23 = vld [vmem:[%s17838_s12 + $0x140] sm:$0xff]  ;;  %v14135_v54 = vld [vmem:[%s17838_s12 + $0x148] sm:$0xff] }
  0xc8   :  { %18726 = vst [vmem:[#allocation407_spill] sm:$0xff] %v14130_v23  ;;  %18727 = vst [vmem:[#allocation408_spill] sm:$0xff] %v14135_v54  ;;  %v14140_v61 = vld [vmem:[%s17838_s12 + $0x150] sm:$0xff]  ;;  %v14145_v31 = vld [vmem:[%s17838_s12 + $0x158] sm:$0xff] }
  0xc9   :  { %18728 = vst [vmem:[#allocation409_spill] sm:$0xff] %v14140_v61  ;;  %18729 = vst [vmem:[#allocation410_spill] sm:$0xff] %v14145_v31  ;;  %v14150_v24 = vld [vmem:[%s17838_s12 + $0x160] sm:$0xff]  ;;  %v14155_v23 = vld [vmem:[%s17838_s12 + $0x168] sm:$0xff] }
  0xca   :  { %18730 = vst [vmem:[#allocation411_spill] sm:$0xff] %v14150_v24  ;;  %18731 = vst [vmem:[#allocation412_spill] sm:$0xff] %v14155_v23  ;;  %v14160_v54 = vld [vmem:[%s17838_s12 + $0x170] sm:$0xff]  ;;  %v14165_v61 = vld [vmem:[%s17838_s12 + $0x178] sm:$0xff] }
  0xcb   :  { %18732 = vst [vmem:[#allocation413_spill] sm:$0xff] %v14160_v54  ;;  %18733 = vst [vmem:[#allocation414_spill] sm:$0xff] %v14165_v61  ;;  %v14170_v31 = vld [vmem:[%s17838_s12 + $0x180] sm:$0xff]  ;;  %v14175_v24 = vld [vmem:[%s17838_s12 + $0x188] sm:$0xff] }
  0xcc   :  { %18734 = vst [vmem:[#allocation415_spill] sm:$0xff] %v14170_v31  ;;  %18735 = vst [vmem:[#allocation416_spill] sm:$0xff] %v14175_v24  ;;  %v14180_v23 = vld [vmem:[%s17838_s12 + $0x190] sm:$0xff]  ;;  %v14185_v54 = vld [vmem:[%s17838_s12 + $0x198] sm:$0xff] }
  0xcd   :  { %18736 = vst [vmem:[#allocation417_spill] sm:$0xff] %v14180_v23  ;;  %18737 = vst [vmem:[#allocation418_spill] sm:$0xff] %v14185_v54  ;;  %v14190_v61 = vld [vmem:[%s17838_s12 + $0x1a0] sm:$0xff]  ;;  %v14195_v31 = vld [vmem:[%s17838_s12 + $0x1a8] sm:$0xff] }
  0xce   :  { %18738 = vst [vmem:[#allocation419_spill] sm:$0xff] %v14190_v61  ;;  %18739 = vst [vmem:[#allocation420_spill] sm:$0xff] %v14195_v31  ;;  %v14200_v24 = vld [vmem:[%s17838_s12 + $0x1b0] sm:$0xff]  ;;  %v14205_v23 = vld [vmem:[%s17838_s12 + $0x1b8] sm:$0xff] }
  0xcf   :  { %18740 = vst [vmem:[#allocation421_spill] sm:$0xff] %v14200_v24  ;;  %18741 = vst [vmem:[#allocation422_spill] sm:$0xff] %v14205_v23  ;;  %v14210_v54 = vld [vmem:[%s17838_s12 + $0x1c0] sm:$0xff]  ;;  %v14215_v61 = vld [vmem:[%s17838_s12 + $0x1c8] sm:$0xff] }
  0xd0   :  { %18742 = vst [vmem:[#allocation423_spill] sm:$0xff] %v14210_v54  ;;  %18743 = vst [vmem:[#allocation424_spill] sm:$0xff] %v14215_v61  ;;  %v14220_v31 = vld [vmem:[%s17838_s12 + $0x1d0] sm:$0xff]  ;;  %v14225_v24 = vld [vmem:[%s17838_s12 + $0x1d8] sm:$0xff] }
  0xd1   :  { %18744 = vst [vmem:[#allocation425_spill] sm:$0xff] %v14220_v31  ;;  %18745 = vst [vmem:[#allocation426_spill] sm:$0xff] %v14225_v24  ;;  %v14230_v23 = vld [vmem:[%s17838_s12 + $0x1e0] sm:$0xff]  ;;  %v14235_v54 = vld [vmem:[%s17838_s12 + $0x1e8] sm:$0xff] }
  0xd2   :  { %18746 = vst [vmem:[#allocation427_spill] sm:$0xff] %v14230_v23  ;;  %18747 = vst [vmem:[#allocation428_spill] sm:$0xff] %v14235_v54  ;;  %v14240_v61 = vld [vmem:[%s17838_s12 + $0x1f0] sm:$0xff]  ;;  %v14245_v31 = vld [vmem:[%s17838_s12 + $0x1f8] sm:$0xff] }
  0xd3   :  { %18748 = vst [vmem:[#allocation429_spill] sm:$0xff] %v14240_v61  ;;  %18749 = vst [vmem:[#allocation430_spill] sm:$0xff] %v14245_v31  ;;  %v14250_v24 = vld [vmem:[%s17838_s12 + $0x200] sm:$0xff]  ;;  %v14255_v23 = vld [vmem:[%s17838_s12 + $0x208] sm:$0xff] }
  0xd4   :  { %18750 = vst [vmem:[#allocation431_spill] sm:$0xff] %v14250_v24  ;;  %18751 = vst [vmem:[#allocation432_spill] sm:$0xff] %v14255_v23  ;;  %v14260_v54 = vld [vmem:[%s17838_s12 + $0x210] sm:$0xff]  ;;  %v14265_v61 = vld [vmem:[%s17838_s12 + $0x218] sm:$0xff] }
  0xd5   :  { %18752 = vst [vmem:[#allocation433_spill] sm:$0xff] %v14260_v54  ;;  %18753 = vst [vmem:[#allocation434_spill] sm:$0xff] %v14265_v61  ;;  %v14270_v31 = vld [vmem:[%s17838_s12 + $0x220] sm:$0xff]  ;;  %v14275_v24 = vld [vmem:[%s17838_s12 + $0x228] sm:$0xff] }
  0xd6   :  { %18754 = vst [vmem:[#allocation435_spill] sm:$0xff] %v14270_v31  ;;  %18755 = vst [vmem:[#allocation436_spill] sm:$0xff] %v14275_v24  ;;  %v14280_v23 = vld [vmem:[%s17838_s12 + $0x230] sm:$0xff]  ;;  %v14285_v54 = vld [vmem:[%s17838_s12 + $0x238] sm:$0xff] }
  0xd7   :  { %18756 = vst [vmem:[#allocation437_spill] sm:$0xff] %v14280_v23  ;;  %18757 = vst [vmem:[#allocation438_spill] sm:$0xff] %v14285_v54  ;;  %v14290_v61 = vld [vmem:[%s17838_s12 + $0x240] sm:$0xff]  ;;  %v14295_v31 = vld [vmem:[%s17838_s12 + $0x248] sm:$0xff] }
  0xd8   :  { %18758 = vst [vmem:[#allocation439_spill] sm:$0xff] %v14290_v61  ;;  %18759 = vst [vmem:[#allocation440_spill] sm:$0xff] %v14295_v31  ;;  %v14300_v24 = vld [vmem:[%s17838_s12 + $0x250] sm:$0xff]  ;;  %v14305_v23 = vld [vmem:[%s17838_s12 + $0x258] sm:$0xff] }
  0xd9   :  { %18760 = vst [vmem:[#allocation441_spill] sm:$0xff] %v14300_v24  ;;  %18761 = vst [vmem:[#allocation442_spill] sm:$0xff] %v14305_v23  ;;  %v14310_v54 = vld [vmem:[%s17838_s12 + $0x260] sm:$0xff]  ;;  %v14315_v61 = vld [vmem:[%s17838_s12 + $0x268] sm:$0xff] }
  0xda   :  { %18762 = vst [vmem:[#allocation443_spill] sm:$0xff] %v14310_v54  ;;  %18763 = vst [vmem:[#allocation444_spill] sm:$0xff] %v14315_v61  ;;  %v14320_v31 = vld [vmem:[%s17838_s12 + $0x270] sm:$0xff]  ;;  %v14325_v24 = vld [vmem:[%s17838_s12 + $0x278] sm:$0xff] }
  0xdb   :  { %18764 = vst [vmem:[#allocation445_spill] sm:$0xff] %v14320_v31  ;;  %18765 = vst [vmem:[#allocation446_spill] sm:$0xff] %v14325_v24  ;;  %v14330_v23 = vld [vmem:[%s17838_s12 + $0x280] sm:$0xff]  ;;  %v14335_v54 = vld [vmem:[%s17838_s12 + $0x288] sm:$0xff] }
  0xdc   :  { %18766 = vst [vmem:[#allocation447_spill] sm:$0xff] %v14330_v23  ;;  %18767 = vst [vmem:[#allocation448_spill] sm:$0xff] %v14335_v54  ;;  %v14340_v61 = vld [vmem:[%s17838_s12 + $0x290] sm:$0xff]  ;;  %v14345_v31 = vld [vmem:[%s17838_s12 + $0x298] sm:$0xff] }
  0xdd   :  { %18768 = vst [vmem:[#allocation449_spill] sm:$0xff] %v14340_v61  ;;  %18769 = vst [vmem:[#allocation450_spill] sm:$0xff] %v14345_v31  ;;  %v14350_v24 = vld [vmem:[%s17838_s12 + $0x2a0] sm:$0xff]  ;;  %v14355_v23 = vld [vmem:[%s17838_s12 + $0x2a8] sm:$0xff] }
  0xde   :  { %18770 = vst [vmem:[#allocation451_spill] sm:$0xff] %v14350_v24  ;;  %18771 = vst [vmem:[#allocation452_spill] sm:$0xff] %v14355_v23  ;;  %v14360_v54 = vld [vmem:[%s17838_s12 + $0x2b0] sm:$0xff]  ;;  %v14365_v61 = vld [vmem:[%s17838_s12 + $0x2b8] sm:$0xff] }
  0xdf   :  { %18772 = vst [vmem:[#allocation453_spill] sm:$0xff] %v14360_v54  ;;  %18773 = vst [vmem:[#allocation454_spill] sm:$0xff] %v14365_v61  ;;  %v14370_v31 = vld [vmem:[%s17838_s12 + $0x2c0] sm:$0xff]  ;;  %v14375_v24 = vld [vmem:[%s17838_s12 + $0x2c8] sm:$0xff] }
  0xe0   :  { %18774 = vst [vmem:[#allocation455_spill] sm:$0xff] %v14370_v31  ;;  %18775 = vst [vmem:[#allocation456_spill] sm:$0xff] %v14375_v24  ;;  %v14380_v23 = vld [vmem:[%s17838_s12 + $0x2d0] sm:$0xff]  ;;  %v14385_v54 = vld [vmem:[%s17838_s12 + $0x2d8] sm:$0xff] }
  0xe1   :  { %18776 = vst [vmem:[#allocation457_spill] sm:$0xff] %v14380_v23  ;;  %18777 = vst [vmem:[#allocation458_spill] sm:$0xff] %v14385_v54  ;;  %v14390_v61 = vld [vmem:[%s17838_s12 + $0x2e0] sm:$0xff]  ;;  %v14395_v31 = vld [vmem:[%s17838_s12 + $0x2e8] sm:$0xff] }
  0xe2   :  { %18778 = vst [vmem:[#allocation459_spill] sm:$0xff] %v14390_v61  ;;  %18779 = vst [vmem:[#allocation460_spill] sm:$0xff] %v14395_v31  ;;  %v14400_v24 = vld [vmem:[%s17838_s12 + $0x2f0] sm:$0xff]  ;;  %v14405_v23 = vld [vmem:[%s17838_s12 + $0x2f8] sm:$0xff] }
  0xe3   :  { %18780 = vst [vmem:[#allocation461_spill] sm:$0xff] %v14400_v24  ;;  %18781 = vst [vmem:[#allocation462_spill] sm:$0xff] %v14405_v23  ;;  %v14410_v54 = vld [vmem:[%s17838_s12 + $0x300] sm:$0xff]  ;;  %v14415_v61 = vld [vmem:[%s17838_s12 + $0x308] sm:$0xff] }
  0xe4   :  { %18782 = vst [vmem:[#allocation463_spill] sm:$0xff] %v14410_v54  ;;  %18783 = vst [vmem:[#allocation464_spill] sm:$0xff] %v14415_v61  ;;  %v14420_v31 = vld [vmem:[%s17838_s12 + $0x310] sm:$0xff]  ;;  %v14425_v24 = vld [vmem:[%s17838_s12 + $0x318] sm:$0xff] }
  0xe5   :  { %18784 = vst [vmem:[#allocation465_spill] sm:$0xff] %v14420_v31  ;;  %18785 = vst [vmem:[#allocation466_spill] sm:$0xff] %v14425_v24  ;;  %v14430_v23 = vld [vmem:[%s17838_s12 + $0x320] sm:$0xff]  ;;  %v14435_v54 = vld [vmem:[%s17838_s12 + $0x328] sm:$0xff] }
  0xe6   :  { %18786 = vst [vmem:[#allocation467_spill] sm:$0xff] %v14430_v23  ;;  %18787 = vst [vmem:[#allocation468_spill] sm:$0xff] %v14435_v54  ;;  %v14440_v61 = vld [vmem:[%s17838_s12 + $0x330] sm:$0xff]  ;;  %v14445_v31 = vld [vmem:[%s17838_s12 + $0x338] sm:$0xff] }
  0xe7   :  { %18788 = vst [vmem:[#allocation469_spill] sm:$0xff] %v14440_v61  ;;  %18789 = vst [vmem:[#allocation470_spill] sm:$0xff] %v14445_v31  ;;  %v14450_v24 = vld [vmem:[%s17838_s12 + $0x340] sm:$0xff]  ;;  %v14455_v23 = vld [vmem:[%s17838_s12 + $0x348] sm:$0xff] }
  0xe8   :  { %18790 = vst [vmem:[#allocation471_spill] sm:$0xff] %v14450_v24  ;;  %18791 = vst [vmem:[#allocation472_spill] sm:$0xff] %v14455_v23  ;;  %v14460_v54 = vld [vmem:[%s17838_s12 + $0x350] sm:$0xff]  ;;  %v14465_v61 = vld [vmem:[%s17838_s12 + $0x358] sm:$0xff] }
  0xe9   :  { %18792 = vst [vmem:[#allocation473_spill] sm:$0xff] %v14460_v54  ;;  %18793 = vst [vmem:[#allocation474_spill] sm:$0xff] %v14465_v61  ;;  %v14470_v31 = vld [vmem:[%s17838_s12 + $0x360] sm:$0xff]  ;;  %v14475_v24 = vld [vmem:[%s17838_s12 + $0x368] sm:$0xff] }
  0xea   :  { %18794 = vst [vmem:[#allocation475_spill] sm:$0xff] %v14470_v31  ;;  %18795 = vst [vmem:[#allocation476_spill] sm:$0xff] %v14475_v24  ;;  %v14480_v23 = vld [vmem:[%s17838_s12 + $0x370] sm:$0xff]  ;;  %v14485_v54 = vld [vmem:[%s17838_s12 + $0x378] sm:$0xff] }
  0xeb   :  { %18796 = vst [vmem:[#allocation477_spill] sm:$0xff] %v14480_v23  ;;  %18797 = vst [vmem:[#allocation478_spill] sm:$0xff] %v14485_v54  ;;  %v14490_v61 = vld [vmem:[%s17838_s12 + $0x380] sm:$0xff]  ;;  %v14495_v31 = vld [vmem:[%s17838_s12 + $0x388] sm:$0xff] }
  0xec   :  { %18798 = vst [vmem:[#allocation479_spill] sm:$0xff] %v14490_v61  ;;  %18799 = vst [vmem:[#allocation480_spill] sm:$0xff] %v14495_v31  ;;  %v14500_v24 = vld [vmem:[%s17838_s12 + $0x390] sm:$0xff]  ;;  %v14505_v23 = vld [vmem:[%s17838_s12 + $0x398] sm:$0xff] }
  0xed   :  { %18800 = vst [vmem:[#allocation481_spill] sm:$0xff] %v14500_v24  ;;  %18801 = vst [vmem:[#allocation482_spill] sm:$0xff] %v14505_v23  ;;  %v14510_v54 = vld [vmem:[%s17838_s12 + $0x3a0] sm:$0xff]  ;;  %v14515_v61 = vld [vmem:[%s17838_s12 + $0x3a8] sm:$0xff] }
  0xee   :  { %18802 = vst [vmem:[#allocation483_spill] sm:$0xff] %v14510_v54  ;;  %18803 = vst [vmem:[#allocation484_spill] sm:$0xff] %v14515_v61  ;;  %v14520_v31 = vld [vmem:[%s17838_s12 + $0x3b0] sm:$0xff]  ;;  %v14525_v24 = vld [vmem:[%s17838_s12 + $0x3b8] sm:$0xff] }
  0xef   :  { %18804 = vst [vmem:[#allocation485_spill] sm:$0xff] %v14520_v31  ;;  %18805 = vst [vmem:[#allocation486_spill] sm:$0xff] %v14525_v24  ;;  %v14530_v23 = vld [vmem:[%s17838_s12 + $0x3c0] sm:$0xff]  ;;  %v14535_v54 = vld [vmem:[%s17838_s12 + $0x3c8] sm:$0xff] }
  0xf0   :  { %18806 = vst [vmem:[#allocation487_spill] sm:$0xff] %v14530_v23  ;;  %18807 = vst [vmem:[#allocation488_spill] sm:$0xff] %v14535_v54  ;;  %v14540_v61 = vld [vmem:[%s17838_s12 + $0x3d0] sm:$0xff]  ;;  %v14545_v31 = vld [vmem:[%s17838_s12 + $0x3d8] sm:$0xff] }
  0xf1   :  { %18808 = vst [vmem:[#allocation489_spill] sm:$0xff] %v14540_v61  ;;  %18809 = vst [vmem:[#allocation490_spill] sm:$0xff] %v14545_v31  ;;  %v14550_v24 = vld [vmem:[%s17838_s12 + $0x3e0] sm:$0xff]  ;;  %v14555_v23 = vld [vmem:[%s17838_s12 + $0x3e8] sm:$0xff] }
  0xf2   :  { %18810 = vst [vmem:[#allocation491_spill] sm:$0xff] %v14550_v24  ;;  %18811 = vst [vmem:[#allocation492_spill] sm:$0xff] %v14555_v23  ;;  %v14560_v54 = vld [vmem:[%s17838_s12 + $0x3f0] sm:$0xff]  ;;  %v14565_v61 = vld [vmem:[%s17838_s12 + $0x3f8] sm:$0xff] }
  0xf3   :  { %18812 = vst [vmem:[#allocation493_spill] sm:$0xff] %v14560_v54  ;;  %18813 = vst [vmem:[#allocation494_spill] sm:$0xff] %v14565_v61 }
  0xf4   :  { %1134 = vsyncadd [#allocation5 + $0x2], 16384  ;;  %v11722_v31 = vld [vmem:[%s17827_s1 + $0x8] sm:$0xff]   ;;  %v18263_v24 = vmov 0.0   ;;  %v11723_v23 = vld [vmem:[%s17827_s1] sm:$0xff]   ;;  %vm12084_vm0 = vmmov 0  }
  0xf5   :  { %11354 = vmatprep.subr.bf16.mxu0 %v18263_v24  ;;  %11358 = vmatprep.mubr.msk.bf16.mxu0 %vm12084_vm0, %v18263_v24  ;;  %v11724_v61 = vld [vmem:[%s17826_s0] sm:$0xff]   ;;  %vm1323_vm1 = vcmask 261120   ;;  %v11736_v54 = vld [vmem:[%s17828_s2 + $0x50] ss:$12 sps:$4 sm:$0xff]   ;;  %v18814_v14 = vmov 0.0   ;;  %vm1801_vm2 = vcmask 523264  }
  0xf6   :  { %11355 = vmatpush3.bf16.msra.mxu0 %v11722_v31  ;;  %v11725_v31 = vld [vmem:[%s17826_s0 + $0x8] sm:$0xff]   ;;  %v11759_v21 = vld [vmem:[%s17828_s2 + $0x18] ss:$12 sps:$4 sm:$0xff]   ;;  %v18815_v4 = vmov 0   ;;  %vm3710_vm3 = vcmask 64512   ;;  %vm3732_vm4 = vcmask 1043456  }
  0xf7   :  { %11356 = vmatprep.subr.bf16.mxu0 %v18263_v24  ;;  %v11757_v3 = vld [vmem:[%s17828_s2 + $0x1c] ss:$12 sps:$4 sm:$0xff]  }
  0xf8   :  { %v11765_v36 = vld [vmem:[%s17829_s3 + $0x18] sm:$0xff]   ;;  %v11778_v5 = vld [vmem:[%s17830_s4] ss:$8 sps:$4 sm:$0xff]  }
  0xfa   :  { %11357 = vmatpush3.bf16.msra.mxu0 %v11723_v23  ;;  %v11726_v23 = vld [vmem:[%s17826_s0 + $0x10] sm:$0xff]  }
  0xfb   :  { %11458 = vmatprep.subr.bf16.mxu0 %v18263_v24 }
  0xfd   :  { %11359 = vmatmul.mubr.msk.bf16.vlgmr.msra.gmra.mxu0 %vm1323_vm1, %v11724_v61  ;;  %v11744_v61 = vld [vmem:[%s17828_s2 + $0x38] ss:$12 sps:$4 sm:$0xff]  }
  0xfe   :  { %11362 = vmatprep.mubr.msk.bf16.mxu0 %vm12084_vm0, %v18263_v24  ;;  %11459 = vmatpush3.bf16.msra.mxu0 %v11736_v54  ;;  %v11728_v54 = vld [vmem:[%s17826_s0 + $0x20] sm:$0xff]  }
  0xff   :  { %11460 = vmatprep.subr.bf16.mxu0 %v18263_v24 }
 0x102   :  { %11461 = vmatpush3.bf16.msra.mxu0 %v11744_v61  ;;  %v11730_v61 = vld [vmem:[%s17826_s0 + $0x30] sm:$0xff]  }
 0x103   :  { %11462 = vmatprep.subr.bf16.mxu0 %v18263_v24 }
 0x105   :  { %11363 = vmatmul.mubr.msk.bf16.gmra.mxu0 %vm1323_vm1, %v11725_v31  ;;  %v11727_v31 = vld [vmem:[%s17826_s0 + $0x18] sm:$0xff]  }
 0x106   :  { %11366 = vmatprep.mubr.msk.bf16.mxu0 %vm12084_vm0, %v18263_v24 }
 0x10d   :  { %11367 = vmatmul.mubr.msk.bf16.gmra.mxu0 %vm1323_vm1, %v11726_v23  ;;  %v11729_v23 = vld [vmem:[%s17826_s0 + $0x28] sm:$0xff]  }
 0x10e   :  { %11370 = vmatprep.mubr.msk.bf16.mxu0 %vm12084_vm0, %v18263_v24 }
 0x115   :  { %11371 = vmatmul.mubr.msk.bf16.gmra.mxu0 %vm1323_vm1, %v11727_v31  ;;  %v11731_v31 = vld [vmem:[%s17826_s0 + $0x38] sm:$0xff]  }
 0x116   :  { %11374 = vmatprep.mubr.msk.bf16.mxu0 %vm12084_vm0, %v18263_v24 }
 0x11d   :  { %11375 = vmatmul.mubr.msk.bf16.gmra.mxu0 %vm1323_vm1, %v11728_v54  ;;  %v11750_v54 = vld [vmem:[%s17828_s2 + $0x4c] ss:$12 sps:$4 sm:$0xff]  }
 0x11e   :  { %11378 = vmatprep.mubr.msk.bf16.mxu0 %vm12084_vm0, %v18263_v24  ;;  %1885 = vmatprep.subr.bf16.mxu1 %v11750_v54  ;;  %v11760_v54 = vld [vmem:[%s17828_s2 + $0x20] ss:$12 sps:$4 sm:$0xff]  }
 0x11f   :  { %11463 = vmatpush3.bf16.msra.mxu0 %v11760_v54  ;;  %v11735_v54 = vld [vmem:[%s17826_s0 + $0x58] sm:$0xff]  }
 0x120   :  { %11464 = vmatprep.subr.bf16.mxu0 %v18814_v14 }
 0x125   :  { %11379 = vmatmul.mubr.msk.bf16.gmra.mxu0 %vm1323_vm1, %v11729_v23  ;;  %v11752_v23 = vld [vmem:[%s17828_s2 + $0x48] ss:$12 sps:$4 sm:$0xff]  }
 0x126   :  { %11382 = vmatprep.mubr.msk.bf16.mxu0 %vm12084_vm0, %v18263_v24  ;;  %1886 = vmatpush1.bf16.msra.mxu1 %v11752_v23  ;;  %v11761_v23 = vld [vmem:[%s17828_s2 + $0x4] ss:$12 sps:$4 sm:$0xff]  }
 0x12d   :  { %11383 = vmatmul.mubr.msk.bf16.gmra.mxu0 %vm1323_vm1, %v11730_v61  ;;  %v11753_v61 = vld [vmem:[%s17828_s2 + $0x34] ss:$12 sps:$4 sm:$0xff]  }
 0x12e   :  { %11386 = vmatprep.mubr.msk.bf16.mxu0 %vm12084_vm0, %v18263_v24  ;;  %v11755_v24 = vld [vmem:[%s17828_s2 + $0x30] ss:$12 sps:$4 sm:$0xff]   ;;  %1887 = vmatprep.subr.bf16.mxu1 %v11753_v61  ;;  %v11763_v61 = vld [vmem:[%s17828_s2] ss:$12 sps:$4 sm:$0xff]  }
 0x12f   :  { %1888 = vmatpush1.bf16.msra.mxu1 %v11755_v24  ;;  %v11733_v24 = vld [vmem:[%s17826_s0 + $0x48] sm:$0xff]  }
 0x130   :  { %1889 = vmatprep.subr.bf16.mxu1 %v11757_v3  ;;  %v11764_v3 = vld [vmem:[%s17828_s2 + $0x8] ss:$12 sps:$4 sm:$0xff]  }
 0x131   :  { %11465 = vmatpush3.bf16.msra.mxu0 %v11764_v3  ;;  %v11740_v3 = vld [vmem:[%s17826_s0 + $0x78] sm:$0xff]  }
 0x133   :  { %1890 = vmatpush1.bf16.msra.mxu1 %v11759_v21  ;;  %v18268_v21 = vmov 0  }
 0x134   :  { %1891 = vmatprep.subr.bf16.mxu1 %v11761_v23  ;;  %1909 = vmatprep.mubr.bf16.mxu1 %v18268_v21  ;;  %v11738_v23 = vld [vmem:[%s17826_s0 + $0x68] sm:$0xff]  }
 0x135   :  { %11387 = vmatmul.mubr.msk.bf16.gmra.mxu0 %vm1323_vm1, %v11731_v31  ;;  %v11732_v31 = vld [vmem:[%s17826_s0 + $0x40] sm:$0xff]  }
 0x136   :  { %11390 = vmatprep.mubr.msk.bf16.mxu0 %vm12084_vm0, %v18814_v14 }
 0x137   :  { %1892 = vmatpush1.bf16.msra.mxu1 %v11763_v61  ;;  %v11739_v61 = vld [vmem:[%s17826_s0 + $0x70] sm:$0xff]  }
 0x138   :  { %11566 = vmatprep.subr.bf16.mxu1 %v18814_v14 }
 0x13d   :  { %11391 = vmatmul.mubr.msk.bf16.gmra.mxu0 %vm1323_vm1, %v11732_v31  ;;  %v11734_v31 = vld [vmem:[%s17826_s0 + $0x50] sm:$0xff]  }
 0x13e   :  { %11394 = vmatprep.mubr.msk.bf16.mxu0 %vm12084_vm0, %v18814_v14 }
 0x145   :  { %11395 = vmatmul.mubr.msk.bf16.gmra.mxu0 %vm1323_vm1, %v11733_v24  ;;  %v11737_v24 = vld [vmem:[%s17826_s0 + $0x60] sm:$0xff]  }
 0x146   :  { %11398 = vmatprep.mubr.msk.bf16.mxu0 %vm12084_vm0, %v18814_v14 }
 0x14d   :  { %11399 = vmatmul.mubr.msk.bf16.gmra.mxu0 %vm1323_vm1, %v11734_v31  ;;  %v11741_v31 = vld [vmem:[%s17826_s0 + $0x80] sm:$0xff]  }
 0x14e   :  { %11402 = vmatprep.mubr.msk.bf16.mxu0 %vm12084_vm0, %v18814_v14 }
 0x155   :  { %11403 = vmatmul.mubr.msk.bf16.gmra.mxu0 %vm1323_vm1, %v11735_v54  ;;  %v11742_v54 = vld [vmem:[%s17826_s0 + $0x88] sm:$0xff]  }
 0x156   :  { %11406 = vmatprep.mubr.msk.bf16.mxu0 %vm12084_vm0, %v18814_v14 }
 0x15d   :  { %11407 = vmatmul.mubr.msk.bf16.gmra.mxu0 %vm1323_vm1, %v11737_v24  ;;  %v11743_v24 = vld [vmem:[%s17826_s0 + $0x90] sm:$0xff]  }
 0x15e   :  { %11410 = vmatprep.mubr.msk.bf16.mxu0 %vm12084_vm0, %v18814_v14 }
 0x165   :  { %11411 = vmatmul.mubr.msk.bf16.gmra.mxu0 %vm1323_vm1, %v11738_v23  ;;  %v11745_v23 = vld [vmem:[%s17826_s0 + $0x98] sm:$0xff]  }
 0x166   :  { %11414 = vmatprep.mubr.msk.bf16.mxu0 %vm12084_vm0, %v18814_v14 }
 0x16d   :  { %11415 = vmatmul.mubr.msk.bf16.gmra.mxu0 %vm1323_vm1, %v11739_v61  ;;  %v11746_v61 = vld [vmem:[%s17826_s0 + $0xa0] sm:$0xff]  }
 0x16e   :  { %11418 = vmatprep.mubr.msk.bf16.mxu0 %vm12084_vm0, %v18814_v14 }
 0x175   :  { %11419 = vmatmul.mubr.msk.bf16.gmra.mxu0 %vm1323_vm1, %v11740_v3  ;;  %v11747_v3 = vld [vmem:[%s17826_s0 + $0xa8] sm:$0xff]  }
 0x176   :  { %11422 = vmatprep.mubr.msk.bf16.mxu0 %vm12084_vm0, %v18814_v14 }
 0x17d   :  { %11423 = vmatmul.mubr.msk.bf16.gmra.mxu0 %vm1323_vm1, %v11741_v31  ;;  %v11748_v31 = vld [vmem:[%s17826_s0 + $0xb0] sm:$0xff]  }
 0x17e   :  { %11426 = vmatprep.mubr.msk.bf16.mxu0 %vm12084_vm0, %v18814_v14 }
 0x185   :  { %11427 = vmatmul.mubr.msk.bf16.gmra.mxu0 %vm1323_vm1, %v11742_v54  ;;  %v11749_v54 = vld [vmem:[%s17826_s0 + $0xb8] sm:$0xff]  }
 0x186   :  { %11430 = vmatprep.mubr.msk.bf16.mxu0 %vm12084_vm0, %v18814_v14 }
 0x18d   :  { %11431 = vmatmul.mubr.msk.bf16.gmra.mxu0 %vm1323_vm1, %v11743_v24  ;;  %v11756_v24 = vld [vmem:[%s17826_s0 + $0xc0] ss:$0 sps:$4 sm:$0xff]  }
 0x18e   :  { %11434 = vmatprep.mubr.msk.bf16.mxu0 %vm12084_vm0, %v18814_v14 }
 0x195   :  { %11435 = vmatmul.mubr.msk.bf16.gmra.mxu0 %vm1323_vm1, %v11745_v23 }
 0x196   :  { %11438 = vmatprep.mubr.msk.bf16.mxu0 %vm12084_vm0, %v18814_v14 }
 0x19d   :  { %11439 = vmatmul.mubr.msk.bf16.gmra.mxu0 %vm1323_vm1, %v11746_v61 }
 0x19e   :  { %11442 = vmatprep.mubr.msk.bf16.mxu0 %vm12084_vm0, %v18814_v14 }
 0x1a5   :  { %11443 = vmatmul.mubr.msk.bf16.gmra.mxu0 %vm1323_vm1, %v11747_v3 }
 0x1a6   :  { %11446 = vmatprep.mubr.msk.bf16.mxu0 %vm12084_vm0, %v18814_v14 }
 0x1ad   :  { %11447 = vmatmul.mubr.msk.bf16.gmra.mxu0 %vm1323_vm1, %v11748_v31 }
 0x1ae   :  { %11450 = vmatprep.mubr.msk.bf16.mxu0 %vm12084_vm0, %v18814_v14 }
 0x1b5   :  { %11451 = vmatmul.mubr.msk.bf16.gmra.mxu0 %vm1323_vm1, %v11749_v54 }
 0x1b6   :  { %11454 = vmatprep.mubr.msk.bf16.mxu0 %vm12084_vm0, %v18814_v14 }
 0x1bd   :  { %v1433_v23 = vpop.f32.mrf.mxu0  ;;  %11455 = vmatmul.mubr.msk.bf16.gmra.mxu0 %vm1323_vm1, %v11756_v24 }
 0x1be   :  { %11466 = vmatprep.mubr.msk.bf16.mxu0 %vm12084_vm0, %v18814_v14  ;;  %v1631_v31 = vmax.f32 %v1433_v23, 0.0 }
 0x1bf   :  { %v11360_v61 = vpop.f32.mrf.mxu0 }
 0x1c1   :  { %v1436_v3 = vpop.f32.mrf.mxu0 }
 0x1c2   :  { %v1632_v21 = vmax.f32 %v1436_v3, 0.0 }
 0x1c3   :  { %v11361_v26 = vpop.f32.mrf.mxu0 }
 0x1c4   :  { %v1712_v54 = vpack.c.bf16 %v1632_v21, %v1631_v31 }
 0x1c5   :  { %v1441_v39 = vpop.f32.mrf.mxu0 }
 0x1c6   :  { %10280 = vmatmul.mubr.msk.bf16.vlgmr.msra.gmra.mxu1 %vm1801_vm2, %v1712_v54  ;;  %11467 = vmatmul.mubr.msk.bf16.vlgmr.msra.gmra.mxu0 %vm1801_vm2, %v1712_v54  ;;  %v1633_v26 = vmax.f32 %v1441_v39, 0.0 }
 0x1c7   :  { %v11364_v24 = vpop.f32.mrf.mxu0  ;;  %1919 = vmatprep.mubr.bf16.mxu1 %v18815_v4  ;;  %11470 = vmatprep.mubr.msk.bf16.mxu0 %vm12084_vm0, %v18814_v14 }
 0x1c8   :  { %11567 = vmatpush3.bf16.msra.mxu1 %v11765_v36 }
 0x1c9   :  { %v1444_v23 = vpop.f32.mrf.mxu0  ;;  %11568 = vmatprep.subr.bf16.mxu1 %v18814_v14 }
 0x1ca   :  { %v1634_v21 = vmax.f32 %v1444_v23, 0.0  ;;  %v11766_v23 = vld [vmem:[%s17829_s3 + $0x10] sm:$0xff]  }
 0x1cb   :  { %v11365_v61 = vpop.f32.mrf.mxu0 }
 0x1cc   :  { %v1713_v3 = vpack.c.bf16 %v1634_v21, %v1633_v26  ;;  %11569 = vmatpush3.bf16.msra.mxu1 %v11766_v23 }
 0x1cd   :  { %v1449_v31 = vpop.f32.mrf.mxu0  ;;  %11570 = vmatprep.subr.bf16.mxu1 %v18814_v14 }
 0x1ce   :  { %10281 = vmatmul.mubr.msk.bf16.gmra.mxu1 %vm1801_vm2, %v1713_v3  ;;  %11471 = vmatmul.mubr.msk.bf16.gmra.mxu0 %vm1801_vm2, %v1713_v3  ;;  %v1635_v36 = vmax.f32 %v1449_v31, 0.0 }
 0x1cf   :  { %v11368_v54 = vpop.f32.mrf.mxu0  ;;  %1929 = vmatprep.mubr.bf16.mxu1 %v18815_v4  ;;  %11474 = vmatprep.mubr.msk.bf16.mxu0 %vm12084_vm0, %v18814_v14 }
 0x1d1   :  { %v1452_v24 = vpop.f32.mrf.mxu0 }
 0x1d2   :  { %v1636_v41 = vmax.f32 %v1452_v24, 0.0 }
 0x1d3   :  { %v11369_v46 = vpop.f32.mrf.mxu0 }
 0x1d4   :  { %v1714_v51 = vpack.c.bf16 %v1636_v41, %v1635_v36 }
 0x1d5   :  { %v1457_v39 = vpop.f32.mrf.mxu0 }
 0x1d6   :  { %10282 = vmatmul.mubr.msk.bf16.gmra.mxu1 %vm1801_vm2, %v1714_v51  ;;  %11475 = vmatmul.mubr.msk.bf16.gmra.mxu0 %vm1801_vm2, %v1714_v51  ;;  %v1637_v41 = vmax.f32 %v1457_v39, 0.0 }
 0x1d7   :  { %v11372_v26 = vpop.f32.mrf.mxu0  ;;  %1939 = vmatprep.mubr.bf16.mxu1 %v18815_v4  ;;  %11478 = vmatprep.mubr.msk.bf16.mxu0 %vm12084_vm0, %v18814_v14 }
 0x1d9   :  { %v1460_v21 = vpop.f32.mrf.mxu0 }
 0x1da   :  { %v1638_v46 = vmax.f32 %v1460_v21, 0.0 }
 0x1db   :  { %v11373_v61 = vpop.f32.mrf.mxu0 }
 0x1dc   :  { %v1715_v3 = vpack.c.bf16 %v1638_v46, %v1637_v41 }
 0x1dd   :  { %v1465_v31 = vpop.f32.mrf.mxu0 }
 0x1de   :  { %10283 = vmatmul.mubr.msk.bf16.gmra.mxu1 %vm1801_vm2, %v1715_v3  ;;  %11479 = vmatmul.mubr.msk.bf16.gmra.mxu0 %vm1801_vm2, %v1715_v3  ;;  %v1639_v24 = vmax.f32 %v1465_v31, 0.0 }
 0x1df   :  { %v11376_v51 = vpop.f32.mrf.mxu0  ;;  %1949 = vmatprep.mubr.bf16.mxu1 %v18815_v4  ;;  %11482 = vmatprep.mubr.msk.bf16.mxu0 %vm12084_vm0, %v18814_v14 }
 0x1e1   :  { %v1468_v54 = vpop.f32.mrf.mxu0 }
 0x1e2   :  { %v1640_v36 = vmax.f32 %v1468_v54, 0.0 }
 0x1e3   :  { %v11377_v23 = vpop.f32.mrf.mxu0 }
 0x1e4   :  { %v1716_v26 = vpack.c.bf16 %v1640_v36, %v1639_v24 }
 0x1e5   :  { %v1473_v39 = vpop.f32.mrf.mxu0 }
 0x1e6   :  { %10284 = vmatmul.mubr.msk.bf16.gmra.mxu1 %vm1801_vm2, %v1716_v26  ;;  %11483 = vmatmul.mubr.msk.bf16.gmra.mxu0 %vm1801_vm2, %v1716_v26  ;;  %v1641_v46 = vmax.f32 %v1473_v39, 0.0 }
 0x1e7   :  { %v11380_v21 = vpop.f32.mrf.mxu0  ;;  %1959 = vmatprep.mubr.bf16.mxu1 %v18815_v4  ;;  %11486 = vmatprep.mubr.msk.bf16.mxu0 %vm12084_vm0, %v18814_v14 }
 0x1e9   :  { %v1476_v41 = vpop.f32.mrf.mxu0 }
 0x1ea   :  { %v1642_v61 = vmax.f32 %v1476_v41, 0.0 }
 0x1eb   :  { %v11381_v3 = vpop.f32.mrf.mxu0 }
 0x1ec   :  { %v1717_v51 = vpack.c.bf16 %v1642_v61, %v1641_v46 }
 0x1ed   :  { %v1481_v31 = vpop.f32.mrf.mxu0 }
 0x1ee   :  { %10285 = vmatmul.mubr.msk.bf16.gmra.mxu1 %vm1801_vm2, %v1717_v51  ;;  %11487 = vmatmul.mubr.msk.bf16.gmra.mxu0 %vm1801_vm2, %v1717_v51  ;;  %v1643_v36 = vmax.f32 %v1481_v31, 0.0 }
 0x1ef   :  { %v11384_v54 = vpop.f32.mrf.mxu0  ;;  %1969 = vmatprep.mubr.bf16.mxu1 %v18815_v4  ;;  %11490 = vmatprep.mubr.msk.bf16.mxu0 %vm12084_vm0, %v18814_v14 }
 0x1f1   :  { %v1484_v24 = vpop.f32.mrf.mxu0 }
 0x1f2   :  { %v1644_v23 = vmax.f32 %v1484_v24, 0.0 }
 0x1f3   :  { %v11385_v26 = vpop.f32.mrf.mxu0 }
 0x1f4   :  { %v1718_v21 = vpack.c.bf16 %v1644_v23, %v1643_v36 }
 0x1f5   :  { %v1489_v39 = vpop.f32.mrf.mxu0 }
 0x1f6   :  { %10286 = vmatmul.mubr.msk.bf16.gmra.mxu1 %vm1801_vm2, %v1718_v21  ;;  %11491 = vmatmul.mubr.msk.bf16.gmra.mxu0 %vm1801_vm2, %v1718_v21  ;;  %v1645_v61 = vmax.f32 %v1489_v39, 0.0 }
 0x1f7   :  { %v11388_v41 = vpop.f32.mrf.mxu0  ;;  %1979 = vmatprep.mubr.bf16.mxu1 %v18815_v4  ;;  %11494 = vmatprep.mubr.msk.bf16.mxu0 %vm12084_vm0, %v18814_v14 }
 0x1f9   :  { %v1492_v46 = vpop.f32.mrf.mxu0 }
 0x1fa   :  { %v1646_v3 = vmax.f32 %v1492_v46, 0.0  ;;  %v11767_v46 = vld [vmem:[%s17829_s3 + $0x8] sm:$0xff]  }
 0x1fb   :  { %v11389_v51 = vpop.f32.mrf.mxu0  ;;  %11571 = vmatpush3.bf16.msra.mxu1 %v11767_v46 }
 0x1fc   :  { %v1719_v54 = vpack.c.bf16 %v1646_v3, %v1645_v61  ;;  %11572 = vmatprep.subr.bf16.mxu1 %v18814_v14 }
 0x1fd   :  { %v1497_v31 = vpop.f32.mrf.mxu0 }
 0x1fe   :  { %10287 = vmatmul.mubr.msk.bf16.gmra.mxu1 %vm1801_vm2, %v1719_v54  ;;  %11495 = vmatmul.mubr.msk.bf16.gmra.mxu0 %vm1801_vm2, %v1719_v54  ;;  %v1647_v23 = vmax.f32 %v1497_v31, 0.0  ;;  %v11768_v31 = vld [vmem:[%s17829_s3] sm:$0xff]  }
 0x1ff   :  { %v11392_v24 = vpop.f32.mrf.mxu0  ;;  %1989 = vmatprep.mubr.bf16.mxu1 %v18815_v4  ;;  %11498 = vmatprep.mubr.msk.bf16.mxu0 %vm12084_vm0, %v18814_v14 }
 0x200   :  { %11573 = vmatpush3.bf16.msra.mxu1 %v11768_v31 }
 0x201   :  { %v1500_v36 = vpop.f32.mrf.mxu0 }
 0x202   :  { %v1648_v26 = vmax.f32 %v1500_v36, 0.0 }
 0x203   :  { %v11393_v21 = vpop.f32.mrf.mxu0 }
 0x204   :  { %v1720_v41 = vpack.c.bf16 %v1648_v26, %v1647_v23 }
 0x205   :  { %v1505_v39 = vpop.f32.mrf.mxu0 }
 0x206   :  { %10288 = vmatmul.mubr.msk.bf16.gmra.mxu1 %vm1801_vm2, %v1720_v41  ;;  %11499 = vmatmul.mubr.msk.bf16.gmra.mxu0 %vm1801_vm2, %v1720_v41  ;;  %v1649_v51 = vmax.f32 %v1505_v39, 0.0 }
 0x207   :  { %v11396_v61 = vpop.f32.mrf.mxu0  ;;  %1999 = vmatprep.mubr.bf16.mxu1 %v18815_v4  ;;  %11502 = vmatprep.mubr.msk.bf16.mxu0 %vm12084_vm0, %v18814_v14 }
 0x209   :  { %v1508_v3 = vpop.f32.mrf.mxu0 }
 0x20a   :  { %v1650_v54 = vmax.f32 %v1508_v3, 0.0 }
 0x20b   :  { %v11397_v24 = vpop.f32.mrf.mxu0 }
 0x20c   :  { %v1721_v36 = vpack.c.bf16 %v1650_v54, %v1649_v51 }
 0x20d   :  { %v1513_v23 = vpop.f32.mrf.mxu0 }
 0x20e   :  { %10289 = vmatmul.mubr.msk.bf16.gmra.mxu1 %vm1801_vm2, %v1721_v36  ;;  %11503 = vmatmul.mubr.msk.bf16.gmra.mxu0 %vm1801_vm2, %v1721_v36  ;;  %v1651_v41 = vmax.f32 %v1513_v23, 0.0 }
 0x20f   :  { %v11400_v26 = vpop.f32.mrf.mxu0  ;;  %2009 = vmatprep.mubr.bf16.mxu1 %v18815_v4  ;;  %11506 = vmatprep.mubr.msk.bf16.mxu0 %vm12084_vm0, %v18814_v14 }
 0x211   :  { %v1516_v21 = vpop.f32.mrf.mxu0 }
 0x212   :  { %v1652_v39 = vmax.f32 %v1516_v21, 0.0 }
 0x213   :  { %v11401_v46 = vpop.f32.mrf.mxu0 }
 0x214   :  { %v1722_v61 = vpack.c.bf16 %v1652_v39, %v1651_v41 }
 0x215   :  { %v1521_v3 = vpop.f32.mrf.mxu0 }
 0x216   :  { %10290 = vmatmul.mubr.msk.bf16.gmra.mxu1 %vm1801_vm2, %v1722_v61  ;;  %11507 = vmatmul.mubr.msk.bf16.gmra.mxu0 %vm1801_vm2, %v1722_v61  ;;  %v1653_v31 = vmax.f32 %v1521_v3, 0.0 }
 0x217   :  { %v11404_v51 = vpop.f32.mrf.mxu0  ;;  %2019 = vmatprep.mubr.bf16.mxu1 %v18815_v4  ;;  %11510 = vmatprep.mubr.msk.bf16.mxu0 %vm12084_vm0, %v18814_v14 }
 0x219   :  { %v1524_v54 = vpop.f32.mrf.mxu0 }
 0x21a   :  { %v1654_v24 = vmax.f32 %v1524_v54, 0.0 }
 0x21b   :  { %v11405_v36 = vpop.f32.mrf.mxu0 }
 0x21c   :  { %v1723_v26 = vpack.c.bf16 %v1654_v24, %v1653_v31 }
 0x21d   :  { %v1529_v23 = vpop.f32.mrf.mxu0 }
 0x21e   :  { %10291 = vmatmul.mubr.msk.bf16.gmra.mxu1 %vm1801_vm2, %v1723_v26  ;;  %11511 = vmatmul.mubr.msk.bf16.gmra.mxu0 %vm1801_vm2, %v1723_v26  ;;  %v1655_v39 = vmax.f32 %v1529_v23, 0.0 }
 0x21f   :  { %v11408_v21 = vpop.f32.mrf.mxu0  ;;  %2029 = vmatprep.mubr.bf16.mxu1 %v18815_v4  ;;  %11514 = vmatprep.mubr.msk.bf16.mxu0 %vm12084_vm0, %v18814_v14 }
 0x221   :  { %v1532_v41 = vpop.f32.mrf.mxu0 }
 0x222   :  { %v1656_v46 = vmax.f32 %v1532_v41, 0.0 }
 0x223   :  { %v11409_v61 = vpop.f32.mrf.mxu0 }
 0x224   :  { %v1724_v51 = vpack.c.bf16 %v1656_v46, %v1655_v39 }
 0x225   :  { %v1537_v3 = vpop.f32.mrf.mxu0 }
 0x226   :  { %10292 = vmatmul.mubr.msk.bf16.gmra.mxu1 %vm1801_vm2, %v1724_v51  ;;  %11515 = vmatmul.mubr.msk.bf16.gmra.mxu0 %vm1801_vm2, %v1724_v51  ;;  %v1657_v24 = vmax.f32 %v1537_v3, 0.0 }
 0x227   :  { %v11412_v54 = vpop.f32.mrf.mxu0  ;;  %2039 = vmatprep.mubr.bf16.mxu1 %v18815_v4  ;;  %11518 = vmatprep.mubr.msk.bf16.mxu0 %vm12084_vm0, %v18814_v14 }
 0x229   :  { %v1540_v31 = vpop.f32.mrf.mxu0 }
 0x22a   :  { %v1658_v36 = vmax.f32 %v1540_v31, 0.0 }
 0x22b   :  { %v11413_v26 = vpop.f32.mrf.mxu0 }
 0x22c   :  { %v1725_v21 = vpack.c.bf16 %v1658_v36, %v1657_v24 }
 0x22d   :  { %v1545_v23 = vpop.f32.mrf.mxu0 }
 0x22e   :  { %10293 = vmatmul.mubr.msk.bf16.gmra.mxu1 %vm1801_vm2, %v1725_v21  ;;  %11519 = vmatmul.mubr.msk.bf16.gmra.mxu0 %vm1801_vm2, %v1725_v21  ;;  %v1659_v46 = vmax.f32 %v1545_v23, 0.0 }
 0x22f   :  { %v11416_v41 = vpop.f32.mrf.mxu0  ;;  %2049 = vmatprep.mubr.bf16.mxu1 %v18815_v4  ;;  %11522 = vmatprep.mubr.msk.bf16.mxu0 %vm12084_vm0, %v18814_v14 }
 0x231   :  { %v1548_v39 = vpop.f32.mrf.mxu0 }
 0x232   :  { %v1660_v61 = vmax.f32 %v1548_v39, 0.0 }
 0x233   :  { %v11417_v51 = vpop.f32.mrf.mxu0 }
 0x234   :  { %v1726_v54 = vpack.c.bf16 %v1660_v61, %v1659_v46 }
 0x235   :  { %v1553_v3 = vpop.f32.mrf.mxu0 }
 0x236   :  { %10294 = vmatmul.mubr.msk.bf16.gmra.mxu1 %vm1801_vm2, %v1726_v54  ;;  %11523 = vmatmul.mubr.msk.bf16.gmra.mxu0 %vm1801_vm2, %v1726_v54  ;;  %v1661_v36 = vmax.f32 %v1553_v3, 0.0 }
 0x237   :  { %v11420_v31 = vpop.f32.mrf.mxu0  ;;  %2059 = vmatprep.mubr.bf16.mxu1 %v18815_v4  ;;  %11526 = vmatprep.mubr.msk.bf16.mxu0 %vm12084_vm0, %v18814_v14 }
 0x239   :  { %v1556_v24 = vpop.f32.mrf.mxu0 }
 0x23a   :  { %v1662_v26 = vmax.f32 %v1556_v24, 0.0 }
 0x23b   :  { %v11421_v21 = vpop.f32.mrf.mxu0 }
 0x23c   :  { %v1727_v41 = vpack.c.bf16 %v1662_v26, %v1661_v36 }
 0x23d   :  { %v1561_v23 = vpop.f32.mrf.mxu0 }
 0x23e   :  { %10295 = vmatmul.mubr.msk.bf16.gmra.mxu1 %vm1801_vm2, %v1727_v41  ;;  %11527 = vmatmul.mubr.msk.bf16.gmra.mxu0 %vm1801_vm2, %v1727_v41  ;;  %v1663_v61 = vmax.f32 %v1561_v23, 0.0 }
 0x23f   :  { %v11424_v39 = vpop.f32.mrf.mxu0  ;;  %2069 = vmatprep.mubr.bf16.mxu1 %v18815_v4  ;;  %11530 = vmatprep.mubr.msk.bf16.mxu0 %vm12084_vm0, %v18814_v14 }
 0x241   :  { %v1564_v46 = vpop.f32.mrf.mxu0 }
 0x242   :  { %v1664_v51 = vmax.f32 %v1564_v46, 0.0 }
 0x243   :  { %v11425_v54 = vpop.f32.mrf.mxu0 }
 0x244   :  { %v1728_v31 = vpack.c.bf16 %v1664_v51, %v1663_v61 }
 0x245   :  { %v1569_v3 = vpop.f32.mrf.mxu0 }
 0x246   :  { %10296 = vmatmul.mubr.msk.bf16.gmra.mxu1 %vm1801_vm2, %v1728_v31  ;;  %11531 = vmatmul.mubr.msk.bf16.gmra.mxu0 %vm1801_vm2, %v1728_v31  ;;  %v1665_v26 = vmax.f32 %v1569_v3, 0.0 }
 0x247   :  { %v11428_v24 = vpop.f32.mrf.mxu0  ;;  %2079 = vmatprep.mubr.bf16.mxu1 %v18815_v4  ;;  %11534 = vmatprep.mubr.msk.bf16.mxu0 %vm12084_vm0, %v18814_v14 }
 0x249   :  { %v1572_v36 = vpop.f32.mrf.mxu0 }
 0x24a   :  { %v1666_v21 = vmax.f32 %v1572_v36, 0.0 }
 0x24b   :  { %v11429_v41 = vpop.f32.mrf.mxu0 }
 0x24c   :  { %v1729_v39 = vpack.c.bf16 %v1666_v21, %v1665_v26 }
 0x24d   :  { %v1577_v23 = vpop.f32.mrf.mxu0 }
 0x24e   :  { %10297 = vmatmul.mubr.msk.bf16.gmra.mxu1 %vm1801_vm2, %v1729_v39  ;;  %11535 = vmatmul.mubr.msk.bf16.gmra.mxu0 %vm1801_vm2, %v1729_v39  ;;  %v1667_v51 = vmax.f32 %v1577_v23, 0.0 }
 0x24f   :  { %v11432_v46 = vpop.f32.mrf.mxu0  ;;  %2089 = vmatprep.mubr.bf16.mxu1 %v18815_v4  ;;  %11538 = vmatprep.mubr.msk.bf16.mxu0 %vm12084_vm0, %v18814_v14 }
 0x251   :  { %v1580_v61 = vpop.f32.mrf.mxu0 }
 0x252   :  { %v1668_v54 = vmax.f32 %v1580_v61, 0.0 }
 0x253   :  { %v11433_v31 = vpop.f32.mrf.mxu0 }
 0x254   :  { %v1730_v24 = vpack.c.bf16 %v1668_v54, %v1667_v51 }
 0x255   :  { %v1585_v3 = vpop.f32.mrf.mxu0 }
 0x256   :  { %10298 = vmatmul.mubr.msk.bf16.gmra.mxu1 %vm1801_vm2, %v1730_v24  ;;  %11539 = vmatmul.mubr.msk.bf16.gmra.mxu0 %vm1801_vm2, %v1730_v24  ;;  %v1669_v21 = vmax.f32 %v1585_v3, 0.0 }
 0x257   :  { %v11436_v36 = vpop.f32.mrf.mxu0  ;;  %2099 = vmatprep.mubr.bf16.mxu1 %v18815_v4  ;;  %11542 = vmatprep.mubr.msk.bf16.mxu0 %vm12084_vm0, %v18814_v14 }
 0x259   :  { %v1588_v26 = vpop.f32.mrf.mxu0 }
 0x25a   :  { %v1670_v41 = vmax.f32 %v1588_v26, 0.0 }
 0x25b   :  { %v11437_v39 = vpop.f32.mrf.mxu0 }
 0x25c   :  { %v1731_v46 = vpack.c.bf16 %v1670_v41, %v1669_v21 }
 0x25d   :  { %v1593_v23 = vpop.f32.mrf.mxu0 }
 0x25e   :  { %10299 = vmatmul.mubr.msk.bf16.gmra.mxu1 %vm1801_vm2, %v1731_v46  ;;  %11543 = vmatmul.mubr.msk.bf16.gmra.mxu0 %vm1801_vm2, %v1731_v46  ;;  %v1671_v54 = vmax.f32 %v1593_v23, 0.0 }
 0x25f   :  { %v11440_v61 = vpop.f32.mrf.mxu0  ;;  %2109 = vmatprep.mubr.bf16.mxu1 %v18815_v4  ;;  %11546 = vmatprep.mubr.msk.bf16.mxu0 %vm12084_vm0, %v18814_v14 }
 0x261   :  { %v1596_v51 = vpop.f32.mrf.mxu0 }
 0x262   :  { %v1672_v31 = vmax.f32 %v1596_v51, 0.0  ;;  %v11769_v51 = vld [vmem:[%s17830_s4 + $0x30] ss:$8 sps:$4 sm:$0xff]  }
 0x263   :  { %v11441_v24 = vpop.f32.mrf.mxu0 }
 0x264   :  { %v1732_v36 = vpack.c.bf16 %v1672_v31, %v1671_v54  ;;  %v11771_v54 = vld [vmem:[%s17830_s4 + $0x34] ss:$8 sps:$4 sm:$0xff]  }
 0x265   :  { %v1601_v3 = vpop.f32.mrf.mxu0  ;;  %2992 = vmatprep.subr.bf16.mxu0 %v11771_v54 }
 0x266   :  { %10300 = vmatmul.mubr.msk.bf16.gmra.mxu1 %vm1801_vm2, %v1732_v36  ;;  %11547 = vmatmul.mubr.msk.bf16.gmra.mxu0 %vm1801_vm2, %v1732_v36  ;;  %v1673_v41 = vmax.f32 %v1601_v3, 0.0 }
 0x267   :  { %v11444_v26 = vpop.f32.mrf.mxu0  ;;  %2119 = vmatprep.mubr.bf16.mxu1 %v18815_v4  ;;  %11550 = vmatprep.mubr.msk.bf16.mxu0 %vm12084_vm0, %v18814_v14 }
 0x268   :  { %2993 = vmatpush1.bf16.msra.mxu0 %v11769_v51 }
 0x269   :  { %v1604_v21 = vpop.f32.mrf.mxu0 }
 0x26a   :  { %v1674_v39 = vmax.f32 %v1604_v21, 0.0 }
 0x26b   :  { %v11445_v46 = vpop.f32.mrf.mxu0 }
 0x26c   :  { %v1733_v61 = vpack.c.bf16 %v1674_v39, %v1673_v41 }
 0x26d   :  { %v1609_v23 = vpop.f32.mrf.mxu0 }
 0x26e   :  { %10301 = vmatmul.mubr.msk.bf16.gmra.mxu1 %vm1801_vm2, %v1733_v61  ;;  %11551 = vmatmul.mubr.msk.bf16.gmra.mxu0 %vm1801_vm2, %v1733_v61  ;;  %v1675_v36 = vmax.f32 %v1609_v23, 0.0 }
 0x26f   :  { %v11448_v31 = vpop.f32.mrf.mxu0  ;;  %2129 = vmatprep.mubr.bf16.mxu1 %v18815_v4  ;;  %11554 = vmatprep.mubr.msk.bf16.mxu0 %vm12084_vm0, %v18814_v14 }
 0x271   :  { %v1612_v24 = vpop.f32.mrf.mxu0 }
 0x272   :  { %v1676_v3 = vmax.f32 %v1612_v24, 0.0 }
 0x273   :  { %v11449_v26 = vpop.f32.mrf.mxu0 }
 0x274   :  { %v1734_v21 = vpack.c.bf16 %v1676_v3, %v1675_v36 }
 0x275   :  { %v1617_v41 = vpop.f32.mrf.mxu0 }
 0x276   :  { %10302 = vmatmul.mubr.msk.bf16.gmra.mxu1 %vm1801_vm2, %v1734_v21  ;;  %11555 = vmatmul.mubr.msk.bf16.gmra.mxu0 %vm1801_vm2, %v1734_v21  ;;  %v1677_v61 = vmax.f32 %v1617_v41, 0.0 }
 0x277   :  { %v11452_v39 = vpop.f32.mrf.mxu0  ;;  %2139 = vmatprep.mubr.bf16.mxu1 %v18815_v4  ;;  %11558 = vmatprep.mubr.msk.bf16.mxu0 %vm12084_vm0, %v18814_v14 }
 0x279   :  { %v1620_v46 = vpop.f32.mrf.mxu0 }
 0x27a   :  { %v1678_v54 = vmax.f32 %v1620_v46, 0.0 }
 0x27b   :  { %v11453_v31 = vpop.f32.mrf.mxu0 }
 0x27c   :  { %v1735_v51 = vpack.c.bf16 %v1678_v54, %v1677_v61 }
 0x27d   :  { %v1625_v23 = vpop.f32.mrf.mxu0 }
 0x27e   :  { %10303 = vmatmul.mubr.msk.bf16.gmra.mxu1 %vm1801_vm2, %v1735_v51  ;;  %11559 = vmatmul.mubr.msk.bf16.gmra.mxu0 %vm1801_vm2, %v1735_v51  ;;  %v1679_v36 = vmax.f32 %v1625_v23, 0.0 }
 0x27f   :  { %v11456_v24 = vpop.f32.mrf.mxu0  ;;  %2149 = vmatprep.mubr.bf16.mxu1 %v18815_v4  ;;  %11562 = vmatprep.mubr.msk.bf16.mxu0 %vm12084_vm0, %v18814_v14 }
 0x280   :  { %v1736_v21 = vpack.c.bf16 %v1679_v36, %v1679_v36 }
 0x281   :  { %v1628_v3 = vpop.f32.mrf.mxu0 }
 0x283   :  { %v11457_v26 = vpop.f32.mrf.mxu0 }
 0x286   :  { %v14910_v39 = vpop.f32.mrf.mxu1  ;;  %10304 = vmatmul.mubr.msk.bf16.gmra.mxu1 %vm1801_vm2, %v1736_v21  ;;  %v2192_v41 = vpop.f32.mrf.mxu0  ;;  %11563 = vmatmul.mubr.msk.bf16.gmra.mxu0 %vm1801_vm2, %v1736_v21 }
 0x287   :  { %11574 = vmatprep.mubr.msk.bf16.mxu1 %vm12084_vm0, %v18814_v14  ;;  %3016 = vmatprep.mubr.bf16.mxu0 %v18815_v4  ;;  %v2390_v51 = vmax.f32 %v2192_v41, 0.0 }
 0x288   :  { %v14917_v46 = vpop.f32.mrf.mxu1  ;;  %v11468_v61 = vpop.f32.mrf.mxu0 }
 0x289   :  { %18816 = vst [vmem:[#allocation495_spill] sm:$0xff] %v14917_v46 }
 0x28a   :  { %v14919_v54 = vpop.f32.mrf.mxu1  ;;  %v2195_v31 = vpop.f32.mrf.mxu0 }
 0x28b   :  { %v2391_v23 = vmax.f32 %v2195_v31, 0.0 }
 0x28c   :  { %v14921_v24 = vpop.f32.mrf.mxu1  ;;  %v11469_v36 = vpop.f32.mrf.mxu0 }
 0x28d   :  { %18817 = vst [vmem:[#allocation496_spill] sm:$0xff] %v14921_v24  ;;  %v2439_v3 = vpack.c.bf16 %v2391_v23, %v2390_v51 }
 0x28e   :  { %v14923_v26 = vpop.f32.mrf.mxu1  ;;  %v2200_v21 = vpop.f32.mrf.mxu0 }
 0x28f   :  { %11575 = vmatmul.mubr.msk.bf16.vlgmr.msra.gmra.mxu1 %vm1801_vm2, %v2439_v3  ;;  %v2392_v41 = vmax.f32 %v2200_v21, 0.0 }
 0x290   :  { %v14926_v56 = vpop.f32.mrf.mxu1  ;;  %v11472_v8 = vpop.f32.mrf.mxu0  ;;  %11578 = vmatprep.mubr.msk.bf16.mxu1 %vm12084_vm0, %v18814_v14 }
 0x291   :  { %18818 = vst [vmem:[#allocation497_spill] sm:$0xff] %v14926_v56 }
 0x292   :  { %v14930_v61 = vpop.f32.mrf.mxu1  ;;  %v2203_v28 = vpop.f32.mrf.mxu0 }
 0x293   :  { %v2393_v31 = vmax.f32 %v2203_v28, 0.0 }
 0x294   :  { %v14932_v63 = vpop.f32.mrf.mxu1  ;;  %v11473_v36 = vpop.f32.mrf.mxu0 }
 0x295   :  { %v2440_v51 = vpack.c.bf16 %v2393_v31, %v2392_v41 }
 0x296   :  { %v14934_v23 = vpop.f32.mrf.mxu1  ;;  %v2208_v53 = vpop.f32.mrf.mxu0 }
 0x297   :  { %18819 = vst [vmem:[#allocation498_spill] sm:$0xff] %v14934_v23  ;;  %11579 = vmatmul.mubr.msk.bf16.gmra.mxu1 %vm1801_vm2, %v2440_v51  ;;  %v2394_v21 = vmax.f32 %v2208_v53, 0.0  ;;  %v11772_v51 = vld [vmem:[%s17830_s4 + $0x20] ss:$8 sps:$4 sm:$0xff]  }
 0x298   :  { %v14937_v3 = vpop.f32.mrf.mxu1  ;;  %v11476_v8 = vpop.f32.mrf.mxu0  ;;  %11582 = vmatprep.mubr.msk.bf16.mxu1 %vm12084_vm0, %v18814_v14 }
 0x299   :  { %v11774_v8 = vld [vmem:[%s17830_s4 + $0x24] ss:$8 sps:$4 sm:$0xff]  }
 0x29a   :  { %v14941_v43 = vpop.f32.mrf.mxu1  ;;  %v2211_v58 = vpop.f32.mrf.mxu0  ;;  %2994 = vmatprep.subr.bf16.mxu0 %v11774_v8 }
 0x29b   :  { %v2395_v28 = vmax.f32 %v2211_v58, 0.0  ;;  %2995 = vmatpush1.bf16.msra.mxu0 %v11772_v51 }
 0x29c   :  { %v14943_v2 = vpop.f32.mrf.mxu1  ;;  %v11477_v36 = vpop.f32.mrf.mxu0 }
 0x29d   :  { %v2441_v41 = vpack.c.bf16 %v2395_v28, %v2394_v21 }
 0x29e   :  { %v14945_v31 = vpop.f32.mrf.mxu1  ;;  %v2216_v12 = vpop.f32.mrf.mxu0 }
 0x29f   :  { %11583 = vmatmul.mubr.msk.bf16.gmra.mxu1 %vm1801_vm2, %v2441_v41  ;;  %v2396_v28 = vmax.f32 %v2216_v12, 0.0 }
 0x2a0   :  { %v14954_v22 = vpop.f32.mrf.mxu1  ;;  %v11480_v53 = vpop.f32.mrf.mxu0  ;;  %11586 = vmatprep.mubr.msk.bf16.mxu1 %vm12084_vm0, %v18814_v14 }
 0x2a2   :  { %v14958_v58 = vpop.f32.mrf.mxu1  ;;  %v2219_v21 = vpop.f32.mrf.mxu0 }
 0x2a3   :  { %v2397_v36 = vmax.f32 %v2219_v21, 0.0 }
 0x2a4   :  { %v14960_v41 = vpop.f32.mrf.mxu1  ;;  %v11481_v32 = vpop.f32.mrf.mxu0 }
 0x2a5   :  { %v2442_v42 = vpack.c.bf16 %v2397_v36, %v2396_v28 }
 0x2a6   :  { %v14962_v52 = vpop.f32.mrf.mxu1  ;;  %v2224_v62 = vpop.f32.mrf.mxu0 }
 0x2a7   :  { %11587 = vmatmul.mubr.msk.bf16.gmra.mxu1 %vm1801_vm2, %v2442_v42  ;;  %v2398_v12 = vmax.f32 %v2224_v62, 0.0 }
 0x2a8   :  { %v14965_v53 = vpop.f32.mrf.mxu1  ;;  %v11484_v44 = vpop.f32.mrf.mxu0  ;;  %11590 = vmatprep.mubr.msk.bf16.mxu1 %vm12084_vm0, %v18814_v14 }
 0x2aa   :  { %v14969_v8 = vpop.f32.mrf.mxu1  ;;  %v2227_v51 = vpop.f32.mrf.mxu0 }
 0x2ab   :  { %v2399_v21 = vmax.f32 %v2227_v51, 0.0 }
 0x2ac   :  { %v14971_v13 = vpop.f32.mrf.mxu1  ;;  %v11485_v32 = vpop.f32.mrf.mxu0 }
 0x2ad   :  { %v2443_v28 = vpack.c.bf16 %v2399_v21, %v2398_v12 }
 0x2ae   :  { %v14973_v36 = vpop.f32.mrf.mxu1  ;;  %v2232_v48 = vpop.f32.mrf.mxu0 }
 0x2af   :  { %11591 = vmatmul.mubr.msk.bf16.gmra.mxu1 %vm1801_vm2, %v2443_v28  ;;  %v2400_v62 = vmax.f32 %v2232_v48, 0.0 }
 0x2b0   :  { %v14976_v42 = vpop.f32.mrf.mxu1  ;;  %v11488_v44 = vpop.f32.mrf.mxu0  ;;  %11594 = vmatprep.mubr.msk.bf16.mxu1 %vm12084_vm0, %v18814_v14 }
 0x2b2   :  { %v14980_v49 = vpop.f32.mrf.mxu1  ;;  %v2235_v38 = vpop.f32.mrf.mxu0 }
 0x2b3   :  { %v2401_v51 = vmax.f32 %v2235_v38, 0.0 }
 0x2b4   :  { %v14982_v1 = vpop.f32.mrf.mxu1  ;;  %v11489_v32 = vpop.f32.mrf.mxu0 }
 0x2b5   :  { %v2444_v12 = vpack.c.bf16 %v2401_v51, %v2400_v62 }
 0x2b6   :  { %v14984_v21 = vpop.f32.mrf.mxu1  ;;  %v2240_v6 = vpop.f32.mrf.mxu0 }
 0x2b7   :  { %11595 = vmatmul.mubr.msk.bf16.gmra.mxu1 %vm1801_vm2, %v2444_v12  ;;  %v2402_v48 = vmax.f32 %v2240_v6, 0.0 }
 0x2b8   :  { %v14987_v28 = vpop.f32.mrf.mxu1  ;;  %v11492_v44 = vpop.f32.mrf.mxu0  ;;  %11598 = vmatprep.mubr.msk.bf16.mxu1 %vm12084_vm0, %v18814_v14 }
 0x2ba   :  { %v14991_v11 = vpop.f32.mrf.mxu1  ;;  %v2243_v16 = vpop.f32.mrf.mxu0 }
 0x2bb   :  { %v2403_v38 = vmax.f32 %v2243_v16, 0.0 }
 0x2bc   :  { %v14993_v18 = vpop.f32.mrf.mxu1  ;;  %v11493_v32 = vpop.f32.mrf.mxu0 }
 0x2bd   :  { %v2445_v62 = vpack.c.bf16 %v2403_v38, %v2402_v48 }
 0x2be   :  { %v14995_v51 = vpop.f32.mrf.mxu1  ;;  %v2248_v7 = vpop.f32.mrf.mxu0 }
 0x2bf   :  { %11599 = vmatmul.mubr.msk.bf16.gmra.mxu1 %vm1801_vm2, %v2445_v62  ;;  %v2404_v6 = vmax.f32 %v2248_v7, 0.0 }
 0x2c0   :  { %v14998_v12 = vpop.f32.mrf.mxu1  ;;  %v11496_v44 = vpop.f32.mrf.mxu0  ;;  %11602 = vmatprep.mubr.msk.bf16.mxu1 %vm12084_vm0, %v18814_v14 }
 0x2c2   :  { %v15002_v17 = vpop.f32.mrf.mxu1  ;;  %v2251_v27 = vpop.f32.mrf.mxu0 }
 0x2c3   :  { %v2405_v16 = vmax.f32 %v2251_v27, 0.0 }
 0x2c4   :  { %v15004_v37 = vpop.f32.mrf.mxu1  ;;  %v11497_v32 = vpop.f32.mrf.mxu0 }
 0x2c5   :  { %v2446_v48 = vpack.c.bf16 %v2405_v16, %v2404_v6 }
 0x2c6   :  { %v15006_v38 = vpop.f32.mrf.mxu1  ;;  %v2256_v47 = vpop.f32.mrf.mxu0 }
 0x2c7   :  { %11603 = vmatmul.mubr.msk.bf16.gmra.mxu1 %vm1801_vm2, %v2446_v48  ;;  %v2406_v7 = vmax.f32 %v2256_v47, 0.0  ;;  %v11777_v48 = vld [vmem:[%s17830_s4 + $0x14] ss:$8 sps:$4 sm:$0xff]  }
 0x2c8   :  { %v15009_v62 = vpop.f32.mrf.mxu1  ;;  %v11500_v44 = vpop.f32.mrf.mxu0  ;;  %11606 = vmatprep.mubr.msk.bf16.mxu1 %vm12084_vm0, %v18814_v14  ;;  %2996 = vmatprep.subr.bf16.mxu0 %v11777_v48 }
 0x2c9   :  { %18820 = vst [vmem:[#allocation499_spill] sm:$0xff] %v15009_v62  ;;  %v11775_v44 = vld [vmem:[%s17830_s4 + $0x10] ss:$8 sps:$4 sm:$0xff]  }
 0x2ca   :  { %v15013_v57 = vpop.f32.mrf.mxu1  ;;  %v2259_v19 = vpop.f32.mrf.mxu0  ;;  %2997 = vmatpush1.bf16.msra.mxu0 %v11775_v44 }
 0x2cb   :  { %v2407_v27 = vmax.f32 %v2259_v19, 0.0 }
 0x2cc   :  { %v15015_v29 = vpop.f32.mrf.mxu1  ;;  %v11501_v32 = vpop.f32.mrf.mxu0 }
 0x2cd   :  { %18821 = vst [vmem:[#allocation500_spill] sm:$0xff] %v15015_v29  ;;  %v2447_v6 = vpack.c.bf16 %v2407_v27, %v2406_v7  ;;  %v11780_v27 = vld [vmem:[%s17830_s4 + $0x4] ss:$8 sps:$4 sm:$0xff]  }
 0x2ce   :  { %v15017_v16 = vpop.f32.mrf.mxu1  ;;  %v2264_v33 = vpop.f32.mrf.mxu0  ;;  %2998 = vmatprep.subr.bf16.mxu0 %v11780_v27 }
 0x2cf   :  { %11607 = vmatmul.mubr.msk.bf16.gmra.mxu1 %vm1801_vm2, %v2447_v6  ;;  %v2408_v32 = vmax.f32 %v2264_v33, 0.0  ;;  %2999 = vmatpush1.bf16.msra.mxu0 %v11778_v5 }
 0x2d0   :  { %v15026_v0 = vpop.f32.mrf.mxu1  ;;  %v11504_v19 = vpop.f32.mrf.mxu0  ;;  %11610 = vmatprep.mubr.msk.bf16.mxu1 %vm12084_vm0, %v18814_v14 }
 0x2d1   :  { %18822 = vst [vmem:[#allocation501_spill] sm:$0xff] %v15026_v0 }
 0x2d2   :  { %v15030_v47 = vpop.f32.mrf.mxu1  ;;  %v2267_v7 = vpop.f32.mrf.mxu0 }
 0x2d3   :  { %v2409_v6 = vmax.f32 %v2267_v7, 0.0 }
 0x2d4   :  { %v15038_v10 = vpop.f32.mrf.mxu1  ;;  %v11505_v19 = vpop.f32.mrf.mxu0 }
 0x2d5   :  { %18823 = vst [vmem:[#allocation502_spill] sm:$0xff] %v15038_v10  ;;  %v2448_v15 = vpack.c.bf16 %v2409_v6, %v2408_v32 }
 0x2d6   :  { %v15040_v48 = vpop.f32.mrf.mxu1  ;;  %v2272_v44 = vpop.f32.mrf.mxu0 }
 0x2d7   :  { %18824 = vst [vmem:[#allocation503_spill] sm:$0xff] %v15040_v48  ;;  %11611 = vmatmul.mubr.msk.bf16.gmra.mxu1 %vm1801_vm2, %v2448_v15  ;;  %v2410_v30 = vmax.f32 %v2272_v44, 0.0 }
 0x2d8   :  { %v15043_v20 = vpop.f32.mrf.mxu1  ;;  %v11508_v25 = vpop.f32.mrf.mxu0  ;;  %11614 = vmatprep.mubr.msk.bf16.mxu1 %vm12084_vm0, %v18814_v14 }
 0x2d9   :  { %18825 = vst [vmem:[#allocation504_spill] sm:$0xff] %v15043_v20 }
 0x2da   :  { %v15047_v33 = vpop.f32.mrf.mxu1  ;;  %v2275_v7 = vpop.f32.mrf.mxu0 }
 0x2db   :  { %18826 = vst [vmem:[#allocation505_spill] sm:$0xff] %v15047_v33  ;;  %v2411_v35 = vmax.f32 %v2275_v7, 0.0 }
 0x2dc   :  { %v15049_v19 = vpop.f32.mrf.mxu1  ;;  %v11509_v27 = vpop.f32.mrf.mxu0 }
 0x2dd   :  { %18827 = vst [vmem:[#allocation506_spill] sm:$0xff] %v15049_v19  ;;  %v2449_v5 = vpack.c.bf16 %v2411_v35, %v2410_v30 }
 0x2de   :  { %v15051_v32 = vpop.f32.mrf.mxu1  ;;  %v2280_v6 = vpop.f32.mrf.mxu0 }
 0x2df   :  { %18828 = vst [vmem:[#allocation507_spill] sm:$0xff] %v15051_v32  ;;  %11615 = vmatmul.mubr.msk.bf16.gmra.mxu1 %vm1801_vm2, %v2449_v5  ;;  %v2412_v44 = vmax.f32 %v2280_v6, 0.0 }
 0x2e0   :  { %v15054_v15 = vpop.f32.mrf.mxu1  ;;  %v11512_v25 = vpop.f32.mrf.mxu0  ;;  %11618 = vmatprep.mubr.msk.bf16.mxu1 %vm12084_vm0, %v18814_v14 }
 0x2e1   :  { %18829 = vst [vmem:[#allocation508_spill] sm:$0xff] %v15054_v15 }
 0x2e2   :  { %v15058_v40 = vpop.f32.mrf.mxu1  ;;  %v2283_v45 = vpop.f32.mrf.mxu0 }
 0x2e3   :  { %18830 = vst [vmem:[#allocation509_spill] sm:$0xff] %v15058_v40  ;;  %v2413_v7 = vmax.f32 %v2283_v45, 0.0 }
 0x2e4   :  { %v15060_v50 = vpop.f32.mrf.mxu1  ;;  %v11513_v27 = vpop.f32.mrf.mxu0 }
 0x2e5   :  { %18831 = vst [vmem:[#allocation510_spill] sm:$0xff] %v15060_v50  ;;  %v2450_v30 = vpack.c.bf16 %v2413_v7, %v2412_v44 }
 0x2e6   :  { %v15062_v35 = vpop.f32.mrf.mxu1  ;;  %v2288_v55 = vpop.f32.mrf.mxu0 }
 0x2e7   :  { %18832 = vst [vmem:[#allocation511_spill] sm:$0xff] %v15062_v35  ;;  %11619 = vmatmul.mubr.msk.bf16.gmra.mxu1 %vm1801_vm2, %v2450_v30  ;;  %v2414_v6 = vmax.f32 %v2288_v55, 0.0 }
 0x2e8   :  { %v15065_v5 = vpop.f32.mrf.mxu1  ;;  %v11516_v25 = vpop.f32.mrf.mxu0  ;;  %11622 = vmatprep.mubr.msk.bf16.mxu1 %vm12084_vm0, %v18814_v14 }
 0x2e9   :  { %18833 = vst [vmem:[#allocation512_spill] sm:$0xff] %v15065_v5 }
 0x2ea   :  { %v15069_v60 = vpop.f32.mrf.mxu1  ;;  %v2291_v9 = vpop.f32.mrf.mxu0 }
 0x2eb   :  { %18834 = vst [vmem:[#allocation513_spill] sm:$0xff] %v15069_v60  ;;  %v2415_v45 = vmax.f32 %v2291_v9, 0.0 }
 0x2ec   :  { %v15071_v34 = vpop.f32.mrf.mxu1  ;;  %v11517_v27 = vpop.f32.mrf.mxu0 }
 0x2ed   :  { %18835 = vst [vmem:[#allocation514_spill] sm:$0xff] %v15071_v34  ;;  %v2451_v44 = vpack.c.bf16 %v2415_v45, %v2414_v6 }
 0x2ee   :  { %v15073_v7 = vpop.f32.mrf.mxu1  ;;  %v2296_v59 = vpop.f32.mrf.mxu0 }
 0x2ef   :  { %18836 = vst [vmem:[#allocation515_spill] sm:$0xff] %v15073_v7  ;;  %11623 = vmatmul.mubr.msk.bf16.gmra.mxu1 %vm1801_vm2, %v2451_v44  ;;  %v2416_v55 = vmax.f32 %v2296_v59, 0.0 }
 0x2f0   :  { %v15076_v30 = vpop.f32.mrf.mxu1  ;;  %v11520_v25 = vpop.f32.mrf.mxu0  ;;  %11626 = vmatprep.mubr.msk.bf16.mxu1 %vm12084_vm0, %v18814_v14 }
 0x2f1   :  { %18837 = vst [vmem:[#allocation516_spill] sm:$0xff] %v15076_v30 }
 0x2f2   :  { %v15080_v62 = vpop.f32.mrf.mxu1  ;;  %v2299_v29 = vpop.f32.mrf.mxu0 }
 0x2f3   :  { %18838 = vst [vmem:[#allocation517_spill] sm:$0xff] %v15080_v62  ;;  %v2417_v9 = vmax.f32 %v2299_v29, 0.0 }
 0x2f4   :  { %v15082_v0 = vpop.f32.mrf.mxu1  ;;  %v11521_v27 = vpop.f32.mrf.mxu0 }
 0x2f5   :  { %18839 = vst [vmem:[#allocation518_spill] sm:$0xff] %v15082_v0  ;;  %v2452_v6 = vpack.c.bf16 %v2417_v9, %v2416_v55 }
 0x2f6   :  { %v15084_v45 = vpop.f32.mrf.mxu1  ;;  %v2304_v48 = vpop.f32.mrf.mxu0 }
 0x2f7   :  { %18840 = vst [vmem:[#allocation519_spill] sm:$0xff] %v15084_v45  ;;  %11627 = vmatmul.mubr.msk.bf16.gmra.mxu1 %vm1801_vm2, %v2452_v6  ;;  %v2418_v59 = vmax.f32 %v2304_v48, 0.0 }
 0x2f8   :  { %v15087_v44 = vpop.f32.mrf.mxu1  ;;  %v11524_v25 = vpop.f32.mrf.mxu0  ;;  %11630 = vmatprep.mubr.msk.bf16.mxu1 %vm12084_vm0, %v18814_v14 }
 0x2f9   :  { %18841 = vst [vmem:[#allocation520_spill] sm:$0xff] %v15087_v44 }
 0x2fa   :  { %v15091_v33 = vpop.f32.mrf.mxu1  ;;  %v2307_v32 = vpop.f32.mrf.mxu0 }
 0x2fb   :  { %18842 = vst [vmem:[#allocation521_spill] sm:$0xff] %v15091_v33  ;;  %v2419_v29 = vmax.f32 %v2307_v32, 0.0 }
 0x2fc   :  { %v15093_v20 = vpop.f32.mrf.mxu1  ;;  %v11525_v27 = vpop.f32.mrf.mxu0 }
 0x2fd   :  { %18843 = vst [vmem:[#allocation522_spill] sm:$0xff] %v15093_v20  ;;  %v2453_v55 = vpack.c.bf16 %v2419_v29, %v2418_v59 }
 0x2fe   :  { %v15095_v9 = vpop.f32.mrf.mxu1  ;;  %v2312_v10 = vpop.f32.mrf.mxu0 }
 0x2ff   :  { %18844 = vst [vmem:[#allocation523_spill] sm:$0xff] %v15095_v9  ;;  %11631 = vmatmul.mubr.msk.bf16.gmra.mxu1 %vm1801_vm2, %v2453_v55  ;;  %v2420_v48 = vmax.f32 %v2312_v10, 0.0 }
 0x300   :  { %v15098_v6 = vpop.f32.mrf.mxu1  ;;  %v11528_v25 = vpop.f32.mrf.mxu0  ;;  %11634 = vmatprep.mubr.msk.bf16.mxu1 %vm12084_vm0, %v18814_v14 }
 0x301   :  { %18845 = vst [vmem:[#allocation524_spill] sm:$0xff] %v15098_v6 }
 0x302   :  { %v15102_v40 = vpop.f32.mrf.mxu1  ;;  %v2315_v19 = vpop.f32.mrf.mxu0 }
 0x303   :  { %18846 = vst [vmem:[#allocation525_spill] sm:$0xff] %v15102_v40  ;;  %v2421_v32 = vmax.f32 %v2315_v19, 0.0 }
 0x304   :  { %v15104_v15 = vpop.f32.mrf.mxu1  ;;  %v11529_v27 = vpop.f32.mrf.mxu0 }
 0x305   :  { %18847 = vst [vmem:[#allocation526_spill] sm:$0xff] %v15104_v15  ;;  %v2454_v59 = vpack.c.bf16 %v2421_v32, %v2420_v48 }
 0x306   :  { %v15106_v29 = vpop.f32.mrf.mxu1  ;;  %v2320_v35 = vpop.f32.mrf.mxu0 }
 0x307   :  { %18848 = vst [vmem:[#allocation527_spill] sm:$0xff] %v15106_v29  ;;  %11635 = vmatmul.mubr.msk.bf16.gmra.mxu1 %vm1801_vm2, %v2454_v59  ;;  %v2422_v10 = vmax.f32 %v2320_v35, 0.0 }
 0x308   :  { %v15109_v55 = vpop.f32.mrf.mxu1  ;;  %v11532_v25 = vpop.f32.mrf.mxu0  ;;  %11638 = vmatprep.mubr.msk.bf16.mxu1 %vm12084_vm0, %v18814_v14 }
 0x309   :  { %18849 = vst [vmem:[#allocation528_spill] sm:$0xff] %v15109_v55 }
 0x30a   :  { %v15113_v60 = vpop.f32.mrf.mxu1  ;;  %v2323_v7 = vpop.f32.mrf.mxu0 }
 0x30b   :  { %18850 = vst [vmem:[#allocation529_spill] sm:$0xff] %v15113_v60  ;;  %v2423_v19 = vmax.f32 %v2323_v7, 0.0 }
 0x30c   :  { %v15115_v5 = vpop.f32.mrf.mxu1  ;;  %v11533_v27 = vpop.f32.mrf.mxu0 }
 0x30d   :  { %18851 = vst [vmem:[#allocation530_spill] sm:$0xff] %v15115_v5  ;;  %v2455_v48 = vpack.c.bf16 %v2423_v19, %v2422_v10 }
 0x30e   :  { %v15117_v32 = vpop.f32.mrf.mxu1  ;;  %v2328_v50 = vpop.f32.mrf.mxu0 }
 0x30f   :  { %18852 = vst [vmem:[#allocation531_spill] sm:$0xff] %v15117_v32  ;;  %11639 = vmatmul.mubr.msk.bf16.gmra.mxu1 %vm1801_vm2, %v2455_v48  ;;  %v2424_v35 = vmax.f32 %v2328_v50, 0.0 }
 0x310   :  { %v15120_v59 = vpop.f32.mrf.mxu1  ;;  %v11536_v25 = vpop.f32.mrf.mxu0  ;;  %11642 = vmatprep.mubr.msk.bf16.mxu1 %vm12084_vm0, %v18814_v14 }
 0x311   :  { %18853 = vst [vmem:[#allocation532_spill] sm:$0xff] %v15120_v59 }
 0x312   :  { %v15124_v55 = vpop.f32.mrf.mxu1  ;;  %v2331_v60 = vpop.f32.mrf.mxu0 }
 0x313   :  { %18854 = vst [vmem:[#allocation533_spill] sm:$0xff] %v15124_v55  ;;  %v2425_v7 = vmax.f32 %v2331_v60, 0.0 }
 0x314   :  { %v15126_v62 = vpop.f32.mrf.mxu1  ;;  %v11537_v27 = vpop.f32.mrf.mxu0 }
 0x315   :  { %18855 = vst [vmem:[#allocation534_spill] sm:$0xff] %v15126_v62  ;;  %v2456_v10 = vpack.c.bf16 %v2425_v7, %v2424_v35 }
 0x316   :  { %v15128_v19 = vpop.f32.mrf.mxu1  ;;  %v2336_v32 = vpop.f32.mrf.mxu0 }
 0x317   :  { %18856 = vst [vmem:[#allocation535_spill] sm:$0xff] %v15128_v19  ;;  %11643 = vmatmul.mubr.msk.bf16.gmra.mxu1 %vm1801_vm2, %v2456_v10  ;;  %v2426_v50 = vmax.f32 %v2336_v32, 0.0 }
 0x318   :  { %v15131_v48 = vpop.f32.mrf.mxu1  ;;  %v11540_v25 = vpop.f32.mrf.mxu0  ;;  %11646 = vmatprep.mubr.msk.bf16.mxu1 %vm12084_vm0, %v18814_v14 }
 0x319   :  { %18857 = vst [vmem:[#allocation536_spill] sm:$0xff] %v15131_v48 }
 0x31a   :  { %v15135_v59 = vpop.f32.mrf.mxu1  ;;  %v2339_v55 = vpop.f32.mrf.mxu0 }
 0x31b   :  { %18858 = vst [vmem:[#allocation537_spill] sm:$0xff] %v15135_v59  ;;  %v2427_v60 = vmax.f32 %v2339_v55, 0.0 }
 0x31c   :  { %v15137_v5 = vpop.f32.mrf.mxu1  ;;  %v11541_v27 = vpop.f32.mrf.mxu0 }
 0x31d   :  { %18859 = vst [vmem:[#allocation538_spill] sm:$0xff] %v15137_v5  ;;  %v2457_v35 = vpack.c.bf16 %v2427_v60, %v2426_v50 }
 0x31e   :  { %v15139_v7 = vpop.f32.mrf.mxu1  ;;  %v2344_v19 = vpop.f32.mrf.mxu0 }
 0x31f   :  { %18860 = vst [vmem:[#allocation539_spill] sm:$0xff] %v15139_v7  ;;  %11647 = vmatmul.mubr.msk.bf16.gmra.mxu1 %vm1801_vm2, %v2457_v35  ;;  %v2428_v32 = vmax.f32 %v2344_v19, 0.0 }
 0x320   :  { %v15142_v10 = vpop.f32.mrf.mxu1  ;;  %v11544_v25 = vpop.f32.mrf.mxu0  ;;  %11650 = vmatprep.mubr.msk.bf16.mxu1 %vm12084_vm0, %v18814_v14 }
 0x321   :  { %18861 = vst [vmem:[#allocation540_spill] sm:$0xff] %v15142_v10 }
 0x322   :  { %v15146_v48 = vpop.f32.mrf.mxu1  ;;  %v2347_v59 = vpop.f32.mrf.mxu0 }
 0x323   :  { %18862 = vst [vmem:[#allocation541_spill] sm:$0xff] %v15146_v48  ;;  %v2429_v55 = vmax.f32 %v2347_v59, 0.0 }
 0x324   :  { %v15148_v62 = vpop.f32.mrf.mxu1  ;;  %v11545_v27 = vpop.f32.mrf.mxu0 }
 0x325   :  { %18863 = vst [vmem:[#allocation542_spill] sm:$0xff] %v15148_v62  ;;  %v2458_v50 = vpack.c.bf16 %v2429_v55, %v2428_v32 }
 0x326   :  { %v15150_v60 = vpop.f32.mrf.mxu1  ;;  %v2352_v7 = vpop.f32.mrf.mxu0 }
 0x327   :  { %18864 = vst [vmem:[#allocation543_spill] sm:$0xff] %v15150_v60  ;;  %11651 = vmatmul.mubr.msk.bf16.gmra.mxu1 %vm1801_vm2, %v2458_v50  ;;  %v2430_v19 = vmax.f32 %v2352_v7, 0.0 }
 0x328   :  { %v15153_v35 = vpop.f32.mrf.mxu1  ;;  %v11548_v25 = vpop.f32.mrf.mxu0  ;;  %11654 = vmatprep.mubr.msk.bf16.mxu1 %vm12084_vm0, %v18814_v14 }
 0x329   :  { %18865 = vst [vmem:[#allocation544_spill] sm:$0xff] %v15153_v35 }
 0x32a   :  { %v15157_v5 = vpop.f32.mrf.mxu1  ;;  %v2355_v48 = vpop.f32.mrf.mxu0 }
 0x32b   :  { %18866 = vst [vmem:[#allocation545_spill] sm:$0xff] %v15157_v5  ;;  %v2431_v59 = vmax.f32 %v2355_v48, 0.0 }
 0x32c   :  { %v15159_v10 = vpop.f32.mrf.mxu1  ;;  %v11549_v27 = vpop.f32.mrf.mxu0 }
 0x32d   :  { %18867 = vst [vmem:[#allocation546_spill] sm:$0xff] %v15159_v10  ;;  %v2459_v32 = vpack.c.bf16 %v2431_v59, %v2430_v19 }
 0x32e   :  { %v15161_v55 = vpop.f32.mrf.mxu1  ;;  %v2360_v60 = vpop.f32.mrf.mxu0 }
 0x32f   :  { %18868 = vst [vmem:[#allocation547_spill] sm:$0xff] %v15161_v55  ;;  %11655 = vmatmul.mubr.msk.bf16.gmra.mxu1 %vm1801_vm2, %v2459_v32  ;;  %v2432_v7 = vmax.f32 %v2360_v60, 0.0 }
 0x330   :  { %v15164_v50 = vpop.f32.mrf.mxu1  ;;  %v11552_v25 = vpop.f32.mrf.mxu0  ;;  %11658 = vmatprep.mubr.msk.bf16.mxu1 %vm12084_vm0, %v18814_v14 }
 0x331   :  { %18869 = vst [vmem:[#allocation548_spill] sm:$0xff] %v15164_v50 }
 0x332   :  { %v15168_v62 = vpop.f32.mrf.mxu1  ;;  %v2363_v5 = vpop.f32.mrf.mxu0 }
 0x333   :  { %18870 = vst [vmem:[#allocation549_spill] sm:$0xff] %v15168_v62  ;;  %v2433_v48 = vmax.f32 %v2363_v5, 0.0 }
 0x334   :  { %v15170_v35 = vpop.f32.mrf.mxu1  ;;  %v11553_v27 = vpop.f32.mrf.mxu0 }
 0x335   :  { %18871 = vst [vmem:[#allocation550_spill] sm:$0xff] %v15170_v35  ;;  %v2460_v19 = vpack.c.bf16 %v2433_v48, %v2432_v7 }
 0x336   :  { %v15172_v59 = vpop.f32.mrf.mxu1  ;;  %v2368_v55 = vpop.f32.mrf.mxu0 }
 0x337   :  { %18872 = vst [vmem:[#allocation551_spill] sm:$0xff] %v15172_v59  ;;  %11659 = vmatmul.mubr.msk.bf16.gmra.mxu1 %vm1801_vm2, %v2460_v19  ;;  %v2434_v60 = vmax.f32 %v2368_v55, 0.0 }
 0x338   :  { %v15175_v32 = vpop.f32.mrf.mxu1  ;;  %v11556_v25 = vpop.f32.mrf.mxu0  ;;  %11662 = vmatprep.mubr.msk.bf16.mxu1 %vm12084_vm0, %v18814_v14 }
 0x339   :  { %18873 = vst [vmem:[#allocation552_spill] sm:$0xff] %v15175_v32 }
 0x33a   :  { %v15179_v10 = vpop.f32.mrf.mxu1  ;;  %v2371_v62 = vpop.f32.mrf.mxu0 }
 0x33b   :  { %18874 = vst [vmem:[#allocation553_spill] sm:$0xff] %v15179_v10  ;;  %v2435_v5 = vmax.f32 %v2371_v62, 0.0 }
 0x33c   :  { %v15181_v50 = vpop.f32.mrf.mxu1  ;;  %v11557_v27 = vpop.f32.mrf.mxu0 }
 0x33d   :  { %18875 = vst [vmem:[#allocation554_spill] sm:$0xff] %v15181_v50  ;;  %v2461_v7 = vpack.c.bf16 %v2435_v5, %v2434_v60 }
 0x33e   :  { %v15183_v48 = vpop.f32.mrf.mxu1  ;;  %v2376_v59 = vpop.f32.mrf.mxu0 }
 0x33f   :  { %18876 = vst [vmem:[#allocation555_spill] sm:$0xff] %v15183_v48  ;;  %11663 = vmatmul.mubr.msk.bf16.gmra.mxu1 %vm1801_vm2, %v2461_v7  ;;  %v2436_v55 = vmax.f32 %v2376_v59, 0.0 }
 0x340   :  { %v15186_v19 = vpop.f32.mrf.mxu1  ;;  %v11560_v25 = vpop.f32.mrf.mxu0  ;;  %11666 = vmatprep.mubr.msk.bf16.mxu1 %vm12084_vm0, %v18814_v14 }
 0x341   :  { %18877 = vst [vmem:[#allocation556_spill] sm:$0xff] %v15186_v19 }
 0x342   :  { %v15190_v35 = vpop.f32.mrf.mxu1  ;;  %v2379_v10 = vpop.f32.mrf.mxu0 }
 0x343   :  { %18878 = vst [vmem:[#allocation557_spill] sm:$0xff] %v15190_v35  ;;  %v2437_v62 = vmax.f32 %v2379_v10, 0.0 }
 0x344   :  { %v15192_v32 = vpop.f32.mrf.mxu1  ;;  %v11561_v27 = vpop.f32.mrf.mxu0 }
 0x345   :  { %18879 = vst [vmem:[#allocation558_spill] sm:$0xff] %v15192_v32  ;;  %v2462_v60 = vpack.c.bf16 %v2437_v62, %v2436_v55 }
 0x346   :  { %v15194_v5 = vpop.f32.mrf.mxu1  ;;  %v2384_v48 = vpop.f32.mrf.mxu0 }
 0x347   :  { %18880 = vst [vmem:[#allocation559_spill] sm:$0xff] %v15194_v5  ;;  %11667 = vmatmul.mubr.msk.bf16.gmra.mxu1 %vm1801_vm2, %v2462_v60  ;;  %v2438_v19 = vmax.f32 %v2384_v48, 0.0 }
 0x348   :  { %v15197_v7 = vpop.f32.mrf.mxu1  ;;  %v11564_v25 = vpop.f32.mrf.mxu0  ;;  %11670 = vmatprep.mubr.msk.bf16.mxu1 %vm12084_vm0, %v18814_v14 }
 0x349   :  { %18881 = vst [vmem:[#allocation560_spill] sm:$0xff] %v15197_v7  ;;  %v2463_v34 = vpack.c.bf16 %v2438_v19, %v2438_v19 }
 0x34a   :  { %v2155_v35 = vpop.f32.mrf.mxu1  ;;  %v2387_v50 = vpop.f32.mrf.mxu0 }
 0x34c   :  { %v2156_v59 = vpop.f32.mrf.mxu1  ;;  %v11565_v10 = vpop.f32.mrf.mxu0 }
 0x34f   :  { %v2597_v32 = vpop.f32.mrf.mxu1  ;;  %11671 = vmatmul.mubr.msk.bf16.gmra.mxu1 %vm1801_vm2, %v2463_v34 }
 0x350   :  { %v2795_v27 = vmax.f32 %v2597_v32, 0.0 }
 0x351   :  { %v11576_v55 = vpop.f32.mrf.mxu1 }
 0x353   :  { %v2600_v62 = vpop.f32.mrf.mxu1 }
 0x354   :  { %v2796_v5 = vmax.f32 %v2600_v62, 0.0 }
 0x355   :  { %v11577_v60 = vpop.f32.mrf.mxu1 }
 0x356   :  { %v2844_v29 = vpack.c.bf16 %v2796_v5, %v2795_v27 }
 0x357   :  { %v2605_v7 = vpop.f32.mrf.mxu1 }
 0x358   :  { %10367 = vmatmul.mubr.msk.bf16.vlgmr.msra.gmra.mxu0 %vm1801_vm2, %v2844_v29  ;;  %v2797_v50 = vmax.f32 %v2605_v7, 0.0 }
 0x359   :  { %v11580_v25 = vpop.f32.mrf.mxu1  ;;  %3026 = vmatprep.mubr.bf16.mxu0 %v18815_v4 }
 0x35b   :  { %v2608_v35 = vpop.f32.mrf.mxu1 }
 0x35c   :  { %v2798_v48 = vmax.f32 %v2608_v35, 0.0 }
 0x35d   :  { %v11581_v59 = vpop.f32.mrf.mxu1 }
 0x35e   :  { %v2845_v19 = vpack.c.bf16 %v2798_v48, %v2797_v50 }
 0x35f   :  { %v2613_v10 = vpop.f32.mrf.mxu1 }
 0x360   :  { %10368 = vmatmul.mubr.msk.bf16.gmra.mxu0 %vm1801_vm2, %v2845_v19  ;;  %v2799_v55 = vmax.f32 %v2613_v10, 0.0 }
 0x361   :  { %v11584_v34 = vpop.f32.mrf.mxu1  ;;  %3036 = vmatprep.mubr.bf16.mxu0 %v18815_v4 }
 0x363   :  { %v2616_v32 = vpop.f32.mrf.mxu1 }
 0x364   :  { %v2800_v5 = vmax.f32 %v2616_v32, 0.0 }
 0x365   :  { %v11585_v62 = vpop.f32.mrf.mxu1 }
 0x366   :  { %v2846_v27 = vpack.c.bf16 %v2800_v5, %v2799_v55 }
 0x367   :  { %v2621_v29 = vpop.f32.mrf.mxu1 }
 0x368   :  { %10369 = vmatmul.mubr.msk.bf16.gmra.mxu0 %vm1801_vm2, %v2846_v27  ;;  %v2801_v25 = vmax.f32 %v2621_v29, 0.0 }
 0x369   :  { %v11588_v60 = vpop.f32.mrf.mxu1  ;;  %3046 = vmatprep.mubr.bf16.mxu0 %v18815_v4 }
 0x36b   :  { %v2624_v7 = vpop.f32.mrf.mxu1 }
 0x36c   :  { %v2802_v35 = vmax.f32 %v2624_v7, 0.0 }
 0x36d   :  { %v11589_v50 = vpop.f32.mrf.mxu1 }
 0x36e   :  { %v2847_v48 = vpack.c.bf16 %v2802_v35, %v2801_v25 }
 0x36f   :  { %v2629_v59 = vpop.f32.mrf.mxu1 }
 0x370   :  { %10370 = vmatmul.mubr.msk.bf16.gmra.mxu0 %vm1801_vm2, %v2847_v48  ;;  %v2803_v34 = vmax.f32 %v2629_v59, 0.0 }
 0x371   :  { %v11592_v19 = vpop.f32.mrf.mxu1  ;;  %3056 = vmatprep.mubr.bf16.mxu0 %v18815_v4 }
 0x373   :  { %v2632_v10 = vpop.f32.mrf.mxu1 }
 0x374   :  { %v2804_v32 = vmax.f32 %v2632_v10, 0.0 }
 0x375   :  { %v11593_v55 = vpop.f32.mrf.mxu1 }
 0x376   :  { %v2848_v5 = vpack.c.bf16 %v2804_v32, %v2803_v34 }
 0x377   :  { %v2637_v62 = vpop.f32.mrf.mxu1 }
 0x378   :  { %10371 = vmatmul.mubr.msk.bf16.gmra.mxu0 %vm1801_vm2, %v2848_v5  ;;  %v2805_v60 = vmax.f32 %v2637_v62, 0.0 }
 0x379   :  { %v11596_v27 = vpop.f32.mrf.mxu1  ;;  %3066 = vmatprep.mubr.bf16.mxu0 %v18815_v4 }
 0x37b   :  { %v2640_v29 = vpop.f32.mrf.mxu1 }
 0x37c   :  { %v2806_v7 = vmax.f32 %v2640_v29, 0.0 }
 0x37d   :  { %v11597_v25 = vpop.f32.mrf.mxu1 }
 0x37e   :  { %v2849_v35 = vpack.c.bf16 %v2806_v7, %v2805_v60 }
 0x37f   :  { %v2645_v50 = vpop.f32.mrf.mxu1 }
 0x380   :  { %10372 = vmatmul.mubr.msk.bf16.gmra.mxu0 %vm1801_vm2, %v2849_v35  ;;  %v2807_v19 = vmax.f32 %v2645_v50, 0.0 }
 0x381   :  { %v11600_v48 = vpop.f32.mrf.mxu1  ;;  %3076 = vmatprep.mubr.bf16.mxu0 %v18815_v4 }
 0x383   :  { %v2648_v59 = vpop.f32.mrf.mxu1 }
 0x384   :  { %v2808_v10 = vmax.f32 %v2648_v59, 0.0 }
 0x385   :  { %v11601_v34 = vpop.f32.mrf.mxu1 }
 0x386   :  { %v2850_v32 = vpack.c.bf16 %v2808_v10, %v2807_v19 }
 0x387   :  { %v2653_v55 = vpop.f32.mrf.mxu1 }
 0x388   :  { %10373 = vmatmul.mubr.msk.bf16.gmra.mxu0 %vm1801_vm2, %v2850_v32  ;;  %v2809_v27 = vmax.f32 %v2653_v55, 0.0 }
 0x389   :  { %v11604_v5 = vpop.f32.mrf.mxu1  ;;  %3086 = vmatprep.mubr.bf16.mxu0 %v18815_v4 }
 0x38b   :  { %v2656_v62 = vpop.f32.mrf.mxu1 }
 0x38c   :  { %v2810_v29 = vmax.f32 %v2656_v62, 0.0 }
 0x38d   :  { %v11605_v60 = vpop.f32.mrf.mxu1 }
 0x38e   :  { %v2851_v7 = vpack.c.bf16 %v2810_v29, %v2809_v27 }
 0x38f   :  { %v2661_v25 = vpop.f32.mrf.mxu1 }
 0x390   :  { %10374 = vmatmul.mubr.msk.bf16.gmra.mxu0 %vm1801_vm2, %v2851_v7  ;;  %v2811_v48 = vmax.f32 %v2661_v25, 0.0 }
 0x391   :  { %v11608_v35 = vpop.f32.mrf.mxu1  ;;  %3096 = vmatprep.mubr.bf16.mxu0 %v18815_v4 }
 0x393   :  { %v2664_v50 = vpop.f32.mrf.mxu1 }
 0x394   :  { %v2812_v59 = vmax.f32 %v2664_v50, 0.0 }
 0x395   :  { %v11609_v19 = vpop.f32.mrf.mxu1 }
 0x396   :  { %v2852_v10 = vpack.c.bf16 %v2812_v59, %v2811_v48 }
 0x397   :  { %v2669_v34 = vpop.f32.mrf.mxu1 }
 0x398   :  { %10375 = vmatmul.mubr.msk.bf16.gmra.mxu0 %vm1801_vm2, %v2852_v10  ;;  %v2813_v5 = vmax.f32 %v2669_v34, 0.0 }
 0x399   :  { %v11612_v32 = vpop.f32.mrf.mxu1  ;;  %3106 = vmatprep.mubr.bf16.mxu0 %v18815_v4 }
 0x39b   :  { %v2672_v55 = vpop.f32.mrf.mxu1 }
 0x39c   :  { %v2814_v62 = vmax.f32 %v2672_v55, 0.0 }
 0x39d   :  { %v11613_v27 = vpop.f32.mrf.mxu1 }
 0x39e   :  { %v2853_v29 = vpack.c.bf16 %v2814_v62, %v2813_v5 }
 0x39f   :  { %v2677_v60 = vpop.f32.mrf.mxu1 }
 0x3a0   :  { %10376 = vmatmul.mubr.msk.bf16.gmra.mxu0 %vm1801_vm2, %v2853_v29  ;;  %v2815_v35 = vmax.f32 %v2677_v60, 0.0 }
 0x3a1   :  { %v11616_v7 = vpop.f32.mrf.mxu1  ;;  %3116 = vmatprep.mubr.bf16.mxu0 %v18815_v4 }
 0x3a3   :  { %v2680_v25 = vpop.f32.mrf.mxu1 }
 0x3a4   :  { %v2816_v50 = vmax.f32 %v2680_v25, 0.0 }
 0x3a5   :  { %v11617_v48 = vpop.f32.mrf.mxu1 }
 0x3a6   :  { %v2854_v59 = vpack.c.bf16 %v2816_v50, %v2815_v35 }
 0x3a7   :  { %v2685_v19 = vpop.f32.mrf.mxu1 }
 0x3a8   :  { %10377 = vmatmul.mubr.msk.bf16.gmra.mxu0 %vm1801_vm2, %v2854_v59  ;;  %v2817_v32 = vmax.f32 %v2685_v19, 0.0 }
 0x3a9   :  { %v11620_v10 = vpop.f32.mrf.mxu1  ;;  %3126 = vmatprep.mubr.bf16.mxu0 %v18815_v4 }
 0x3ab   :  { %v2688_v34 = vpop.f32.mrf.mxu1 }
 0x3ac   :  { %v2818_v55 = vmax.f32 %v2688_v34, 0.0 }
 0x3ad   :  { %v11621_v5 = vpop.f32.mrf.mxu1 }
 0x3ae   :  { %v2855_v62 = vpack.c.bf16 %v2818_v55, %v2817_v32 }
 0x3af   :  { %v2693_v27 = vpop.f32.mrf.mxu1 }
 0x3b0   :  { %10378 = vmatmul.mubr.msk.bf16.gmra.mxu0 %vm1801_vm2, %v2855_v62  ;;  %v2819_v7 = vmax.f32 %v2693_v27, 0.0 }
 0x3b1   :  { %v11624_v29 = vpop.f32.mrf.mxu1  ;;  %3136 = vmatprep.mubr.bf16.mxu0 %v18815_v4 }
 0x3b3   :  { %v2696_v60 = vpop.f32.mrf.mxu1 }
 0x3b4   :  { %v2820_v25 = vmax.f32 %v2696_v60, 0.0 }
 0x3b5   :  { %v11625_v35 = vpop.f32.mrf.mxu1 }
 0x3b6   :  { %v2856_v50 = vpack.c.bf16 %v2820_v25, %v2819_v7 }
 0x3b7   :  { %v2701_v48 = vpop.f32.mrf.mxu1 }
 0x3b8   :  { %10379 = vmatmul.mubr.msk.bf16.gmra.mxu0 %vm1801_vm2, %v2856_v50  ;;  %v2821_v10 = vmax.f32 %v2701_v48, 0.0 }
 0x3b9   :  { %v11628_v59 = vpop.f32.mrf.mxu1  ;;  %3146 = vmatprep.mubr.bf16.mxu0 %v18815_v4 }
 0x3bb   :  { %v2704_v19 = vpop.f32.mrf.mxu1 }
 0x3bc   :  { %v2822_v34 = vmax.f32 %v2704_v19, 0.0 }
 0x3bd   :  { %v11629_v32 = vpop.f32.mrf.mxu1 }
 0x3be   :  { %v2857_v55 = vpack.c.bf16 %v2822_v34, %v2821_v10 }
 0x3bf   :  { %v2709_v5 = vpop.f32.mrf.mxu1 }
 0x3c0   :  { %10380 = vmatmul.mubr.msk.bf16.gmra.mxu0 %vm1801_vm2, %v2857_v55  ;;  %v2823_v29 = vmax.f32 %v2709_v5, 0.0 }
 0x3c1   :  { %v11632_v62 = vpop.f32.mrf.mxu1  ;;  %3156 = vmatprep.mubr.bf16.mxu0 %v18815_v4 }
 0x3c3   :  { %v2712_v27 = vpop.f32.mrf.mxu1 }
 0x3c4   :  { %v2824_v60 = vmax.f32 %v2712_v27, 0.0 }
 0x3c5   :  { %v11633_v7 = vpop.f32.mrf.mxu1 }
 0x3c6   :  { %v2858_v25 = vpack.c.bf16 %v2824_v60, %v2823_v29 }
 0x3c7   :  { %v2717_v35 = vpop.f32.mrf.mxu1 }
 0x3c8   :  { %10381 = vmatmul.mubr.msk.bf16.gmra.mxu0 %vm1801_vm2, %v2858_v25  ;;  %v2825_v59 = vmax.f32 %v2717_v35, 0.0 }
 0x3c9   :  { %v11636_v50 = vpop.f32.mrf.mxu1  ;;  %3166 = vmatprep.mubr.bf16.mxu0 %v18815_v4 }
 0x3cb   :  { %v2720_v48 = vpop.f32.mrf.mxu1 }
 0x3cc   :  { %v2826_v19 = vmax.f32 %v2720_v48, 0.0 }
 0x3cd   :  { %v11637_v10 = vpop.f32.mrf.mxu1 }
 0x3ce   :  { %v2859_v34 = vpack.c.bf16 %v2826_v19, %v2825_v59 }
 0x3cf   :  { %v2725_v32 = vpop.f32.mrf.mxu1 }
 0x3d0   :  { %10382 = vmatmul.mubr.msk.bf16.gmra.mxu0 %vm1801_vm2, %v2859_v34  ;;  %v2827_v62 = vmax.f32 %v2725_v32, 0.0 }
 0x3d1   :  { %v11640_v55 = vpop.f32.mrf.mxu1  ;;  %3176 = vmatprep.mubr.bf16.mxu0 %v18815_v4 }
 0x3d3   :  { %v2728_v5 = vpop.f32.mrf.mxu1 }
 0x3d4   :  { %v2828_v27 = vmax.f32 %v2728_v5, 0.0 }
 0x3d5   :  { %v11641_v29 = vpop.f32.mrf.mxu1 }
 0x3d6   :  { %v2860_v60 = vpack.c.bf16 %v2828_v27, %v2827_v62 }
 0x3d7   :  { %v2733_v7 = vpop.f32.mrf.mxu1 }
 0x3d8   :  { %10383 = vmatmul.mubr.msk.bf16.gmra.mxu0 %vm1801_vm2, %v2860_v60  ;;  %v2829_v50 = vmax.f32 %v2733_v7, 0.0 }
 0x3d9   :  { %v11644_v25 = vpop.f32.mrf.mxu1  ;;  %3186 = vmatprep.mubr.bf16.mxu0 %v18815_v4 }
 0x3db   :  { %v2736_v35 = vpop.f32.mrf.mxu1 }
 0x3dc   :  { %v2830_v48 = vmax.f32 %v2736_v35, 0.0 }
 0x3dd   :  { %v11645_v59 = vpop.f32.mrf.mxu1 }
 0x3de   :  { %v2861_v19 = vpack.c.bf16 %v2830_v48, %v2829_v50 }
 0x3df   :  { %v2741_v10 = vpop.f32.mrf.mxu1 }
 0x3e0   :  { %10384 = vmatmul.mubr.msk.bf16.gmra.mxu0 %vm1801_vm2, %v2861_v19  ;;  %v2831_v55 = vmax.f32 %v2741_v10, 0.0 }
 0x3e1   :  { %v11648_v34 = vpop.f32.mrf.mxu1  ;;  %3196 = vmatprep.mubr.bf16.mxu0 %v18815_v4 }
 0x3e3   :  { %v2744_v32 = vpop.f32.mrf.mxu1 }
 0x3e4   :  { %v2832_v5 = vmax.f32 %v2744_v32, 0.0 }
 0x3e5   :  { %v11649_v62 = vpop.f32.mrf.mxu1 }
 0x3e6   :  { %v2862_v27 = vpack.c.bf16 %v2832_v5, %v2831_v55 }
 0x3e7   :  { %v2749_v29 = vpop.f32.mrf.mxu1 }
 0x3e8   :  { %10385 = vmatmul.mubr.msk.bf16.gmra.mxu0 %vm1801_vm2, %v2862_v27  ;;  %v2833_v25 = vmax.f32 %v2749_v29, 0.0 }
 0x3e9   :  { %v11652_v60 = vpop.f32.mrf.mxu1  ;;  %3206 = vmatprep.mubr.bf16.mxu0 %v18815_v4 }
 0x3eb   :  { %v2752_v7 = vpop.f32.mrf.mxu1 }
 0x3ec   :  { %v2834_v35 = vmax.f32 %v2752_v7, 0.0 }
 0x3ed   :  { %v11653_v50 = vpop.f32.mrf.mxu1 }
 0x3ee   :  { %v2863_v48 = vpack.c.bf16 %v2834_v35, %v2833_v25 }
 0x3ef   :  { %v2757_v59 = vpop.f32.mrf.mxu1 }
 0x3f0   :  { %10386 = vmatmul.mubr.msk.bf16.gmra.mxu0 %vm1801_vm2, %v2863_v48  ;;  %v2835_v34 = vmax.f32 %v2757_v59, 0.0 }
 0x3f1   :  { %v11656_v19 = vpop.f32.mrf.mxu1  ;;  %3216 = vmatprep.mubr.bf16.mxu0 %v18815_v4 }
 0x3f3   :  { %v2760_v10 = vpop.f32.mrf.mxu1 }
 0x3f4   :  { %v2836_v32 = vmax.f32 %v2760_v10, 0.0 }
 0x3f5   :  { %v11657_v55 = vpop.f32.mrf.mxu1 }
 0x3f6   :  { %v2864_v5 = vpack.c.bf16 %v2836_v32, %v2835_v34 }
 0x3f7   :  { %v2765_v62 = vpop.f32.mrf.mxu1 }
 0x3f8   :  { %10387 = vmatmul.mubr.msk.bf16.gmra.mxu0 %vm1801_vm2, %v2864_v5  ;;  %v2837_v60 = vmax.f32 %v2765_v62, 0.0 }
 0x3f9   :  { %v11660_v27 = vpop.f32.mrf.mxu1  ;;  %3226 = vmatprep.mubr.bf16.mxu0 %v18815_v4 }
 0x3fb   :  { %v2768_v29 = vpop.f32.mrf.mxu1 }
 0x3fc   :  { %v2838_v7 = vmax.f32 %v2768_v29, 0.0 }
 0x3fd   :  { %v11661_v25 = vpop.f32.mrf.mxu1 }
 0x3fe   :  { %v2865_v35 = vpack.c.bf16 %v2838_v7, %v2837_v60 }
 0x3ff   :  { %v2773_v50 = vpop.f32.mrf.mxu1 }
 0x400   :  { %10388 = vmatmul.mubr.msk.bf16.gmra.mxu0 %vm1801_vm2, %v2865_v35  ;;  %v2839_v19 = vmax.f32 %v2773_v50, 0.0 }
 0x401   :  { %v11664_v48 = vpop.f32.mrf.mxu1  ;;  %3236 = vmatprep.mubr.bf16.mxu0 %v18815_v4 }
 0x403   :  { %v2776_v59 = vpop.f32.mrf.mxu1 }
 0x404   :  { %v2840_v10 = vmax.f32 %v2776_v59, 0.0 }
 0x405   :  { %v11665_v34 = vpop.f32.mrf.mxu1 }
 0x406   :  { %v2866_v32 = vpack.c.bf16 %v2840_v10, %v2839_v19 }
 0x407   :  { %v2781_v55 = vpop.f32.mrf.mxu1 }
 0x408   :  { %10389 = vmatmul.mubr.msk.bf16.gmra.mxu0 %vm1801_vm2, %v2866_v32  ;;  %v2841_v27 = vmax.f32 %v2781_v55, 0.0 }
 0x409   :  { %v11668_v5 = vpop.f32.mrf.mxu1  ;;  %3246 = vmatprep.mubr.bf16.mxu0 %v18815_v4 }
 0x40b   :  { %v2784_v62 = vpop.f32.mrf.mxu1 }
 0x40c   :  { %v2842_v29 = vmax.f32 %v2784_v62, 0.0 }
 0x40d   :  { %v11669_v60 = vpop.f32.mrf.mxu1 }
 0x40e   :  { %v2867_v7 = vpack.c.bf16 %v2842_v29, %v2841_v27 }
 0x40f   :  { %v2789_v25 = vpop.f32.mrf.mxu1 }
 0x410   :  { %10390 = vmatmul.mubr.msk.bf16.gmra.mxu0 %vm1801_vm2, %v2867_v7  ;;  %v2843_v50 = vmax.f32 %v2789_v25, 0.0 }
 0x411   :  { %v11672_v35 = vpop.f32.mrf.mxu1  ;;  %3256 = vmatprep.mubr.bf16.mxu0 %v18815_v4 }
 0x412   :  { %v2868_v19 = vpack.c.bf16 %v2843_v50, %v2843_v50 }
 0x413   :  { %v2792_v48 = vpop.f32.mrf.mxu1 }
 0x415   :  { %v11673_v59 = vpop.f32.mrf.mxu1 }
 0x418   :  { %v3018_v10 = vpop.f32.mrf.mxu0  ;;  %10391 = vmatmul.mubr.msk.bf16.gmra.mxu0 %vm1801_vm2, %v2868_v19 }
 0x419   :  { %v3019_v32 = vadd.f32 %v3018_v10, %v14910_v39 }
 0x41a   :  { %v15251_v34 = vpop.f32.mrf.mxu0 }
 0x41b   :  { %18882 = vst [vmem:[#allocation561_spill] sm:$0xff] %v15251_v34  ;;  %v3265_v27 = vmax.f32 %v3019_v32, 0.0 }
 0x41c   :  { %v3022_v55 = vpop.f32.mrf.mxu0 }
 0x41d   :  { %v3023_v5 = vadd.f32 %v3022_v55, %v14919_v54 }
 0x41e   :  { %v15255_v62 = vpop.f32.mrf.mxu0 }
 0x41f   :  { %18883 = vst [vmem:[#allocation562_spill] sm:$0xff] %v15255_v62  ;;  %v3267_v29 = vmax.f32 %v3023_v5, 0.0 }
 0x420   :  { %v3028_v60 = vpop.f32.mrf.mxu0 }
 0x421   :  { %v15257_v7 = vpack.c.bf16 %v3267_v29, %v3265_v27  ;;  %v3029_v35 = vadd.f32 %v3028_v60, %v14923_v26 }
 0x422   :  { %v15259_v25 = vpop.f32.mrf.mxu0 }
 0x423   :  { %18884 = vst [vmem:[#allocation563_spill] sm:$0xff] %v15257_v7  ;;  %18885 = vst [vmem:[#allocation564_spill] sm:$0xff] %v15259_v25  ;;  %v3269_v39 = vmax.f32 %v3029_v35, 0.0 }
 0x424   :  { %v3032_v50 = vpop.f32.mrf.mxu0 }
 0x425   :  { %v3033_v48 = vadd.f32 %v3032_v50, %v14930_v61 }
 0x426   :  { %v15263_v59 = vpop.f32.mrf.mxu0 }
 0x427   :  { %v3271_v19 = vmax.f32 %v3033_v48, 0.0 }
 0x428   :  { %v15265_v10 = vpop.f32.mrf.mxu0 }
 0x429   :  { %18886 = vst [vmem:[#allocation565_spill] sm:$0xff] %v15265_v10  ;;  %v15267_v54 = vpack.c.bf16 %v3271_v19, %v3269_v39  ;;  %v11783_v19 = vld [vmem:[%s17831_s5 + $0x4] ss:$16 sps:$4 sm:$0xff]  }
 0x42a   :  { %v15269_v32 = vpop.f32.mrf.mxu0  ;;  %3771 = vmatprep.mubr.bf16.mxu1 %v11783_v19 }
 0x42b   :  { %18887 = vst [vmem:[#allocation566_spill] sm:$0xff] %v15267_v54 }
 0x42c   :  { %v15271_v55 = vpop.f32.mrf.mxu0 }
 0x42e   :  { %v15273_v5 = vpop.f32.mrf.mxu0 }
 0x430   :  { %v15275_v27 = vpop.f32.mrf.mxu0 }
 0x432   :  { %v15277_v26 = vpop.f32.mrf.mxu0 }
 0x434   :  { %v15279_v29 = vpop.f32.mrf.mxu0 }
 0x436   :  { %v3054_v61 = vpop.f32.mrf.mxu0 }
 0x438   :  { %v15281_v60 = vpop.f32.mrf.mxu0 }
 0x43a   :  { %v3060_v35 = vpop.f32.mrf.mxu0 }
 0x43c   :  { %v3062_v50 = vpop.f32.mrf.mxu0 }
 0x43e   :  { %v3064_v48 = vpop.f32.mrf.mxu0 }
 0x440   :  { %v3068_v39 = vpop.f32.mrf.mxu0 }
 0x442   :  { %v3070_v14 = vpop.f32.mrf.mxu0 }
 0x444   :  { %v3072_v4 = vpop.f32.mrf.mxu0 }
 0x446   :  { %v3074_v30 = vpop.f32.mrf.mxu0 }
 0x447   :  { %v3075_v56 = vadd.f32 %v3074_v30, %v14982_v1  ;;  %v3065_v1 = vadd.f32 %v3064_v48, %v14971_v13  ;;  %v3069_v30 = vadd.f32 %v3068_v39, %v14973_v36 }
 0x448   :  { %v3078_v45 = vpop.f32.mrf.mxu0 }
 0x44a   :  { %v3080_v0 = vpop.f32.mrf.mxu0 }
 0x44b   :  { %v3081_v19 = vadd.f32 %v3080_v0, %v14987_v28 }
 0x44c   :  { %v3082_v33 = vpop.f32.mrf.mxu0 }
 0x44d   :  { %v3083_v62 = vadd.f32 %v3082_v33, %v14991_v11  ;;  %v3073_v11 = vadd.f32 %v3072_v4, %v14980_v49 }
 0x44e   :  { %v3084_v15 = vpop.f32.mrf.mxu0 }
 0x44f   :  { %v3085_v6 = vadd.f32 %v3084_v15, %v14993_v18  ;;  %v3291_v28 = vmax.f32 %v3083_v62, 0.0  ;;  %v3287_v13 = vmax.f32 %v3073_v11, 0.0  ;;  %v3285_v62 = vmax.f32 %v3069_v30, 0.0  ;;  %v18894_v30 = vld [vmem:[#allocation495_spill] sm:$0xff] }
 0x450   :  { %v3088_v44 = vpop.f32.mrf.mxu0 }
 0x451   :  { %v3089_v54 = vadd.f32 %v3088_v44, %v14995_v51  ;;  %v3292_v10 = vmax.f32 %v3085_v6, 0.0  ;;  %v3290_v51 = vmax.f32 %v3081_v19, 0.0 }
 0x452   :  { %v3090_v9 = vpop.f32.mrf.mxu0 }
 0x453   :  { %v3091_v20 = vadd.f32 %v3090_v9, %v14998_v12  ;;  %v3079_v12 = vadd.f32 %v3078_v45, %v14984_v21  ;;  %v3293_v15 = vmax.f32 %v3089_v54, 0.0  ;;  %v3546_v21 = vpack.c.bf16 %v3292_v10, %v3290_v51 }
 0x454   :  { %v3092_v40 = vpop.f32.mrf.mxu0  ;;  %v3284_v9 = vmax.f32 %v3065_v1, 0.0  ;;  %v3543_v54 = vpack.c.bf16 %v3287_v13, %v3285_v62 }
 0x455   :  { %v3093_v7 = vadd.f32 %v3092_v40, %v15002_v17  ;;  %v3294_v23 = vmax.f32 %v3091_v20, 0.0  ;;  %v3071_v40 = vadd.f32 %v3070_v14, %v14976_v42  ;;  %v3288_v20 = vmax.f32 %v3075_v56, 0.0 }
 0x456   :  { %v3094_v34 = vpop.f32.mrf.mxu0  ;;  %v3289_v45 = vmax.f32 %v3079_v12, 0.0 }
 0x457   :  { %v3095_v46 = vadd.f32 %v3094_v34, %v15004_v37  ;;  %v3295_v24 = vmax.f32 %v3093_v7, 0.0  ;;  %v3286_v42 = vmax.f32 %v3071_v40, 0.0  ;;  %v3059_v34 = vadd.f32 %v15281_v60, %v14962_v52 }
 0x458   :  { %v3098_v25 = vpop.f32.mrf.mxu0  ;;  %v3545_v56 = vpack.c.bf16 %v3291_v28, %v3289_v45  ;;  %v3051_v7 = vadd.f32 %v15277_v26, %v14954_v22  ;;  %v3045_v52 = vadd.f32 %v15273_v5, %v14943_v2  ;;  %v3049_v22 = vadd.f32 %v15275_v27, %v14945_v31  ;;  %v18895_v45 = vld [vmem:[#allocation561_spill] sm:$0xff] }
 0x459   :  { %v3296_v18 = vmax.f32 %v3095_v46, 0.0  ;;  %v3099_v0 = vadd.f32 %v3098_v25, %v15006_v38  ;;  %v3547_v33 = vpack.c.bf16 %v3295_v24, %v3293_v15  ;;  %v3063_v24 = vadd.f32 %v3062_v50, %v14969_v8  ;;  %v18888_v15 = vld [vmem:[#allocation498_spill] sm:$0xff] }
 0x45a   :  { %v15295_v17 = vpop.f32.mrf.mxu0  ;;  %v3544_v36 = vpack.c.bf16 %v3288_v20, %v3286_v42  ;;  %v3281_v26 = vmax.f32 %v3059_v34, 0.0  ;;  %v3043_v2 = vadd.f32 %v15271_v55, %v14941_v43  ;;  %v3035_v31 = vadd.f32 %v15263_v59, %v14932_v63  ;;  %v18891_v43 = vld [vmem:[#allocation564_spill] sm:$0xff]  ;;  %v18893_v59 = vld [vmem:[#allocation562_spill] sm:$0xff] }
 0x45b   :  { %v3548_v37 = vpack.c.bf16 %v3296_v18, %v3294_v23  ;;  %v3061_v23 = vadd.f32 %v3060_v35, %v14965_v53  ;;  %v3297_v4 = vmax.f32 %v3099_v0, 0.0  ;;  %v3283_v10 = vmax.f32 %v3063_v24, 0.0  ;;  %v18890_v0 = vld [vmem:[#allocation497_spill] sm:$0xff]  ;;  %v18892_v63 = vld [vmem:[#allocation496_spill] sm:$0xff]  ;;  %v18896_v34 = vld [vmem:[#allocation566_spill] sm:$0xff] }
 0x45c   :  { %v3102_v44 = vpop.f32.mrf.mxu0  ;;  %v3276_v27 = vmax.f32 %v3045_v52, 0.0  ;;  %v3277_v40 = vmax.f32 %v3049_v22, 0.0  ;;  %v3031_v55 = vadd.f32 %v18891_v43, %v18890_v0  ;;  %v3275_v11 = vmax.f32 %v3043_v2, 0.0  ;;  %v18899_v2 = vld [vmem:[#allocation524_spill] sm:$0xff]  ;;  %v18904_v43 = vld [vmem:[#allocation521_spill] sm:$0xff] }
 0x45d   :  { %v3103_v46 = vadd.f32 %v3102_v44, %v15013_v57  ;;  %3739 = vmatprep.subr.bf16.mxu1 %v3548_v37  ;;  %v3055_v57 = vadd.f32 %v3054_v61, %v14960_v41  ;;  %v3282_v8 = vmax.f32 %v3061_v23, 0.0  ;;  %v3053_v41 = vadd.f32 %v15279_v29, %v14958_v58 }
 0x45e   :  { %v15303_v14 = vpop.f32.mrf.mxu0  ;;  %3740 = vmatpush1.bf16.msra.mxu1 %v3547_v33  ;;  %v3041_v58 = vadd.f32 %v15269_v32, %v14937_v3  ;;  %v18889_v3 = vld [vmem:[#allocation565_spill] sm:$0xff]  ;;  %v3025_v44 = vadd.f32 %v18893_v59, %v18892_v63  ;;  %v3272_v1 = vmax.f32 %v3035_v31, 0.0  ;;  %v3021_v23 = vadd.f32 %v18895_v45, %v18894_v30 }
 0x45f   :  { %v3299_v49 = vmax.f32 %v3103_v46, 0.0  ;;  %3741 = vmatprep.subr.bf16.mxu1 %v3546_v21  ;;  %v3280_v60 = vmax.f32 %v3055_v57, 0.0  ;;  %v3542_v50 = vpack.c.bf16 %v3284_v9, %v3282_v8  ;;  %v3279_v5 = vmax.f32 %v3053_v41, 0.0  ;;  %v18897_v8 = vld [vmem:[#allocation563_spill] sm:$0xff] }
 0x460   :  { %v3108_v38 = vpop.f32.mrf.mxu0  ;;  %v3039_v32 = vadd.f32 %v18889_v3, %v18888_v15  ;;  %v3274_v37 = vmax.f32 %v3041_v58, 0.0  ;;  %v3270_v42 = vmax.f32 %v3031_v55, 0.0  ;;  %v3268_v24 = vmax.f32 %v3025_v44, 0.0  ;;  %v18902_v3 = vld [vmem:[#allocation520_spill] sm:$0xff] }
 0x461   :  { %v15308_v6 = vpack.c.bf16 %v3299_v49, %v3297_v4  ;;  %v3109_v25 = vadd.f32 %v3108_v38, %v15017_v16  ;;  %v3278_v16 = vmax.f32 %v3051_v7, 0.0  ;;  %v3539_v28 = vpack.c.bf16 %v3279_v5, %v3277_v40  ;;  %v18903_v40 = vld [vmem:[#allocation526_spill] sm:$0xff] }
 0x462   :  { %v15312_v53 = vpop.f32.mrf.mxu0  ;;  %3742 = vmatpush1.bf16.msra.mxu1 %v3545_v56  ;;  %v3538_v20 = vpack.c.bf16 %v3276_v27, %v3274_v37  ;;  %v3273_v46 = vmax.f32 %v3039_v32, 0.0  ;;  %v3536_v13 = vpack.c.bf16 %v3272_v1, %v3270_v42  ;;  %v3266_v38 = vmax.f32 %v3021_v23, 0.0  ;;  %v18901_v27 = vld [vmem:[#allocation523_spill] sm:$0xff]  ;;  %v18907_v23 = vld [vmem:[#allocation516_spill] sm:$0xff] }
 0x463   :  { %3743 = vmatprep.subr.bf16.mxu1 %v3544_v36  ;;  %v3301_v29 = vmax.f32 %v3109_v25, 0.0  ;;  %v3540_v12 = vpack.c.bf16 %v3280_v60, %v3278_v16 }
 0x464   :  { %v3112_v61 = vpop.f32.mrf.mxu0  ;;  %v3537_v4 = vpack.c.bf16 %v3275_v11, %v3273_v46  ;;  %v3534_v9 = vpack.c.bf16 %v3268_v24, %v3266_v38 }
 0x465   :  { %v3113_v35 = vadd.f32 %v3112_v61, %v15030_v47  ;;  %v3541_v47 = vpack.c.bf16 %v3283_v10, %v3281_v26 }
 0x466   :  { %v15324_v48 = vpop.f32.mrf.mxu0  ;;  %3744 = vmatpush1.bf16.msra.mxu1 %v3543_v54 }
 0x467   :  { %v3303_v39 = vmax.f32 %v3113_v35, 0.0  ;;  %3745 = vmatprep.subr.bf16.mxu1 %v3542_v50 }
 0x468   :  { %v15330_v19 = vpop.f32.mrf.mxu0 }
 0x469   :  { %v15334_v18 = vpack.c.bf16 %v3303_v39, %v3301_v29  ;;  %v18898_v29 = vld [vmem:[#allocation522_spill] sm:$0xff] }
 0x46a   :  { %v15338_v51 = vpop.f32.mrf.mxu0  ;;  %3746 = vmatpush1.bf16.msra.mxu1 %v3541_v47  ;;  %v18900_v47 = vld [vmem:[#allocation525_spill] sm:$0xff] }
 0x46b   :  { %3747 = vmatprep.subr.bf16.mxu1 %v3540_v12 }
 0x46c   :  { %v15342_v33 = vpop.f32.mrf.mxu0 }
 0x46e   :  { %v15346_v21 = vpop.f32.mrf.mxu0  ;;  %3748 = vmatpush1.bf16.msra.mxu1 %v3539_v28  ;;  %v18905_v28 = vld [vmem:[#allocation518_spill] sm:$0xff] }
 0x46f   :  { %3749 = vmatprep.subr.bf16.mxu1 %v3538_v20  ;;  %v18906_v20 = vld [vmem:[#allocation519_spill] sm:$0xff] }
 0x470   :  { %v15350_v49 = vpop.f32.mrf.mxu0 }
 0x472   :  { %v15352_v56 = vpop.f32.mrf.mxu0  ;;  %3750 = vmatpush1.bf16.msra.mxu1 %v3537_v4 }
 0x473   :  { %3751 = vmatprep.subr.bf16.mxu1 %v3536_v13  ;;  %v18908_v13 = vld [vmem:[#allocation527_spill] sm:$0xff] }
 0x474   :  { %v15354_v57 = vpop.f32.mrf.mxu0 }
 0x476   :  { %v3134_v36 = vpop.f32.mrf.mxu0  ;;  %3752 = vmatpush1.bf16.msra.mxu1 %v18896_v34 }
 0x477   :  { %3753 = vmatprep.subr.bf16.mxu1 %v3534_v9  ;;  %v18909_v9 = vld [vmem:[#allocation514_spill] sm:$0xff] }
 0x478   :  { %v15357_v62 = vpop.f32.mrf.mxu0 }
 0x47a   :  { %v3140_v7 = vpop.f32.mrf.mxu0  ;;  %3754 = vmatpush1.bf16.msra.mxu1 %v18897_v8  ;;  %v18910_v8 = vld [vmem:[#allocation517_spill] sm:$0xff] }
 0x47c   :  { %v3142_v25 = vpop.f32.mrf.mxu0 }
 0x47e   :  { %v3144_v41 = vpop.f32.mrf.mxu0 }
 0x47f   :  { %v3145_v34 = vadd.f32 %v3144_v41, %v18909_v9 }
 0x480   :  { %v3148_v10 = vpop.f32.mrf.mxu0 }
 0x482   :  { %v3150_v54 = vpop.f32.mrf.mxu0 }
 0x483   :  { %v3151_v42 = vadd.f32 %v3150_v54, %v18907_v23  ;;  %v18920_v23 = vld [vmem:[#allocation531_spill] sm:$0xff] }
 0x484   :  { %v3152_v61 = vpop.f32.mrf.mxu0 }
 0x486   :  { %v3154_v52 = vpop.f32.mrf.mxu0 }
 0x487   :  { %v3155_v63 = vadd.f32 %v3154_v52, %v18905_v28 }
 0x488   :  { %v3158_v60 = vpop.f32.mrf.mxu0 }
 0x489   :  { %v3159_v46 = vadd.f32 %v3158_v60, %v18906_v20  ;;  %v18912_v60 = vld [vmem:[#allocation529_spill] sm:$0xff] }
 0x48a   :  { %v3160_v35 = vpop.f32.mrf.mxu0 }
 0x48b   :  { %v3161_v32 = vadd.f32 %v3160_v35, %v18902_v3  ;;  %v3153_v35 = vadd.f32 %v3152_v61, %v18910_v8  ;;  %v3318_v61 = vmax.f32 %v3151_v42, 0.0 }
 0x48c   :  { %v3162_v50 = vpop.f32.mrf.mxu0 }
 0x48d   :  { %v3163_v55 = vadd.f32 %v3162_v50, %v18904_v43  ;;  %v3322_v4 = vmax.f32 %v3161_v32, 0.0  ;;  %v18916_v32 = vld [vmem:[#allocation530_spill] sm:$0xff] }
 0x48e   :  { %v3164_v22 = vpop.f32.mrf.mxu0 }
 0x48f   :  { %v3165_v39 = vadd.f32 %v3164_v22, %v18898_v29  ;;  %v3323_v50 = vmax.f32 %v3163_v55, 0.0  ;;  %v3316_v55 = vmax.f32 %v3145_v34, 0.0 }
 0x490   :  { %v3168_v26 = vpop.f32.mrf.mxu0 }
 0x491   :  { %v3169_v12 = vadd.f32 %v3168_v26, %v18901_v27  ;;  %v3324_v59 = vmax.f32 %v3165_v39, 0.0  ;;  %v3320_v26 = vmax.f32 %v3155_v63, 0.0 }
 0x492   :  { %v3170_v58 = vpop.f32.mrf.mxu0 }
 0x493   :  { %v3171_v5 = vadd.f32 %v3170_v58, %v18899_v2  ;;  %v3325_v30 = vmax.f32 %v3169_v12, 0.0  ;;  %v3562_v58 = vpack.c.bf16 %v3324_v59, %v3322_v4  ;;  %v18913_v2 = vld [vmem:[#allocation510_spill] sm:$0xff]  ;;  %v3321_v12 = vmax.f32 %v3159_v46, 0.0  ;;  %v18918_v59 = vld [vmem:[#allocation511_spill] sm:$0xff]  ;;  %v18919_v46 = vld [vmem:[#allocation508_spill] sm:$0xff] }
 0x494   :  { %v3172_v16 = vpop.f32.mrf.mxu0  ;;  %v3135_v54 = vadd.f32 %v3134_v36, %v18913_v2  ;;  %v3560_v36 = vpack.c.bf16 %v3320_v26, %v3318_v61  ;;  %v18921_v4 = vld [vmem:[#allocation506_spill] sm:$0xff] }
 0x495   :  { %v3173_v31 = vadd.f32 %v3172_v16, %v18900_v47  ;;  %v3326_v44 = vmax.f32 %v3171_v5, 0.0  ;;  %v18911_v16 = vld [vmem:[#allocation528_spill] sm:$0xff]  ;;  %v18925_v26 = vld [vmem:[#allocation502_spill] sm:$0xff] }
 0x496   :  { %v3174_v15 = vpop.f32.mrf.mxu0  ;;  %v18914_v5 = vld [vmem:[#allocation512_spill] sm:$0xff]  ;;  %v3312_v8 = vmax.f32 %v3135_v54, 0.0 }
 0x497   :  { %v3175_v0 = vadd.f32 %v3174_v15, %v18903_v40  ;;  %v3327_v37 = vmax.f32 %v3173_v31, 0.0  ;;  %v3141_v47 = vadd.f32 %v3140_v7, %v18914_v5  ;;  %v18915_v31 = vld [vmem:[#allocation515_spill] sm:$0xff] }
 0x498   :  { %v3178_v11 = vpop.f32.mrf.mxu0  ;;  %v3149_v27 = vadd.f32 %v3148_v10, %v18915_v31 }
 0x499   :  { %v3328_v1 = vmax.f32 %v3175_v0, 0.0  ;;  %v3179_v38 = vadd.f32 %v3178_v11, %v18908_v13  ;;  %v3563_v22 = vpack.c.bf16 %v3327_v37, %v3325_v30  ;;  %v18917_v0 = vld [vmem:[#allocation513_spill] sm:$0xff]  ;;  %v3319_v37 = vmax.f32 %v3153_v35, 0.0 }
 0x49a   :  { %v3180_v45 = vpop.f32.mrf.mxu0  ;;  %v3143_v43 = vadd.f32 %v3142_v25, %v18917_v0  ;;  %v3561_v11 = vpack.c.bf16 %v3323_v50, %v3321_v12  ;;  %v3131_v30 = vadd.f32 %v15352_v56, %v18919_v46  ;;  %v18922_v13 = vld [vmem:[#allocation509_spill] sm:$0xff]  ;;  %v18923_v50 = vld [vmem:[#allocation532_spill] sm:$0xff] }
 0x49b   :  { %v3564_v24 = vpack.c.bf16 %v3328_v1, %v3326_v44  ;;  %v3181_v29 = vadd.f32 %v3180_v45, %v18911_v16  ;;  %v3329_v15 = vmax.f32 %v3179_v38, 0.0  ;;  %v3139_v44 = vadd.f32 %v15357_v62, %v18918_v59  ;;  %v18924_v56 = vld [vmem:[#allocation533_spill] sm:$0xff]  ;;  %v18926_v16 = vld [vmem:[#allocation504_spill] sm:$0xff] }
 0x49c   :  { %v3182_v52 = vpop.f32.mrf.mxu0  ;;  %v3317_v1 = vmax.f32 %v3149_v27, 0.0  ;;  %v3314_v45 = vmax.f32 %v3141_v47, 0.0  ;;  %v3133_v38 = vadd.f32 %v15354_v57, %v18922_v13  ;;  %v3315_v9 = vmax.f32 %v3143_v43, 0.0  ;;  %v18928_v47 = vld [vmem:[#allocation534_spill] sm:$0xff]  ;;  %v18929_v27 = vld [vmem:[#allocation505_spill] sm:$0xff]  ;;  %v18932_v59 = vld [vmem:[#allocation500_spill] sm:$0xff] }
 0x49d   :  { %v3183_v39 = vadd.f32 %v3182_v52, %v18912_v60  ;;  %3755 = vmatprep.subr.bf16.mxu1 %v3564_v24  ;;  %v3330_v63 = vmax.f32 %v3181_v29, 0.0  ;;  %v3125_v24 = vadd.f32 %v15346_v21, %v18921_v4  ;;  %v3121_v29 = vadd.f32 %v15338_v51, %v18926_v16  ;;  %v18927_v60 = vld [vmem:[#allocation507_spill] sm:$0xff] }
 0x49e   :  { %v3184_v41 = vpop.f32.mrf.mxu0  ;;  %3756 = vmatpush2.bf16.msra.mxu1 %v3563_v22  ;;  %v3559_v62 = vpack.c.bf16 %v3319_v37, %v3317_v1  ;;  %v3558_v35 = vpack.c.bf16 %v3316_v55, %v3314_v45  ;;  %v3129_v21 = vadd.f32 %v15350_v49, %v18927_v60  ;;  %v3310_v2 = vmax.f32 %v3131_v30, 0.0  ;;  %v18931_v37 = vld [vmem:[#allocation501_spill] sm:$0xff]  ;;  %v18933_v30 = vld [vmem:[#allocation499_spill] sm:$0xff] }
 0x49f   :  { %v3331_v3 = vmax.f32 %v3183_v39, 0.0  ;;  %v3185_v40 = vadd.f32 %v3184_v41, %v18916_v32  ;;  %3757 = vmatprep.subr.bf16.mxu1 %v3562_v58  ;;  %v3115_v58 = vadd.f32 %v15324_v48, %v18925_v26  ;;  %v3313_v39 = vmax.f32 %v3139_v44, 0.0  ;;  %v11822_v13 = vld [vmem:[%s17832_s6 + $0x128] ss:$20 sps:$4 sm:$0xff]   ;;  %v11784_v16 = vld [vmem:[%s17831_s5 + $0x20] ss:$16 sps:$4 sm:$0xff]  }
 0x4a0   :  { %v3188_v28 = vpop.f32.mrf.mxu0  ;;  %v3123_v12 = vadd.f32 %v15342_v33, %v18929_v27  ;;  %v3308_v41 = vmax.f32 %v3125_v24, 0.0  ;;  %v3311_v48 = vmax.f32 %v3133_v38, 0.0  ;;  %v3556_v51 = vpack.c.bf16 %v3312_v8, %v3310_v2  ;;  %v11789_v60 = vld [vmem:[%s17831_s5 + $0x44] ss:$16 sps:$4 sm:$0xff]   ;;  %v11790_v27 = vld [vmem:[%s17831_s5 + $0x60] ss:$16 sps:$4 sm:$0xff]  }
 0x4a1   :  { %v15380_v7 = vpack.c.bf16 %v3331_v3, %v3329_v15  ;;  %v3332_v10 = vmax.f32 %v3185_v40, 0.0  ;;  %v3189_v42 = vadd.f32 %v3188_v28, %v18920_v23  ;;  %v3557_v61 = vpack.c.bf16 %v3315_v9, %v3313_v39  ;;  %v18930_v40 = vld [vmem:[#allocation503_spill] sm:$0xff] }
 0x4a2   :  { %v3190_v20 = vpop.f32.mrf.mxu0  ;;  %3758 = vmatpush2.bf16.msra.mxu1 %v3561_v11  ;;  %v3119_v0 = vadd.f32 %v15330_v19, %v18930_v40  ;;  %v3309_v43 = vmax.f32 %v3129_v21, 0.0  ;;  %v3111_v33 = vadd.f32 %v15312_v53, %v18931_v37  ;;  %v3306_v11 = vmax.f32 %v3121_v29, 0.0  ;;  %v18936_v40 = vld [vmem:[#allocation557_spill] sm:$0xff] }
 0x4a3   :  { %v15386_v25 = vpack.c.bf16 %v3332_v10, %v3330_v63  ;;  %3759 = vmatprep.subr.bf16.mxu1 %v3560_v36  ;;  %v3191_v22 = vadd.f32 %v3190_v20, %v18923_v50  ;;  %v3333_v5 = vmax.f32 %v3189_v42, 0.0  ;;  %v3307_v36 = vmax.f32 %v3123_v12, 0.0 }
 0x4a4   :  { %v3192_v34 = vpop.f32.mrf.mxu0  ;;  %v3555_v63 = vpack.c.bf16 %v3311_v48, %v3309_v43  ;;  %v3105_v44 = vadd.f32 %v15303_v14, %v18932_v59  ;;  %v3304_v1 = vmax.f32 %v3115_v58, 0.0  ;;  %v3554_v19 = vpack.c.bf16 %v3308_v41, %v3306_v11  ;;  %v11821_v14 = vld [vmem:[%s17832_s6 + $0x268] ss:$20 sps:$4 sm:$0xff]   ;;  %v11795_v41 = vld [vmem:[%s17831_s5 + $0x84] ss:$16 sps:$4 sm:$0xff]  }
 0x4a5   :  { %v3193_v52 = vadd.f32 %v3192_v34, %v18924_v56  ;;  %v3334_v3 = vmax.f32 %v3191_v22, 0.0  ;;  %v3305_v20 = vmax.f32 %v3119_v0, 0.0  ;;  %v3101_v53 = vadd.f32 %v15295_v17, %v18933_v30  ;;  %v11823_v17 = vld [vmem:[%s17832_s6 + $0x240] ss:$20 sps:$4 sm:$0xff]   ;;  %11193 = vmatprep.subr.bf16.mxu0 %v11821_v14  ;;  %v18938_v11 = vld [vmem:[#allocation552_spill] sm:$0xff] }
 0x4a6   :  { %v3194_v57 = vpop.f32.mrf.mxu0  ;;  %3760 = vmatpush2.bf16.msra.mxu1 %v3559_v62  ;;  %v3302_v45 = vmax.f32 %v3111_v33, 0.0  ;;  %v3300_v4 = vmax.f32 %v3105_v44, 0.0  ;;  %11194 = vmatpush3.bf16.msra.mxu0 %v11822_v13  ;;  %v11824_v34 = vld [vmem:[%s17832_s6 + $0x100] ss:$20 sps:$4 sm:$0xff]  }
 0x4a7   :  { %v3335_v54 = vmax.f32 %v3193_v52, 0.0  ;;  %v3195_v31 = vadd.f32 %v3194_v57, %v18928_v47  ;;  %3761 = vmatprep.subr.bf16.mxu1 %v3558_v35  ;;  %v3553_v23 = vpack.c.bf16 %v3307_v36, %v3305_v20  ;;  %v3298_v9 = vmax.f32 %v3101_v53, 0.0  ;;  %11195 = vmatprep.subr.bf16.mxu0 %v11823_v17  ;;  %v11781_v22 = vld [vmem:[%s17831_s5] ss:$16 sps:$4 sm:$0xff]   ;;  %v11786_v52 = vld [vmem:[%s17831_s5 + $0x24] ss:$16 sps:$4 sm:$0xff]  }
 0x4a8   :  { %v15404_v15 = vpop.f32.mrf.mxu0  ;;  %v3552_v24 = vpack.c.bf16 %v3304_v1, %v3302_v45  ;;  %v11787_v57 = vld [vmem:[%s17831_s5 + $0x40] ss:$16 sps:$4 sm:$0xff]  }
 0x4a9   :  { %v15406_v49 = vpack.c.bf16 %v3335_v54, %v3333_v5  ;;  %v3336_v32 = vmax.f32 %v3195_v31, 0.0  ;;  %v3550_v8 = vpack.c.bf16 %v3300_v4, %v3298_v9  ;;  %v11792_v5 = vld [vmem:[%s17831_s5 + $0x64] ss:$16 sps:$4 sm:$0xff]   ;;  %v18941_v30 = vld [vmem:[#allocation550_spill] sm:$0xff] }
 0x4aa   :  { %v15410_v55 = vpop.f32.mrf.mxu0  ;;  %3762 = vmatpush2.bf16.msra.mxu1 %v3557_v61  ;;  %11196 = vmatpush3.bf16.msra.mxu0 %v11824_v34  ;;  %v18934_v61 = vld [vmem:[#allocation554_spill] sm:$0xff]  ;;  %v18937_v43 = vld [vmem:[#allocation555_spill] sm:$0xff]  ;;  %v18940_v44 = vld [vmem:[#allocation553_spill] sm:$0xff] }
 0x4ab   :  { %v15414_v28 = vpack.c.bf16 %v3336_v32, %v3334_v3  ;;  %3763 = vmatprep.subr.bf16.mxu1 %v3556_v51  ;;  %v18935_v3 = vld [vmem:[#allocation556_spill] sm:$0xff]  ;;  %v18942_v14 = vld [vmem:[#allocation551_spill] sm:$0xff] }
 0x4ac   :  { %v15416_v10 = vpop.f32.mrf.mxu0  ;;  %v11798_v34 = vld [vmem:[%s17831_s5 + $0xa4] ss:$16 sps:$4 sm:$0xff]  }
 0x4ae   :  { %v15420_v46 = vpop.f32.mrf.mxu0  ;;  %3764 = vmatpush2.bf16.msra.mxu1 %v3555_v63  ;;  %v18939_v63 = vld [vmem:[#allocation558_spill] sm:$0xff] }
 0x4af   :  { %3765 = vmatprep.subr.bf16.mxu1 %v3554_v19 }
 0x4b0   :  { %v15424_v42 = vpop.f32.mrf.mxu0 }
 0x4b2   :  { %v15432_v38 = vpop.f32.mrf.mxu0  ;;  %3766 = vmatpush2.bf16.msra.mxu1 %v3553_v23 }
 0x4b3   :  { %3767 = vmatprep.subr.bf16.mxu1 %v3552_v24  ;;  %v11793_v24 = vld [vmem:[%s17831_s5 + $0x80] ss:$16 sps:$4 sm:$0xff]  }
 0x4b4   :  { %v15437_v62 = vpop.f32.mrf.mxu0 }
 0x4b6   :  { %v15442_v35 = vpop.f32.mrf.mxu0  ;;  %3768 = vmatpush2.bf16.msra.mxu1 %v15334_v18 }
 0x4b7   :  { %3769 = vmatprep.subr.bf16.mxu1 %v3550_v8  ;;  %v18943_v8 = vld [vmem:[#allocation548_spill] sm:$0xff] }
 0x4b8   :  { %v15445_v50 = vpop.f32.mrf.mxu0 }
 0x4ba   :  { %v15450_v56 = vpop.f32.mrf.mxu0  ;;  %3770 = vmatpush2.bf16.msra.mxu1 %v15308_v6 }
 0x4bc   :  { %v15456_v26 = vpop.f32.mrf.mxu0 }
 0x4bd   :  { %3772 = vmatmul.mubr.bf16.vlgmr.msra.gmra.mxu1 %v11781_v22 }
 0x4be   :  { %v3224_v18 = vpop.f32.mrf.mxu0  ;;  %3781 = vmatprep.mubr.bf16.mxu1 %v11786_v52 }
 0x4c0   :  { %v3228_v58 = vpop.f32.mrf.mxu0 }
 0x4c2   :  { %v3230_v29 = vpop.f32.mrf.mxu0 }
 0x4c3   :  { %v3231_v22 = vadd.f32 %v3230_v29, %v18943_v8  ;;  %v18947_v29 = vld [vmem:[#allocation544_spill] sm:$0xff] }
 0x4c4   :  { %v3232_v6 = vpop.f32.mrf.mxu0 }
 0x4c5   :  { %3782 = vmatmul.mubr.bf16.gmra.mxu1 %v11784_v16 }
 0x4c6   :  { %v3234_v21 = vpop.f32.mrf.mxu0  ;;  %3791 = vmatprep.mubr.bf16.mxu1 %v11789_v60  ;;  %v18944_v60 = vld [vmem:[#allocation549_spill] sm:$0xff] }
 0x4c7   :  { %v3235_v53 = vadd.f32 %v3234_v21, %v18941_v30  ;;  %v3233_v21 = vadd.f32 %v3232_v6, %v18944_v60  ;;  %v3531_v6 = vld [vmem:[%s17831_s5 + $0xc0] sm:$0xff] }
 0x4c8   :  { %v3238_v39 = vpop.f32.mrf.mxu0  ;;  %v18957_v60 = vld [vmem:[#allocation535_spill] sm:$0xff] }
 0x4c9   :  { %v3239_v13 = vadd.f32 %v3238_v39, %v18942_v14 }
 0x4ca   :  { %v3240_v2 = vpop.f32.mrf.mxu0 }
 0x4cb   :  { %v3241_v36 = vadd.f32 %v3240_v2, %v18938_v11 }
 0x4cc   :  { %v3242_v54 = vpop.f32.mrf.mxu0 }
 0x4cd   :  { %3792 = vmatmul.mubr.bf16.gmra.mxu1 %v11787_v57  ;;  %v3243_v1 = vadd.f32 %v3242_v54, %v18940_v44  ;;  %v3354_v52 = vmax.f32 %v3241_v36, 0.0  ;;  %v18945_v54 = vld [vmem:[#allocation546_spill] sm:$0xff] }
 0x4ce   :  { %v3244_v47 = vpop.f32.mrf.mxu0  ;;  %3801 = vmatprep.mubr.bf16.mxu1 %v11792_v5 }
 0x4cf   :  { %v3245_v51 = vadd.f32 %v3244_v47, %v18934_v61  ;;  %v3355_v57 = vmax.f32 %v3243_v1, 0.0  ;;  %v3225_v47 = vadd.f32 %v3224_v18, %v18945_v54  ;;  %v3221_v61 = vadd.f32 %v15450_v56, %v18947_v29  ;;  %v18948_v18 = vld [vmem:[#allocation545_spill] sm:$0xff] }
 0x4d0   :  { %v3248_v31 = vpop.f32.mrf.mxu0  ;;  %v11796_v56 = vld [vmem:[%s17831_s5 + $0xa0] ss:$16 sps:$4 sm:$0xff]  }
 0x4d1   :  { %v3249_v37 = vadd.f32 %v3248_v31, %v18937_v43  ;;  %v3356_v45 = vmax.f32 %v3245_v51, 0.0  ;;  %v3352_v31 = vmax.f32 %v3235_v53, 0.0  ;;  %v3350_v51 = vmax.f32 %v3231_v22, 0.0  ;;  %v18952_v1 = vld [vmem:[#allocation541_spill] sm:$0xff]  ;;  %v18953_v53 = vld [vmem:[#allocation538_spill] sm:$0xff] }
 0x4d2   :  { %v3250_v12 = vpop.f32.mrf.mxu0  ;;  %v3348_v43 = vmax.f32 %v3225_v47, 0.0  ;;  %v3346_v44 = vmax.f32 %v3221_v61, 0.0  ;;  %v11830_v61 = vld [vmem:[%s17832_s6 + $0xf4] ss:$20 sps:$4 sm:$0xff]  }
 0x4d3   :  { %v3251_v32 = vadd.f32 %v3250_v12, %v18935_v3  ;;  %v3357_v17 = vmax.f32 %v3249_v37, 0.0  ;;  %v3578_v39 = vpack.c.bf16 %v3356_v45, %v3354_v52  ;;  %v3223_v3 = vadd.f32 %v15456_v26, %v18948_v18  ;;  %v11831_v18 = vld [vmem:[%s17832_s6 + $0x218] ss:$20 sps:$4 sm:$0xff]  }
 0x4d4   :  { %v3252_v48 = vpop.f32.mrf.mxu0  ;;  %v3576_v37 = vpack.c.bf16 %v3352_v31, %v3350_v51  ;;  %v3205_v45 = vadd.f32 %v15420_v46, %v18953_v53  ;;  %v11806_v51 = vld [vmem:[%s17831_s5 + $0x28] ss:$16 sps:$4 sm:$0xff]   ;;  %11197 = vmatprep.subr.bf16.mxu0 %v11831_v18 }
 0x4d5   :  { %v3253_v0 = vadd.f32 %v3252_v48, %v18936_v40  ;;  %3802 = vmatmul.mubr.bf16.gmra.mxu1 %v11790_v27  ;;  %v3358_v23 = vmax.f32 %v3251_v32, 0.0  ;;  %v18946_v27 = vld [vmem:[#allocation547_spill] sm:$0xff]  ;;  %v3351_v32 = vmax.f32 %v3233_v21, 0.0  ;;  %v3199_v21 = vadd.f32 %v15404_v15, %v18957_v60  ;;  %v11851_v53 = vld [vmem:[%s17832_s6 + $0x258] ss:$20 sps:$4 sm:$0xff]  }
 0x4d6   :  { %v3254_v33 = vpop.f32.mrf.mxu0  ;;  %3811 = vmatprep.mubr.bf16.mxu1 %v11795_v41  ;;  %v3229_v12 = vadd.f32 %v3228_v58, %v18946_v27  ;;  %v3353_v41 = vmax.f32 %v3239_v13, 0.0  ;;  %v3340_v46 = vmax.f32 %v3205_v45, 0.0  ;;  %v18958_v15 = vld [vmem:[#allocation559_spill] sm:$0xff]  ;;  %v11853_v45 = vld [vmem:[%s17832_s6 + $0x25c] ss:$20 sps:$4 sm:$0xff]  }
 0x4d7   :  { %v3255_v59 = vadd.f32 %v3254_v33, %v18939_v63  ;;  %v3359_v19 = vmax.f32 %v3253_v0, 0.0  ;;  %v18949_v0 = vld [vmem:[#allocation542_spill] sm:$0xff]  ;;  %v18950_v33 = vld [vmem:[#allocation543_spill] sm:$0xff]  ;;  %v10417_v63 = vcombine.high %v3531_v6, %v3531_v6  ;;  %v3337_v54 = vmax.f32 %v3199_v21, 0.0 }
 0x4d8   :  { %v15483_v20 = vpop.f32.mrf.mxu0  ;;  %v3577_v40 = vpack.c.bf16 %v3355_v57, %v3353_v41  ;;  %v3215_v58 = vadd.f32 %v15442_v35, %v18949_v0  ;;  %v3219_v11 = vadd.f32 %v15445_v50, %v18950_v33  ;;  %v3349_v36 = vmax.f32 %v3229_v12, 0.0  ;;  %v18954_v50 = vld [vmem:[#allocation539_spill] sm:$0xff]  ;;  %v11803_v57 = vld [vmem:[%s17831_s5 + $0xc] ss:$16 sps:$4 sm:$0xff]  }
 0x4d9   :  { %v3360_v4 = vmax.f32 %v3255_v59, 0.0  ;;  %v3579_v2 = vpack.c.bf16 %v3359_v19, %v3357_v17  ;;  %v18951_v59 = vld [vmem:[#allocation540_spill] sm:$0xff]  ;;  %v3213_v35 = vadd.f32 %v15437_v62, %v18952_v1  ;;  %v3347_v19 = vmax.f32 %v3223_v3, 0.0  ;;  %v18956_v62 = vld [vmem:[#allocation537_spill] sm:$0xff] }
 0x4da   :  { %v15490_v9 = vpop.f32.mrf.mxu0  ;;  %v3211_v26 = vadd.f32 %v15432_v38, %v18951_v59  ;;  %v3575_v30 = vpack.c.bf16 %v3351_v32, %v3349_v36  ;;  %v3345_v14 = vmax.f32 %v3219_v11, 0.0  ;;  %v18955_v38 = vld [vmem:[#allocation536_spill] sm:$0xff]  ;;  %v3259_v31 = vadd.f32 %v15483_v20, %v18958_v15  ;;  %v11836_v0 = vld [vmem:[%s17832_s6 + $0xa0] ss:$20 sps:$4 sm:$0xff]  }
 0x4db   :  { %v3580_v16 = vpack.c.bf16 %v3360_v4, %v3358_v23  ;;  %v3344_v23 = vmax.f32 %v3215_v58, 0.0  ;;  %v3574_v4 = vpack.c.bf16 %v3348_v43, %v3346_v44  ;;  %v3201_v13 = vadd.f32 %v15410_v55, %v18955_v38  ;;  %v11832_v3 = vld [vmem:[%s17832_s6 + $0xc8] ss:$20 sps:$4 sm:$0xff]   ;;  %v11834_v32 = vld [vmem:[%s17832_s6 + $0xcc] ss:$20 sps:$4 sm:$0xff]  }
 0x4dc   :  { %v3262_v5 = vpop.f32.mrf.mxu0  ;;  %v3342_v17 = vmax.f32 %v3211_v26, 0.0  ;;  %v3343_v8 = vmax.f32 %v3213_v35, 0.0  ;;  %v3573_v22 = vpack.c.bf16 %v3347_v19, %v3345_v14  ;;  %v3361_v12 = vmax.f32 %v3259_v31, 0.0  ;;  %v11838_v58 = vld [vmem:[%s17832_s6 + $0xa4] ss:$20 sps:$4 sm:$0xff]  }
 0x4dd   :  { %3840 = vmatprep.subr.bf16.mxu1 %v3580_v16  ;;  %3812 = vmatmul.mubr.bf16.gmra.mxu1 %v11793_v24  ;;  %v3209_v24 = vadd.f32 %v15424_v42, %v18954_v50  ;;  %v10416_v16 = vcombine.low %v3531_v6, %v3531_v6  ;;  %v3338_v55 = vmax.f32 %v3201_v13, 0.0  ;;  %v11807_v6 = vld [vmem:[%s17831_s5 + $0x4c] ss:$16 sps:$4 sm:$0xff]   ;;  %v11809_v43 = vld [vmem:[%s17831_s5 + $0x48] ss:$16 sps:$4 sm:$0xff]  }
 0x4de   :  { %v3263_v48 = vpop.f32.mrf.mxu0  ;;  %3841 = vmatpush1.bf16.msra.mxu1 %v3579_v2  ;;  %3821 = vmatprep.mubr.bf16.mxu1 %v11798_v34  ;;  %v3203_v34 = vadd.f32 %v15416_v10, %v18956_v62  ;;  %v3572_v52 = vpack.c.bf16 %v3344_v23, %v3342_v17  ;;  %v11841_v33 = vld [vmem:[%s17832_s6 + $0x7c] ss:$20 sps:$4 sm:$0xff]   ;;  %v11844_v36 = vld [vmem:[%s17832_s6 + $0x54] ss:$20 sps:$4 sm:$0xff]   ;;  %v11847_v44 = vld [vmem:[%s17832_s6 + $0x2c] ss:$20 sps:$4 sm:$0xff]  }
 0x4df   :  { %3842 = vmatprep.subr.bf16.mxu1 %v3578_v39  ;;  %v3341_v42 = vmax.f32 %v3209_v24, 0.0  ;;  %v3570_v10 = vpack.c.bf16 %v3340_v46, %v3338_v55  ;;  %v18959_v39 = vld [vmem:[#allocation560_spill] sm:$0xff]  ;;  %v3581_v48 = vpack.c.bf16 %v3361_v12, %v3361_v12  ;;  %v11848_v1 = vld [vmem:[%s17832_s6] ss:$20 sps:$4 sm:$0xff]   ;;  %v11850_v35 = vld [vmem:[%s17832_s6 + $0x4] ss:$20 sps:$4 sm:$0xff]  }
 0x4e0   :  { %v3339_v2 = vmax.f32 %v3203_v34, 0.0  ;;  %v3261_v27 = vadd.f32 %v15490_v9, %v18959_v39  ;;  %v11801_v9 = vld [vmem:[%s17831_s5 + $0x8] ss:$16 sps:$4 sm:$0xff]   ;;  %v11842_v11 = vld [vmem:[%s17832_s6 + $0x50] ss:$20 sps:$4 sm:$0xff]  }
 0x4e1   :  { %v3571_v5 = vpack.c.bf16 %v3343_v8, %v3341_v42  ;;  %v3734_v20 = vsel %vm3732_vm4, %v3581_v48, 0  ;;  %v11813_v59 = vld [vmem:[%s17831_s5 + $0x8c] ss:$16 sps:$4 sm:$0xff]   ;;  %v11815_v19 = vld [vmem:[%s17831_s5 + $0x88] ss:$16 sps:$4 sm:$0xff]  }
 0x4e2   :  { %3843 = vmatpush1.bf16.msra.mxu1 %v3577_v40  ;;  %v3569_v47 = vpack.c.bf16 %v3339_v2, %v3337_v54  ;;  %v3362_v41 = vmax.f32 %v3261_v27, 0.0  ;;  %v11835_v40 = vld [vmem:[%s17832_s6 + $0xd8] ss:$20 sps:$4 sm:$0xff]   ;;  %v11845_v26 = vld [vmem:[%s17832_s6 + $0x28] ss:$20 sps:$4 sm:$0xff]  }
 0x4e3   :  { %3844 = vmatprep.subr.bf16.mxu1 %v3576_v37  ;;  %11198 = vmatpush3.bf16.msra.mxu0 %v11835_v40  ;;  %v11810_v37 = vld [vmem:[%s17831_s5 + $0x6c] ss:$16 sps:$4 sm:$0xff]   ;;  %v11854_v23 = vld [vmem:[%s17832_s6 + $0x1f0] ss:$20 sps:$4 sm:$0xff]   ;;  %v11858_v14 = vld [vmem:[%s17832_s6 + $0x234] ss:$20 sps:$4 sm:$0xff]  }
 0x4e4   :  { %v3582_v29 = vpack.c.bf16 %v3362_v41, %v3362_v41  ;;  %11199 = vmatprep.subr.bf16.mxu0 %v11854_v23  ;;  %v3532_v50 = vld [vmem:[%s17831_s5 + $0xc8] sm:$0xff]  ;;  %v11856_v24 = vld [vmem:[%s17832_s6 + $0x230] ss:$20 sps:$4 sm:$0xff]   ;;  %v11862_v34 = vld [vmem:[%s17832_s6 + $0x1e0] ss:$20 sps:$4 sm:$0xff]  }
 0x4e5   :  { %3822 = vmatmul.mubr.bf16.gmra.mxu1 %v11796_v56  ;;  %v11839_v56 = vld [vmem:[%s17832_s6 + $0x78] ss:$20 sps:$4 sm:$0xff]   ;;  %v10419_v13 = vcombine.high %v3532_v50, %v3532_v50  ;;  %v11859_v17 = vld [vmem:[%s17832_s6 + $0x208] ss:$20 sps:$4 sm:$0xff]   ;;  %v11870_v21 = vld [vmem:[%s17832_s6 + $0x190] ss:$20 sps:$4 sm:$0xff]  }
 0x4e6   :  { %3845 = vmatpush1.bf16.msra.mxu1 %v3575_v30  ;;  %3831 = vmatprep.mubr.bf16.mxu1 %v10417_v63  ;;  %v11812_v63 = vld [vmem:[%s17831_s5 + $0x68] ss:$16 sps:$4 sm:$0xff]   ;;  %v11816_v30 = vld [vmem:[%s17831_s5 + $0xac] ss:$16 sps:$4 sm:$0xff]   ;;  %v11874_v55 = vld [vmem:[%s17832_s6 + $0x60] ss:$20 sps:$4 sm:$0xff]  }
 0x4e7   :  { %3846 = vmatprep.subr.bf16.mxu1 %v3574_v4  ;;  %v11855_v4 = vld [vmem:[%s17832_s6 + $0xb0] ss:$20 sps:$4 sm:$0xff]   ;;  %v11818_v38 = vld [vmem:[%s17831_s5 + $0xa8] ss:$16 sps:$4 sm:$0xff]   ;;  %v11861_v62 = vld [vmem:[%s17832_s6 + $0x20c] ss:$20 sps:$4 sm:$0xff]  }
 0x4e8   :  { %11200 = vmatpush3.bf16.msra.mxu0 %v11855_v4  ;;  %v11864_v8 = vld [vmem:[%s17832_s6 + $0x1e4] ss:$20 sps:$4 sm:$0xff]   ;;  %v11869_v60 = vld [vmem:[%s17832_s6 + $0x88] ss:$20 sps:$4 sm:$0xff]   ;;  %v11877_v2 = vld [vmem:[%s17832_s6 + $0x16c] ss:$20 sps:$4 sm:$0xff]  }
 0x4e9   :  { %v11865_v46 = vld [vmem:[%s17832_s6 + $0x1b8] ss:$20 sps:$4 sm:$0xff]   ;;  %v11872_v42 = vld [vmem:[%s17832_s6 + $0x194] ss:$20 sps:$4 sm:$0xff]   ;;  %v11883_v31 = vld [vmem:[%s17832_s6 + $0x150] ss:$20 sps:$4 sm:$0xff]  }
 0x4ea   :  { %3847 = vmatpush1.bf16.msra.mxu1 %v3573_v22  ;;  %v10418_v22 = vcombine.low %v3532_v50, %v3532_v50  ;;  %v11879_v54 = vld [vmem:[%s17832_s6 + $0x38] ss:$20 sps:$4 sm:$0xff]   ;;  %v11880_v15 = vld [vmem:[%s17832_s6 + $0x140] ss:$20 sps:$4 sm:$0xff]   ;;  %v11884_v39 = vld [vmem:[%s17832_s6 + $0x10] ss:$20 sps:$4 sm:$0xff]  }
 0x4eb   :  { %3848 = vmatprep.subr.bf16.mxu1 %v3572_v52  ;;  %v11867_v52 = vld [vmem:[%s17832_s6 + $0x1bc] ss:$20 sps:$4 sm:$0xff]   ;;  %v11887_v27 = vld [vmem:[%s17832_s6 + $0x124] ss:$20 sps:$4 sm:$0xff]  }
 0x4ed   :  { %3832 = vmatmul.mubr.bf16.gmra.mxu1 %v10416_v16  ;;  %v11868_v16 = vld [vmem:[%s17832_s6 + $0x1c8] ss:$20 sps:$4 sm:$0xff]  }
 0x4ee   :  { %3849 = vmatpush1.bf16.msra.mxu1 %v3571_v5  ;;  %10421 = vmatprep.mubr.msk.bf16.mxu1 %vm3710_vm3, %v11803_v57  ;;  %v11873_v57 = vld [vmem:[%s17832_s6 + $0x1a0] ss:$20 sps:$4 sm:$0xff]   ;;  %v11875_v5 = vld [vmem:[%s17832_s6 + $0x168] ss:$20 sps:$4 sm:$0xff]  }
 0x4ef   :  { %3850 = vmatprep.subr.bf16.mxu1 %v3570_v10  ;;  %11201 = vmatprep.subr.bf16.mxu0 %v11868_v16  ;;  %v11878_v10 = vld [vmem:[%s17832_s6 + $0x178] ss:$20 sps:$4 sm:$0xff]  }
 0x4f0   :  { %11202 = vmatpush3.bf16.msra.mxu0 %v11869_v60 }
 0x4f1   :  { %11203 = vmatprep.subr.bf16.mxu0 %v11873_v57 }
 0x4f2   :  { %3851 = vmatpush1.bf16.msra.mxu1 %v3569_v47  ;;  %v11882_v47 = vld [vmem:[%s17832_s6 + $0x144] ss:$20 sps:$4 sm:$0xff]  }
 0x4f3   :  { %3852 = vmatprep.subr.bf16.mxu1 %v15414_v28  ;;  %v11828_v28 = vld [vmem:[%s17832_s6 + $0xf0] ss:$20 sps:$4 sm:$0xff]  }
 0x4f4   :  { %11204 = vmatpush3.bf16.msra.mxu0 %v11874_v55 }
 0x4f5   :  { %11205 = vmatprep.subr.bf16.mxu0 %v11878_v10  ;;  %v11894_v10 = vld [vmem:[%s17832_s6 + $0xa8] ss:$20 sps:$4 sm:$0xff]  }
 0x4f6   :  { %3853 = vmatpush1.bf16.msra.mxu1 %v15406_v49  ;;  %v11804_v49 = vld [vmem:[%s17831_s5 + $0x2c] ss:$16 sps:$4 sm:$0xff]  }
 0x4f7   :  { %3854 = vmatprep.subr.bf16.mxu1 %v15386_v25  ;;  %v11825_v25 = vld [vmem:[%s17832_s6 + $0x118] ss:$20 sps:$4 sm:$0xff]  }
 0x4f8   :  { %11206 = vmatpush3.bf16.msra.mxu0 %v11879_v54 }
 0x4f9   :  { %11207 = vmatprep.subr.bf16.mxu0 %v11883_v31 }
 0x4fa   :  { %3855 = vmatpush1.bf16.msra.mxu1 %v15380_v7  ;;  %v11827_v7 = vld [vmem:[%s17832_s6 + $0x11c] ss:$20 sps:$4 sm:$0xff]  }
 0x4fb   :  { %10420 = vmatprep.subr.msk.bf16.mxu1 %vm3732_vm4, %v3582_v29 }
 0x4fc   :  { %11208 = vmatpush3.bf16.msra.mxu0 %v11884_v39 }
 0x4fe   :  { %3871 = vmatpush2.bf16.msra.mxu1 %v3734_v20 }
 0x4ff   :  { %4371 = vmatprep.subr.bf16.mxu1 %v11827_v7 }
 0x501   :  { %3873 = vmatmul.mubr.bf16.vlgmr.msra.gmra.mxu1 %v11801_v9 }
 0x502   :  { %10422 = vmatprep.mubr.msk.bf16.mxu1 %vm3710_vm3, %v11804_v49  ;;  %4372 = vmatpush1.bf16.msra.mxu1 %v11825_v25 }
 0x503   :  { %4373 = vmatprep.subr.bf16.mxu1 %v11830_v61 }
 0x506   :  { %4374 = vmatpush1.bf16.msra.mxu1 %v11828_v28 }
 0x507   :  { %4375 = vmatprep.subr.bf16.mxu1 %v11834_v32 }
 0x509   :  { %3883 = vmatmul.mubr.bf16.gmra.mxu1 %v11806_v51 }
 0x50a   :  { %10423 = vmatprep.mubr.msk.bf16.mxu1 %vm3710_vm3, %v11807_v6  ;;  %4376 = vmatpush1.bf16.msra.mxu1 %v11832_v3 }
 0x50b   :  { %4377 = vmatprep.subr.bf16.mxu1 %v11838_v58 }
 0x50e   :  { %4378 = vmatpush1.bf16.msra.mxu1 %v11836_v0 }
 0x50f   :  { %4379 = vmatprep.subr.bf16.mxu1 %v11841_v33 }
 0x511   :  { %3893 = vmatmul.mubr.bf16.gmra.mxu1 %v11809_v43 }
 0x512   :  { %10424 = vmatprep.mubr.msk.bf16.mxu1 %vm3710_vm3, %v11810_v37  ;;  %4380 = vmatpush1.bf16.msra.mxu1 %v11839_v56 }
 0x513   :  { %4381 = vmatprep.subr.bf16.mxu1 %v11844_v36 }
 0x516   :  { %4382 = vmatpush1.bf16.msra.mxu1 %v11842_v11 }
 0x517   :  { %4383 = vmatprep.subr.bf16.mxu1 %v11847_v44 }
 0x519   :  { %3903 = vmatmul.mubr.bf16.gmra.mxu1 %v11812_v63 }
 0x51a   :  { %10425 = vmatprep.mubr.msk.bf16.mxu1 %vm3710_vm3, %v11813_v59  ;;  %4384 = vmatpush1.bf16.msra.mxu1 %v11845_v26 }
 0x51b   :  { %4385 = vmatprep.subr.bf16.mxu1 %v11850_v35 }
 0x51e   :  { %4386 = vmatpush1.bf16.msra.mxu1 %v11848_v1 }
 0x51f   :  { %4387 = vmatprep.subr.bf16.mxu1 %v11853_v45 }
 0x521   :  { %3913 = vmatmul.mubr.bf16.gmra.mxu1 %v11815_v19 }
 0x522   :  { %10426 = vmatprep.mubr.msk.bf16.mxu1 %vm3710_vm3, %v11816_v30  ;;  %4388 = vmatpush2.bf16.msra.mxu1 %v11851_v53 }
 0x523   :  { %4389 = vmatprep.subr.bf16.mxu1 %v11858_v14 }
 0x526   :  { %4390 = vmatpush2.bf16.msra.mxu1 %v11856_v24  ;;  %v11885_v24 = vld [vmem:[%s17832_s6 + $0x120] ss:$20 sps:$4 sm:$0xff]  }
 0x527   :  { %4391 = vmatprep.subr.bf16.mxu1 %v11861_v62  ;;  %v11888_v62 = vld [vmem:[%s17832_s6 + $0xf8] ss:$20 sps:$4 sm:$0xff]  }
 0x529   :  { %3923 = vmatmul.mubr.bf16.gmra.mxu1 %v11818_v38 }
 0x52a   :  { %10427 = vmatprep.mubr.msk.bf16.mxu1 %vm3710_vm3, %v10419_v13  ;;  %4392 = vmatpush2.bf16.msra.mxu1 %v11859_v17  ;;  %v11890_v13 = vld [vmem:[%s17832_s6 + $0xfc] ss:$20 sps:$4 sm:$0xff]  }
 0x52b   :  { %4393 = vmatprep.subr.bf16.mxu1 %v11864_v8 }
 0x52e   :  { %4394 = vmatpush2.bf16.msra.mxu1 %v11862_v34 }
 0x52f   :  { %4395 = vmatprep.subr.bf16.mxu1 %v11867_v52 }
 0x531   :  { %3933 = vmatmul.mubr.bf16.gmra.mxu1 %v10418_v22  ;;  %v11893_v22 = vld [vmem:[%s17832_s6 + $0xd4] ss:$20 sps:$4 sm:$0xff]  }
 0x532   :  { %4396 = vmatpush2.bf16.msra.mxu1 %v11865_v46 }
 0x533   :  { %4397 = vmatprep.subr.bf16.mxu1 %v11872_v42  ;;  %v11891_v42 = vld [vmem:[%s17832_s6 + $0xd0] ss:$20 sps:$4 sm:$0xff]  }
 0x536   :  { %4398 = vmatpush2.bf16.msra.mxu1 %v11870_v21 }
 0x537   :  { %4399 = vmatprep.subr.bf16.mxu1 %v11877_v2  ;;  %v11896_v2 = vld [vmem:[%s17832_s6 + $0xac] ss:$20 sps:$4 sm:$0xff]  }
 0x53a   :  { %4400 = vmatpush2.bf16.msra.mxu1 %v11875_v5 }
 0x53b   :  { %4401 = vmatprep.subr.bf16.mxu1 %v11882_v47 }
 0x53e   :  { %4402 = vmatpush2.bf16.msra.mxu1 %v11880_v15  ;;  %v11899_v15 = vld [vmem:[%s17832_s6 + $0x84] ss:$20 sps:$4 sm:$0xff]  }
 0x53f   :  { %4472 = vmatprep.subr.bf16.mxu1 %v11887_v27 }
 0x57d   :  { %v3773_v12 = vpop.f32.mrf.mxu1 }
 0x57f   :  { %v3775_v41 = vpop.f32.mrf.mxu1 }
 0x581   :  { %v3777_v48 = vpop.f32.mrf.mxu1 }
 0x583   :  { %v3779_v29 = vpop.f32.mrf.mxu1 }
 0x585   :  { %v3783_v20 = vpop.f32.mrf.mxu1 }
 0x587   :  { %v3785_v9 = vpop.f32.mrf.mxu1 }
 0x589   :  { %v3787_v49 = vpop.f32.mrf.mxu1 }
 0x58b   :  { %v3789_v25 = vpop.f32.mrf.mxu1 }
 0x58d   :  { %v15718_v7 = vpop.f32.mrf.mxu1 }
 0x58f   :  { %v15720_v28 = vpop.f32.mrf.mxu1 }
 0x591   :  { %v3797_v61 = vpop.f32.mrf.mxu1 }
 0x593   :  { %v15722_v51 = vpop.f32.mrf.mxu1 }
 0x595   :  { %v15724_v6 = vpop.f32.mrf.mxu1 }
 0x597   :  { %v15726_v18 = vpop.f32.mrf.mxu1 }
 0x599   :  { %v15728_v3 = vpop.f32.mrf.mxu1 }
 0x59b   :  { %v15730_v32 = vpop.f32.mrf.mxu1 }
 0x59d   :  { %v15732_v40 = vpop.f32.mrf.mxu1 }
 0x59f   :  { %v15734_v0 = vpop.f32.mrf.mxu1 }
 0x5a1   :  { %v15736_v58 = vpop.f32.mrf.mxu1 }
 0x5a3   :  { %v15738_v43 = vpop.f32.mrf.mxu1 }
 0x5a5   :  { %v15740_v37 = vpop.f32.mrf.mxu1 }
 0x5a7   :  { %v15742_v56 = vpop.f32.mrf.mxu1 }
 0x5a9   :  { %v15744_v33 = vpop.f32.mrf.mxu1 }
 0x5ab   :  { %v15746_v11 = vpop.f32.mrf.mxu1 }
 0x5ad   :  { %v15748_v36 = vpop.f32.mrf.mxu1 }
 0x5af   :  { %v15750_v63 = vpop.f32.mrf.mxu1 }
 0x5b1   :  { %v3837_v59 = vpop.f32.mrf.mxu1 }
 0x5b3   :  { %v3838_v26 = vpop.f32.mrf.mxu1 }
 0x5c1   :  { %v3874_v44 = vpop.f32.mrf.mxu1 }
 0x5c2   :  { %v3875_v23 = vadd.f32 %v3874_v44, %v3773_v12 }
 0x5c3   :  { %v3876_v1 = vpop.f32.mrf.mxu1 }
 0x5c4   :  { %v3877_v53 = vadd.f32 %v3876_v1, %v3775_v41 }
 0x5c5   :  { %v3878_v35 = vpop.f32.mrf.mxu1 }
 0x5c6   :  { %v3879_v19 = vadd.f32 %v3878_v35, %v3777_v48  ;;  %v11897_v48 = vld [vmem:[%s17832_s6 + $0x80] ss:$20 sps:$4 sm:$0xff]  }
 0x5c7   :  { %v3880_v30 = vpop.f32.mrf.mxu1 }
 0x5c8   :  { %v3881_v45 = vadd.f32 %v3880_v30, %v3779_v29  ;;  %v15757_v14 = vpack.c.bf16 %v3879_v19, %v3875_v23 }
 0x5c9   :  { %v3884_v4 = vpop.f32.mrf.mxu1 }
 0x5ca   :  { %v15752_v50 = vpack.c.bf16 %v3881_v45, %v3877_v53  ;;  %v3885_v16 = vadd.f32 %v3884_v4, %v3783_v20  ;;  %v11911_v45 = vld [vmem:[%s17832_s6 + $0x264] ss:$20 sps:$4 sm:$0xff]  }
 0x5cb   :  { %v3886_v38 = vpop.f32.mrf.mxu1 }
 0x5cc   :  { %4403 = vmatprep.mubr.bf16.mxu1 %v15752_v50  ;;  %4605 = vmatprep.mubr.bf16.mxu0 %v15752_v50  ;;  %v3887_v46 = vadd.f32 %v3886_v38, %v3785_v9  ;;  %v11902_v9 = vld [vmem:[%s17832_s6 + $0x5c] ss:$20 sps:$4 sm:$0xff]  }
 0x5cd   :  { %v3888_v17 = vpop.f32.mrf.mxu1  ;;  %4404 = vmatmul.mubr.bf16.vlgmr.msra.gmra.mxu1 %v15757_v14  ;;  %4606 = vmatmul.mubr.bf16.vlgmr.msra.gmra.mxu0 %v15757_v14 }
 0x5ce   :  { %4473 = vmatpush1.bf16.msra.mxu1 %v11885_v24  ;;  %v3889_v34 = vadd.f32 %v3888_v17, %v3787_v49 }
 0x5cf   :  { %v3890_v8 = vpop.f32.mrf.mxu1  ;;  %4474 = vmatprep.subr.bf16.mxu1 %v11890_v13 }
 0x5d0   :  { %v3891_v52 = vadd.f32 %v3890_v8, %v3789_v25  ;;  %v15777_v57 = vpack.c.bf16 %v3889_v34, %v3885_v16  ;;  %v11900_v25 = vld [vmem:[%s17832_s6 + $0x58] ss:$20 sps:$4 sm:$0xff]  }
 0x5d1   :  { %v3894_v60 = vpop.f32.mrf.mxu1 }
 0x5d2   :  { %v15772_v21 = vpack.c.bf16 %v3891_v52, %v3887_v46  ;;  %4475 = vmatpush1.bf16.msra.mxu1 %v11888_v62  ;;  %v3895_v27 = vadd.f32 %v3894_v60, %v15718_v7 }
 0x5d3   :  { %v3896_v55 = vpop.f32.mrf.mxu1  ;;  %4476 = vmatprep.subr.bf16.mxu1 %v11893_v22  ;;  %v11917_v22 = vld [vmem:[%s17832_s6 + $0x214] ss:$20 sps:$4 sm:$0xff]  }
 0x5d4   :  { %4413 = vmatprep.mubr.bf16.mxu1 %v15772_v21  ;;  %4613 = vmatprep.mubr.bf16.mxu0 %v15772_v21  ;;  %v3897_v31 = vadd.f32 %v3896_v55, %v15720_v28 }
 0x5d5   :  { %v3898_v5 = vpop.f32.mrf.mxu1  ;;  %4414 = vmatmul.mubr.bf16.gmra.mxu1 %v15777_v57  ;;  %4614 = vmatmul.mubr.bf16.gmra.mxu0 %v15777_v57 }
 0x5d6   :  { %4477 = vmatpush1.bf16.msra.mxu1 %v11891_v42  ;;  %v3899_v54 = vadd.f32 %v3898_v5, %v3797_v61  ;;  %v11905_v61 = vld [vmem:[%s17832_s6 + $0x34] ss:$20 sps:$4 sm:$0xff]  }
 0x5d7   :  { %v3900_v47 = vpop.f32.mrf.mxu1  ;;  %4478 = vmatprep.subr.bf16.mxu1 %v11896_v2 }
 0x5d8   :  { %v3901_v39 = vadd.f32 %v3900_v47, %v15722_v51  ;;  %v15800_v29 = vpack.c.bf16 %v3899_v54, %v3895_v27  ;;  %v11923_v47 = vld [vmem:[%s17832_s6 + $0x1c4] ss:$20 sps:$4 sm:$0xff]   ;;  %v11929_v27 = vld [vmem:[%s17832_s6 + $0x174] ss:$20 sps:$4 sm:$0xff]  }
 0x5d9   :  { %v3904_v12 = vpop.f32.mrf.mxu1 }
 0x5da   :  { %v15795_v41 = vpack.c.bf16 %v3901_v39, %v3897_v31  ;;  %4479 = vmatpush1.bf16.msra.mxu1 %v11894_v10  ;;  %v3905_v26 = vadd.f32 %v3904_v12, %v15724_v6  ;;  %v11918_v10 = vld [vmem:[%s17832_s6 + $0x1e8] ss:$20 sps:$4 sm:$0xff]   ;;  %v11924_v39 = vld [vmem:[%s17832_s6 + $0x198] ss:$20 sps:$4 sm:$0xff]   ;;  %v18960_v12 = vmov 0  }
 0x5db   :  { %v3906_v20 = vpop.f32.mrf.mxu1  ;;  %4480 = vmatprep.subr.bf16.mxu1 %v11899_v15  ;;  %v11921_v15 = vld [vmem:[%s17832_s6 + $0x1c0] ss:$20 sps:$4 sm:$0xff]  }
 0x5dc   :  { %4423 = vmatprep.mubr.bf16.mxu1 %v15795_v41  ;;  %4621 = vmatprep.mubr.bf16.mxu0 %v15795_v41  ;;  %v3907_v51 = vadd.f32 %v3906_v20, %v15726_v18  ;;  %v11908_v18 = vld [vmem:[%s17832_s6 + $0xc] ss:$20 sps:$4 sm:$0xff]   ;;  %v11930_v20 = vld [vmem:[%s17832_s6 + $0x148] ss:$20 sps:$4 sm:$0xff]  }
 0x5dd   :  { %v3908_v49 = vpop.f32.mrf.mxu1  ;;  %4424 = vmatmul.mubr.bf16.gmra.mxu1 %v15800_v29  ;;  %4622 = vmatmul.mubr.bf16.gmra.mxu0 %v15800_v29 }
 0x5de   :  { %4481 = vmatpush1.bf16.msra.mxu1 %v11897_v48  ;;  %v3909_v7 = vadd.f32 %v3908_v49, %v15728_v3  ;;  %v11903_v3 = vld [vmem:[%s17832_s6 + $0x30] ss:$20 sps:$4 sm:$0xff]   ;;  %v18961_v49 = vmov 0.0  }
 0x5df   :  { %v3910_v28 = vpop.f32.mrf.mxu1  ;;  %4482 = vmatprep.subr.bf16.mxu1 %v11902_v9  ;;  %v11927_v48 = vld [vmem:[%s17832_s6 + $0x170] ss:$20 sps:$4 sm:$0xff]   ;;  %v11933_v9 = vld [vmem:[%s17833_s7 + $0x38] sm:$0xff]  }
 0x5e0   :  { %v3911_v59 = vadd.f32 %v3910_v28, %v15730_v32  ;;  %v15824_v35 = vpack.c.bf16 %v3909_v7, %v3905_v26  ;;  %v11906_v32 = vld [vmem:[%s17832_s6 + $0x8] ss:$20 sps:$4 sm:$0xff]   ;;  %v11941_v28 = vld [vmem:[%s17834_s8 + $0xe0] ss:$16 sps:$4 sm:$0xff]  }
 0x5e1   :  { %v3914_v44 = vpop.f32.mrf.mxu1  ;;  %v11935_v7 = vld [vmem:[%s17833_s7 + $0x28] sm:$0xff]   ;;  %v11947_v26 = vld [vmem:[%s17834_s8 + $0xc0] ss:$16 sps:$4 sm:$0xff]  }
 0x5e2   :  { %v15819_v1 = vpack.c.bf16 %v3911_v59, %v3907_v51  ;;  %4483 = vmatpush1.bf16.msra.mxu1 %v11900_v25  ;;  %v3915_v24 = vadd.f32 %v3914_v44, %v15732_v40  ;;  %v11934_v25 = vld [vmem:[%s17833_s7 + $0x30] sm:$0xff]   ;;  %v11946_v51 = vld [vmem:[%s17834_s8 + $0xec] ss:$16 sps:$4 sm:$0xff]  }
 0x5e3   :  { %v3916_v19 = vpop.f32.mrf.mxu1  ;;  %4484 = vmatprep.subr.bf16.mxu1 %v11905_v61  ;;  %v11943_v61 = vld [vmem:[%s17834_s8 + $0xe4] ss:$16 sps:$4 sm:$0xff]  }
 0x5e4   :  { %4433 = vmatprep.mubr.bf16.mxu1 %v15819_v1  ;;  %4629 = vmatprep.mubr.bf16.mxu0 %v15819_v1  ;;  %v3917_v23 = vadd.f32 %v3916_v19, %v15734_v0  ;;  %v11914_v0 = vld [vmem:[%s17832_s6 + $0x23c] ss:$20 sps:$4 sm:$0xff]   ;;  %v11949_v59 = vld [vmem:[%s17834_s8 + $0xc4] ss:$16 sps:$4 sm:$0xff]  }
 0x5e5   :  { %v3918_v6 = vpop.f32.mrf.mxu1  ;;  %4434 = vmatmul.mubr.bf16.gmra.mxu1 %v15824_v35  ;;  %4630 = vmatmul.mubr.bf16.gmra.mxu0 %v15824_v35  ;;  %v11955_v44 = vld [vmem:[%s17834_s8 + $0xa4] ss:$16 sps:$4 sm:$0xff]  }
 0x5e6   :  { %4485 = vmatpush1.bf16.msra.mxu1 %v11903_v3  ;;  %v3919_v30 = vadd.f32 %v3918_v6, %v15736_v58  ;;  %v11909_v58 = vld [vmem:[%s17832_s6 + $0x260] ss:$20 sps:$4 sm:$0xff]   ;;  %4997 = vmatprep.subr.bf16.mxu0 %v11943_v61  ;;  %v11968_v61 = vld [vmem:[%s17834_s8 + $0x68] ss:$16 sps:$4 sm:$0xff]  }
 0x5e7   :  { %v3920_v53 = vpop.f32.mrf.mxu1  ;;  %4486 = vmatprep.subr.bf16.mxu1 %v11908_v18  ;;  %4998 = vmatpush1.bf16.msra.mxu0 %v11941_v28  ;;  %v11961_v3 = vld [vmem:[%s17834_s8 + $0x84] ss:$16 sps:$4 sm:$0xff]   ;;  %v11959_v18 = vld [vmem:[%s17834_s8 + $0x80] ss:$16 sps:$4 sm:$0xff]  }
 0x5e8   :  { %v3921_v4 = vadd.f32 %v3920_v53, %v15738_v43  ;;  %v15848_v17 = vpack.c.bf16 %v3919_v30, %v3915_v24  ;;  %v11912_v43 = vld [vmem:[%s17832_s6 + $0x238] ss:$20 sps:$4 sm:$0xff]   ;;  %4999 = vmatprep.subr.bf16.mxu0 %v11949_v59  ;;  %v11967_v30 = vld [vmem:[%s17834_s8 + $0x64] ss:$16 sps:$4 sm:$0xff]  }
 0x5e9   :  { %v3924_v38 = vpop.f32.mrf.mxu1  ;;  %v11976_v59 = vld [vmem:[%s17834_s8 + $0x4c] ss:$16 sps:$4 sm:$0xff]  }
 0x5ea   :  { %v15843_v13 = vpack.c.bf16 %v3921_v4, %v3917_v23  ;;  %4487 = vmatpush1.bf16.msra.mxu1 %v11906_v32  ;;  %v3925_v16 = vadd.f32 %v3924_v38, %v15740_v37  ;;  %v11965_v4 = vld [vmem:[%s17834_s8 + $0x60] ss:$16 sps:$4 sm:$0xff]  }
 0x5eb   :  { %v3926_v62 = vpop.f32.mrf.mxu1  ;;  %4488 = vmatprep.subr.bf16.mxu1 %v11911_v45  ;;  %5000 = vmatpush1.bf16.msra.mxu0 %v11947_v26 }
 0x5ec   :  { %4443 = vmatprep.mubr.bf16.mxu1 %v15843_v13  ;;  %4637 = vmatprep.mubr.bf16.mxu0 %v15843_v13  ;;  %v3927_v46 = vadd.f32 %v3926_v62, %v15742_v56  ;;  %v11920_v56 = vld [vmem:[%s17832_s6 + $0x1ec] ss:$20 sps:$4 sm:$0xff]  }
 0x5ed   :  { %v3928_v40 = vpop.f32.mrf.mxu1  ;;  %4444 = vmatmul.mubr.bf16.gmra.mxu1 %v15848_v17  ;;  %4638 = vmatmul.mubr.bf16.gmra.mxu0 %v15848_v17 }
 0x5ee   :  { %4489 = vmatpush2.bf16.msra.mxu1 %v11909_v58  ;;  %v3929_v34 = vadd.f32 %v3928_v40, %v15744_v33  ;;  %v11915_v33 = vld [vmem:[%s17832_s6 + $0x210] ss:$20 sps:$4 sm:$0xff]   ;;  %5001 = vmatprep.subr.bf16.mxu0 %v11955_v44 }
 0x5ef   :  { %v3930_v8 = vpop.f32.mrf.mxu1  ;;  %4490 = vmatprep.subr.bf16.mxu1 %v11914_v0 }
 0x5f0   :  { %v3931_v52 = vadd.f32 %v3930_v8, %v15746_v11  ;;  %v15872_v55 = vpack.c.bf16 %v3929_v34, %v3925_v16 }
 0x5f1   :  { %v3934_v60 = vpop.f32.mrf.mxu1 }
 0x5f2   :  { %v15867_v42 = vpack.c.bf16 %v3931_v52, %v3927_v46  ;;  %4491 = vmatpush2.bf16.msra.mxu1 %v11912_v43  ;;  %v3935_v54 = vadd.f32 %v3934_v60, %v15748_v36  ;;  %v11926_v36 = vld [vmem:[%s17832_s6 + $0x19c] ss:$20 sps:$4 sm:$0xff]  }
 0x5f3   :  { %4492 = vmatprep.subr.bf16.mxu1 %v11917_v22  ;;  %v3936_v2 = vpop.f32.mrf.mxu1  ;;  %v11971_v43 = vld [vmem:[%s17834_s8 + $0x40] ss:$16 sps:$4 sm:$0xff]   ;;  %v11944_v22 = vld [vmem:[%s17834_s8 + $0xe8] ss:$16 sps:$4 sm:$0xff]   ;;  %v11952_v52 = vld [vmem:[%s17834_s8 + $0xcc] ss:$16 sps:$4 sm:$0xff]  }
 0x5f4   :  { %4453 = vmatprep.mubr.bf16.mxu1 %v15867_v42  ;;  %4645 = vmatprep.mubr.bf16.mxu0 %v15867_v42  ;;  %v3937_v37 = vadd.f32 %v3936_v2, %v15750_v63  ;;  %v3953_v31 = vpack.c.bf16 %v3935_v54, %v3935_v54  ;;  %v11950_v2 = vld [vmem:[%s17834_s8 + $0xc8] ss:$16 sps:$4 sm:$0xff]  }
 0x5f5   :  { %4454 = vmatmul.mubr.bf16.gmra.mxu1 %v15872_v55  ;;  %4646 = vmatmul.mubr.bf16.gmra.mxu0 %v15872_v55  ;;  %v3938_v11 = vpop.f32.mrf.mxu1 }
 0x5f6   :  { %4493 = vmatpush2.bf16.msra.mxu1 %v11915_v33  ;;  %v15882_v5 = vpack.c.bf16 %v3937_v37, %v3937_v37  ;;  %v11958_v37 = vld [vmem:[%s17834_s8 + $0xac] ss:$16 sps:$4 sm:$0xff]  }
 0x5f7   :  { %4494 = vmatprep.subr.bf16.mxu1 %v11920_v56  ;;  %v3939_v63 = vpop.f32.mrf.mxu1 }
 0x5f8   :  { %4463 = vmatprep.mubr.bf16.mxu1 %v15882_v5  ;;  %4653 = vmatprep.mubr.bf16.mxu0 %v15882_v5 }
 0x5fa   :  { %4495 = vmatpush2.bf16.msra.mxu1 %v11918_v10 }
 0x5fb   :  { %4496 = vmatprep.subr.bf16.mxu1 %v11923_v47 }
 0x5fd   :  { %4464 = vmatmul.mubr.bf16.gmra.mxu1 %v3953_v31  ;;  %4654 = vmatmul.mubr.bf16.gmra.mxu0 %v3953_v31 }
 0x5fe   :  { %4497 = vmatpush2.bf16.msra.mxu1 %v11921_v15  ;;  %4504 = vmatprep.mubr.bf16.mxu1 %v15752_v50  ;;  %v11932_v50 = vld [vmem:[%s17832_s6 + $0x14c] ss:$20 sps:$4 sm:$0xff]   ;;  %v11956_v15 = vld [vmem:[%s17834_s8 + $0xa8] ss:$16 sps:$4 sm:$0xff]  }
 0x5ff   :  { %4498 = vmatprep.subr.bf16.mxu1 %v11926_v36  ;;  %5029 = vmatprep.mubr.bf16.mxu0 %v18960_v12  ;;  %v11964_v36 = vld [vmem:[%s17834_s8 + $0x8c] ss:$16 sps:$4 sm:$0xff]  }
 0x602   :  { %4499 = vmatpush2.bf16.msra.mxu1 %v11924_v39 }
 0x603   :  { %4500 = vmatprep.subr.bf16.mxu1 %v11929_v27 }
 0x606   :  { %4501 = vmatpush2.bf16.msra.mxu1 %v11927_v48 }
 0x607   :  { %4502 = vmatprep.subr.bf16.mxu1 %v11932_v50 }
 0x60a   :  { %4503 = vmatpush2.bf16.msra.mxu1 %v11930_v20 }
 0x60b   :  { %11674 = vmatprep.subr.bf16.mxu1 %v18961_v49 }
 0x60d   :  { %4505 = vmatmul.mubr.bf16.vlgmr.msra.gmra.mxu1 %v15757_v14  ;;  %v11936_v14 = vld [vmem:[%s17833_s7 + $0x20] sm:$0xff]  }
 0x60e   :  { %4514 = vmatprep.mubr.bf16.mxu1 %v15772_v21  ;;  %11675 = vmatpush3.bf16.msra.mxu1 %v11933_v9  ;;  %v11937_v21 = vld [vmem:[%s17833_s7 + $0x18] sm:$0xff]  }
 0x60f   :  { %11676 = vmatprep.subr.bf16.mxu1 %v18961_v49  ;;  %v11962_v9 = vld [vmem:[%s17834_s8 + $0x88] ss:$16 sps:$4 sm:$0xff]  }
 0x612   :  { %11677 = vmatpush3.bf16.msra.mxu1 %v11934_v25 }
 0x613   :  { %11678 = vmatprep.subr.bf16.mxu1 %v18961_v49 }
 0x615   :  { %4515 = vmatmul.mubr.bf16.gmra.mxu1 %v15777_v57  ;;  %v11938_v57 = vld [vmem:[%s17833_s7 + $0x10] sm:$0xff]  }
 0x616   :  { %4524 = vmatprep.mubr.bf16.mxu1 %v15795_v41  ;;  %11679 = vmatpush3.bf16.msra.mxu1 %v11935_v7  ;;  %v11939_v41 = vld [vmem:[%s17833_s7 + $0x8] sm:$0xff]  }
 0x617   :  { %11680 = vmatprep.subr.bf16.mxu1 %v18961_v49  ;;  %v11970_v7 = vld [vmem:[%s17834_s8 + $0x6c] ss:$16 sps:$4 sm:$0xff]  }
 0x61a   :  { %11681 = vmatpush3.bf16.msra.mxu1 %v11936_v14 }
 0x61b   :  { %11682 = vmatprep.subr.bf16.mxu1 %v18961_v49 }
 0x61d   :  { %4525 = vmatmul.mubr.bf16.gmra.mxu1 %v15800_v29  ;;  %v11940_v29 = vld [vmem:[%s17833_s7] sm:$0xff]  }
 0x61e   :  { %4534 = vmatprep.mubr.bf16.mxu1 %v15819_v1  ;;  %11683 = vmatpush3.bf16.msra.mxu1 %v11937_v21  ;;  %v11953_v1 = vld [vmem:[%s17834_s8 + $0xa0] ss:$16 sps:$4 sm:$0xff]  }
 0x61f   :  { %11684 = vmatprep.subr.bf16.mxu1 %v18961_v49  ;;  %5002 = vmatpush1.bf16.msra.mxu0 %v11953_v1 }
 0x620   :  { %5003 = vmatprep.subr.bf16.mxu0 %v11961_v3 }
 0x622   :  { %11685 = vmatpush3.bf16.msra.mxu1 %v11938_v57 }
 0x623   :  { %11686 = vmatprep.subr.bf16.mxu1 %v18961_v49  ;;  %5004 = vmatpush1.bf16.msra.mxu0 %v11959_v18  ;;  %v11974_v18 = vld [vmem:[%s17834_s8 + $0x48] ss:$16 sps:$4 sm:$0xff]  }
 0x624   :  { %5005 = vmatprep.subr.bf16.mxu0 %v11967_v30 }
 0x625   :  { %4535 = vmatmul.mubr.bf16.gmra.mxu1 %v15824_v35 }
 0x626   :  { %4544 = vmatprep.mubr.bf16.mxu1 %v15843_v13  ;;  %11687 = vmatpush3.bf16.msra.mxu1 %v11939_v41  ;;  %v11973_v13 = vld [vmem:[%s17834_s8 + $0x44] ss:$16 sps:$4 sm:$0xff]  }
 0x627   :  { %11688 = vmatprep.subr.bf16.mxu1 %v18961_v49  ;;  %5006 = vmatpush1.bf16.msra.mxu0 %v11965_v4 }
 0x628   :  { %5007 = vmatprep.subr.bf16.mxu0 %v11973_v13 }
 0x62a   :  { %11689 = vmatpush3.bf16.msra.mxu1 %v11940_v29 }
 0x62b   :  { %5098 = vmatprep.subr.bf16.mxu1 %v11946_v51  ;;  %5008 = vmatpush1.bf16.msra.mxu0 %v11971_v43 }
 0x62d   :  { %4545 = vmatmul.mubr.bf16.gmra.mxu1 %v15848_v17 }
 0x62e   :  { %4554 = vmatprep.mubr.bf16.mxu1 %v15867_v42 }
 0x635   :  { %4555 = vmatmul.mubr.bf16.gmra.mxu1 %v15872_v55 }
 0x636   :  { %4564 = vmatprep.mubr.bf16.mxu1 %v15882_v5 }
 0x63d   :  { %4565 = vmatmul.mubr.bf16.gmra.mxu1 %v3953_v31 }
 0x63e   :  { %11690 = vmatprep.mubr.msk.bf16.mxu1 %vm12084_vm0, %v18961_v49 }
 0x68d   :  { %v11209_v35 = vpop.f32.mrf.mxu0  ;;  %v15986_v19 = vpop.f32.mrf.mxu1 }
 0x68f   :  { %v11210_v6 = vpop.f32.mrf.mxu0  ;;  %v15991_v32 = vpop.f32.mrf.mxu1 }
 0x690   :  { %v11211_v23 = vadd.f32 %v11210_v6, %v11209_v35 }
 0x691   :  { %v11212_v53 = vpop.f32.mrf.mxu0  ;;  %v15996_v45 = vpop.f32.mrf.mxu1 }
 0x692   :  { %v4661_v0 = vmax.f32 %v11211_v23, 0.0 }
 0x693   :  { %v11213_v24 = vpop.f32.mrf.mxu0  ;;  %v16001_v38 = vpop.f32.mrf.mxu1 }
 0x694   :  { %v11214_v58 = vadd.f32 %v11213_v24, %v11212_v53 }
 0x695   :  { %v11215_v17 = vpop.f32.mrf.mxu0  ;;  %v16006_v62 = vpop.f32.mrf.mxu1 }
 0x696   :  { %v4662_v40 = vmax.f32 %v11214_v58, 0.0 }
 0x697   :  { %v11216_v34 = vpop.f32.mrf.mxu0  ;;  %v16011_v8 = vpop.f32.mrf.mxu1 }
 0x698   :  { %v4674_v46 = vpack.c.bf16 %v4662_v40, %v4661_v0  ;;  %v11217_v42 = vadd.f32 %v11216_v34, %v11215_v17 }
 0x699   :  { %v11218_v16 = vpop.f32.mrf.mxu0  ;;  %v16019_v60 = vpop.f32.mrf.mxu1 }
 0x69a   :  { %11691 = vmatmul.mubr.bf16.vlgmr.msra.gmra.mxu1 %v4674_v46  ;;  %v4663_v10 = vmax.f32 %v11217_v42, 0.0 }
 0x69b   :  { %v11219_v33 = vpop.f32.mrf.mxu0  ;;  %11694 = vmatprep.mubr.msk.bf16.mxu1 %vm12084_vm0, %v18961_v49  ;;  %v16023_v55 = vpop.f32.mrf.mxu1  ;;  %5099 = vmatpush1.bf16.msra.mxu1 %v11944_v22 }
 0x69c   :  { %v11220_v56 = vadd.f32 %v11219_v33, %v11218_v16  ;;  %5100 = vmatprep.subr.bf16.mxu1 %v11952_v52 }
 0x69d   :  { %v11221_v11 = vpop.f32.mrf.mxu0  ;;  %v16031_v5 = vpop.f32.mrf.mxu1 }
 0x69e   :  { %v4664_v54 = vmax.f32 %v11220_v56, 0.0 }
 0x69f   :  { %v11222_v47 = vpop.f32.mrf.mxu0  ;;  %v16033_v63 = vpop.f32.mrf.mxu1  ;;  %5101 = vmatpush1.bf16.msra.mxu1 %v11950_v2 }
 0x6a0   :  { %v4675_v31 = vpack.c.bf16 %v4664_v54, %v4663_v10  ;;  %5102 = vmatprep.subr.bf16.mxu1 %v11958_v37  ;;  %v11223_v48 = vadd.f32 %v11222_v47, %v11221_v11 }
 0x6a1   :  { %v11224_v39 = vpop.f32.mrf.mxu0  ;;  %v16041_v27 = vpop.f32.mrf.mxu1 }
 0x6a2   :  { %11695 = vmatmul.mubr.bf16.gmra.mxu1 %v4675_v31  ;;  %v4665_v57 = vmax.f32 %v11223_v48, 0.0 }
 0x6a3   :  { %v11225_v50 = vpop.f32.mrf.mxu0  ;;  %11698 = vmatprep.mubr.msk.bf16.mxu1 %vm12084_vm0, %v18961_v49  ;;  %v16045_v20 = vpop.f32.mrf.mxu1  ;;  %5103 = vmatpush1.bf16.msra.mxu1 %v11956_v15 }
 0x6a4   :  { %v11226_v25 = vadd.f32 %v11225_v50, %v11224_v39  ;;  %5104 = vmatprep.subr.bf16.mxu1 %v11964_v36 }
 0x6a5   :  { %v11227_v14 = vpop.f32.mrf.mxu0  ;;  %v16053_v21 = vpop.f32.mrf.mxu1 }
 0x6a6   :  { %v4666_v41 = vmax.f32 %v11226_v25, 0.0 }
 0x6a7   :  { %v11228_v29 = vpop.f32.mrf.mxu0  ;;  %v16055_v28 = vpop.f32.mrf.mxu1  ;;  %5105 = vmatpush1.bf16.msra.mxu1 %v11962_v9 }
 0x6a8   :  { %v4676_v51 = vpack.c.bf16 %v4666_v41, %v4665_v57  ;;  %5106 = vmatprep.subr.bf16.mxu1 %v11970_v7  ;;  %v11229_v1 = vadd.f32 %v11228_v29, %v11227_v14 }
 0x6a9   :  { %v11230_v26 = vpop.f32.mrf.mxu0  ;;  %v16063_v44 = vpop.f32.mrf.mxu1 }
 0x6aa   :  { %11699 = vmatmul.mubr.bf16.gmra.mxu1 %v4676_v51  ;;  %v4667_v23 = vmax.f32 %v11229_v1, 0.0 }
 0x6ab   :  { %v11231_v3 = vpop.f32.mrf.mxu0  ;;  %11702 = vmatprep.mubr.msk.bf16.mxu1 %vm12084_vm0, %v18961_v49  ;;  %v16067_v35 = vpop.f32.mrf.mxu1  ;;  %5107 = vmatpush1.bf16.msra.mxu1 %v11968_v61 }
 0x6ac   :  { %v11232_v6 = vadd.f32 %v11231_v3, %v11230_v26  ;;  %5108 = vmatprep.subr.bf16.mxu1 %v11976_v59 }
 0x6ad   :  { %v11233_v30 = vpop.f32.mrf.mxu0  ;;  %v16072_v53 = vpop.f32.mrf.mxu1 }
 0x6ae   :  { %v4668_v4 = vmax.f32 %v11232_v6, 0.0 }
 0x6af   :  { %v11234_v24 = vpop.f32.mrf.mxu0  ;;  %v16074_v13 = vpop.f32.mrf.mxu1  ;;  %5109 = vmatpush1.bf16.msra.mxu1 %v11974_v18 }
 0x6b0   :  { %v4677_v58 = vpack.c.bf16 %v4668_v4, %v4667_v23  ;;  %v11235_v40 = vadd.f32 %v11234_v24, %v11233_v30  ;;  %v11979_v23 = vld [vmem:[%s17834_s8 + $0x24] ss:$16 sps:$4 sm:$0xff]   ;;  %v11982_v4 = vld [vmem:[%s17834_s8 + $0x2c] ss:$16 sps:$4 sm:$0xff]  }
 0x6b1   :  { %v11236_v17 = vpop.f32.mrf.mxu0  ;;  %v16076_v0 = vpop.f32.mrf.mxu1  ;;  %5009 = vmatprep.subr.bf16.mxu0 %v11979_v23  ;;  %5110 = vmatprep.subr.bf16.mxu1 %v11982_v4 }
 0x6b2   :  { %11703 = vmatmul.mubr.bf16.gmra.mxu1 %v4677_v58  ;;  %v4669_v16 = vmax.f32 %v11235_v40, 0.0  ;;  %v11977_v58 = vld [vmem:[%s17834_s8 + $0x20] ss:$16 sps:$4 sm:$0xff]  }
 0x6b3   :  { %v11237_v43 = vpop.f32.mrf.mxu0  ;;  %11706 = vmatprep.mubr.msk.bf16.mxu1 %vm12084_vm0, %v18961_v49  ;;  %v16080_v34 = vpop.f32.mrf.mxu1  ;;  %5010 = vmatpush1.bf16.msra.mxu0 %v11977_v58 }
 0x6b4   :  { %v11238_v22 = vadd.f32 %v11237_v43, %v11236_v17  ;;  %v11980_v17 = vld [vmem:[%s17834_s8 + $0x28] ss:$16 sps:$4 sm:$0xff]   ;;  %v11985_v43 = vld [vmem:[%s17834_s8 + $0x4] ss:$16 sps:$4 sm:$0xff]  }
 0x6b5   :  { %v11239_v46 = vpop.f32.mrf.mxu0  ;;  %v16082_v52 = vpop.f32.mrf.mxu1  ;;  %5111 = vmatpush1.bf16.msra.mxu1 %v11980_v17  ;;  %5011 = vmatprep.subr.bf16.mxu0 %v11985_v43 }
 0x6b6   :  { %v4670_v42 = vmax.f32 %v11238_v22, 0.0  ;;  %v11988_v22 = vld [vmem:[%s17834_s8 + $0xc] ss:$16 sps:$4 sm:$0xff]  }
 0x6b7   :  { %v11240_v33 = vpop.f32.mrf.mxu0  ;;  %v16084_v2 = vpop.f32.mrf.mxu1  ;;  %5112 = vmatprep.subr.bf16.mxu1 %v11988_v22 }
 0x6b8   :  { %v4678_v56 = vpack.c.bf16 %v4670_v42, %v4669_v16  ;;  %v11241_v10 = vadd.f32 %v11240_v33, %v11239_v46  ;;  %v11983_v16 = vld [vmem:[%s17834_s8] ss:$16 sps:$4 sm:$0xff]   ;;  %v11986_v42 = vld [vmem:[%s17834_s8 + $0x8] ss:$16 sps:$4 sm:$0xff]  }
 0x6b9   :  { %v11242_v37 = vpop.f32.mrf.mxu0  ;;  %v16086_v11 = vpop.f32.mrf.mxu1  ;;  %5012 = vmatpush1.bf16.msra.mxu0 %v11983_v16  ;;  %5113 = vmatpush1.bf16.msra.mxu1 %v11986_v42 }
 0x6ba   :  { %11707 = vmatmul.mubr.bf16.gmra.mxu1 %v4678_v56  ;;  %v4671_v39 = vmax.f32 %v11241_v10, 0.0 }
 0x6bb   :  { %v11243_v54 = vpop.f32.mrf.mxu0  ;;  %11710 = vmatprep.mubr.msk.bf16.mxu1 %vm12084_vm0, %v18961_v49  ;;  %v16090_v47 = vpop.f32.mrf.mxu1 }
 0x6bc   :  { %v11244_v15 = vadd.f32 %v11243_v54, %v11242_v37 }
 0x6bd   :  { %v16092_v31 = vpop.f32.mrf.mxu1  ;;  %v11245_v36 = vpop.f32.mrf.mxu0 }
 0x6be   :  { %18962 = vst [vmem:[#allocation498_spill] sm:$0xff] %v16092_v31  ;;  %v4672_v48 = vmax.f32 %v11244_v15, 0.0 }
 0x6bf   :  { %v16094_v50 = vpop.f32.mrf.mxu1  ;;  %v11246_v9 = vpop.f32.mrf.mxu0 }
 0x6c0   :  { %18963 = vst [vmem:[#allocation565_spill] sm:$0xff] %v16094_v50  ;;  %v4679_v25 = vpack.c.bf16 %v4672_v48, %v4671_v39  ;;  %v11247_v7 = vadd.f32 %v11246_v9, %v11245_v36 }
 0x6c1   :  { %v4469_v14 = vpop.f32.mrf.mxu1  ;;  %v11248_v57 = vpop.f32.mrf.mxu0 }
 0x6c2   :  { %11711 = vmatmul.mubr.bf16.gmra.mxu1 %v4679_v25  ;;  %v4673_v61 = vmax.f32 %v11247_v7, 0.0 }
 0x6c3   :  { %v4470_v41 = vpop.f32.mrf.mxu1  ;;  %11714 = vmatprep.mubr.msk.bf16.mxu1 %vm12084_vm0, %v18961_v49  ;;  %v11249_v29 = vpop.f32.mrf.mxu0 }
 0x6c4   :  { %v4680_v51 = vpack.c.bf16 %v4673_v61, %v4673_v61 }
 0x6ca   :  { %11715 = vmatmul.mubr.bf16.gmra.mxu1 %v4680_v51 }
 0x6cb   :  { %5130 = vmatprep.mubr.bf16.mxu1 %v18960_v12 }
 0x6cd   :  { %v16099_v59 = vpop.f32.mrf.mxu1 }
 0x6cf   :  { %v16101_v26 = vpop.f32.mrf.mxu1 }
 0x6d1   :  { %v16103_v1 = vpop.f32.mrf.mxu1 }
 0x6d3   :  { %v16105_v3 = vpop.f32.mrf.mxu1 }
 0x6d5   :  { %v16107_v18 = vpop.f32.mrf.mxu1 }
 0x6d7   :  { %v16109_v6 = vpop.f32.mrf.mxu1 }
 0x6d9   :  { %v16111_v30 = vpop.f32.mrf.mxu1 }
 0x6db   :  { %v16119_v24 = vpop.f32.mrf.mxu1 }
 0x6dd   :  { %v16127_v40 = vpop.f32.mrf.mxu1 }
 0x6df   :  { %v16135_v46 = vpop.f32.mrf.mxu1 }
 0x6e1   :  { %v16143_v33 = vpop.f32.mrf.mxu1 }
 0x6e3   :  { %v16145_v56 = vpop.f32.mrf.mxu1 }
 0x6e5   :  { %v16147_v37 = vpop.f32.mrf.mxu1 }
 0x6e7   :  { %v16149_v10 = vpop.f32.mrf.mxu1 }
 0x6e9   :  { %v16151_v54 = vpop.f32.mrf.mxu1 }
 0x6eb   :  { %v16153_v15 = vpop.f32.mrf.mxu1 }
 0x6ed   :  { %v16155_v36 = vpop.f32.mrf.mxu1 }
 0x6ef   :  { %v16157_v39 = vpop.f32.mrf.mxu1 }
 0x6f1   :  { %v16159_v48 = vpop.f32.mrf.mxu1 }
 0x6f3   :  { %v16161_v9 = vpop.f32.mrf.mxu1 }
 0x6f5   :  { %v16163_v25 = vpop.f32.mrf.mxu1 }
 0x6f7   :  { %v16165_v7 = vpop.f32.mrf.mxu1 }
 0x6f9   :  { %v16167_v14 = vpop.f32.mrf.mxu1 }
 0x6fb   :  { %v16169_v57 = vpop.f32.mrf.mxu1 }
 0x6fd   :  { %v16171_v41 = vpop.f32.mrf.mxu1 }
 0x6fe   :  { %18964 = vst [vmem:[#allocation497_spill] sm:$0xff] %v16171_v41 }
 0x6ff   :  { %v16173_v29 = vpop.f32.mrf.mxu1 }
 0x700   :  { %18965 = vst [vmem:[#allocation564_spill] sm:$0xff] %v16173_v29 }
 0x701   :  { %v4570_v61 = vpop.f32.mrf.mxu1 }
 0x703   :  { %v4571_v51 = vpop.f32.mrf.mxu1 }
 0x75a   :  { %v4763_v23 = vpop.f32.mrf.mxu1 }
 0x75b   :  { %v4817_v17 = vmax.f32 %v4763_v23, 0.0 }
 0x75c   :  { %v11692_v4 = vpop.f32.mrf.mxu1 }
 0x75e   :  { %v4766_v58 = vpop.f32.mrf.mxu1 }
 0x75f   :  { %v4818_v43 = vmax.f32 %v4766_v58, 0.0 }
 0x760   :  { %v11693_v22 = vpop.f32.mrf.mxu1 }
 0x761   :  { %v4830_v16 = vpack.c.bf16 %v4818_v43, %v4817_v17 }
 0x762   :  { %v4771_v42 = vpop.f32.mrf.mxu1 }
 0x763   :  { %5030 = vmatmul.mubr.bf16.vlgmr.msra.gmra.mxu0 %v4830_v16  ;;  %5131 = vmatmul.mubr.bf16.vlgmr.msra.gmra.mxu1 %v4830_v16  ;;  %v4819_v41 = vmax.f32 %v4771_v42, 0.0 }
 0x764   :  { %v11696_v49 = vpop.f32.mrf.mxu1  ;;  %5039 = vmatprep.mubr.bf16.mxu0 %v18960_v12  ;;  %5140 = vmatprep.mubr.bf16.mxu1 %v18960_v12 }
 0x766   :  { %v4774_v50 = vpop.f32.mrf.mxu1 }
 0x767   :  { %v4820_v29 = vmax.f32 %v4774_v50, 0.0 }
 0x768   :  { %v11697_v61 = vpop.f32.mrf.mxu1 }
 0x769   :  { %v4831_v51 = vpack.c.bf16 %v4820_v29, %v4819_v41 }
 0x76a   :  { %v4779_v31 = vpop.f32.mrf.mxu1 }
 0x76b   :  { %5040 = vmatmul.mubr.bf16.gmra.mxu0 %v4831_v51  ;;  %5141 = vmatmul.mubr.bf16.gmra.mxu1 %v4831_v51  ;;  %v4821_v58 = vmax.f32 %v4779_v31, 0.0 }
 0x76c   :  { %v11700_v23 = vpop.f32.mrf.mxu1  ;;  %5049 = vmatprep.mubr.bf16.mxu0 %v18960_v12  ;;  %5150 = vmatprep.mubr.bf16.mxu1 %v18960_v12 }
 0x76e   :  { %v4782_v4 = vpop.f32.mrf.mxu1 }
 0x76f   :  { %v4822_v49 = vmax.f32 %v4782_v4, 0.0 }
 0x770   :  { %v11701_v17 = vpop.f32.mrf.mxu1 }
 0x771   :  { %v4832_v43 = vpack.c.bf16 %v4822_v49, %v4821_v58 }
 0x772   :  { %v4787_v22 = vpop.f32.mrf.mxu1 }
 0x773   :  { %5050 = vmatmul.mubr.bf16.gmra.mxu0 %v4832_v43  ;;  %5151 = vmatmul.mubr.bf16.gmra.mxu1 %v4832_v43  ;;  %v4823_v41 = vmax.f32 %v4787_v22, 0.0 }
 0x774   :  { %v11704_v16 = vpop.f32.mrf.mxu1  ;;  %5059 = vmatprep.mubr.bf16.mxu0 %v18960_v12  ;;  %5160 = vmatprep.mubr.bf16.mxu1 %v18960_v12 }
 0x776   :  { %v4790_v50 = vpop.f32.mrf.mxu1 }
 0x777   :  { %v4824_v29 = vmax.f32 %v4790_v50, 0.0 }
 0x778   :  { %v11705_v42 = vpop.f32.mrf.mxu1 }
 0x779   :  { %v4833_v61 = vpack.c.bf16 %v4824_v29, %v4823_v41 }
 0x77a   :  { %v4795_v51 = vpop.f32.mrf.mxu1 }
 0x77b   :  { %5060 = vmatmul.mubr.bf16.gmra.mxu0 %v4833_v61  ;;  %5161 = vmatmul.mubr.bf16.gmra.mxu1 %v4833_v61  ;;  %v4825_v4 = vmax.f32 %v4795_v51, 0.0 }
 0x77c   :  { %v11708_v31 = vpop.f32.mrf.mxu1  ;;  %5069 = vmatprep.mubr.bf16.mxu0 %v18960_v12  ;;  %5170 = vmatprep.mubr.bf16.mxu1 %v18960_v12 }
 0x77e   :  { %v4798_v23 = vpop.f32.mrf.mxu1 }
 0x77f   :  { %v4826_v58 = vmax.f32 %v4798_v23, 0.0 }
 0x780   :  { %v11709_v49 = vpop.f32.mrf.mxu1 }
 0x781   :  { %v4834_v17 = vpack.c.bf16 %v4826_v58, %v4825_v4 }
 0x782   :  { %v4803_v43 = vpop.f32.mrf.mxu1 }
 0x783   :  { %5070 = vmatmul.mubr.bf16.gmra.mxu0 %v4834_v17  ;;  %5171 = vmatmul.mubr.bf16.gmra.mxu1 %v4834_v17  ;;  %v4827_v50 = vmax.f32 %v4803_v43, 0.0 }
 0x784   :  { %v11712_v22 = vpop.f32.mrf.mxu1  ;;  %5079 = vmatprep.mubr.bf16.mxu0 %v18960_v12  ;;  %5180 = vmatprep.mubr.bf16.mxu1 %v18960_v12 }
 0x786   :  { %v4806_v16 = vpop.f32.mrf.mxu1 }
 0x787   :  { %v4828_v41 = vmax.f32 %v4806_v16, 0.0 }
 0x788   :  { %v11713_v29 = vpop.f32.mrf.mxu1 }
 0x789   :  { %v4835_v42 = vpack.c.bf16 %v4828_v41, %v4827_v50 }
 0x78a   :  { %v4811_v61 = vpop.f32.mrf.mxu1 }
 0x78b   :  { %5080 = vmatmul.mubr.bf16.gmra.mxu0 %v4835_v42  ;;  %5181 = vmatmul.mubr.bf16.gmra.mxu1 %v4835_v42  ;;  %v4829_v31 = vmax.f32 %v4811_v61, 0.0 }
 0x78c   :  { %5089 = vmatprep.mubr.bf16.mxu0 %v18960_v12  ;;  %5190 = vmatprep.mubr.bf16.mxu1 %v18960_v12  ;;  %v11716_v51 = vpop.f32.mrf.mxu1 }
 0x78d   :  { %v4836_v58 = vpack.c.bf16 %v4829_v31, %v4829_v31 }
 0x78e   :  { %v4814_v23 = vpop.f32.mrf.mxu1 }
 0x790   :  { %v11717_v4 = vpop.f32.mrf.mxu1 }
 0x793   :  { %5090 = vmatmul.mubr.bf16.gmra.mxu0 %v4836_v58  ;;  %5191 = vmatmul.mubr.bf16.gmra.mxu1 %v4836_v58 }
 0x823   :  { %v5031_v49 = vpop.f32.mrf.mxu0  ;;  %v5132_v17 = vpop.f32.mrf.mxu1 }
 0x824   :  { %v16188_v43 = vadd.f32 %v5031_v49, %v15986_v19  ;;  %v16191_v22 = vadd.f32 %v5132_v17, %v16099_v59 }
 0x825   :  { %v5033_v16 = vpop.f32.mrf.mxu0  ;;  %v5134_v50 = vpop.f32.mrf.mxu1 }
 0x826   :  { %18966 = vst [vmem:[#allocation496_spill] sm:$0xff] %v16191_v22  ;;  %v16196_v42 = vadd.f32 %v5033_v16, %v15991_v32  ;;  %v16199_v61 = vadd.f32 %v5134_v50, %v16101_v26 }
 0x827   :  { %v5035_v51 = vpop.f32.mrf.mxu0  ;;  %v5136_v31 = vpop.f32.mrf.mxu1 }
 0x828   :  { %18967 = vst [vmem:[#allocation562_spill] sm:$0xff] %v16199_v61  ;;  %v16204_v59 = vadd.f32 %v5035_v51, %v15996_v45  ;;  %v16207_v4 = vadd.f32 %v5136_v31, %v16103_v1  ;;  %v18974_v61 = vld [vmem:[#allocation564_spill] sm:$0xff] }
 0x829   :  { %v5037_v58 = vpop.f32.mrf.mxu0  ;;  %v5138_v49 = vpop.f32.mrf.mxu1 }
 0x82a   :  { %18968 = vst [vmem:[#allocation495_spill] sm:$0xff] %v16207_v4  ;;  %v16212_v26 = vadd.f32 %v5037_v58, %v16001_v38  ;;  %v16215_v16 = vadd.f32 %v5138_v49, %v16105_v3 }
 0x82b   :  { %v5041_v50 = vpop.f32.mrf.mxu0  ;;  %v5142_v29 = vpop.f32.mrf.mxu1 }
 0x82c   :  { %18969 = vst [vmem:[#allocation561_spill] sm:$0xff] %v16215_v16  ;;  %v16220_v1 = vadd.f32 %v5041_v50, %v16006_v62  ;;  %v16223_v31 = vadd.f32 %v5142_v29, %v16107_v18  ;;  %v18973_v16 = vld [vmem:[#allocation565_spill] sm:$0xff] }
 0x82d   :  { %v5043_v23 = vpop.f32.mrf.mxu0  ;;  %v5144_v17 = vpop.f32.mrf.mxu1 }
 0x82e   :  { %v16228_v3 = vadd.f32 %v5043_v23, %v16011_v8  ;;  %v16231_v49 = vadd.f32 %v5144_v17, %v16109_v6 }
 0x82f   :  { %v5045_v32 = vpop.f32.mrf.mxu0  ;;  %v5146_v51 = vpop.f32.mrf.mxu1 }
 0x830   :  { %v16236_v18 = vadd.f32 %v5045_v32, %v16019_v60  ;;  %v16239_v29 = vadd.f32 %v5146_v51, %v16111_v30 }
 0x831   :  { %v5047_v41 = vpop.f32.mrf.mxu0  ;;  %v5148_v58 = vpop.f32.mrf.mxu1 }
 0x832   :  { %18970 = vst [vmem:[#allocation566_spill] sm:$0xff] %v16239_v29  ;;  %v16244_v6 = vadd.f32 %v5047_v41, %v16023_v55  ;;  %v16247_v17 = vadd.f32 %v5148_v58, %v16119_v24 }
 0x833   :  { %v5051_v45 = vpop.f32.mrf.mxu0  ;;  %v5152_v50 = vpop.f32.mrf.mxu1 }
 0x834   :  { %v16252_v30 = vadd.f32 %v5051_v45, %v16031_v5  ;;  %v16255_v51 = vadd.f32 %v5152_v50, %v16127_v40 }
 0x835   :  { %v5053_v19 = vpop.f32.mrf.mxu0  ;;  %v5154_v23 = vpop.f32.mrf.mxu1 }
 0x836   :  { %v16260_v24 = vadd.f32 %v5053_v19, %v16033_v63  ;;  %v16263_v58 = vadd.f32 %v5154_v23, %v16135_v46 }
 0x837   :  { %v5055_v8 = vpop.f32.mrf.mxu0  ;;  %v5156_v32 = vpop.f32.mrf.mxu1 }
 0x838   :  { %v16268_v40 = vadd.f32 %v5055_v8, %v16041_v27  ;;  %v16271_v50 = vadd.f32 %v5156_v32, %v16143_v33 }
 0x839   :  { %v5057_v38 = vpop.f32.mrf.mxu0  ;;  %v5158_v41 = vpop.f32.mrf.mxu1 }
 0x83a   :  { %v16276_v46 = vadd.f32 %v5057_v38, %v16045_v20  ;;  %v16279_v23 = vadd.f32 %v5158_v41, %v16145_v56 }
 0x83b   :  { %v5061_v60 = vpop.f32.mrf.mxu0  ;;  %v5162_v45 = vpop.f32.mrf.mxu1 }
 0x83c   :  { %v16284_v33 = vadd.f32 %v5061_v60, %v16053_v21  ;;  %v16287_v32 = vadd.f32 %v5162_v45, %v16147_v37 }
 0x83d   :  { %v5063_v62 = vpop.f32.mrf.mxu0  ;;  %v5164_v19 = vpop.f32.mrf.mxu1 }
 0x83e   :  { %v16292_v56 = vadd.f32 %v5063_v62, %v16055_v28  ;;  %v16295_v41 = vadd.f32 %v5164_v19, %v16149_v10 }
 0x83f   :  { %v5065_v63 = vpop.f32.mrf.mxu0  ;;  %v5166_v8 = vpop.f32.mrf.mxu1 }
 0x840   :  { %v16300_v37 = vadd.f32 %v5065_v63, %v16063_v44  ;;  %v16303_v45 = vadd.f32 %v5166_v8, %v16151_v54 }
 0x841   :  { %v5067_v55 = vpop.f32.mrf.mxu0  ;;  %v5168_v38 = vpop.f32.mrf.mxu1 }
 0x842   :  { %v16308_v10 = vadd.f32 %v5067_v55, %v16067_v35  ;;  %v16311_v19 = vadd.f32 %v5168_v38, %v16153_v15 }
 0x843   :  { %v5071_v27 = vpop.f32.mrf.mxu0  ;;  %v5172_v60 = vpop.f32.mrf.mxu1 }
 0x844   :  { %v16316_v54 = vadd.f32 %v5071_v27, %v16072_v53  ;;  %v16319_v8 = vadd.f32 %v5172_v60, %v16155_v36  ;;  %v18971_v53 = vld [vmem:[#allocation498_spill] sm:$0xff] }
 0x845   :  { %v5073_v5 = vpop.f32.mrf.mxu0  ;;  %v5174_v62 = vpop.f32.mrf.mxu1 }
 0x846   :  { %v16324_v15 = vadd.f32 %v5073_v5, %v16074_v13  ;;  %v16327_v38 = vadd.f32 %v5174_v62, %v16157_v39 }
 0x847   :  { %v5075_v28 = vpop.f32.mrf.mxu0  ;;  %v5176_v63 = vpop.f32.mrf.mxu1 }
 0x848   :  { %v16332_v36 = vadd.f32 %v5075_v28, %v16076_v0  ;;  %v16335_v60 = vadd.f32 %v5176_v63, %v16159_v48 }
 0x849   :  { %v5077_v20 = vpop.f32.mrf.mxu0  ;;  %v5178_v55 = vpop.f32.mrf.mxu1 }
 0x84a   :  { %v5078_v39 = vadd.f32 %v5077_v20, %v16080_v34  ;;  %v16341_v62 = vadd.f32 %v5178_v55, %v16161_v9 }
 0x84b   :  { %v5081_v44 = vpop.f32.mrf.mxu0  ;;  %v5182_v21 = vpop.f32.mrf.mxu1 }
 0x84c   :  { %v5236_v27 = vmax.f32 %v5078_v39, 0.0  ;;  %v5082_v28 = vadd.f32 %v5081_v44, %v16082_v52  ;;  %v16346_v48 = vadd.f32 %v5182_v21, %v16163_v25 }
 0x84d   :  { %v5083_v63 = vpop.f32.mrf.mxu0  ;;  %v5184_v35 = vpop.f32.mrf.mxu1 }
 0x84e   :  { %v5239_v13 = vmax.f32 %v5082_v28, 0.0  ;;  %v5084_v34 = vadd.f32 %v5083_v63, %v16084_v2  ;;  %v16351_v9 = vadd.f32 %v5184_v35, %v16165_v7 }
 0x84f   :  { %v5085_v20 = vpop.f32.mrf.mxu0  ;;  %v5186_v55 = vpop.f32.mrf.mxu1 }
 0x850   :  { %v5240_v39 = vmax.f32 %v5084_v34, 0.0  ;;  %v5086_v52 = vadd.f32 %v5085_v20, %v16086_v11  ;;  %v16356_v25 = vadd.f32 %v5186_v55, %v16167_v14  ;;  %v18972_v20 = vld [vmem:[#allocation497_spill] sm:$0xff] }
 0x851   :  { %v5087_v21 = vpop.f32.mrf.mxu0  ;;  %v5188_v44 = vpop.f32.mrf.mxu1 }
 0x852   :  { %v5243_v28 = vmax.f32 %v5086_v52, 0.0  ;;  %v5088_v2 = vadd.f32 %v5087_v21, %v16090_v47  ;;  %v16361_v7 = vadd.f32 %v5188_v44, %v16169_v57 }
 0x853   :  { %v5091_v35 = vpop.f32.mrf.mxu0  ;;  %v5192_v63 = vpop.f32.mrf.mxu1 }
 0x854   :  { %v5244_v34 = vmax.f32 %v5088_v2, 0.0  ;;  %v5092_v11 = vadd.f32 %v5091_v35, %v18971_v53  ;;  %v5193_v14 = vadd.f32 %v5192_v63, %v18972_v20 }
 0x855   :  { %v5093_v55 = vpop.f32.mrf.mxu0  ;;  %v5194_v4 = vpop.f32.mrf.mxu1 }
 0x856   :  { %v5247_v22 = vmax.f32 %v5092_v11, 0.0  ;;  %v5249_v52 = vmax.f32 %v5193_v14, 0.0  ;;  %v5094_v5 = vadd.f32 %v5093_v55, %v18973_v16  ;;  %v16368_v47 = vadd.f32 %v5194_v4, %v18974_v61 }
 0x857   :  { %v5095_v57 = vpop.f32.mrf.mxu0  ;;  %v5196_v21 = vpop.f32.mrf.mxu1 }
 0x858   :  { %v5248_v44 = vmax.f32 %v5094_v5, 0.0  ;;  %v5250_v2 = vmax.f32 %v16368_v47, 0.0 }
 0x859   :  { %v5096_v29 = vpop.f32.mrf.mxu0  ;;  %v5197_v0 = vpop.f32.mrf.mxu1 }
 0x85a   :  { %12075 = dma.done.wait [#allocation5], 40960 }
 0x85b   :  { %12076 = vsyncadd [#allocation5], 4294926336 }
 0x85c   :  { %12077 = dma.done.wait [#allocation5 + $0x1], 4096 }
 0x85d   :  { %12078 = vsyncadd [#allocation5 + $0x1], 4294963200  ;;  %v5776_v53 = vpack.c.bf16 %v5248_v44, %v5248_v44  ;;  %v5775_v35 = vpack.c.bf16 %v5247_v22, %v5247_v22  ;;  %v5772_v63 = vpack.c.bf16 %v5244_v34, %v5240_v39 }
 0x85e   :  { %12079 = dma.done.wait [#allocation5 + $0x2], 16384 }
 0x85f   :  { %12080 = vsyncadd [#allocation5 + $0x2], 4294950912  ;;  %5840 = vmatprep.mubr.bf16.mxu0 %v18960_v12  ;;  %10550 = vmatprep.subr.msk.bf16.mxu0 %vm3732_vm4, %v5776_v53  ;;  %v5797_v61 = vsel %vm3732_vm4, %v5775_v35, 0  ;;  %v5771_v4 = vpack.c.bf16 %v5243_v28, %v5239_v13  ;;  %v18975_v16 = vmax.f32 %v16324_v15, 0.0  ;;  %v5777_v5 = vpack.c.bf16 %v5249_v52, %v5249_v52  ;;  %v18978_v34 = vld [vmem:[#allocation90_spill] sm:$0xff]  ;;  %v18979_v11 = vld [vmem:[#allocation85_spill] sm:$0xff] }
 0x860   :  { %5811 = vmatpush1.bf16.msra.mxu0 %v5797_v61  ;;  %v18976_v0 = vmax.f32 %v16316_v54, 0.0  ;;  %v18977_v22 = vmax.f32 %v16332_v36, 0.0  ;;  %v10627_v20 = vcombine.high %v18979_v11, %v18978_v34  ;;  %v18980_v14 = vmax.f32 %v16292_v56, 0.0  ;;  %v18983_v52 = vld [vmem:[#allocation75_spill] sm:$0xff]  ;;  %v18986_v57 = vld [vmem:[#allocation70_spill] sm:$0xff]  ;;  %v18987_v21 = vld [vmem:[#allocation65_spill] sm:$0xff] }
 0x861   :  { %5812 = vmatprep.subr.bf16.mxu0 %v5772_v63  ;;  %v5768_v29 = vpack.c.bf16 %v5236_v27, %v18975_v16  ;;  %v18981_v55 = vmax.f32 %v16308_v10, 0.0  ;;  %v5803_v28 = vsel %vm3732_vm4, %v5777_v5, 0  ;;  %v10626_v15 = vcombine.low %v18979_v11, %v18978_v34  ;;  %v18982_v27 = vld [vmem:[#allocation80_spill] sm:$0xff]  ;;  %v18998_v34 = vld [vmem:[#allocation50_spill] sm:$0xff]  ;;  %v18999_v11 = vld [vmem:[#allocation45_spill] sm:$0xff]  ;;  %s12086_s27 = smov [#allocation6]  }
 0x862   :  { %v5767_v39 = vpack.c.bf16 %v18977_v22, %v18976_v0  ;;  %v10617_v54 = vcombine.high %v18983_v52, %v18982_v27  ;;  %7522 = vmatprep.subr.bf16.mxu1 %v10627_v20  ;;  %v10616_v36 = vcombine.low %v18983_v52, %v18982_v27  ;;  %v18984_v47 = vmax.f32 %v16284_v33, 0.0  ;;  %v18992_v16 = vld [vmem:[#allocation60_spill] sm:$0xff]  ;;  %v19005_v27 = vld [vmem:[#allocation35_spill] sm:$0xff]  ;;  %s10164_s28 = sshll.u32 %s12086_s27, 4  ;;  %s10165_s28 = int_to_ptr.vmem [resolvable:$true] %s10164_s28 }
 0x863   :  { %v5764_v13 = vpack.c.bf16 %v18981_v55, %v18980_v14  ;;  %7523 = vmatpush1.bf16.msra.mxu1 %v10626_v15  ;;  %v18985_v56 = vmax.f32 %v16300_v37, 0.0  ;;  %v10607_v44 = vcombine.high %v18987_v21, %v18986_v57  ;;  %v18988_v53 = vmax.f32 %v16260_v24, 0.0  ;;  %v19004_v15 = vld [vmem:[#allocation40_spill] sm:$0xff]  ;;  %s12055_s29 = scalar_lea.vmem %s10165_s28, 32  ;;  %p12060_p1 = scmp.lt.s32.totalorder %s10165_s28, %s10165_s28 }
 0x864   :  { %5813 = vmatpush1.bf16.msra.mxu0 %v5771_v4  ;;  %7524 = vmatprep.subr.bf16.mxu1 %v10617_v54  ;;  %v18989_v35 = vmax.f32 %v16276_v46, 0.0  ;;  %v10606_v61 = vcombine.low %v18987_v21, %v18986_v57  ;;  %v18990_v33 = vmax.f32 %v16252_v30, 0.0  ;;  %v18991_v37 = vmax.f32 %v16268_v40, 0.0  ;;  %p12056_p0 = scmp.ne.s32.totalorder %s10165_s28, %s12055_s29  ;;  %p12061_p2 = scmp.lt.s32.totalorder %s12055_s29, %s12055_s29 }
 0x865   :  { %5814 = vmatprep.subr.bf16.mxu0 %v5768_v29  ;;  %v5763_v10 = vpack.c.bf16 %v18985_v56, %v18984_v47  ;;  %v18993_v29 = vld [vmem:[#allocation55_spill] sm:$0xff]  ;;  %v18994_v24 = vmax.f32 %v16228_v3, 0.0  ;;  %v18995_v46 = vmax.f32 %v16244_v6, 0.0  ;;  %v18996_v30 = vmax.f32 %v16220_v1, 0.0  ;;  %v19008_v47 = vld [vmem:[#allocation30_spill] sm:$0xff]  ;;  %v19009_v56 = vld [vmem:[#allocation25_spill] sm:$0xff] }
 0x866   :  { %v5760_v63 = vpack.c.bf16 %v18989_v35, %v18988_v53  ;;  %v5759_v4 = vpack.c.bf16 %v18991_v37, %v18990_v33  ;;  %v10597_v5 = vcombine.high %v18993_v29, %v18992_v16  ;;  %v10596_v22 = vcombine.low %v18993_v29, %v18992_v16  ;;  %v16463_v35 = vld [vmem:[%s17835_s9 + $0x8] sm:$0xff]   ;;  %v19021_v29 = vld [vmem:[#allocation165_spill] sm:$0xff]  ;;  %p12062_p3 = por %p12061_p2, %p12060_p1 }
 0x867   :  { %7525 = vmatpush1.bf16.msra.mxu1 %v10616_v36  ;;  %v5756_v0 = vpack.c.bf16 %v18995_v46, %v18994_v24  ;;  %v18997_v40 = vmax.f32 %v16236_v18, 0.0  ;;  %vm5789_vm5 = vcmask 850944   ;;  %v10587_v20 = vcombine.high %v18999_v11, %v18998_v34 }
 0x868   :  { %5815 = vmatpush1.bf16.msra.mxu0 %v5767_v39  ;;  %7526 = vmatprep.subr.bf16.mxu1 %v10607_v44  ;;  %v19000_v3 = vmax.f32 %v16196_v42, 0.0  ;;  %v19001_v6 = vmax.f32 %v16212_v26, 0.0  ;;  %v10586_v55 = vcombine.low %v18999_v11, %v18998_v34  ;;  %v19002_v1 = vmax.f32 %v16188_v43, 0.0  ;;  %v16438_v42 = vld [vmem:[%s17835_s9] sm:$0xff]   ;;  %p12063_p4 = pnand %p12062_p3, %p12056_p0 }
 0x869   :  { %5816 = vmatprep.subr.bf16.mxu0 %v5764_v13  ;;  %v5755_v39 = vpack.c.bf16 %v18997_v40, %v18996_v30  ;;  %v19003_v18 = vmax.f32 %v16204_v59, 0.0  ;;  %v10577_v52 = vcombine.high %v19005_v27, %v19004_v15  ;;  %v5778_v26 = vpack.c.bf16 %v5250_v2, %v5250_v2  ;;  %v19030_v11 = vld [vmem:[#allocation150_spill] sm:$0xff] }
 0x86a   :  { %v5752_v14 = vpack.c.bf16 %v19001_v6, %v19000_v3  ;;  %v10576_v54 = vcombine.low %v19005_v27, %v19004_v15  ;;  %v19006_v43 = vmax.f32 %v16351_v9, 0.0  ;;  %v19007_v59 = vmax.f32 %v16361_v7, 0.0  ;;  %v19012_v9 = vld [vmem:[#allocation20_spill] sm:$0xff]  ;;  %v19013_v7 = vld [vmem:[#allocation15_spill] sm:$0xff]  ;;  %v19039_v27 = vld [vmem:[#allocation562_spill] sm:$0xff] }
 0x86b   :  { %7527 = vmatpush1.bf16.msra.mxu1 %v10606_v61  ;;  %v5751_v13 = vpack.c.bf16 %v19003_v18, %v19002_v1  ;;  %v10566_v2 = vcombine.low %v19009_v56, %v19008_v47  ;;  %v19010_v57 = vmax.f32 %v16346_v48, 0.0  ;;  %v19011_v21 = vmax.f32 %v16356_v25, 0.0  ;;  %v19037_v18 = vld [vmem:[#allocation140_spill] sm:$0xff] }
 0x86c   :  { %5817 = vmatpush1.bf16.msra.mxu0 %v5763_v10  ;;  %7528 = vmatprep.subr.bf16.mxu1 %v10597_v5  ;;  %v5774_v36 = vpack.c.bf16 %v19007_v59, %v19006_v43  ;;  %v10567_v10 = vcombine.high %v19009_v56, %v19008_v47  ;;  %v10557_v53 = vcombine.high %v19013_v7, %v19012_v9  ;;  %v19016_v25 = vmax.f32 %v16319_v8, 0.0  ;;  %v19043_v43 = vld [vmem:[#allocation496_spill] sm:$0xff]  ;;  %v19045_v59 = vld [vmem:[#allocation495_spill] sm:$0xff]  ;;  %v19047_v56 = vld [vmem:[#allocation130_spill] sm:$0xff] }
 0x86d   :  { %5818 = vmatprep.subr.bf16.mxu0 %v5760_v63  ;;  %v5773_v44 = vpack.c.bf16 %v19011_v21, %v19010_v57  ;;  %v19014_v63 = vmax.f32 %v16327_v38, 0.0  ;;  %v10556_v48 = vcombine.low %v19013_v7, %v19012_v9  ;;  %v19017_v33 = vmax.f32 %v16335_v60, 0.0  ;;  %v19049_v57 = vld [vmem:[#allocation250_spill] sm:$0xff]  ;;  %v19050_v21 = vld [vmem:[#allocation245_spill] sm:$0xff] }
 0x86e   :  { %v19019_v38 = vmax.f32 %v16311_v19, 0.0  ;;  %v19022_v60 = vmax.f32 %v16287_v32, 0.0  ;;  %v19023_v24 = vmax.f32 %v16303_v45, 0.0  ;;  %v19025_v19 = vld [vmem:[#allocation155_spill] sm:$0xff]  ;;  %v19027_v30 = vmax.f32 %v16279_v23, 0.0 }
 0x86f   :  { %7529 = vmatpush1.bf16.msra.mxu1 %v10596_v22  ;;  %v5769_v37 = vpack.c.bf16 %v19017_v33, %v19016_v25  ;;  %v19026_v22 = vmax.f32 %v16263_v58, 0.0  ;;  %v19028_v32 = vmax.f32 %v16255_v51, 0.0  ;;  %v19029_v45 = vmax.f32 %v16271_v50, 0.0 }
 0x870   :  { %5819 = vmatpush1.bf16.msra.mxu0 %v5759_v4  ;;  %7530 = vmatprep.subr.bf16.mxu1 %v10587_v20  ;;  %v19018_v4 = vmax.f32 %v16295_v41, 0.0  ;;  %v5765_v46 = vpack.c.bf16 %v19023_v24, %v19022_v60  ;;  %v19024_v41 = vld [vmem:[#allocation160_spill] sm:$0xff]  ;;  %v19031_v20 = vld [vmem:[#allocation145_spill] sm:$0xff]  ;;  %v19032_v58 = vmax.f32 %v16231_v49, 0.0  ;;  %v19033_v23 = vmax.f32 %v16247_v17, 0.0 }
 0x871   :  { %5820 = vmatprep.subr.bf16.mxu0 %v5756_v0  ;;  %v10697_v0 = vcombine.high %v19025_v19, %v19024_v41  ;;  %v5762_v40 = vpack.c.bf16 %v19027_v30, %v19026_v22  ;;  %v5761_v34 = vpack.c.bf16 %v19029_v45, %v19028_v32  ;;  %v10687_v3 = vcombine.high %v19031_v20, %v19030_v11  ;;  %v19060_v60 = vld [vmem:[#allocation205_spill] sm:$0xff]  ;;  %v19063_v22 = vld [vmem:[#allocation190_spill] sm:$0xff] }
 0x872   :  { %v5766_v16 = vpack.c.bf16 %v19019_v38, %v19018_v4  ;;  %v5758_v6 = vpack.c.bf16 %v19033_v23, %v19032_v58  ;;  %v19034_v51 = vmax.f32 %v16223_v31, 0.0  ;;  %v19040_v49 = vmax.f32 %v19039_v27, 0.0  ;;  %v19055_v4 = vld [vmem:[#allocation230_spill] sm:$0xff]  ;;  %v19056_v38 = vld [vmem:[#allocation225_spill] sm:$0xff]  ;;  %v19074_v27 = vld [vmem:[#allocation315_spill] sm:$0xff] }
 0x873   :  { %7531 = vmatpush1.bf16.msra.mxu1 %v10586_v55  ;;  %v19035_v55 = vld [vmem:[#allocation566_spill] sm:$0xff]  ;;  %v19044_v31 = vmax.f32 %v19043_v43, 0.0  ;;  %v10786_v7 = vcombine.low %v19050_v21, %v19049_v57  ;;  %v19064_v30 = vld [vmem:[#allocation185_spill] sm:$0xff] }
 0x874   :  { %5821 = vmatpush1.bf16.msra.mxu0 %v5755_v39  ;;  %7532 = vmatprep.subr.bf16.mxu1 %v10577_v52  ;;  %v10696_v39 = vcombine.low %v19025_v19, %v19024_v41  ;;  %v19036_v50 = vmax.f32 %v19035_v55, 0.0  ;;  %v19041_v52 = vld [vmem:[#allocation561_spill] sm:$0xff]  ;;  %v19061_v41 = vld [vmem:[#allocation200_spill] sm:$0xff]  ;;  %v19062_v19 = vld [vmem:[#allocation195_spill] sm:$0xff] }
 0x875   :  { %5822 = vmatprep.subr.bf16.mxu0 %v5752_v14  ;;  %v10686_v14 = vcombine.low %v19031_v20, %v19030_v11  ;;  %v19042_v17 = vmax.f32 %v19041_v52, 0.0  ;;  %v19065_v32 = vld [vmem:[#allocation110_spill] sm:$0xff]  ;;  %v19066_v45 = vld [vmem:[#allocation105_spill] sm:$0xff]  ;;  %v19067_v11 = vld [vmem:[#allocation180_spill] sm:$0xff] }
 0x876   :  { %v5757_v1 = vpack.c.bf16 %v19036_v50, %v19034_v51  ;;  %v19068_v20 = vld [vmem:[#allocation175_spill] sm:$0xff]  ;;  %v10646_v58 = vcombine.low %v19066_v45, %v19065_v32  ;;  %v19071_v55 = vld [vmem:[#allocation330_spill] sm:$0xff]  ;;  %v19072_v50 = vld [vmem:[#allocation325_spill] sm:$0xff] }
 0x877   :  { %7533 = vmatpush1.bf16.msra.mxu1 %v10576_v54  ;;  %v10716_v23 = vcombine.low %v19068_v20, %v19067_v11  ;;  %v19075_v52 = vld [vmem:[#allocation91_spill] sm:$0xff]  ;;  %v19077_v43 = vld [vmem:[#allocation310_spill] sm:$0xff] }
 0x878   :  { %5823 = vmatpush1.bf16.msra.mxu0 %v5751_v13  ;;  %7534 = vmatprep.subr.bf16.mxu1 %v10567_v10  ;;  %v19038_v13 = vld [vmem:[#allocation135_spill] sm:$0xff]  ;;  %v19048_v10 = vld [vmem:[#allocation125_spill] sm:$0xff] }
 0x879   :  { %10553 = vmatprep.subr.msk.bf16.mxu0 %vm3732_vm4, %v5778_v26  ;;  %v10677_v15 = vcombine.high %v19038_v13, %v19037_v18  ;;  %v5754_v26 = vpack.c.bf16 %v19042_v17, %v19040_v49  ;;  %v10676_v54 = vcombine.low %v19038_v13, %v19037_v18  ;;  %v10666_v9 = vcombine.low %v19048_v10, %v19047_v56  ;;  %v19076_v17 = vld [vmem:[#allocation86_spill] sm:$0xff] }
 0x87a   :  { %v10866_v13 = vcombine.low %v19072_v50, %v19071_v55 }
 0x87b   :  { %10551 = vmatmul.mubr.msk.bf16.vlgmr.msra.gmra.mxu0 %vm5789_vm5, %v16438_v42  ;;  %7535 = vmatpush1.bf16.msra.mxu1 %v10566_v2  ;;  %v10667_v2 = vcombine.high %v19048_v10, %v19047_v56  ;;  %v19080_v56 = vld [vmem:[#allocation295_spill] sm:$0xff] }
 0x87c   :  { %5864 = vmatpush1.bf16.msra.mxu0 %v5803_v28  ;;  %5850 = vmatprep.mubr.bf16.mxu0 %v18960_v12  ;;  %v19015_v28 = vmax.f32 %v16341_v62, 0.0  ;;  %v19020_v62 = vld [vmem:[#allocation170_spill] sm:$0xff] }
 0x87d   :  { %5865 = vmatprep.subr.bf16.mxu0 %v5774_v36  ;;  %7536 = vmatprep.subr.bf16.mxu1 %v10557_v53  ;;  %v10707_v5 = vcombine.high %v19021_v29, %v19020_v62  ;;  %v10706_v8 = vcombine.low %v19021_v29, %v19020_v62  ;;  %v19046_v36 = vmax.f32 %v19045_v59, 0.0  ;;  %v19051_v53 = vld [vmem:[#allocation240_spill] sm:$0xff]  ;;  %v19058_v29 = vld [vmem:[#allocation215_spill] sm:$0xff] }
 0x87e   :  { %v5770_v61 = vpack.c.bf16 %v19015_v28, %v19014_v63  ;;  %v19052_v63 = vld [vmem:[#allocation235_spill] sm:$0xff]  ;;  %v19057_v62 = vld [vmem:[#allocation220_spill] sm:$0xff] }
 0x87f   :  { %7537 = vmatpush1.bf16.msra.mxu1 %v10556_v48  ;;  %v5753_v47 = vpack.c.bf16 %v19046_v36, %v19044_v31  ;;  %v10777_v28 = vcombine.high %v19052_v63, %v19051_v53  ;;  %v19054_v48 = vld [vmem:[#allocation115_spill] sm:$0xff]  ;;  %v19078_v31 = vld [vmem:[#allocation305_spill] sm:$0xff] }
 0x880   :  { %5866 = vmatpush1.bf16.msra.mxu0 %v5773_v44  ;;  %7538 = vmatprep.subr.bf16.mxu1 %v10707_v5  ;;  %v10787_v44 = vcombine.high %v19050_v21, %v19049_v57  ;;  %v10757_v5 = vcombine.high %v19058_v29, %v19057_v62  ;;  %v10847_v59 = vcombine.high %v19078_v31, %v19077_v43  ;;  %v19081_v57 = vld [vmem:[#allocation290_spill] sm:$0xff]  ;;  %v19082_v21 = vld [vmem:[#allocation285_spill] sm:$0xff] }
 0x881   :  { %5867 = vmatprep.subr.bf16.mxu0 %v5770_v61  ;;  %v19053_v61 = vld [vmem:[#allocation120_spill] sm:$0xff]  ;;  %v10846_v36 = vcombine.low %v19078_v31, %v19077_v43 }
 0x882   :  { %v10657_v25 = vcombine.high %v19054_v48, %v19053_v61  ;;  %v10656_v33 = vcombine.low %v19054_v48, %v19053_v61  ;;  %v19085_v61 = vld [vmem:[#allocation270_spill] sm:$0xff]  ;;  %v19086_v48 = vld [vmem:[#allocation265_spill] sm:$0xff] }
 0x883   :  { %10552 = vmatmul.mubr.msk.bf16.gmra.mxu0 %vm5789_vm5, %v16463_v35  ;;  %7539 = vmatpush2.bf16.msra.mxu1 %v10706_v8  ;;  %v19059_v8 = vld [vmem:[#allocation210_spill] sm:$0xff] }
 0x884   :  { %5868 = vmatpush1.bf16.msra.mxu0 %v5769_v37  ;;  %5893 = vmatprep.mubr.bf16.mxu0 %v18960_v12  ;;  %v10776_v37 = vcombine.low %v19052_v63, %v19051_v53  ;;  %v10747_v24 = vcombine.high %v19060_v60, %v19059_v8  ;;  %v19084_v53 = vld [vmem:[#allocation275_spill] sm:$0xff] }
 0x885   :  { %5869 = vmatprep.subr.bf16.mxu0 %v5766_v16  ;;  %7540 = vmatprep.subr.bf16.mxu1 %v10697_v0  ;;  %v10767_v16 = vcombine.high %v19056_v38, %v19055_v4  ;;  %v10737_v0 = vcombine.high %v19062_v19, %v19061_v41 }
 0x887   :  { %7541 = vmatpush2.bf16.msra.mxu1 %v10696_v39  ;;  %v10726_v39 = vcombine.low %v19064_v30, %v19063_v22 }
 0x888   :  { %5870 = vmatpush1.bf16.msra.mxu0 %v5765_v46  ;;  %7542 = vmatprep.subr.bf16.mxu1 %v10687_v3  ;;  %v10746_v46 = vcombine.low %v19060_v60, %v19059_v8  ;;  %v10717_v3 = vcombine.high %v19068_v20, %v19067_v11 }
 0x889   :  { %5871 = vmatprep.subr.bf16.mxu0 %v5762_v40  ;;  %v10727_v40 = vcombine.high %v19064_v30, %v19063_v22 }
 0x88b   :  { %7543 = vmatpush2.bf16.msra.mxu1 %v10686_v14  ;;  %v19070_v14 = vld [vmem:[#allocation95_spill] sm:$0xff] }
 0x88c   :  { %5872 = vmatpush1.bf16.msra.mxu0 %v5761_v34  ;;  %7544 = vmatprep.subr.bf16.mxu1 %v10677_v15  ;;  %v10647_v34 = vcombine.high %v19066_v45, %v19065_v32  ;;  %v19073_v15 = vld [vmem:[#allocation320_spill] sm:$0xff]  ;;  %v19093_v32 = vld [vmem:[#allocation71_spill] sm:$0xff]  ;;  %v19094_v45 = vld [vmem:[#allocation66_spill] sm:$0xff] }
 0x88d   :  { %5873 = vmatprep.subr.bf16.mxu0 %v5758_v6  ;;  %v19069_v6 = vld [vmem:[#allocation100_spill] sm:$0xff]  ;;  %v10857_v49 = vcombine.high %v19074_v27, %v19073_v15 }
 0x88e   :  { %v10637_v51 = vcombine.high %v19070_v14, %v19069_v6  ;;  %v10636_v18 = vcombine.low %v19070_v14, %v19069_v6  ;;  %v19096_v6 = vld [vmem:[#allocation56_spill] sm:$0xff] }
 0x88f   :  { %7545 = vmatpush2.bf16.msra.mxu1 %v10676_v54  ;;  %v10856_v54 = vcombine.low %v19074_v27, %v19073_v15  ;;  %v19100_v15 = vld [vmem:[#allocation36_spill] sm:$0xff] }
 0x890   :  { %5874 = vmatpush1.bf16.msra.mxu0 %v5757_v1  ;;  %7546 = vmatprep.subr.bf16.mxu1 %v10667_v2  ;;  %v10867_v1 = vcombine.high %v19072_v50, %v19071_v55  ;;  %v19097_v55 = vld [vmem:[#allocation51_spill] sm:$0xff]  ;;  %v19098_v50 = vld [vmem:[#allocation46_spill] sm:$0xff] }
 0x891   :  { %5875 = vmatprep.subr.bf16.mxu0 %v5754_v26  ;;  %v10629_v26 = vcombine.high %v19076_v17, %v19075_v52 }
 0x893   :  { %7547 = vmatpush2.bf16.msra.mxu1 %v10666_v9  ;;  %v10826_v9 = vcombine.low %v19082_v21, %v19081_v57 }
 0x894   :  { %5876 = vmatpush1.bf16.msra.mxu0 %v5753_v47  ;;  %7548 = vmatprep.subr.bf16.mxu1 %v10657_v25  ;;  %v19079_v47 = vld [vmem:[#allocation300_spill] sm:$0xff]  ;;  %v10807_v25 = vcombine.high %v19086_v48, %v19085_v61 }
 0x895   :  { %7575 = vmatprep.subr.bf16.mxu0 %v10787_v44  ;;  %v10837_v10 = vcombine.high %v19080_v56, %v19079_v47  ;;  %v10836_v2 = vcombine.low %v19080_v56, %v19079_v47  ;;  %v10827_v44 = vcombine.high %v19082_v21, %v19081_v57  ;;  %v19104_v47 = vld [vmem:[#allocation16_spill] sm:$0xff] }
 0x897   :  { %10554 = vmatmul.mubr.msk.bf16.vlgmr.msra.gmra.mxu0 %vm5789_vm5, %v16438_v42  ;;  %7549 = vmatpush2.bf16.msra.mxu1 %v10656_v33  ;;  %v10766_v42 = vcombine.low %v19056_v38, %v19055_v4  ;;  %v10806_v33 = vcombine.low %v19086_v48, %v19085_v61  ;;  %v19088_v4 = vld [vmem:[#allocation255_spill] sm:$0xff]  ;;  %v19108_v61 = vld [vmem:[#allocation236_spill] sm:$0xff] }
 0x898   :  { %5903 = vmatprep.mubr.bf16.mxu0 %v18960_v12  ;;  %7576 = vmatpush1.bf16.msra.mxu0 %v10786_v7  ;;  %v10756_v12 = vcombine.low %v19058_v29, %v19057_v62  ;;  %v19083_v7 = vld [vmem:[#allocation280_spill] sm:$0xff]  ;;  %v19090_v62 = vld [vmem:[#allocation246_spill] sm:$0xff] }
 0x899   :  { %7577 = vmatprep.subr.bf16.mxu0 %v10777_v28  ;;  %7550 = vmatprep.subr.bf16.mxu1 %v10647_v34  ;;  %v10817_v63 = vcombine.high %v19084_v53, %v19083_v7  ;;  %v10816_v28 = vcombine.low %v19084_v53, %v19083_v7  ;;  %v10609_v34 = vcombine.high %v19094_v45, %v19093_v32  ;;  %v19105_v7 = vld [vmem:[#allocation171_spill] sm:$0xff]  ;;  %v19106_v53 = vld [vmem:[#allocation166_spill] sm:$0xff] }
 0x89b   :  { %7551 = vmatpush2.bf16.msra.mxu1 %v10646_v58  ;;  %v10608_v58 = vcombine.low %v19094_v45, %v19093_v32 }
 0x89c   :  { %7578 = vmatpush1.bf16.msra.mxu0 %v10776_v37  ;;  %7552 = vmatprep.subr.bf16.mxu1 %v10637_v51  ;;  %v19087_v37 = vld [vmem:[#allocation260_spill] sm:$0xff] }
 0x89d   :  { %7579 = vmatprep.subr.bf16.mxu0 %v10767_v16  ;;  %v10797_v38 = vcombine.high %v19088_v4, %v19087_v37  ;;  %v10796_v16 = vcombine.low %v19088_v4, %v19087_v37 }
 0x89f   :  { %10555 = vmatmul.mubr.msk.bf16.gmra.mxu0 %vm5789_vm5, %v16463_v35  ;;  %v10736_v35 = vcombine.low %v19062_v19, %v19061_v41  ;;  %7553 = vmatpush2.bf16.msra.mxu1 %v10636_v18  ;;  %v10588_v18 = vcombine.low %v19098_v50, %v19097_v55 }
 0x8a0   :  { %7580 = vmatpush1.bf16.msra.mxu0 %v10766_v42  ;;  %7628 = vmatprep.subr.bf16.mxu1 %v10629_v26  ;;  %v19089_v42 = vld [vmem:[#allocation251_spill] sm:$0xff]  ;;  %v19102_v26 = vld [vmem:[#allocation26_spill] sm:$0xff] }
 0x8a1   :  { %7581 = vmatprep.subr.bf16.mxu0 %v10757_v5  ;;  %v10789_v29 = vcombine.high %v19090_v62, %v19089_v42  ;;  %v10788_v21 = vcombine.low %v19090_v62, %v19089_v42  ;;  %v19111_v62 = vld [vmem:[#allocation231_spill] sm:$0xff] }
 0x8a4   :  { %7582 = vmatpush1.bf16.msra.mxu0 %v10756_v12 }
 0x8a5   :  { %7583 = vmatprep.subr.bf16.mxu0 %v10747_v24 }
 0x8a8   :  { %7584 = vmatpush1.bf16.msra.mxu0 %v10746_v46  ;;  %v10628_v46 = vcombine.low %v19076_v17, %v19075_v52  ;;  %v19101_v17 = vld [vmem:[#allocation31_spill] sm:$0xff] }
 0x8a9   :  { %7585 = vmatprep.subr.bf16.mxu0 %v10737_v0  ;;  %v19091_v0 = vld [vmem:[#allocation81_spill] sm:$0xff]  ;;  %v10568_v31 = vcombine.low %v19102_v26, %v19101_v17 }
 0x8ac   :  { %7586 = vmatpush1.bf16.msra.mxu0 %v10736_v35  ;;  %v19092_v35 = vld [vmem:[#allocation76_spill] sm:$0xff] }
 0x8ad   :  { %7587 = vmatprep.subr.bf16.mxu0 %v10727_v40  ;;  %v10619_v22 = vcombine.high %v19092_v35, %v19091_v0  ;;  %v10618_v40 = vcombine.low %v19092_v35, %v19091_v0  ;;  %v19113_v0 = vld [vmem:[#allocation151_spill] sm:$0xff]  ;;  %v19114_v35 = vld [vmem:[#allocation146_spill] sm:$0xff] }
 0x8ae   :  { %v10688_v32 = vcombine.low %v19114_v35, %v19113_v0 }
 0x8b0   :  { %7588 = vmatpush1.bf16.msra.mxu0 %v10726_v39 }
 0x8b1   :  { %7589 = vmatprep.subr.bf16.mxu0 %v10717_v3 }
 0x8b4   :  { %7590 = vmatpush1.bf16.msra.mxu0 %v10716_v23  ;;  %v19095_v23 = vld [vmem:[#allocation61_spill] sm:$0xff] }
 0x8b5   :  { %7591 = vmatprep.subr.bf16.mxu0 %v10867_v1  ;;  %v10599_v14 = vcombine.high %v19096_v6, %v19095_v23  ;;  %v10598_v51 = vcombine.low %v19096_v6, %v19095_v23  ;;  %v10589_v1 = vcombine.high %v19098_v50, %v19097_v55  ;;  %v19119_v23 = vld [vmem:[#allocation211_spill] sm:$0xff]  ;;  %v19120_v6 = vld [vmem:[#allocation206_spill] sm:$0xff] }
 0x8b6   :  { %v10748_v55 = vcombine.low %v19120_v6, %v19119_v23  ;;  %v19121_v50 = vld [vmem:[#allocation131_spill] sm:$0xff] }
 0x8b8   :  { %7592 = vmatpush2.bf16.msra.mxu0 %v10866_v13  ;;  %v19099_v13 = vld [vmem:[#allocation41_spill] sm:$0xff] }
 0x8b9   :  { %7593 = vmatprep.subr.bf16.mxu0 %v10857_v49  ;;  %v10579_v27 = vcombine.high %v19100_v15, %v19099_v13  ;;  %v10578_v49 = vcombine.low %v19100_v15, %v19099_v13  ;;  %v19123_v13 = vld [vmem:[#allocation201_spill] sm:$0xff]  ;;  %v19124_v15 = vld [vmem:[#allocation196_spill] sm:$0xff] }
 0x8bc   :  { %7594 = vmatpush2.bf16.msra.mxu0 %v10856_v54  ;;  %v10569_v54 = vcombine.high %v19102_v26, %v19101_v17  ;;  %v19125_v17 = vld [vmem:[#allocation121_spill] sm:$0xff]  ;;  %v19126_v26 = vld [vmem:[#allocation116_spill] sm:$0xff] }
 0x8bd   :  { %7595 = vmatprep.subr.bf16.mxu0 %v10847_v59 }
 0x8c0   :  { %7596 = vmatpush2.bf16.msra.mxu0 %v10846_v36  ;;  %v19103_v36 = vld [vmem:[#allocation21_spill] sm:$0xff] }
 0x8c1   :  { %7597 = vmatprep.subr.bf16.mxu0 %v10837_v10  ;;  %v10559_v56 = vcombine.high %v19104_v47, %v19103_v36  ;;  %v10558_v57 = vcombine.low %v19104_v47, %v19103_v36  ;;  %v10658_v36 = vcombine.low %v19126_v26, %v19125_v17 }
 0x8c4   :  { %7598 = vmatpush2.bf16.msra.mxu0 %v10836_v2 }
 0x8c5   :  { %7599 = vmatprep.subr.bf16.mxu0 %v10827_v44 }
 0x8c8   :  { %7600 = vmatpush2.bf16.msra.mxu0 %v10826_v9 }
 0x8c9   :  { %7601 = vmatprep.subr.bf16.mxu0 %v10817_v63  ;;  %v10709_v63 = vcombine.high %v19106_v53, %v19105_v7 }
 0x8cc   :  { %7602 = vmatpush2.bf16.msra.mxu0 %v10816_v28  ;;  %v19107_v28 = vld [vmem:[#allocation241_spill] sm:$0xff] }
 0x8cd   :  { %7603 = vmatprep.subr.bf16.mxu0 %v10807_v25  ;;  %v10779_v48 = vcombine.high %v19108_v61, %v19107_v28  ;;  %v10778_v37 = vcombine.low %v19108_v61, %v19107_v28  ;;  %v19133_v28 = vld [vmem:[#allocation101_spill] sm:$0xff]  ;;  %v19134_v61 = vld [vmem:[#allocation96_spill] sm:$0xff] }
 0x8d0   :  { %7604 = vmatpush2.bf16.msra.mxu0 %v10806_v33  ;;  %v10708_v33 = vcombine.low %v19106_v53, %v19105_v7 }
 0x8d1   :  { %7605 = vmatprep.subr.bf16.mxu0 %v10797_v38  ;;  %v19109_v38 = vld [vmem:[#allocation161_spill] sm:$0xff] }
 0x8d4   :  { %7606 = vmatpush2.bf16.msra.mxu0 %v10796_v16  ;;  %v19110_v16 = vld [vmem:[#allocation156_spill] sm:$0xff] }
 0x8d5   :  { %7681 = vmatprep.subr.bf16.mxu0 %v10789_v29  ;;  %v10699_v42 = vcombine.high %v19110_v16, %v19109_v38  ;;  %v19112_v29 = vld [vmem:[#allocation226_spill] sm:$0xff] }
 0x93b   :  { %v5842_v5 = vpop.f32.mrf.mxu0 }
 0x93d   :  { %v5844_v12 = vpop.f32.mrf.mxu0 }
 0x93f   :  { %v5846_v8 = vpop.f32.mrf.mxu0 }
 0x940   :  { %v16619_v41 = vpack.c.bf16 %v5846_v8, %v5842_v5  ;;  %v10769_v5 = vcombine.high %v19112_v29, %v19111_v62 }
 0x941   :  { %v5848_v60 = vpop.f32.mrf.mxu0 }
 0x942   :  { %v16615_v24 = vpack.c.bf16 %v5848_v60, %v5844_v12 }
 0x943   :  { %v5852_v19 = vpop.f32.mrf.mxu0 }
 0x944   :  { %7554 = vmatprep.mubr.bf16.mxu1 %v16615_v24 }
 0x945   :  { %v5854_v30 = vpop.f32.mrf.mxu0  ;;  %7555 = vmatmul.mubr.bf16.vlgmr.msra.gmra.mxu1 %v16619_v41 }
 0x946   :  { %7629 = vmatpush1.bf16.msra.mxu1 %v10628_v46  ;;  %v10698_v46 = vcombine.low %v19110_v16, %v19109_v38  ;;  %v19137_v16 = vld [vmem:[#allocation321_spill] sm:$0xff] }
 0x947   :  { %v5856_v39 = vpop.f32.mrf.mxu0  ;;  %7630 = vmatprep.subr.bf16.mxu1 %v10619_v22  ;;  %v10689_v22 = vcombine.high %v19114_v35, %v19113_v0  ;;  %v19141_v0 = vld [vmem:[#allocation311_spill] sm:$0xff]  ;;  %v19142_v35 = vld [vmem:[#allocation306_spill] sm:$0xff] }
 0x948   :  { %v16629_v11 = vpack.c.bf16 %v5856_v39, %v5852_v19  ;;  %v10768_v19 = vcombine.low %v19112_v29, %v19111_v62  ;;  %v19139_v29 = vld [vmem:[#allocation92_spill] sm:$0xff] }
 0x949   :  { %v5858_v20 = vpop.f32.mrf.mxu0 }
 0x94a   :  { %v16631_v3 = vpack.c.bf16 %v5858_v20, %v5854_v30  ;;  %7631 = vmatpush1.bf16.msra.mxu1 %v10618_v40  ;;  %v19115_v30 = vld [vmem:[#allocation221_spill] sm:$0xff]  ;;  %v19116_v40 = vld [vmem:[#allocation216_spill] sm:$0xff] }
 0x94b   :  { %7632 = vmatprep.subr.bf16.mxu1 %v10609_v34  ;;  %v10759_v39 = vcombine.high %v19116_v40, %v19115_v30  ;;  %v10758_v45 = vcombine.low %v19116_v40, %v19115_v30  ;;  %v19117_v34 = vld [vmem:[#allocation141_spill] sm:$0xff]  ;;  %v19118_v20 = vld [vmem:[#allocation136_spill] sm:$0xff]  ;;  %v19143_v30 = vld [vmem:[#allocation82_spill] sm:$0xff] }
 0x94c   :  { %7564 = vmatprep.mubr.bf16.mxu1 %v16631_v3  ;;  %v19144_v40 = vld [vmem:[#allocation77_spill] sm:$0xff] }
 0x94d   :  { %7565 = vmatmul.mubr.bf16.gmra.mxu1 %v16629_v11 }
 0x94e   :  { %7633 = vmatpush1.bf16.msra.mxu1 %v10608_v58  ;;  %7660 = vmatprep.mubr.bf16.mxu1 %v16615_v24  ;;  %v10679_v58 = vcombine.high %v19118_v20, %v19117_v34 }
 0x94f   :  { %7634 = vmatprep.subr.bf16.mxu1 %v10599_v14  ;;  %v10749_v14 = vcombine.high %v19120_v6, %v19119_v23  ;;  %v19147_v23 = vld [vmem:[#allocation72_spill] sm:$0xff]  ;;  %v19148_v6 = vld [vmem:[#allocation67_spill] sm:$0xff] }
 0x952   :  { %7635 = vmatpush1.bf16.msra.mxu1 %v10598_v51  ;;  %v10678_v51 = vcombine.low %v19118_v20, %v19117_v34  ;;  %v19145_v34 = vld [vmem:[#allocation301_spill] sm:$0xff]  ;;  %v19146_v20 = vld [vmem:[#allocation296_spill] sm:$0xff] }
 0x953   :  { %7636 = vmatprep.subr.bf16.mxu1 %v10589_v1  ;;  %v19122_v1 = vld [vmem:[#allocation126_spill] sm:$0xff] }
 0x956   :  { %7637 = vmatpush1.bf16.msra.mxu1 %v10588_v18  ;;  %v10669_v18 = vcombine.high %v19122_v1, %v19121_v50 }
 0x957   :  { %v5895_v52 = vpop.f32.mrf.mxu0  ;;  %7638 = vmatprep.subr.bf16.mxu1 %v10579_v27  ;;  %v10739_v27 = vcombine.high %v19124_v15, %v19123_v13 }
 0x959   :  { %v5897_v43 = vpop.f32.mrf.mxu0 }
 0x95a   :  { %7639 = vmatpush1.bf16.msra.mxu1 %v10578_v49  ;;  %v10668_v49 = vcombine.low %v19122_v1, %v19121_v50  ;;  %v19149_v50 = vld [vmem:[#allocation291_spill] sm:$0xff]  ;;  %v19150_v1 = vld [vmem:[#allocation286_spill] sm:$0xff] }
 0x95b   :  { %v5899_v59 = vpop.f32.mrf.mxu0  ;;  %7640 = vmatprep.subr.bf16.mxu1 %v10569_v54  ;;  %v10659_v54 = vcombine.high %v19126_v26, %v19125_v17  ;;  %v19153_v17 = vld [vmem:[#allocation281_spill] sm:$0xff]  ;;  %v19154_v26 = vld [vmem:[#allocation276_spill] sm:$0xff] }
 0x95c   :  { %v16662_v44 = vpack.c.bf16 %v5899_v59, %v5895_v52  ;;  %v10738_v52 = vcombine.low %v19124_v15, %v19123_v13  ;;  %v19151_v13 = vld [vmem:[#allocation62_spill] sm:$0xff]  ;;  %v19152_v15 = vld [vmem:[#allocation57_spill] sm:$0xff] }
 0x95d   :  { %v5901_v10 = vpop.f32.mrf.mxu0 }
 0x95e   :  { %v16656_v2 = vpack.c.bf16 %v5901_v10, %v5897_v43  ;;  %7641 = vmatpush1.bf16.msra.mxu1 %v10568_v31  ;;  %v19127_v43 = vld [vmem:[#allocation191_spill] sm:$0xff]  ;;  %v19128_v31 = vld [vmem:[#allocation186_spill] sm:$0xff] }
 0x95f   :  { %v5905_v9 = vpop.f32.mrf.mxu0  ;;  %7642 = vmatprep.subr.bf16.mxu1 %v10559_v56  ;;  %v10729_v59 = vcombine.high %v19128_v31, %v19127_v43  ;;  %v10728_v47 = vcombine.low %v19128_v31, %v19127_v43  ;;  %v19129_v56 = vld [vmem:[#allocation111_spill] sm:$0xff]  ;;  %v19130_v10 = vld [vmem:[#allocation106_spill] sm:$0xff]  ;;  %v19155_v43 = vld [vmem:[#allocation52_spill] sm:$0xff] }
 0x960   :  { %7607 = vmatprep.mubr.bf16.mxu0 %v16656_v2  ;;  %v10648_v53 = vcombine.low %v19130_v10, %v19129_v56  ;;  %v19156_v31 = vld [vmem:[#allocation47_spill] sm:$0xff] }
 0x961   :  { %v5907_v25 = vpop.f32.mrf.mxu0  ;;  %7608 = vmatmul.mubr.bf16.vlgmr.msra.gmra.mxu0 %v16662_v44 }
 0x962   :  { %7643 = vmatpush1.bf16.msra.mxu1 %v10558_v57  ;;  %7682 = vmatpush1.bf16.msra.mxu0 %v10788_v21  ;;  %v10649_v57 = vcombine.high %v19130_v10, %v19129_v56  ;;  %v19131_v21 = vld [vmem:[#allocation181_spill] sm:$0xff]  ;;  %v19157_v56 = vld [vmem:[#allocation271_spill] sm:$0xff]  ;;  %v19158_v10 = vld [vmem:[#allocation266_spill] sm:$0xff] }
 0x963   :  { %v5909_v4 = vpop.f32.mrf.mxu0  ;;  %7644 = vmatprep.subr.bf16.mxu1 %v10709_v63  ;;  %7683 = vmatprep.subr.bf16.mxu0 %v10779_v48  ;;  %v10639_v48 = vcombine.high %v19134_v61, %v19133_v28 }
 0x964   :  { %v16678_v12 = vpack.c.bf16 %v5909_v4, %v5905_v9  ;;  %v19132_v9 = vld [vmem:[#allocation176_spill] sm:$0xff]  ;;  %v10638_v4 = vcombine.low %v19134_v61, %v19133_v28  ;;  %v19161_v28 = vld [vmem:[#allocation261_spill] sm:$0xff] }
 0x965   :  { %v5911_v8 = vpop.f32.mrf.mxu0  ;;  %v10719_v7 = vcombine.high %v19132_v9, %v19131_v21  ;;  %v10718_v63 = vcombine.low %v19132_v9, %v19131_v21  ;;  %v19159_v21 = vld [vmem:[#allocation42_spill] sm:$0xff]  ;;  %v19160_v9 = vld [vmem:[#allocation37_spill] sm:$0xff]  ;;  %v19162_v61 = vld [vmem:[#allocation256_spill] sm:$0xff] }
 0x966   :  { %v16680_v60 = vpack.c.bf16 %v5911_v8, %v5907_v25  ;;  %7645 = vmatpush2.bf16.msra.mxu1 %v10708_v33  ;;  %7684 = vmatpush1.bf16.msra.mxu0 %v10778_v37  ;;  %v19135_v25 = vld [vmem:[#allocation331_spill] sm:$0xff]  ;;  %v19136_v33 = vld [vmem:[#allocation326_spill] sm:$0xff] }
 0x967   :  { %7646 = vmatprep.subr.bf16.mxu1 %v10699_v42  ;;  %7685 = vmatprep.subr.bf16.mxu0 %v10769_v5  ;;  %v10869_v37 = vcombine.high %v19136_v33, %v19135_v25  ;;  %v10868_v38 = vcombine.low %v19136_v33, %v19135_v25  ;;  %v19138_v42 = vld [vmem:[#allocation316_spill] sm:$0xff]  ;;  %v19140_v5 = vld [vmem:[#allocation87_spill] sm:$0xff] }
 0x968   :  { %7617 = vmatprep.mubr.bf16.mxu0 %v16680_v60  ;;  %v10859_v62 = vcombine.high %v19138_v42, %v19137_v16  ;;  %v10631_v8 = vcombine.high %v19140_v5, %v19139_v29  ;;  %v19163_v25 = vld [vmem:[#allocation32_spill] sm:$0xff]  ;;  %v19164_v33 = vld [vmem:[#allocation27_spill] sm:$0xff] }
 0x969   :  { %7618 = vmatmul.mubr.bf16.gmra.mxu0 %v16678_v12 }
 0x96a   :  { %7647 = vmatpush2.bf16.msra.mxu1 %v10698_v46  ;;  %7686 = vmatpush1.bf16.msra.mxu0 %v10768_v19  ;;  %v10858_v46 = vcombine.low %v19138_v42, %v19137_v16  ;;  %v10630_v19 = vcombine.low %v19140_v5, %v19139_v29  ;;  %v19165_v16 = vld [vmem:[#allocation252_spill] sm:$0xff]  ;;  %v19166_v42 = vld [vmem:[#allocation247_spill] sm:$0xff]  ;;  %v19167_v29 = vld [vmem:[#allocation22_spill] sm:$0xff] }
 0x96b   :  { %7713 = vmatprep.mubr.bf16.mxu0 %v16656_v2  ;;  %7648 = vmatprep.subr.bf16.mxu1 %v10689_v22  ;;  %v10849_v22 = vcombine.high %v19142_v35, %v19141_v0  ;;  %v19168_v5 = vld [vmem:[#allocation17_spill] sm:$0xff] }
 0x96c   :  { %7687 = vmatprep.subr.bf16.mxu0 %v10759_v39  ;;  %v10621_v39 = vcombine.high %v19144_v40, %v19143_v30 }
 0x96e   :  { %7649 = vmatpush2.bf16.msra.mxu1 %v10688_v32  ;;  %7688 = vmatpush1.bf16.msra.mxu0 %v10758_v45  ;;  %v10848_v32 = vcombine.low %v19142_v35, %v19141_v0  ;;  %v10620_v45 = vcombine.low %v19144_v40, %v19143_v30  ;;  %v19169_v0 = vld [vmem:[#allocation242_spill] sm:$0xff]  ;;  %v19170_v35 = vld [vmem:[#allocation237_spill] sm:$0xff]  ;;  %v19171_v30 = vld [vmem:[#allocation172_spill] sm:$0xff] }
 0x96f   :  { %7650 = vmatprep.subr.bf16.mxu1 %v10679_v58  ;;  %7689 = vmatprep.subr.bf16.mxu0 %v10749_v14  ;;  %v10839_v58 = vcombine.high %v19146_v20, %v19145_v34  ;;  %v10611_v14 = vcombine.high %v19148_v6, %v19147_v23  ;;  %v19172_v40 = vld [vmem:[#allocation167_spill] sm:$0xff] }
 0x972   :  { %7651 = vmatpush2.bf16.msra.mxu1 %v10678_v51  ;;  %7690 = vmatpush1.bf16.msra.mxu0 %v10748_v55  ;;  %v10838_v51 = vcombine.low %v19146_v20, %v19145_v34  ;;  %v10610_v55 = vcombine.low %v19148_v6, %v19147_v23  ;;  %v19173_v34 = vld [vmem:[#allocation232_spill] sm:$0xff]  ;;  %v19174_v20 = vld [vmem:[#allocation227_spill] sm:$0xff]  ;;  %v19175_v23 = vld [vmem:[#allocation162_spill] sm:$0xff] }
 0x973   :  { %7652 = vmatprep.subr.bf16.mxu1 %v10669_v18  ;;  %7691 = vmatprep.subr.bf16.mxu0 %v10739_v27  ;;  %v10829_v18 = vcombine.high %v19150_v1, %v19149_v50  ;;  %v10601_v27 = vcombine.high %v19152_v15, %v19151_v13  ;;  %v19176_v6 = vld [vmem:[#allocation157_spill] sm:$0xff] }
 0x976   :  { %7653 = vmatpush2.bf16.msra.mxu1 %v10668_v49  ;;  %7692 = vmatpush1.bf16.msra.mxu0 %v10738_v52  ;;  %v10828_v49 = vcombine.low %v19150_v1, %v19149_v50  ;;  %v10600_v52 = vcombine.low %v19152_v15, %v19151_v13  ;;  %v19177_v50 = vld [vmem:[#allocation222_spill] sm:$0xff]  ;;  %v19178_v1 = vld [vmem:[#allocation217_spill] sm:$0xff]  ;;  %v19179_v13 = vld [vmem:[#allocation152_spill] sm:$0xff] }
 0x977   :  { %7654 = vmatprep.subr.bf16.mxu1 %v10659_v54  ;;  %7693 = vmatprep.subr.bf16.mxu0 %v10729_v59  ;;  %v10819_v54 = vcombine.high %v19154_v26, %v19153_v17  ;;  %v10591_v59 = vcombine.high %v19156_v31, %v19155_v43  ;;  %v19180_v15 = vld [vmem:[#allocation147_spill] sm:$0xff] }
 0x97a   :  { %7655 = vmatpush2.bf16.msra.mxu1 %v10658_v36  ;;  %7694 = vmatpush1.bf16.msra.mxu0 %v10728_v47  ;;  %v10818_v36 = vcombine.low %v19154_v26, %v19153_v17  ;;  %v10590_v47 = vcombine.low %v19156_v31, %v19155_v43  ;;  %v19181_v17 = vld [vmem:[#allocation212_spill] sm:$0xff]  ;;  %v19182_v26 = vld [vmem:[#allocation207_spill] sm:$0xff]  ;;  %v19183_v43 = vld [vmem:[#allocation142_spill] sm:$0xff] }
 0x97b   :  { %7656 = vmatprep.subr.bf16.mxu1 %v10649_v57  ;;  %7695 = vmatprep.subr.bf16.mxu0 %v10719_v7  ;;  %v10809_v57 = vcombine.high %v19158_v10, %v19157_v56  ;;  %v10581_v7 = vcombine.high %v19160_v9, %v19159_v21  ;;  %v19184_v31 = vld [vmem:[#allocation137_spill] sm:$0xff] }
 0x97e   :  { %7657 = vmatpush2.bf16.msra.mxu1 %v10648_v53  ;;  %7696 = vmatpush1.bf16.msra.mxu0 %v10718_v63  ;;  %v10808_v53 = vcombine.low %v19158_v10, %v19157_v56  ;;  %v10580_v63 = vcombine.low %v19160_v9, %v19159_v21  ;;  %v19185_v56 = vld [vmem:[#allocation202_spill] sm:$0xff]  ;;  %v19186_v10 = vld [vmem:[#allocation197_spill] sm:$0xff]  ;;  %v19187_v21 = vld [vmem:[#allocation132_spill] sm:$0xff] }
 0x97f   :  { %7658 = vmatprep.subr.bf16.mxu1 %v10639_v48  ;;  %7697 = vmatprep.subr.bf16.mxu0 %v10869_v37  ;;  %v10799_v48 = vcombine.high %v19162_v61, %v19161_v28  ;;  %v10571_v37 = vcombine.high %v19164_v33, %v19163_v25  ;;  %v19188_v9 = vld [vmem:[#allocation127_spill] sm:$0xff] }
 0x982   :  { %7659 = vmatpush2.bf16.msra.mxu1 %v10638_v4  ;;  %7698 = vmatpush2.bf16.msra.mxu0 %v10868_v38  ;;  %v10798_v4 = vcombine.low %v19162_v61, %v19161_v28  ;;  %v10570_v38 = vcombine.low %v19164_v33, %v19163_v25  ;;  %v19189_v28 = vld [vmem:[#allocation192_spill] sm:$0xff]  ;;  %v19190_v61 = vld [vmem:[#allocation187_spill] sm:$0xff]  ;;  %v19191_v25 = vld [vmem:[#allocation122_spill] sm:$0xff] }
 0x983   :  { %7699 = vmatprep.subr.bf16.mxu0 %v10859_v62  ;;  %7734 = vmatprep.subr.bf16.mxu1 %v10631_v8  ;;  %v10791_v62 = vcombine.high %v19166_v42, %v19165_v16  ;;  %v10561_v8 = vcombine.high %v19168_v5, %v19167_v29  ;;  %v19192_v33 = vld [vmem:[#allocation117_spill] sm:$0xff] }
 0x985   :  { %7661 = vmatmul.mubr.bf16.vlgmr.msra.gmra.mxu1 %v16619_v41 }
 0x986   :  { %7670 = vmatprep.mubr.bf16.mxu1 %v16631_v3  ;;  %7700 = vmatpush2.bf16.msra.mxu0 %v10858_v46  ;;  %v10790_v46 = vcombine.low %v19166_v42, %v19165_v16  ;;  %v19193_v16 = vld [vmem:[#allocation182_spill] sm:$0xff]  ;;  %v19194_v42 = vld [vmem:[#allocation177_spill] sm:$0xff] }
 0x987   :  { %7735 = vmatpush1.bf16.msra.mxu1 %v10630_v19  ;;  %7701 = vmatprep.subr.bf16.mxu0 %v10849_v22  ;;  %v10560_v19 = vcombine.low %v19168_v5, %v19167_v29  ;;  %v10781_v22 = vcombine.high %v19170_v35, %v19169_v0  ;;  %v19195_v29 = vld [vmem:[#allocation112_spill] sm:$0xff]  ;;  %v19196_v5 = vld [vmem:[#allocation107_spill] sm:$0xff] }
 0x988   :  { %7736 = vmatprep.subr.bf16.mxu1 %v10621_v39  ;;  %v10711_v39 = vcombine.high %v19172_v40, %v19171_v30 }
 0x98a   :  { %7702 = vmatpush2.bf16.msra.mxu0 %v10848_v32  ;;  %v10780_v32 = vcombine.low %v19170_v35, %v19169_v0  ;;  %v19197_v0 = vld [vmem:[#allocation332_spill] sm:$0xff]  ;;  %v19198_v35 = vld [vmem:[#allocation327_spill] sm:$0xff] }
 0x98b   :  { %7737 = vmatpush1.bf16.msra.mxu1 %v10620_v45  ;;  %7703 = vmatprep.subr.bf16.mxu0 %v10839_v58  ;;  %v10710_v45 = vcombine.low %v19172_v40, %v19171_v30  ;;  %v10771_v58 = vcombine.high %v19174_v20, %v19173_v34  ;;  %v19199_v30 = vld [vmem:[#allocation102_spill] sm:$0xff]  ;;  %v19200_v40 = vld [vmem:[#allocation97_spill] sm:$0xff] }
 0x98c   :  { %7738 = vmatprep.subr.bf16.mxu1 %v10611_v14  ;;  %v10701_v14 = vcombine.high %v19176_v6, %v19175_v23 }
 0x98d   :  { %7671 = vmatmul.mubr.bf16.gmra.mxu1 %v16629_v11 }
 0x98e   :  { %7704 = vmatpush2.bf16.msra.mxu0 %v10838_v51  ;;  %7766 = vmatprep.mubr.bf16.mxu1 %v16615_v24  ;;  %v10770_v51 = vcombine.low %v19174_v20, %v19173_v34  ;;  %v19201_v34 = vld [vmem:[#allocation322_spill] sm:$0xff]  ;;  %v19202_v20 = vld [vmem:[#allocation317_spill] sm:$0xff] }
 0x98f   :  { %7739 = vmatpush1.bf16.msra.mxu1 %v10610_v55  ;;  %7705 = vmatprep.subr.bf16.mxu0 %v10829_v18  ;;  %v10700_v55 = vcombine.low %v19176_v6, %v19175_v23  ;;  %v10761_v18 = vcombine.high %v19178_v1, %v19177_v50  ;;  %v19203_v23 = vld [vmem:[#allocation93_spill] sm:$0xff]  ;;  %v19204_v6 = vld [vmem:[#allocation88_spill] sm:$0xff] }
 0x990   :  { %7740 = vmatprep.subr.bf16.mxu1 %v10601_v27  ;;  %v10691_v27 = vcombine.high %v19180_v15, %v19179_v13 }
 0x992   :  { %7706 = vmatpush2.bf16.msra.mxu0 %v10828_v49  ;;  %v10760_v49 = vcombine.low %v19178_v1, %v19177_v50  ;;  %v19205_v50 = vld [vmem:[#allocation312_spill] sm:$0xff]  ;;  %v19206_v1 = vld [vmem:[#allocation307_spill] sm:$0xff] }
 0x993   :  { %7741 = vmatpush1.bf16.msra.mxu1 %v10600_v52  ;;  %7707 = vmatprep.subr.bf16.mxu0 %v10819_v54  ;;  %v10690_v52 = vcombine.low %v19180_v15, %v19179_v13  ;;  %v10751_v54 = vcombine.high %v19182_v26, %v19181_v17  ;;  %v19207_v13 = vld [vmem:[#allocation83_spill] sm:$0xff]  ;;  %v19208_v15 = vld [vmem:[#allocation78_spill] sm:$0xff] }
 0x994   :  { %7742 = vmatprep.subr.bf16.mxu1 %v10591_v59  ;;  %v10681_v59 = vcombine.high %v19184_v31, %v19183_v43 }
 0x996   :  { %7708 = vmatpush2.bf16.msra.mxu0 %v10818_v36  ;;  %v10750_v36 = vcombine.low %v19182_v26, %v19181_v17  ;;  %v19209_v17 = vld [vmem:[#allocation302_spill] sm:$0xff]  ;;  %v19210_v26 = vld [vmem:[#allocation297_spill] sm:$0xff] }
 0x997   :  { %7743 = vmatpush1.bf16.msra.mxu1 %v10590_v47  ;;  %7709 = vmatprep.subr.bf16.mxu0 %v10809_v57  ;;  %v10680_v47 = vcombine.low %v19184_v31, %v19183_v43  ;;  %v10741_v57 = vcombine.high %v19186_v10, %v19185_v56  ;;  %v19211_v43 = vld [vmem:[#allocation73_spill] sm:$0xff]  ;;  %v19212_v31 = vld [vmem:[#allocation68_spill] sm:$0xff] }
 0x998   :  { %7744 = vmatprep.subr.bf16.mxu1 %v10581_v7  ;;  %v10671_v7 = vcombine.high %v19188_v9, %v19187_v21 }
 0x99a   :  { %7710 = vmatpush2.bf16.msra.mxu0 %v10808_v53  ;;  %v10740_v53 = vcombine.low %v19186_v10, %v19185_v56  ;;  %v19213_v56 = vld [vmem:[#allocation292_spill] sm:$0xff]  ;;  %v19214_v10 = vld [vmem:[#allocation287_spill] sm:$0xff] }
 0x99b   :  { %7745 = vmatpush1.bf16.msra.mxu1 %v10580_v63  ;;  %7711 = vmatprep.subr.bf16.mxu0 %v10799_v48  ;;  %v10670_v63 = vcombine.low %v19188_v9, %v19187_v21  ;;  %v10731_v48 = vcombine.high %v19190_v61, %v19189_v28  ;;  %v19215_v21 = vld [vmem:[#allocation63_spill] sm:$0xff]  ;;  %v19216_v9 = vld [vmem:[#allocation58_spill] sm:$0xff] }
 0x99c   :  { %7746 = vmatprep.subr.bf16.mxu1 %v10571_v37  ;;  %v10661_v37 = vcombine.high %v19192_v33, %v19191_v25 }
 0x99e   :  { %7712 = vmatpush2.bf16.msra.mxu0 %v10798_v4  ;;  %v10730_v4 = vcombine.low %v19190_v61, %v19189_v28  ;;  %v19217_v28 = vld [vmem:[#allocation282_spill] sm:$0xff]  ;;  %v19218_v61 = vld [vmem:[#allocation277_spill] sm:$0xff] }
 0x99f   :  { %7747 = vmatpush1.bf16.msra.mxu1 %v10570_v38  ;;  %7787 = vmatprep.subr.bf16.mxu0 %v10791_v62  ;;  %v10660_v38 = vcombine.low %v19192_v33, %v19191_v25  ;;  %v10721_v62 = vcombine.high %v19194_v42, %v19193_v16  ;;  %v19219_v25 = vld [vmem:[#allocation53_spill] sm:$0xff]  ;;  %v19220_v33 = vld [vmem:[#allocation48_spill] sm:$0xff] }
 0x9a0   :  { %7748 = vmatprep.subr.bf16.mxu1 %v10561_v8  ;;  %v10651_v8 = vcombine.high %v19196_v5, %v19195_v29 }
 0x9a1   :  { %7714 = vmatmul.mubr.bf16.vlgmr.msra.gmra.mxu0 %v16662_v44 }
 0x9a2   :  { %7723 = vmatprep.mubr.bf16.mxu0 %v16680_v60  ;;  %7788 = vmatpush1.bf16.msra.mxu0 %v10790_v46  ;;  %v10720_v46 = vcombine.low %v19194_v42, %v19193_v16  ;;  %v19221_v16 = vld [vmem:[#allocation272_spill] sm:$0xff]  ;;  %v19222_v42 = vld [vmem:[#allocation267_spill] sm:$0xff] }
 0x9a3   :  { %7749 = vmatpush1.bf16.msra.mxu1 %v10560_v19  ;;  %7789 = vmatprep.subr.bf16.mxu0 %v10781_v22  ;;  %v10650_v19 = vcombine.low %v19196_v5, %v19195_v29  ;;  %v10871_v22 = vcombine.high %v19198_v35, %v19197_v0  ;;  %v19223_v29 = vld [vmem:[#allocation43_spill] sm:$0xff]  ;;  %v19224_v5 = vld [vmem:[#allocation38_spill] sm:$0xff] }
 0x9a4   :  { %7750 = vmatprep.subr.bf16.mxu1 %v10711_v39  ;;  %v10641_v39 = vcombine.high %v19200_v40, %v19199_v30 }
 0x9a6   :  { %7790 = vmatpush1.bf16.msra.mxu0 %v10780_v32  ;;  %v10870_v32 = vcombine.low %v19198_v35, %v19197_v0  ;;  %v19225_v0 = vld [vmem:[#allocation262_spill] sm:$0xff]  ;;  %v19226_v35 = vld [vmem:[#allocation257_spill] sm:$0xff] }
 0x9a7   :  { %7751 = vmatpush2.bf16.msra.mxu1 %v10710_v45  ;;  %7791 = vmatprep.subr.bf16.mxu0 %v10771_v58  ;;  %v10640_v45 = vcombine.low %v19200_v40, %v19199_v30  ;;  %v10861_v58 = vcombine.high %v19202_v20, %v19201_v34  ;;  %v19227_v30 = vld [vmem:[#allocation33_spill] sm:$0xff]  ;;  %v19228_v40 = vld [vmem:[#allocation28_spill] sm:$0xff] }
 0x9a8   :  { %7752 = vmatprep.subr.bf16.mxu1 %v10701_v14  ;;  %v10633_v14 = vcombine.high %v19204_v6, %v19203_v23 }
 0x9a9   :  { %7724 = vmatmul.mubr.bf16.gmra.mxu0 %v16678_v12 }
 0x9aa   :  { %7792 = vmatpush1.bf16.msra.mxu0 %v10770_v51  ;;  %7819 = vmatprep.mubr.bf16.mxu0 %v16656_v2  ;;  %v10860_v51 = vcombine.low %v19202_v20, %v19201_v34  ;;  %v19229_v34 = vld [vmem:[#allocation253_spill] sm:$0xff]  ;;  %v19230_v20 = vld [vmem:[#allocation248_spill] sm:$0xff] }
 0x9ab   :  { %7753 = vmatpush2.bf16.msra.mxu1 %v10700_v55  ;;  %7793 = vmatprep.subr.bf16.mxu0 %v10761_v18  ;;  %v10632_v55 = vcombine.low %v19204_v6, %v19203_v23  ;;  %v10851_v18 = vcombine.high %v19206_v1, %v19205_v50  ;;  %v19231_v23 = vld [vmem:[#allocation23_spill] sm:$0xff]  ;;  %v19232_v6 = vld [vmem:[#allocation18_spill] sm:$0xff] }
 0x9ac   :  { %7754 = vmatprep.subr.bf16.mxu1 %v10691_v27  ;;  %v10623_v27 = vcombine.high %v19208_v15, %v19207_v13 }
 0x9ae   :  { %7794 = vmatpush1.bf16.msra.mxu0 %v10760_v49  ;;  %v10850_v49 = vcombine.low %v19206_v1, %v19205_v50  ;;  %v19233_v50 = vld [vmem:[#allocation243_spill] sm:$0xff]  ;;  %v19234_v1 = vld [vmem:[#allocation238_spill] sm:$0xff] }
 0x9af   :  { %7755 = vmatpush2.bf16.msra.mxu1 %v10690_v52  ;;  %7795 = vmatprep.subr.bf16.mxu0 %v10751_v54  ;;  %v10622_v52 = vcombine.low %v19208_v15, %v19207_v13  ;;  %v10841_v54 = vcombine.high %v19210_v26, %v19209_v17  ;;  %v19235_v13 = vld [vmem:[#allocation173_spill] sm:$0xff]  ;;  %v19236_v15 = vld [vmem:[#allocation168_spill] sm:$0xff] }
 0x9b0   :  { %7756 = vmatprep.subr.bf16.mxu1 %v10681_v59  ;;  %v10613_v59 = vcombine.high %v19212_v31, %v19211_v43 }
 0x9b2   :  { %7796 = vmatpush1.bf16.msra.mxu0 %v10750_v36  ;;  %v10840_v36 = vcombine.low %v19210_v26, %v19209_v17  ;;  %v19237_v17 = vld [vmem:[#allocation233_spill] sm:$0xff]  ;;  %v19238_v26 = vld [vmem:[#allocation228_spill] sm:$0xff] }
 0x9b3   :  { %7757 = vmatpush2.bf16.msra.mxu1 %v10680_v47  ;;  %7797 = vmatprep.subr.bf16.mxu0 %v10741_v57  ;;  %v10612_v47 = vcombine.low %v19212_v31, %v19211_v43  ;;  %v10831_v57 = vcombine.high %v19214_v10, %v19213_v56  ;;  %v19239_v43 = vld [vmem:[#allocation163_spill] sm:$0xff]  ;;  %v19240_v31 = vld [vmem:[#allocation158_spill] sm:$0xff] }
 0x9b4   :  { %7758 = vmatprep.subr.bf16.mxu1 %v10671_v7  ;;  %v10603_v7 = vcombine.high %v19216_v9, %v19215_v21 }
 0x9b6   :  { %7798 = vmatpush1.bf16.msra.mxu0 %v10740_v53  ;;  %v10830_v53 = vcombine.low %v19214_v10, %v19213_v56  ;;  %v19241_v56 = vld [vmem:[#allocation223_spill] sm:$0xff]  ;;  %v19242_v10 = vld [vmem:[#allocation218_spill] sm:$0xff] }
 0x9b7   :  { %7759 = vmatpush2.bf16.msra.mxu1 %v10670_v63  ;;  %7799 = vmatprep.subr.bf16.mxu0 %v10731_v48  ;;  %v10602_v63 = vcombine.low %v19216_v9, %v19215_v21  ;;  %v10821_v48 = vcombine.high %v19218_v61, %v19217_v28  ;;  %v19243_v21 = vld [vmem:[#allocation153_spill] sm:$0xff]  ;;  %v19244_v9 = vld [vmem:[#allocation148_spill] sm:$0xff] }
 0x9b8   :  { %7760 = vmatprep.subr.bf16.mxu1 %v10661_v37  ;;  %v10593_v37 = vcombine.high %v19220_v33, %v19219_v25 }
 0x9ba   :  { %7800 = vmatpush1.bf16.msra.mxu0 %v10730_v4  ;;  %v10820_v4 = vcombine.low %v19218_v61, %v19217_v28  ;;  %v19245_v28 = vld [vmem:[#allocation213_spill] sm:$0xff]  ;;  %v19246_v61 = vld [vmem:[#allocation208_spill] sm:$0xff] }
 0x9bb   :  { %7761 = vmatpush2.bf16.msra.mxu1 %v10660_v38  ;;  %7801 = vmatprep.subr.bf16.mxu0 %v10721_v62  ;;  %v10592_v38 = vcombine.low %v19220_v33, %v19219_v25  ;;  %v10811_v62 = vcombine.high %v19222_v42, %v19221_v16  ;;  %v19247_v25 = vld [vmem:[#allocation143_spill] sm:$0xff]  ;;  %v19248_v33 = vld [vmem:[#allocation138_spill] sm:$0xff] }
 0x9bc   :  { %7762 = vmatprep.subr.bf16.mxu1 %v10651_v8  ;;  %v10583_v8 = vcombine.high %v19224_v5, %v19223_v29 }
 0x9be   :  { %7802 = vmatpush1.bf16.msra.mxu0 %v10720_v46  ;;  %v10810_v46 = vcombine.low %v19222_v42, %v19221_v16  ;;  %v19249_v16 = vld [vmem:[#allocation203_spill] sm:$0xff]  ;;  %v19250_v42 = vld [vmem:[#allocation198_spill] sm:$0xff] }
 0x9bf   :  { %7763 = vmatpush2.bf16.msra.mxu1 %v10650_v19  ;;  %7803 = vmatprep.subr.bf16.mxu0 %v10871_v22  ;;  %v10582_v19 = vcombine.low %v19224_v5, %v19223_v29  ;;  %v10801_v22 = vcombine.high %v19226_v35, %v19225_v0  ;;  %v19251_v29 = vld [vmem:[#allocation133_spill] sm:$0xff]  ;;  %v19252_v5 = vld [vmem:[#allocation128_spill] sm:$0xff] }
 0x9c0   :  { %7764 = vmatprep.subr.bf16.mxu1 %v10641_v39  ;;  %v10573_v39 = vcombine.high %v19228_v40, %v19227_v30 }
 0x9c2   :  { %7804 = vmatpush2.bf16.msra.mxu0 %v10870_v32  ;;  %v10800_v32 = vcombine.low %v19226_v35, %v19225_v0  ;;  %v19253_v0 = vld [vmem:[#allocation193_spill] sm:$0xff]  ;;  %v19254_v35 = vld [vmem:[#allocation188_spill] sm:$0xff] }
 0x9c3   :  { %7765 = vmatpush2.bf16.msra.mxu1 %v10640_v45  ;;  %7805 = vmatprep.subr.bf16.mxu0 %v10861_v58  ;;  %v10572_v45 = vcombine.low %v19228_v40, %v19227_v30  ;;  %v10793_v58 = vcombine.high %v19230_v20, %v19229_v34  ;;  %v19255_v30 = vld [vmem:[#allocation123_spill] sm:$0xff]  ;;  %v19256_v40 = vld [vmem:[#allocation118_spill] sm:$0xff] }
 0x9c4   :  { %7840 = vmatprep.subr.bf16.mxu1 %v10633_v14  ;;  %v10563_v14 = vcombine.high %v19232_v6, %v19231_v23 }
 0x9c6   :  { %7767 = vmatmul.mubr.bf16.vlgmr.msra.gmra.mxu1 %v16619_v41  ;;  %7806 = vmatpush2.bf16.msra.mxu0 %v10860_v51  ;;  %v10792_v51 = vcombine.low %v19230_v20, %v19229_v34  ;;  %v19257_v34 = vld [vmem:[#allocation183_spill] sm:$0xff]  ;;  %v19258_v20 = vld [vmem:[#allocation178_spill] sm:$0xff] }
 0x9c7   :  { %7776 = vmatprep.mubr.bf16.mxu1 %v16631_v3  ;;  %7841 = vmatpush1.bf16.msra.mxu1 %v10632_v55  ;;  %v10562_v55 = vcombine.low %v19232_v6, %v19231_v23  ;;  %v19259_v23 = vld [vmem:[#allocation113_spill] sm:$0xff]  ;;  %v19260_v6 = vld [vmem:[#allocation108_spill] sm:$0xff] }
 0x9c8   :  { %7807 = vmatprep.subr.bf16.mxu0 %v10851_v18  ;;  %7842 = vmatprep.subr.bf16.mxu1 %v10623_v27  ;;  %v10783_v18 = vcombine.high %v19234_v1, %v19233_v50  ;;  %v10713_v27 = vcombine.high %v19236_v15, %v19235_v13 }
 0x9ca   :  { %7808 = vmatpush2.bf16.msra.mxu0 %v10850_v49  ;;  %v10782_v49 = vcombine.low %v19234_v1, %v19233_v50  ;;  %v19261_v50 = vld [vmem:[#allocation333_spill] sm:$0xff]  ;;  %v19262_v1 = vld [vmem:[#allocation328_spill] sm:$0xff] }
 0x9cb   :  { %7843 = vmatpush1.bf16.msra.mxu1 %v10622_v52  ;;  %7809 = vmatprep.subr.bf16.mxu0 %v10841_v54  ;;  %v10712_v52 = vcombine.low %v19236_v15, %v19235_v13  ;;  %v10773_v54 = vcombine.high %v19238_v26, %v19237_v17  ;;  %v19263_v13 = vld [vmem:[#allocation103_spill] sm:$0xff]  ;;  %v19264_v15 = vld [vmem:[#allocation98_spill] sm:$0xff] }
 0x9cc   :  { %7844 = vmatprep.subr.bf16.mxu1 %v10613_v59  ;;  %v10703_v59 = vcombine.high %v19240_v31, %v19239_v43 }
 0x9ce   :  { %7777 = vmatmul.mubr.bf16.gmra.mxu1 %v16629_v11  ;;  %7810 = vmatpush2.bf16.msra.mxu0 %v10840_v36  ;;  %v10772_v36 = vcombine.low %v19238_v26, %v19237_v17  ;;  %v19265_v17 = vld [vmem:[#allocation323_spill] sm:$0xff]  ;;  %v19266_v26 = vld [vmem:[#allocation318_spill] sm:$0xff] }
 0x9cf   :  { %7845 = vmatpush1.bf16.msra.mxu1 %v10612_v47  ;;  %7872 = vmatprep.mubr.bf16.mxu1 %v16615_v24  ;;  %v10702_v47 = vcombine.low %v19240_v31, %v19239_v43  ;;  %v19267_v43 = vld [vmem:[#allocation94_spill] sm:$0xff]  ;;  %v19268_v31 = vld [vmem:[#allocation89_spill] sm:$0xff] }
 0x9d0   :  { %7811 = vmatprep.subr.bf16.mxu0 %v10831_v57  ;;  %7846 = vmatprep.subr.bf16.mxu1 %v10603_v7  ;;  %v10763_v57 = vcombine.high %v19242_v10, %v19241_v56  ;;  %v10693_v7 = vcombine.high %v19244_v9, %v19243_v21 }
 0x9d2   :  { %7812 = vmatpush2.bf16.msra.mxu0 %v10830_v53  ;;  %v10762_v53 = vcombine.low %v19242_v10, %v19241_v56  ;;  %v19269_v56 = vld [vmem:[#allocation313_spill] sm:$0xff]  ;;  %v19270_v10 = vld [vmem:[#allocation308_spill] sm:$0xff] }
 0x9d3   :  { %7847 = vmatpush1.bf16.msra.mxu1 %v10602_v63  ;;  %7813 = vmatprep.subr.bf16.mxu0 %v10821_v48  ;;  %v10692_v63 = vcombine.low %v19244_v9, %v19243_v21  ;;  %v10753_v48 = vcombine.high %v19246_v61, %v19245_v28  ;;  %v19271_v21 = vld [vmem:[#allocation84_spill] sm:$0xff]  ;;  %v19272_v9 = vld [vmem:[#allocation79_spill] sm:$0xff] }
 0x9d4   :  { %7848 = vmatprep.subr.bf16.mxu1 %v10593_v37  ;;  %v10683_v37 = vcombine.high %v19248_v33, %v19247_v25 }
 0x9d6   :  { %7814 = vmatpush2.bf16.msra.mxu0 %v10820_v4  ;;  %v10752_v4 = vcombine.low %v19246_v61, %v19245_v28  ;;  %v19273_v28 = vld [vmem:[#allocation303_spill] sm:$0xff]  ;;  %v19274_v61 = vld [vmem:[#allocation298_spill] sm:$0xff] }
 0x9d7   :  { %7849 = vmatpush1.bf16.msra.mxu1 %v10592_v38  ;;  %7815 = vmatprep.subr.bf16.mxu0 %v10811_v62  ;;  %v10682_v38 = vcombine.low %v19248_v33, %v19247_v25  ;;  %v10743_v62 = vcombine.high %v19250_v42, %v19249_v16  ;;  %v19275_v25 = vld [vmem:[#allocation74_spill] sm:$0xff]  ;;  %v19276_v33 = vld [vmem:[#allocation69_spill] sm:$0xff] }
 0x9d8   :  { %7850 = vmatprep.subr.bf16.mxu1 %v10583_v8  ;;  %v10673_v8 = vcombine.high %v19252_v5, %v19251_v29 }
 0x9da   :  { %7816 = vmatpush2.bf16.msra.mxu0 %v10810_v46  ;;  %v10742_v46 = vcombine.low %v19250_v42, %v19249_v16  ;;  %v19277_v16 = vld [vmem:[#allocation293_spill] sm:$0xff]  ;;  %v19278_v42 = vld [vmem:[#allocation288_spill] sm:$0xff] }
 0x9db   :  { %7851 = vmatpush1.bf16.msra.mxu1 %v10582_v19  ;;  %7817 = vmatprep.subr.bf16.mxu0 %v10801_v22  ;;  %v10672_v19 = vcombine.low %v19252_v5, %v19251_v29  ;;  %v10733_v22 = vcombine.high %v19254_v35, %v19253_v0  ;;  %v19279_v29 = vld [vmem:[#allocation64_spill] sm:$0xff]  ;;  %v19280_v5 = vld [vmem:[#allocation59_spill] sm:$0xff] }
 0x9dc   :  { %7852 = vmatprep.subr.bf16.mxu1 %v10573_v39  ;;  %v10663_v39 = vcombine.high %v19256_v40, %v19255_v30 }
 0x9de   :  { %7818 = vmatpush2.bf16.msra.mxu0 %v10800_v32  ;;  %v10732_v32 = vcombine.low %v19254_v35, %v19253_v0  ;;  %v19281_v0 = vld [vmem:[#allocation283_spill] sm:$0xff]  ;;  %v19282_v35 = vld [vmem:[#allocation278_spill] sm:$0xff] }
 0x9df   :  { %7853 = vmatpush1.bf16.msra.mxu1 %v10572_v45  ;;  %7893 = vmatprep.subr.bf16.mxu0 %v10793_v58  ;;  %v10662_v45 = vcombine.low %v19256_v40, %v19255_v30  ;;  %v10723_v58 = vcombine.high %v19258_v20, %v19257_v34  ;;  %v19283_v30 = vld [vmem:[#allocation54_spill] sm:$0xff]  ;;  %v19284_v40 = vld [vmem:[#allocation49_spill] sm:$0xff] }
 0x9e0   :  { %7854 = vmatprep.subr.bf16.mxu1 %v10563_v14  ;;  %v10653_v14 = vcombine.high %v19260_v6, %v19259_v23 }
 0x9e1   :  { %7820 = vmatmul.mubr.bf16.vlgmr.msra.gmra.mxu0 %v16662_v44 }
 0x9e2   :  { %7829 = vmatprep.mubr.bf16.mxu0 %v16680_v60  ;;  %7894 = vmatpush1.bf16.msra.mxu0 %v10792_v51  ;;  %v10722_v51 = vcombine.low %v19258_v20, %v19257_v34  ;;  %v19285_v34 = vld [vmem:[#allocation273_spill] sm:$0xff]  ;;  %v19286_v20 = vld [vmem:[#allocation268_spill] sm:$0xff] }
 0x9e3   :  { %7855 = vmatpush1.bf16.msra.mxu1 %v10562_v55  ;;  %7895 = vmatprep.subr.bf16.mxu0 %v10783_v18  ;;  %v10652_v55 = vcombine.low %v19260_v6, %v19259_v23  ;;  %v10873_v18 = vcombine.high %v19262_v1, %v19261_v50  ;;  %v19287_v23 = vld [vmem:[#allocation44_spill] sm:$0xff]  ;;  %v19288_v6 = vld [vmem:[#allocation39_spill] sm:$0xff] }
 0x9e4   :  { %7856 = vmatprep.subr.bf16.mxu1 %v10713_v27  ;;  %v10643_v27 = vcombine.high %v19264_v15, %v19263_v13 }
 0x9e6   :  { %7896 = vmatpush1.bf16.msra.mxu0 %v10782_v49  ;;  %v10872_v49 = vcombine.low %v19262_v1, %v19261_v50  ;;  %v10584_v50 = vcombine.low %v19288_v6, %v19287_v23  ;;  %v19289_v1 = vld [vmem:[#allocation263_spill] sm:$0xff] }
 0x9e7   :  { %7857 = vmatpush2.bf16.msra.mxu1 %v10712_v52  ;;  %7897 = vmatprep.subr.bf16.mxu0 %v10773_v54  ;;  %v10642_v52 = vcombine.low %v19264_v15, %v19263_v13  ;;  %v10863_v54 = vcombine.high %v19266_v26, %v19265_v17  ;;  %v19291_v15 = vld [vmem:[#allocation34_spill] sm:$0xff] }
 0x9e8   :  { %7858 = vmatprep.subr.bf16.mxu1 %v10703_v59  ;;  %v10635_v59 = vcombine.high %v19268_v31, %v19267_v43 }
 0x9e9   :  { %7830 = vmatmul.mubr.bf16.gmra.mxu0 %v16678_v12 }
 0x9ea   :  { %7898 = vmatpush1.bf16.msra.mxu0 %v10772_v36  ;;  %7925 = vmatprep.mubr.bf16.mxu0 %v16656_v2  ;;  %v10862_v36 = vcombine.low %v19266_v26, %v19265_v17 }
 0x9eb   :  { %7859 = vmatpush2.bf16.msra.mxu1 %v10702_v47  ;;  %7899 = vmatprep.subr.bf16.mxu0 %v10763_v57  ;;  %v10634_v47 = vcombine.low %v19268_v31, %v19267_v43  ;;  %v10853_v57 = vcombine.high %v19270_v10, %v19269_v56  ;;  %v19294_v43 = vld [vmem:[#allocation249_spill] sm:$0xff] }
 0x9ec   :  { %7860 = vmatprep.subr.bf16.mxu1 %v10693_v7  ;;  %v10625_v7 = vcombine.high %v19272_v9, %v19271_v21 }
 0x9ee   :  { %7900 = vmatpush1.bf16.msra.mxu0 %v10762_v53  ;;  %v10852_v53 = vcombine.low %v19270_v10, %v19269_v56 }
 0x9ef   :  { %7861 = vmatpush2.bf16.msra.mxu1 %v10692_v63  ;;  %7901 = vmatprep.subr.bf16.mxu0 %v10753_v48  ;;  %v10624_v63 = vcombine.low %v19272_v9, %v19271_v21  ;;  %v10843_v48 = vcombine.high %v19274_v61, %v19273_v28  ;;  %v19297_v21 = vld [vmem:[#allocation244_spill] sm:$0xff]  ;;  %v19298_v9 = vld [vmem:[#allocation239_spill] sm:$0xff] }
 0x9f0   :  { %7862 = vmatprep.subr.bf16.mxu1 %v10683_v37  ;;  %v10615_v37 = vcombine.high %v19276_v33, %v19275_v25 }
 0x9f2   :  { %7902 = vmatpush1.bf16.msra.mxu0 %v10752_v4  ;;  %v10842_v4 = vcombine.low %v19274_v61, %v19273_v28 }
 0x9f3   :  { %7863 = vmatpush2.bf16.msra.mxu1 %v10682_v38  ;;  %7903 = vmatprep.subr.bf16.mxu0 %v10743_v62  ;;  %v10614_v38 = vcombine.low %v19276_v33, %v19275_v25  ;;  %v10833_v62 = vcombine.high %v19278_v42, %v19277_v16  ;;  %v10784_v25 = vcombine.low %v19298_v9, %v19297_v21 }
 0x9f4   :  { %7864 = vmatprep.subr.bf16.mxu1 %v10673_v8  ;;  %v10605_v8 = vcombine.high %v19280_v5, %v19279_v29 }
 0x9f6   :  { %7904 = vmatpush1.bf16.msra.mxu0 %v10742_v46  ;;  %v10832_v46 = vcombine.low %v19278_v42, %v19277_v16  ;;  %v19302_v16 = vld [vmem:[#allocation229_spill] sm:$0xff] }
 0x9f7   :  { %7865 = vmatpush2.bf16.msra.mxu1 %v10672_v19  ;;  %7905 = vmatprep.subr.bf16.mxu0 %v10733_v22  ;;  %v10604_v19 = vcombine.low %v19280_v5, %v19279_v29  ;;  %v10823_v22 = vcombine.high %v19282_v35, %v19281_v0  ;;  %v19303_v29 = vld [vmem:[#allocation164_spill] sm:$0xff]  ;;  %v19304_v5 = vld [vmem:[#allocation159_spill] sm:$0xff] }
 0x9f8   :  { %7866 = vmatprep.subr.bf16.mxu1 %v10663_v39  ;;  %v10595_v39 = vcombine.high %v19284_v40, %v19283_v30 }
 0x9fa   :  { %7906 = vmatpush1.bf16.msra.mxu0 %v10732_v32  ;;  %v10822_v32 = vcombine.low %v19282_v35, %v19281_v0 }
 0x9fb   :  { %7867 = vmatpush2.bf16.msra.mxu1 %v10662_v45  ;;  %7907 = vmatprep.subr.bf16.mxu0 %v10723_v58  ;;  %v10813_v58 = vcombine.high %v19286_v20, %v19285_v34 }
 0x9fc   :  { %7868 = vmatprep.subr.bf16.mxu1 %v10653_v14  ;;  %v10585_v14 = vcombine.high %v19288_v6, %v19287_v23 }
 0x9fe   :  { %7908 = vmatpush1.bf16.msra.mxu0 %v10722_v51  ;;  %v10812_v51 = vcombine.low %v19286_v20, %v19285_v34  ;;  %v19308_v34 = vld [vmem:[#allocation149_spill] sm:$0xff] }
 0x9ff   :  { %7869 = vmatpush2.bf16.msra.mxu1 %v10652_v55  ;;  %7909 = vmatprep.subr.bf16.mxu0 %v10873_v18  ;;  %v19290_v18 = vld [vmem:[#allocation258_spill] sm:$0xff] }
 0xa00   :  { %7870 = vmatprep.subr.bf16.mxu1 %v10643_v27  ;;  %v10803_v13 = vcombine.high %v19290_v18, %v19289_v1  ;;  %v19292_v27 = vld [vmem:[#allocation29_spill] sm:$0xff] }
 0xa01   :  { %v10574_v26 = vcombine.low %v19292_v27, %v19291_v15 }
 0xa02   :  { %7910 = vmatpush2.bf16.msra.mxu0 %v10872_v49  ;;  %v10575_v49 = vcombine.high %v19292_v27, %v19291_v15  ;;  %v19311_v15 = vld [vmem:[#allocation144_spill] sm:$0xff]  ;;  %v19312_v27 = vld [vmem:[#allocation139_spill] sm:$0xff] }
 0xa03   :  { %7871 = vmatpush2.bf16.msra.mxu1 %v10642_v52  ;;  %7911 = vmatprep.subr.bf16.mxu0 %v10863_v54  ;;  %v10802_v52 = vcombine.low %v19290_v18, %v19289_v1  ;;  %v19293_v54 = vld [vmem:[#allocation254_spill] sm:$0xff]  ;;  %v19310_v1 = vld [vmem:[#allocation209_spill] sm:$0xff] }
 0xa04   :  { %7946 = vmatprep.subr.bf16.mxu1 %v10635_v59  ;;  %v10795_v31 = vcombine.high %v19294_v43, %v19293_v54  ;;  %v19295_v59 = vld [vmem:[#allocation24_spill] sm:$0xff]  ;;  %v10794_v56 = vcombine.low %v19294_v43, %v19293_v54  ;;  %v10684_v43 = vcombine.low %v19312_v27, %v19311_v15 }
 0xa05   :  { %v7556_v45 = vpop.f32.mrf.mxu1 }
 0xa06   :  { %7873 = vmatmul.mubr.bf16.vlgmr.msra.gmra.mxu1 %v16619_v41  ;;  %7912 = vmatpush2.bf16.msra.mxu0 %v10862_v36  ;;  %v19296_v36 = vld [vmem:[#allocation19_spill] sm:$0xff] }
 0xa07   :  { %7882 = vmatprep.mubr.bf16.mxu1 %v16631_v3  ;;  %7947 = vmatpush1.bf16.msra.mxu1 %v10634_v47  ;;  %v7558_v55 = vpop.f32.mrf.mxu1  ;;  %v10565_v47 = vcombine.high %v19296_v36, %v19295_v59 }
 0xa08   :  { %7913 = vmatprep.subr.bf16.mxu0 %v10853_v57  ;;  %7948 = vmatprep.subr.bf16.mxu1 %v10625_v7  ;;  %v10564_v57 = vcombine.low %v19296_v36, %v19295_v59  ;;  %v10785_v7 = vcombine.high %v19298_v9, %v19297_v21  ;;  %v19314_v59 = vld [vmem:[#allocation199_spill] sm:$0xff] }
 0xa09   :  { %v7560_v17 = vpop.f32.mrf.mxu1 }
 0xa0a   :  { %7914 = vmatpush2.bf16.msra.mxu0 %v10852_v53  ;;  %v19299_v53 = vld [vmem:[#allocation174_spill] sm:$0xff] }
 0xa0b   :  { %7949 = vmatpush1.bf16.msra.mxu1 %v10624_v63  ;;  %7915 = vmatprep.subr.bf16.mxu0 %v10843_v48  ;;  %v7562_v10 = vpop.f32.mrf.mxu1  ;;  %v19300_v63 = vld [vmem:[#allocation169_spill] sm:$0xff] }
 0xa0c   :  { %7950 = vmatprep.subr.bf16.mxu1 %v10615_v37  ;;  %v10715_v28 = vcombine.high %v19300_v63, %v19299_v53 }
 0xa0d   :  { %v7566_v33 = vpop.f32.mrf.mxu1 }
 0xa0e   :  { %7883 = vmatmul.mubr.bf16.gmra.mxu1 %v16629_v11  ;;  %7916 = vmatpush2.bf16.msra.mxu0 %v10842_v4  ;;  %v10714_v4 = vcombine.low %v19300_v63, %v19299_v53  ;;  %v19318_v53 = vld [vmem:[#allocation189_spill] sm:$0xff] }
 0xa0f   :  { %7951 = vmatpush1.bf16.msra.mxu1 %v10614_v38  ;;  %7978 = vmatprep.mubr.bf16.mxu1 %v16615_v24  ;;  %v10594_v24 = vcombine.low %v19284_v40, %v19283_v30  ;;  %v19301_v38 = vld [vmem:[#allocation234_spill] sm:$0xff]  ;;  %v7568_v35 = vpop.f32.mrf.mxu1  ;;  %v10704_v30 = vcombine.low %v19304_v5, %v19303_v29  ;;  %v19305_v40 = vld [vmem:[#allocation224_spill] sm:$0xff] }
 0xa10   :  { %7917 = vmatprep.subr.bf16.mxu0 %v10833_v62  ;;  %7952 = vmatprep.subr.bf16.mxu1 %v10605_v8  ;;  %v10775_v42 = vcombine.high %v19302_v16, %v19301_v38  ;;  %v10705_v8 = vcombine.high %v19304_v5, %v19303_v29  ;;  %v10774_v0 = vcombine.low %v19302_v16, %v19301_v38  ;;  %v19322_v38 = vld [vmem:[#allocation179_spill] sm:$0xff]  ;;  %v19324_v29 = vld [vmem:[#allocation109_spill] sm:$0xff] }
 0xa12   :  { %7918 = vmatpush2.bf16.msra.mxu0 %v10832_v46 }
 0xa13   :  { %7953 = vmatpush1.bf16.msra.mxu1 %v10604_v19  ;;  %7919 = vmatprep.subr.bf16.mxu0 %v10823_v22 }
 0xa14   :  { %7954 = vmatprep.subr.bf16.mxu1 %v10595_v39  ;;  %v19306_v39 = vld [vmem:[#allocation219_spill] sm:$0xff] }
 0xa15   :  { %v10764_v6 = vcombine.low %v19306_v39, %v19305_v40 }
 0xa16   :  { %7920 = vmatpush2.bf16.msra.mxu0 %v10822_v32  ;;  %v10765_v32 = vcombine.high %v19306_v39, %v19305_v40  ;;  %v19328_v40 = vld [vmem:[#allocation99_spill] sm:$0xff] }
 0xa17   :  { %7955 = vmatpush1.bf16.msra.mxu1 %v10594_v24  ;;  %7921 = vmatprep.subr.bf16.mxu0 %v10813_v58  ;;  %v19307_v24 = vld [vmem:[#allocation154_spill] sm:$0xff] }
 0xa18   :  { %7956 = vmatprep.subr.bf16.mxu1 %v10585_v14  ;;  %v10695_v20 = vcombine.high %v19308_v34, %v19307_v24  ;;  %v7570_v14 = vpop.f32.mrf.mxu1 }
 0xa1a   :  { %7922 = vmatpush2.bf16.msra.mxu0 %v10812_v51 }
 0xa1b   :  { %7957 = vmatpush1.bf16.msra.mxu1 %v10584_v50  ;;  %7923 = vmatprep.subr.bf16.mxu0 %v10803_v13  ;;  %v19309_v50 = vld [vmem:[#allocation214_spill] sm:$0xff] }
 0xa1c   :  { %7958 = vmatprep.subr.bf16.mxu1 %v10575_v49  ;;  %v10755_v18 = vcombine.high %v19310_v1, %v19309_v50  ;;  %v10685_v49 = vcombine.high %v19312_v27, %v19311_v15 }
 0xa1e   :  { %7924 = vmatpush2.bf16.msra.mxu0 %v10802_v52 }
 0xa1f   :  { %7959 = vmatpush1.bf16.msra.mxu1 %v10574_v26  ;;  %7999 = vmatprep.subr.bf16.mxu0 %v10795_v31  ;;  %v7572_v26 = vpop.f32.mrf.mxu1  ;;  %v19313_v31 = vld [vmem:[#allocation204_spill] sm:$0xff] }
 0xa20   :  { %7960 = vmatprep.subr.bf16.mxu1 %v10565_v47  ;;  %v10745_v36 = vcombine.high %v19314_v59, %v19313_v31  ;;  %v10744_v21 = vcombine.low %v19314_v59, %v19313_v31  ;;  %v19339_v59 = vld [vmem:[#allocation274_spill] sm:$0xff] }
 0xa21   :  { %7926 = vmatmul.mubr.bf16.vlgmr.msra.gmra.mxu0 %v16662_v44  ;;  %v7609_v61 = vpop.f32.mrf.mxu0 }
 0xa22   :  { %v17082_v48 = vadd.f32 %v7609_v61, %v7556_v45  ;;  %7935 = vmatprep.mubr.bf16.mxu0 %v16680_v60  ;;  %8000 = vmatpush1.bf16.msra.mxu0 %v10794_v56  ;;  %v19315_v56 = vld [vmem:[#allocation134_spill] sm:$0xff]  ;;  %v19320_v61 = vld [vmem:[#allocation119_spill] sm:$0xff] }
 0xa23   :  { %7961 = vmatpush1.bf16.msra.mxu1 %v10564_v57  ;;  %v7611_v37 = vpop.f32.mrf.mxu0  ;;  %8001 = vmatprep.subr.bf16.mxu0 %v10785_v7  ;;  %v19317_v7 = vld [vmem:[#allocation194_spill] sm:$0xff] }
 0xa24   :  { %v17091_v62 = vadd.f32 %v7611_v37, %v7558_v55  ;;  %7962 = vmatprep.subr.bf16.mxu1 %v10715_v28  ;;  %v10694_v55 = vcombine.low %v19308_v34, %v19307_v24  ;;  %v10735_v63 = vcombine.high %v19318_v53, %v19317_v7  ;;  %v19319_v28 = vld [vmem:[#allocation124_spill] sm:$0xff] }
 0xa25   :  { %v7613_v46 = vpop.f32.mrf.mxu0  ;;  %v10664_v37 = vcombine.low %v19320_v61, %v19319_v28  ;;  %v19329_v34 = vld [vmem:[#allocation324_spill] sm:$0xff] }
 0xa26   :  { %v17095_v19 = vadd.f32 %v7613_v46, %v7560_v17  ;;  %8002 = vmatpush1.bf16.msra.mxu0 %v10784_v25  ;;  %v10754_v17 = vcombine.low %v19310_v1, %v19309_v50  ;;  %v10665_v25 = vcombine.high %v19320_v61, %v19319_v28  ;;  %v19333_v1 = vld [vmem:[#allocation304_spill] sm:$0xff] }
 0xa27   :  { %7963 = vmatpush2.bf16.msra.mxu1 %v10714_v4  ;;  %v7615_v22 = vpop.f32.mrf.mxu0  ;;  %8003 = vmatprep.subr.bf16.mxu0 %v10775_v42  ;;  %v19321_v4 = vld [vmem:[#allocation184_spill] sm:$0xff]  ;;  %v19323_v42 = vld [vmem:[#allocation114_spill] sm:$0xff] }
 0xa28   :  { %v17103_v45 = vadd.f32 %v7615_v22, %v7562_v10  ;;  %7964 = vmatprep.subr.bf16.mxu1 %v10705_v8  ;;  %v19316_v10 = vld [vmem:[#allocation129_spill] sm:$0xff]  ;;  %v10725_v16 = vcombine.high %v19322_v38, %v19321_v4  ;;  %v10655_v5 = vcombine.high %v19324_v29, %v19323_v42  ;;  %v10724_v8 = vcombine.low %v19322_v38, %v19321_v4 }
 0xa29   :  { %7936 = vmatmul.mubr.bf16.gmra.mxu0 %v16678_v12  ;;  %v7619_v58 = vpop.f32.mrf.mxu0  ;;  %v10675_v57 = vcombine.high %v19316_v10, %v19315_v56  ;;  %v10674_v9 = vcombine.low %v19316_v10, %v19315_v56  ;;  %v10654_v46 = vcombine.low %v19324_v29, %v19323_v42 }
 0xa2a   :  { %v17108_v23 = vadd.f32 %v7619_v58, %v7566_v33  ;;  %8004 = vmatpush1.bf16.msra.mxu0 %v10774_v0  ;;  %8031 = vmatprep.mubr.bf16.mxu0 %v16656_v2  ;;  %v10734_v33 = vcombine.low %v19318_v53, %v19317_v7  ;;  %v19325_v0 = vld [vmem:[#allocation334_spill] sm:$0xff] }
 0xa2b   :  { %7965 = vmatpush2.bf16.msra.mxu1 %v10704_v30  ;;  %v7621_v51 = vpop.f32.mrf.mxu0  ;;  %8005 = vmatprep.subr.bf16.mxu0 %v10765_v32  ;;  %v19327_v30 = vld [vmem:[#allocation104_spill] sm:$0xff] }
 0xa2c   :  { %v17117_v13 = vadd.f32 %v7621_v51, %v7568_v35  ;;  %7966 = vmatprep.subr.bf16.mxu1 %v10695_v20  ;;  %v19326_v35 = vld [vmem:[#allocation329_spill] sm:$0xff]  ;;  %v10645_v39 = vcombine.high %v19328_v40, %v19327_v30  ;;  %v10644_v24 = vcombine.low %v19328_v40, %v19327_v30  ;;  %v19330_v20 = vld [vmem:[#allocation319_spill] sm:$0xff] }
 0xa2d   :  { %v7623_v2 = vpop.f32.mrf.mxu0  ;;  %v10875_v22 = vcombine.high %v19326_v35, %v19325_v0  ;;  %v10874_v32 = vcombine.low %v19326_v35, %v19325_v0  ;;  %v10865_v58 = vcombine.high %v19330_v20, %v19329_v34  ;;  %v19332_v51 = vld [vmem:[#allocation309_spill] sm:$0xff] }
 0xa2e   :  { %v17121_v52 = vadd.f32 %v7623_v2, %v7570_v14  ;;  %8006 = vmatpush1.bf16.msra.mxu0 %v10764_v6  ;;  %v10864_v6 = vcombine.low %v19330_v20, %v19329_v34  ;;  %v19331_v14 = vld [vmem:[#allocation314_spill] sm:$0xff]  ;;  %v19336_v2 = vld [vmem:[#allocation289_spill] sm:$0xff]  ;;  %v19346_v20 = vld [vmem:[#allocation347_spill] sm:$0xff] }
 0xa2f   :  { %7967 = vmatpush2.bf16.msra.mxu1 %v10694_v55  ;;  %v7625_v54 = vpop.f32.mrf.mxu0  ;;  %8007 = vmatprep.subr.bf16.mxu0 %v10755_v18  ;;  %v10855_v55 = vcombine.high %v19332_v51, %v19331_v14  ;;  %v10854_v50 = vcombine.low %v19332_v51, %v19331_v14  ;;  %v19334_v18 = vld [vmem:[#allocation299_spill] sm:$0xff]  ;;  %v19344_v30 = vld [vmem:[#allocation349_spill] sm:$0xff]  ;;  %v19347_v14 = vld [vmem:[#allocation346_spill] sm:$0xff] }
 0xa30   :  { %v17129_v47 = vadd.f32 %v7625_v54, %v7572_v26  ;;  %7968 = vmatprep.subr.bf16.mxu1 %v10685_v49  ;;  %v10845_v15 = vcombine.high %v19334_v18, %v19333_v1  ;;  %v10844_v27 = vcombine.low %v19334_v18, %v19333_v1  ;;  %v19335_v49 = vld [vmem:[#allocation294_spill] sm:$0xff]  ;;  %v19338_v26 = vld [vmem:[#allocation279_spill] sm:$0xff]  ;;  %v19348_v51 = vld [vmem:[#allocation345_spill] sm:$0xff] }
 0xa31   :  { %v19349_v1 = vld [vmem:[#allocation344_spill] sm:$0xff]  ;;  %v19350_v18 = vld [vmem:[#allocation343_spill] sm:$0xff] }
 0xa32   :  { %8008 = vmatpush1.bf16.msra.mxu0 %v10754_v17  ;;  %v10835_v17 = vcombine.high %v19336_v2, %v19335_v49 }
 0xa33   :  { %7969 = vmatpush2.bf16.msra.mxu1 %v10684_v43  ;;  %8009 = vmatprep.subr.bf16.mxu0 %v10745_v36  ;;  %v19340_v36 = vld [vmem:[#allocation269_spill] sm:$0xff] }
 0xa34   :  { %7970 = vmatprep.subr.bf16.mxu1 %v10675_v57  ;;  %v10815_v56 = vcombine.high %v19340_v36, %v19339_v59  ;;  %v19341_v57 = vld [vmem:[#allocation264_spill] sm:$0xff] }
 0xa36   :  { %8010 = vmatpush1.bf16.msra.mxu0 %v10744_v21  ;;  %v19342_v21 = vld [vmem:[#allocation259_spill] sm:$0xff] }
 0xa37   :  { %7971 = vmatpush2.bf16.msra.mxu1 %v10674_v9  ;;  %8011 = vmatprep.subr.bf16.mxu0 %v10735_v63  ;;  %v10805_v9 = vcombine.high %v19342_v21, %v19341_v57  ;;  %v10804_v7 = vcombine.low %v19342_v21, %v19341_v57 }
 0xa38   :  { %7972 = vmatprep.subr.bf16.mxu1 %v10665_v25 }
 0xa3a   :  { %8012 = vmatpush1.bf16.msra.mxu0 %v10734_v33 }
 0xa3b   :  { %7973 = vmatpush2.bf16.msra.mxu1 %v10664_v37  ;;  %8013 = vmatprep.subr.bf16.mxu0 %v10725_v16 }
 0xa3c   :  { %7974 = vmatprep.subr.bf16.mxu1 %v10655_v5 }
 0xa3e   :  { %8014 = vmatpush1.bf16.msra.mxu0 %v10724_v8 }
 0xa3f   :  { %7975 = vmatpush2.bf16.msra.mxu1 %v10654_v46  ;;  %8015 = vmatprep.subr.bf16.mxu0 %v10875_v22  ;;  %v19343_v22 = vld [vmem:[#allocation350_spill] sm:$0xff] }
 0xa40   :  { %7976 = vmatprep.subr.bf16.mxu1 %v10645_v39  ;;  %v10891_v40 = vcombine.high %v19344_v30, %v19343_v22 }
 0xa42   :  { %8016 = vmatpush2.bf16.msra.mxu0 %v10874_v32 }
 0xa43   :  { %7977 = vmatpush2.bf16.msra.mxu1 %v10644_v24  ;;  %8017 = vmatprep.subr.bf16.mxu0 %v10865_v58  ;;  %v10890_v24 = vcombine.low %v19344_v30, %v19343_v22  ;;  %v19366_v22 = vld [vmem:[#allocation359_spill] sm:$0xff] }
 0xa44   :  { %8224 = vmatprep.subr.bf16.mxu1 %v10891_v40 }
 0xa45   :  { %v7662_v31 = vpop.f32.mrf.mxu1 }
 0xa46   :  { %7979 = vmatmul.mubr.bf16.vlgmr.msra.gmra.mxu1 %v16619_v41  ;;  %8018 = vmatpush2.bf16.msra.mxu0 %v10864_v6  ;;  %v10834_v41 = vcombine.low %v19336_v2, %v19335_v49  ;;  %v19351_v49 = vld [vmem:[#allocation342_spill] sm:$0xff]  ;;  %v19352_v2 = vld [vmem:[#allocation341_spill] sm:$0xff] }
 0xa47   :  { %7988 = vmatprep.mubr.bf16.mxu1 %v16631_v3  ;;  %8019 = vmatprep.subr.bf16.mxu0 %v10855_v55  ;;  %v19337_v3 = vld [vmem:[#allocation284_spill] sm:$0xff]  ;;  %v7664_v10 = vpop.f32.mrf.mxu1  ;;  %v10887_v55 = vcombine.high %v19348_v51, %v19347_v14 }
 0xa48   :  { %v10825_v54 = vcombine.high %v19338_v26, %v19337_v3  ;;  %v10824_v43 = vcombine.low %v19338_v26, %v19337_v3  ;;  %8225 = vmatpush1.bf16.msra.mxu1 %v10890_v24  ;;  %v19353_v3 = vld [vmem:[#allocation340_spill] sm:$0xff]  ;;  %v19354_v26 = vld [vmem:[#allocation339_spill] sm:$0xff]  ;;  %v19368_v24 = vld [vmem:[#allocation357_spill] sm:$0xff] }
 0xa49   :  { %v7666_v53 = vpop.f32.mrf.mxu1 }
 0xa4a   :  { %8020 = vmatpush2.bf16.msra.mxu0 %v10854_v50  ;;  %v10886_v50 = vcombine.low %v19348_v51, %v19347_v14 }
 0xa4b   :  { %8021 = vmatprep.subr.bf16.mxu0 %v10845_v15  ;;  %v7668_v63 = vpop.f32.mrf.mxu1  ;;  %v10885_v15 = vcombine.high %v19350_v18, %v19349_v1 }
 0xa4d   :  { %v7672_v25 = vpop.f32.mrf.mxu1 }
 0xa4e   :  { %7989 = vmatmul.mubr.bf16.gmra.mxu1 %v16629_v11  ;;  %8022 = vmatpush2.bf16.msra.mxu0 %v10844_v27  ;;  %v10814_v11 = vcombine.low %v19340_v36, %v19339_v59  ;;  %v10884_v27 = vcombine.low %v19350_v18, %v19349_v1  ;;  %v19356_v59 = vld [vmem:[#allocation337_spill] sm:$0xff] }
 0xa4f   :  { %8023 = vmatprep.subr.bf16.mxu0 %v10835_v17  ;;  %v7674_v16 = vpop.f32.mrf.mxu1  ;;  %v10883_v17 = vcombine.high %v19352_v2, %v19351_v49 }
 0xa52   :  { %8024 = vmatpush2.bf16.msra.mxu0 %v10834_v41  ;;  %v10882_v41 = vcombine.low %v19352_v2, %v19351_v49 }
 0xa53   :  { %8025 = vmatprep.subr.bf16.mxu0 %v10825_v54  ;;  %v10881_v54 = vcombine.high %v19354_v26, %v19353_v3 }
 0xa56   :  { %8026 = vmatpush2.bf16.msra.mxu0 %v10824_v43  ;;  %v10880_v43 = vcombine.low %v19354_v26, %v19353_v3  ;;  %v19372_v3 = vld [vmem:[#allocation353_spill] sm:$0xff] }
 0xa57   :  { %8027 = vmatprep.subr.bf16.mxu0 %v10815_v56 }
 0xa5a   :  { %8028 = vmatpush2.bf16.msra.mxu0 %v10814_v11  ;;  %v19357_v11 = vld [vmem:[#allocation336_spill] sm:$0xff] }
 0xa5b   :  { %8029 = vmatprep.subr.bf16.mxu0 %v10805_v9  ;;  %v19359_v9 = vld [vmem:[#allocation366_spill] sm:$0xff] }
 0xa5e   :  { %8030 = vmatpush2.bf16.msra.mxu0 %v10804_v7  ;;  %v19360_v7 = vld [vmem:[#allocation365_spill] sm:$0xff] }
 0xa61   :  { %v7715_v28 = vpop.f32.mrf.mxu0  ;;  %8032 = vmatmul.mubr.bf16.vlgmr.msra.gmra.mxu0 %v16662_v44  ;;  %v7676_v44 = vpop.f32.mrf.mxu1 }
 0xa62   :  { %v17193_v61 = vadd.f32 %v7715_v28, %v7662_v31  ;;  %8041 = vmatprep.mubr.bf16.mxu0 %v16680_v60  ;;  %v19355_v31 = vld [vmem:[#allocation338_spill] sm:$0xff]  ;;  %v19361_v28 = vld [vmem:[#allocation364_spill] sm:$0xff] }
 0xa63   :  { %v7717_v33 = vpop.f32.mrf.mxu0  ;;  %v7678_v39 = vpop.f32.mrf.mxu1  ;;  %v10879_v36 = vcombine.high %v19356_v59, %v19355_v31  ;;  %v10878_v56 = vcombine.low %v19356_v59, %v19355_v31 }
 0xa64   :  { %v17196_v37 = vadd.f32 %v7717_v33, %v7664_v10  ;;  %v19358_v10 = vld [vmem:[#allocation335_spill] sm:$0xff] }
 0xa65   :  { %v7719_v4 = vpop.f32.mrf.mxu0  ;;  %v10877_v57 = vcombine.high %v19358_v10, %v19357_v11  ;;  %v10876_v21 = vcombine.low %v19358_v10, %v19357_v11  ;;  %v19373_v11 = vld [vmem:[#allocation352_spill] sm:$0xff]  ;;  %v19374_v10 = vld [vmem:[#allocation351_spill] sm:$0xff] }
 0xa66   :  { %v17198_v38 = vadd.f32 %v7719_v4, %v7666_v53  ;;  %v10907_v53 = vcombine.high %v19360_v7, %v19359_v9 }
 0xa67   :  { %v7721_v42 = vpop.f32.mrf.mxu0 }
 0xa68   :  { %v17200_v29 = vadd.f32 %v7721_v42, %v7668_v63  ;;  %v10906_v63 = vcombine.low %v19360_v7, %v19359_v9  ;;  %v19363_v42 = vld [vmem:[#allocation362_spill] sm:$0xff]  ;;  %v10892_v7 = vcombine.low %v19374_v10, %v19373_v11 }
 0xa69   :  { %v7725_v5 = vpop.f32.mrf.mxu0  ;;  %8042 = vmatmul.mubr.bf16.gmra.mxu0 %v16678_v12  ;;  %v19345_v12 = vld [vmem:[#allocation348_spill] sm:$0xff] }
 0xa6a   :  { %v17203_v8 = vadd.f32 %v7725_v5, %v7672_v25  ;;  %v10889_v58 = vcombine.high %v19346_v20, %v19345_v12  ;;  %v10888_v6 = vcombine.low %v19346_v20, %v19345_v12  ;;  %v19362_v25 = vld [vmem:[#allocation363_spill] sm:$0xff]  ;;  %v19364_v5 = vld [vmem:[#allocation361_spill] sm:$0xff] }
 0xa6b   :  { %v7727_v46 = vpop.f32.mrf.mxu0  ;;  %v10905_v33 = vcombine.high %v19362_v25, %v19361_v28 }
 0xa6c   :  { %v17205_v0 = vadd.f32 %v7727_v46, %v7674_v16  ;;  %8226 = vmatprep.subr.bf16.mxu1 %v10889_v58  ;;  %v10904_v16 = vcombine.low %v19362_v25, %v19361_v28  ;;  %v10902_v46 = vcombine.low %v19364_v5, %v19363_v42 }
 0xa6d   :  { %v7729_v60 = vpop.f32.mrf.mxu0  ;;  %8227 = vmatpush1.bf16.msra.mxu1 %v10888_v6 }
 0xa6e   :  { %v17207_v35 = vadd.f32 %v7729_v60, %v7676_v44  ;;  %8228 = vmatprep.subr.bf16.mxu1 %v10887_v55  ;;  %v10903_v44 = vcombine.high %v19364_v5, %v19363_v42  ;;  %v19365_v60 = vld [vmem:[#allocation360_spill] sm:$0xff]  ;;  %v19376_v42 = vld [vmem:[#allocation423_spill] sm:$0xff] }
 0xa6f   :  { %v7731_v32 = vpop.f32.mrf.mxu0  ;;  %v10901_v30 = vcombine.high %v19366_v22, %v19365_v60  ;;  %v19369_v55 = vld [vmem:[#allocation356_spill] sm:$0xff] }
 0xa70   :  { %v17213_v34 = vadd.f32 %v7731_v32, %v7678_v39  ;;  %v10900_v39 = vcombine.low %v19366_v22, %v19365_v60  ;;  %v19367_v32 = vld [vmem:[#allocation358_spill] sm:$0xff] }
 0xa71   :  { %8229 = vmatpush1.bf16.msra.mxu1 %v10886_v50  ;;  %v10899_v12 = vcombine.high %v19368_v24, %v19367_v32  ;;  %v10898_v58 = vcombine.low %v19368_v24, %v19367_v32  ;;  %v19370_v50 = vld [vmem:[#allocation355_spill] sm:$0xff] }
 0xa72   :  { %8230 = vmatprep.subr.bf16.mxu1 %v10885_v15  ;;  %v10897_v1 = vcombine.high %v19370_v50, %v19369_v55  ;;  %v19381_v24 = vld [vmem:[#allocation411_spill] sm:$0xff] }
 0xa75   :  { %8231 = vmatpush1.bf16.msra.mxu1 %v10884_v27  ;;  %v10896_v27 = vcombine.low %v19370_v50, %v19369_v55 }
 0xa76   :  { %8232 = vmatprep.subr.bf16.mxu1 %v10883_v17 }
 0xa79   :  { %8233 = vmatpush1.bf16.msra.mxu1 %v10882_v41  ;;  %v19371_v41 = vld [vmem:[#allocation354_spill] sm:$0xff] }
 0xa7a   :  { %8234 = vmatprep.subr.bf16.mxu1 %v10881_v54  ;;  %v10895_v26 = vcombine.high %v19372_v3, %v19371_v41  ;;  %v10894_v31 = vcombine.low %v19372_v3, %v19371_v41  ;;  %v19388_v41 = vld [vmem:[#allocation383_spill] sm:$0xff] }
 0xa7d   :  { %8235 = vmatpush1.bf16.msra.mxu1 %v10880_v43 }
 0xa7e   :  { %8236 = vmatprep.subr.bf16.mxu1 %v10879_v36 }
 0xa81   :  { %8237 = vmatpush1.bf16.msra.mxu1 %v10878_v56 }
 0xa82   :  { %8238 = vmatprep.subr.bf16.mxu1 %v10877_v57  ;;  %v10893_v57 = vcombine.high %v19374_v10, %v19373_v11  ;;  %v19391_v11 = vld [vmem:[#allocation371_spill] sm:$0xff] }
 0xa83   :  { %v19392_v10 = vld [vmem:[#allocation367_spill] sm:$0xff] }
 0xa85   :  { %8239 = vmatpush1.bf16.msra.mxu1 %v10876_v21 }
 0xa86   :  { %8240 = vmatprep.subr.bf16.mxu1 %v10907_v53  ;;  %v7768_v4 = vpop.f32.mrf.mxu1 }
 0xa88   :  { %v7770_v40 = vpop.f32.mrf.mxu1 }
 0xa89   :  { %8241 = vmatpush2.bf16.msra.mxu1 %v10906_v63 }
 0xa8a   :  { %8242 = vmatprep.subr.bf16.mxu1 %v10905_v33  ;;  %v7772_v20 = vpop.f32.mrf.mxu1 }
 0xa8c   :  { %v7774_v6 = vpop.f32.mrf.mxu1 }
 0xa8d   :  { %8243 = vmatpush2.bf16.msra.mxu1 %v10904_v16  ;;  %v19375_v16 = vld [vmem:[#allocation427_spill] sm:$0xff] }
 0xa8e   :  { %8244 = vmatprep.subr.bf16.mxu1 %v10903_v44  ;;  %v7778_v18 = vpop.f32.mrf.mxu1  ;;  %v10965_v5 = vcombine.high %v19376_v42, %v19375_v16  ;;  %v19377_v44 = vld [vmem:[#allocation428_spill] sm:$0xff]  ;;  %v10964_v22 = vcombine.low %v19376_v42, %v19375_v16  ;;  %v19395_v42 = vld [vmem:[#allocation483_spill] sm:$0xff] }
 0xa90   :  { %v7780_v54 = vpop.f32.mrf.mxu1  ;;  %8929 = vmatprep.subr.bf16.mxu0 %v10965_v5  ;;  %v19396_v5 = vld [vmem:[#allocation479_spill] sm:$0xff] }
 0xa91   :  { %8245 = vmatpush2.bf16.msra.mxu1 %v10902_v46  ;;  %v19378_v46 = vld [vmem:[#allocation424_spill] sm:$0xff]  ;;  %8930 = vmatpush1.bf16.msra.mxu0 %v10964_v22  ;;  %v11020_v22 = vcombine.low %v19396_v5, %v19395_v42 }
 0xa92   :  { %8246 = vmatprep.subr.bf16.mxu1 %v10901_v30  ;;  %v7782_v21 = vpop.f32.mrf.mxu1  ;;  %v10967_v60 = vcombine.high %v19378_v46, %v19377_v44  ;;  %v19379_v30 = vld [vmem:[#allocation419_spill] sm:$0xff] }
 0xa94   :  { %v7784_v25 = vpop.f32.mrf.mxu1 }
 0xa95   :  { %8247 = vmatpush2.bf16.msra.mxu1 %v10900_v39 }
 0xa96   :  { %8248 = vmatprep.subr.bf16.mxu1 %v10899_v12  ;;  %v19382_v12 = vld [vmem:[#allocation407_spill] sm:$0xff] }
 0xa99   :  { %8249 = vmatpush2.bf16.msra.mxu1 %v10898_v58  ;;  %v10948_v58 = vcombine.low %v19382_v12, %v19381_v24 }
 0xa9a   :  { %8250 = vmatprep.subr.bf16.mxu1 %v10897_v1  ;;  %v19385_v1 = vld [vmem:[#allocation395_spill] sm:$0xff] }
 0xa9d   :  { %8251 = vmatpush2.bf16.msra.mxu1 %v10896_v27 }
 0xa9e   :  { %8252 = vmatprep.subr.bf16.mxu1 %v10895_v26 }
 0xaa1   :  { %v7821_v14 = vpop.f32.mrf.mxu0  ;;  %8253 = vmatpush2.bf16.msra.mxu1 %v10894_v31 }
 0xaa2   :  { %v17263_v51 = vadd.f32 %v7821_v14, %v7768_v4  ;;  %8254 = vmatprep.subr.bf16.mxu1 %v10893_v57  ;;  %v19384_v14 = vld [vmem:[#allocation399_spill] sm:$0xff]  ;;  %v10909_v57 = vcombine.high %v19392_v10, %v19391_v11 }
 0xaa3   :  { %v7823_v15 = vpop.f32.mrf.mxu0 }
 0xaa4   :  { %v17269_v49 = vadd.f32 %v7823_v15, %v7770_v40  ;;  %v19380_v40 = vld [vmem:[#allocation415_spill] sm:$0xff] }
 0xaa5   :  { %v7825_v2 = vpop.f32.mrf.mxu0  ;;  %8255 = vmatpush2.bf16.msra.mxu1 %v10892_v7  ;;  %v10957_v39 = vcombine.high %v19380_v40, %v19379_v30  ;;  %v10956_v32 = vcombine.low %v19380_v40, %v19379_v30  ;;  %v19393_v7 = vld [vmem:[#allocation491_spill] sm:$0xff] }
 0xaa6   :  { %v17271_v17 = vadd.f32 %v7825_v2, %v7772_v20  ;;  %8982 = vmatprep.subr.bf16.mxu1 %v10967_v60  ;;  %v10949_v20 = vcombine.high %v19382_v12, %v19381_v24  ;;  %v19387_v2 = vld [vmem:[#allocation387_spill] sm:$0xff]  ;;  %v11021_v60 = vcombine.high %v19396_v5, %v19395_v42 }
 0xaa7   :  { %v7827_v43 = vpop.f32.mrf.mxu0  ;;  %8931 = vmatprep.subr.bf16.mxu0 %v10957_v39  ;;  %v10925_v3 = vcombine.high %v19388_v41, %v19387_v2  ;;  %v10924_v26 = vcombine.low %v19388_v41, %v19387_v2  ;;  %v19397_v40 = vld [vmem:[#allocation475_spill] sm:$0xff] }
 0xaa8   :  { %v17277_v59 = vadd.f32 %v7827_v43, %v7774_v6  ;;  %8932 = vmatpush1.bf16.msra.mxu0 %v10956_v32  ;;  %v19383_v6 = vld [vmem:[#allocation403_spill] sm:$0xff] }
 0xaa9   :  { %v7831_v36 = vpop.f32.mrf.mxu0  ;;  %8933 = vmatprep.subr.bf16.mxu0 %v10949_v20  ;;  %v10941_v55 = vcombine.high %v19384_v14, %v19383_v6  ;;  %v10940_v50 = vcombine.low %v19384_v14, %v19383_v6  ;;  %v19390_v43 = vld [vmem:[#allocation375_spill] sm:$0xff] }
 0xaaa   :  { %v17279_v56 = vadd.f32 %v7831_v36, %v7778_v18  ;;  %v19386_v18 = vld [vmem:[#allocation391_spill] sm:$0xff] }
 0xaab   :  { %v7833_v9 = vpop.f32.mrf.mxu0  ;;  %v10933_v15 = vcombine.high %v19386_v18, %v19385_v1  ;;  %v10932_v27 = vcombine.low %v19386_v18, %v19385_v1  ;;  %v19398_v39 = vld [vmem:[#allocation471_spill] sm:$0xff] }
 0xaac   :  { %v17285_v53 = vadd.f32 %v7833_v9, %v7780_v54  ;;  %8934 = vmatpush1.bf16.msra.mxu0 %v10948_v58  ;;  %v19389_v54 = vld [vmem:[#allocation379_spill] sm:$0xff]  ;;  %v11013_v32 = vcombine.high %v19398_v39, %v19397_v40  ;;  %v11012_v24 = vcombine.low %v19398_v39, %v19397_v40 }
 0xaad   :  { %v7835_v63 = vpop.f32.mrf.mxu0  ;;  %8935 = vmatprep.subr.bf16.mxu0 %v10941_v55  ;;  %v10917_v31 = vcombine.high %v19390_v43, %v19389_v54  ;;  %v10916_v36 = vcombine.low %v19390_v43, %v19389_v54  ;;  %v19399_v20 = vld [vmem:[#allocation467_spill] sm:$0xff] }
 0xaae   :  { %v17287_v28 = vadd.f32 %v7835_v63, %v7782_v21  ;;  %v10908_v21 = vcombine.low %v19392_v10, %v19391_v11  ;;  %v19394_v63 = vld [vmem:[#allocation487_spill] sm:$0xff] }
 0xaaf   :  { %v7837_v33 = vpop.f32.mrf.mxu0  ;;  %v19400_v58 = vld [vmem:[#allocation463_spill] sm:$0xff] }
 0xab0   :  { %v17289_v4 = vadd.f32 %v7837_v33, %v7784_v25  ;;  %8936 = vmatpush1.bf16.msra.mxu0 %v10940_v50  ;;  %v11029_v25 = vcombine.high %v19394_v63, %v19393_v7  ;;  %v11028_v33 = vcombine.low %v19394_v63, %v19393_v7  ;;  %v11005_v6 = vcombine.high %v19400_v58, %v19399_v20  ;;  %v19404_v11 = vld [vmem:[#allocation447_spill] sm:$0xff] }
 0xab1   :  { %8937 = vmatprep.subr.bf16.mxu0 %v10933_v15  ;;  %v11004_v50 = vcombine.low %v19400_v58, %v19399_v20  ;;  %v19401_v15 = vld [vmem:[#allocation459_spill] sm:$0xff] }
 0xab4   :  { %8938 = vmatpush1.bf16.msra.mxu0 %v10932_v27  ;;  %v19402_v27 = vld [vmem:[#allocation455_spill] sm:$0xff] }
 0xab5   :  { %8939 = vmatprep.subr.bf16.mxu0 %v10925_v3  ;;  %v10997_v2 = vcombine.high %v19402_v27, %v19401_v15  ;;  %v10996_v54 = vcombine.low %v19402_v27, %v19401_v15 }
 0xab8   :  { %8940 = vmatpush1.bf16.msra.mxu0 %v10924_v26 }
 0xab9   :  { %8941 = vmatprep.subr.bf16.mxu0 %v10917_v31 }
 0xabc   :  { %8942 = vmatpush1.bf16.msra.mxu0 %v10916_v36  ;;  %v19403_v36 = vld [vmem:[#allocation451_spill] sm:$0xff] }
 0xabd   :  { %8943 = vmatprep.subr.bf16.mxu0 %v10909_v57  ;;  %v10989_v10 = vcombine.high %v19404_v11, %v19403_v36 }
 0xac0   :  { %8944 = vmatpush1.bf16.msra.mxu0 %v10908_v21 }
 0xac1   :  { %8945 = vmatprep.subr.bf16.mxu0 %v11029_v25 }
 0xac4   :  { %8946 = vmatpush2.bf16.msra.mxu0 %v11028_v33 }
 0xac5   :  { %8947 = vmatprep.subr.bf16.mxu0 %v11021_v60 }
 0xac6   :  { %v7874_v9 = vpop.f32.mrf.mxu1 }
 0xac8   :  { %v7876_v16 = vpop.f32.mrf.mxu1  ;;  %8948 = vmatpush2.bf16.msra.mxu0 %v11020_v22 }
 0xac9   :  { %8949 = vmatprep.subr.bf16.mxu0 %v11013_v32 }
 0xaca   :  { %v7878_v30 = vpop.f32.mrf.mxu1 }
 0xacc   :  { %v7880_v12 = vpop.f32.mrf.mxu1  ;;  %8950 = vmatpush2.bf16.msra.mxu0 %v11012_v24 }
 0xacd   :  { %8951 = vmatprep.subr.bf16.mxu0 %v11005_v6 }
 0xace   :  { %v7884_v1 = vpop.f32.mrf.mxu1 }
 0xad0   :  { %8952 = vmatpush2.bf16.msra.mxu0 %v11004_v50  ;;  %v7886_v43 = vpop.f32.mrf.mxu1 }
 0xad1   :  { %8953 = vmatprep.subr.bf16.mxu0 %v10997_v2 }
 0xad2   :  { %v7888_v7 = vpop.f32.mrf.mxu1 }
 0xad4   :  { %8954 = vmatpush2.bf16.msra.mxu0 %v10996_v54  ;;  %v7890_v42 = vpop.f32.mrf.mxu1 }
 0xad5   :  { %8955 = vmatprep.subr.bf16.mxu0 %v10989_v10 }
 0xae1   :  { %v7927_v14 = vpop.f32.mrf.mxu0 }
 0xae2   :  { %v17339_v55 = vadd.f32 %v7927_v14, %v7874_v9 }
 0xae3   :  { %v7929_v18 = vpop.f32.mrf.mxu0 }
 0xae4   :  { %v17345_v41 = vadd.f32 %v7929_v18, %v7876_v16 }
 0xae5   :  { %v7931_v3 = vpop.f32.mrf.mxu0 }
 0xae6   :  { %v17347_v26 = vadd.f32 %v7931_v3, %v7878_v30 }
 0xae7   :  { %v7933_v31 = vpop.f32.mrf.mxu0 }
 0xae8   :  { %v17353_v57 = vadd.f32 %v7933_v31, %v7880_v12 }
 0xae9   :  { %v7937_v21 = vpop.f32.mrf.mxu0 }
 0xaea   :  { %v17355_v9 = vadd.f32 %v7937_v21, %v7884_v1  ;;  %v10966_v21 = vcombine.low %v19378_v46, %v19377_v44  ;;  %v19407_v44 = vld [vmem:[#allocation412_spill] sm:$0xff] }
 0xaeb   :  { %v7939_v63 = vpop.f32.mrf.mxu0  ;;  %v19408_v46 = vld [vmem:[#allocation408_spill] sm:$0xff] }
 0xaec   :  { %v17357_v25 = vadd.f32 %v7939_v63, %v7886_v43 }
 0xaed   :  { %v7941_v33 = vpop.f32.mrf.mxu0 }
 0xaee   :  { %v17359_v16 = vadd.f32 %v7941_v33, %v7888_v7  ;;  %v19405_v33 = vld [vmem:[#allocation420_spill] sm:$0xff] }
 0xaef   :  { %v7943_v5 = vpop.f32.mrf.mxu0 }
 0xaf0   :  { %v17361_v60 = vadd.f32 %v7943_v5, %v7890_v42  ;;  %v19406_v42 = vld [vmem:[#allocation416_spill] sm:$0xff] }
 0xaf1   :  { %v10959_v5 = vcombine.high %v19406_v42, %v19405_v33 }
 0xb06   :  { %v7980_v22 = vpop.f32.mrf.mxu1 }
 0xb08   :  { %v7982_v30 = vpop.f32.mrf.mxu1 }
 0xb0a   :  { %v7984_v40 = vpop.f32.mrf.mxu1 }
 0xb0c   :  { %v7986_v39 = vpop.f32.mrf.mxu1 }
 0xb0e   :  { %v7990_v24 = vpop.f32.mrf.mxu1 }
 0xb10   :  { %v7992_v14 = vpop.f32.mrf.mxu1 }
 0xb12   :  { %v7994_v54 = vpop.f32.mrf.mxu1 }
 0xb21   :  { %v8033_v32 = vpop.f32.mrf.mxu0 }
 0xb22   :  { %v8034_v50 = vadd.f32 %v8033_v32, %v7980_v22 }
 0xb23   :  { %v8035_v12 = vpop.f32.mrf.mxu0 }
 0xb24   :  { %v8036_v58 = vadd.f32 %v8035_v12, %v7982_v30  ;;  %v8052_v43 = vmax.f32 %v8034_v50, 0.0 }
 0xb25   :  { %v8037_v20 = vpop.f32.mrf.mxu0 }
 0xb26   :  { %v8038_v6 = vadd.f32 %v8037_v20, %v7984_v40  ;;  %v8053_v2 = vmax.f32 %v8036_v58, 0.0  ;;  %v7996_v40 = vpop.f32.mrf.mxu1  ;;  %v10958_v20 = vcombine.low %v19406_v42, %v19405_v33 }
 0xb27   :  { %v8039_v1 = vpop.f32.mrf.mxu0 }
 0xb28   :  { %v8040_v18 = vadd.f32 %v8039_v1, %v7986_v39  ;;  %v8054_v15 = vmax.f32 %v8038_v6, 0.0  ;;  %v10951_v6 = vcombine.high %v19408_v46, %v19407_v44 }
 0xb29   :  { %v8043_v27 = vpop.f32.mrf.mxu0 }
 0xb2a   :  { %v8055_v3 = vmax.f32 %v8040_v18, 0.0  ;;  %v8060_v7 = vpack.c.bf16 %v8054_v15, %v8052_v43  ;;  %v8044_v39 = vadd.f32 %v8043_v27, %v7990_v24  ;;  %v10950_v24 = vcombine.low %v19408_v46, %v19407_v44  ;;  %v19409_v27 = vld [vmem:[#allocation404_spill] sm:$0xff] }
 0xb2b   :  { %v8045_v31 = vpop.f32.mrf.mxu0  ;;  %v19411_v43 = vld [vmem:[#allocation396_spill] sm:$0xff] }
 0xb2c   :  { %v8061_v10 = vpack.c.bf16 %v8055_v3, %v8053_v2  ;;  %v8046_v30 = vadd.f32 %v8045_v31, %v7992_v14  ;;  %v8056_v18 = vmax.f32 %v8044_v39, 0.0  ;;  %v19410_v2 = vld [vmem:[#allocation400_spill] sm:$0xff] }
 0xb2d   :  { %v8047_v63 = vpop.f32.mrf.mxu0  ;;  %v10943_v3 = vcombine.high %v19410_v2, %v19409_v27  ;;  %v19412_v31 = vld [vmem:[#allocation392_spill] sm:$0xff] }
 0xb2e   :  { %v8048_v22 = vadd.f32 %v8047_v63, %v7994_v54  ;;  %8256 = vmatprep.mubr.bf16.mxu1 %v8061_v10  ;;  %v8057_v50 = vmax.f32 %v8046_v30, 0.0  ;;  %v10942_v54 = vcombine.low %v19410_v2, %v19409_v27  ;;  %v10935_v10 = vcombine.high %v19412_v31, %v19411_v43  ;;  %v19414_v63 = vld [vmem:[#allocation384_spill] sm:$0xff] }
 0xb2f   :  { %v8049_v32 = vpop.f32.mrf.mxu0  ;;  %8257 = vmatmul.mubr.bf16.vlgmr.msra.gmra.mxu1 %v8060_v7  ;;  %v19413_v7 = vld [vmem:[#allocation388_spill] sm:$0xff] }
 0xb30   :  { %v8050_v12 = vadd.f32 %v8049_v32, %v7996_v40  ;;  %8983 = vmatpush1.bf16.msra.mxu1 %v10966_v21  ;;  %v8058_v58 = vmax.f32 %v8048_v22, 0.0  ;;  %v10934_v21 = vcombine.low %v19412_v31, %v19411_v43  ;;  %v10927_v33 = vcombine.high %v19414_v63, %v19413_v7  ;;  %v19416_v30 = vld [vmem:[#allocation376_spill] sm:$0xff] }
 0xb31   :  { %8984 = vmatprep.subr.bf16.mxu1 %v10959_v5  ;;  %v10926_v42 = vcombine.low %v19414_v63, %v19413_v7  ;;  %v19415_v5 = vld [vmem:[#allocation380_spill] sm:$0xff] }
 0xb32   :  { %v8059_v1 = vmax.f32 %v8050_v12, 0.0  ;;  %v8062_v15 = vpack.c.bf16 %v8058_v58, %v8056_v18  ;;  %v10919_v22 = vcombine.high %v19416_v30, %v19415_v5  ;;  %v10918_v40 = vcombine.low %v19416_v30, %v19415_v5  ;;  %v19417_v39 = vld [vmem:[#allocation372_spill] sm:$0xff] }
 0xb33   :  { %v19418_v32 = vld [vmem:[#allocation368_spill] sm:$0xff]  ;;  %v10988_v30 = vcombine.low %v19404_v11, %v19403_v36  ;;  %v19435_v36 = vld [vmem:[#allocation435_spill] sm:$0xff] }
 0xb34   :  { %v8063_v14 = vpack.c.bf16 %v8059_v1, %v8057_v50  ;;  %8985 = vmatpush1.bf16.msra.mxu1 %v10958_v20  ;;  %v10911_v12 = vcombine.high %v19418_v32, %v19417_v39  ;;  %v10910_v20 = vcombine.low %v19418_v32, %v19417_v39  ;;  %v19419_v58 = vld [vmem:[#allocation492_spill] sm:$0xff]  ;;  %v19432_v39 = vld [vmem:[#allocation439_spill] sm:$0xff] }
 0xb35   :  { %8986 = vmatprep.subr.bf16.mxu1 %v10951_v6  ;;  %v19420_v44 = vld [vmem:[#allocation488_spill] sm:$0xff]  ;;  %8956 = vmatpush2.bf16.msra.mxu0 %v10988_v30  ;;  %v19436_v11 = vld [vmem:[#allocation431_spill] sm:$0xff] }
 0xb36   :  { %8266 = vmatprep.mubr.bf16.mxu1 %v8063_v14  ;;  %v11031_v46 = vcombine.high %v19420_v44, %v19419_v58  ;;  %v11030_v6 = vcombine.low %v19420_v44, %v19419_v58  ;;  %v19421_v50 = vld [vmem:[#allocation484_spill] sm:$0xff] }
 0xb37   :  { %8267 = vmatmul.mubr.bf16.gmra.mxu1 %v8062_v15  ;;  %v19422_v1 = vld [vmem:[#allocation480_spill] sm:$0xff] }
 0xb38   :  { %8987 = vmatpush1.bf16.msra.mxu1 %v10950_v24  ;;  %v11023_v18 = vcombine.high %v19422_v1, %v19421_v50  ;;  %v11022_v14 = vcombine.low %v19422_v1, %v19421_v50  ;;  %v19423_v24 = vld [vmem:[#allocation476_spill] sm:$0xff] }
 0xb39   :  { %8988 = vmatprep.subr.bf16.mxu1 %v10943_v3  ;;  %v19424_v15 = vld [vmem:[#allocation472_spill] sm:$0xff] }
 0xb3a   :  { %v11015_v27 = vcombine.high %v19424_v15, %v19423_v24  ;;  %v11014_v2 = vcombine.low %v19424_v15, %v19423_v24  ;;  %v19425_v3 = vld [vmem:[#allocation468_spill] sm:$0xff]  ;;  %v19439_v15 = vld [vmem:[#allocation429_spill] sm:$0xff] }
 0xb3b   :  { %v19437_v50 = vld [vmem:[#allocation436_spill] sm:$0xff] }
 0xb3c   :  { %8989 = vmatpush1.bf16.msra.mxu1 %v10942_v54  ;;  %v19426_v54 = vld [vmem:[#allocation464_spill] sm:$0xff] }
 0xb3d   :  { %8990 = vmatprep.subr.bf16.mxu1 %v10935_v10  ;;  %v11007_v43 = vcombine.high %v19426_v54, %v19425_v3  ;;  %v11006_v31 = vcombine.low %v19426_v54, %v19425_v3  ;;  %v19427_v10 = vld [vmem:[#allocation460_spill] sm:$0xff]  ;;  %v19441_v3 = vld [vmem:[#allocation430_spill] sm:$0xff] }
 0xb3e   :  { %v19438_v1 = vld [vmem:[#allocation432_spill] sm:$0xff]  ;;  %v19442_v54 = vld [vmem:[#allocation426_spill] sm:$0xff] }
 0xb3f   :  { %v10974_v24 = vcombine.low %v19438_v1, %v19437_v50 }
 0xb40   :  { %8991 = vmatpush1.bf16.msra.mxu1 %v10934_v21  ;;  %v19428_v21 = vld [vmem:[#allocation456_spill] sm:$0xff] }
 0xb41   :  { %8992 = vmatprep.subr.bf16.mxu1 %v10927_v33  ;;  %v10999_v7 = vcombine.high %v19428_v21, %v19427_v10  ;;  %v10998_v63 = vcombine.low %v19428_v21, %v19427_v10  ;;  %v19429_v33 = vld [vmem:[#allocation452_spill] sm:$0xff] }
 0xb44   :  { %8993 = vmatpush1.bf16.msra.mxu1 %v10926_v42  ;;  %v19430_v42 = vld [vmem:[#allocation448_spill] sm:$0xff] }
 0xb45   :  { %8994 = vmatprep.subr.bf16.mxu1 %v10919_v22  ;;  %v10991_v5 = vcombine.high %v19430_v42, %v19429_v33  ;;  %v10990_v22 = vcombine.low %v19430_v42, %v19429_v33 }
 0xb48   :  { %8995 = vmatpush1.bf16.msra.mxu1 %v10918_v40  ;;  %v19431_v40 = vld [vmem:[#allocation443_spill] sm:$0xff] }
 0xb49   :  { %8996 = vmatprep.subr.bf16.mxu1 %v10911_v12  ;;  %v10981_v32 = vcombine.high %v19432_v39, %v19431_v40  ;;  %v19433_v12 = vld [vmem:[#allocation444_spill] sm:$0xff]  ;;  %v10980_v44 = vcombine.low %v19432_v39, %v19431_v40  ;;  %v10970_v39 = vcombine.low %v19442_v54, %v19441_v3 }
 0xb4b   :  { %8957 = vmatprep.subr.bf16.mxu0 %v10981_v32 }
 0xb4c   :  { %8997 = vmatpush1.bf16.msra.mxu1 %v10910_v20  ;;  %v19434_v20 = vld [vmem:[#allocation440_spill] sm:$0xff]  ;;  %8958 = vmatpush2.bf16.msra.mxu0 %v10980_v44 }
 0xb4d   :  { %8998 = vmatprep.subr.bf16.mxu1 %v11031_v46  ;;  %v10983_v58 = vcombine.high %v19434_v20, %v19433_v12  ;;  %v10982_v46 = vcombine.low %v19434_v20, %v19433_v12  ;;  %v19443_v20 = vld [vmem:[#allocation421_spill] sm:$0xff] }
 0xb50   :  { %8999 = vmatpush2.bf16.msra.mxu1 %v11030_v6  ;;  %v10973_v6 = vcombine.high %v19436_v11, %v19435_v36 }
 0xb51   :  { %9000 = vmatprep.subr.bf16.mxu1 %v11023_v18  ;;  %v10975_v18 = vcombine.high %v19438_v1, %v19437_v50 }
 0xb52   :  { %8959 = vmatprep.subr.bf16.mxu0 %v10973_v6 }
 0xb54   :  { %9001 = vmatpush2.bf16.msra.mxu1 %v11022_v14  ;;  %v10972_v14 = vcombine.low %v19436_v11, %v19435_v36  ;;  %v19446_v36 = vld [vmem:[#allocation418_spill] sm:$0xff] }
 0xb55   :  { %9002 = vmatprep.subr.bf16.mxu1 %v11015_v27  ;;  %v19440_v27 = vld [vmem:[#allocation425_spill] sm:$0xff] }
 0xb56   :  { %8960 = vmatpush2.bf16.msra.mxu0 %v10972_v14  ;;  %v10968_v40 = vcombine.low %v19440_v27, %v19439_v15 }
 0xb58   :  { %9003 = vmatpush2.bf16.msra.mxu1 %v11014_v2  ;;  %v10969_v2 = vcombine.high %v19440_v27, %v19439_v15  ;;  %v19448_v15 = vld [vmem:[#allocation409_spill] sm:$0xff] }
 0xb59   :  { %9004 = vmatprep.subr.bf16.mxu1 %v11007_v43  ;;  %v10971_v43 = vcombine.high %v19442_v54, %v19441_v3  ;;  %v19450_v3 = vld [vmem:[#allocation410_spill] sm:$0xff] }
 0xb5a   :  { %9035 = vmatprep.subr.bf16.mxu0 %v10969_v2  ;;  %v19449_v2 = vld [vmem:[#allocation414_spill] sm:$0xff] }
 0xb5b   :  { %v10955_v54 = vcombine.high %v19450_v3, %v19449_v2 }
 0xb5c   :  { %9005 = vmatpush2.bf16.msra.mxu1 %v11006_v31 }
 0xb5d   :  { %9006 = vmatprep.subr.bf16.mxu1 %v10999_v7 }
 0xb60   :  { %9007 = vmatpush2.bf16.msra.mxu1 %v10998_v63 }
 0xb61   :  { %9008 = vmatprep.subr.bf16.mxu1 %v10991_v5 }
 0xb64   :  { %9009 = vmatpush2.bf16.msra.mxu1 %v10990_v22 }
 0xb65   :  { %9010 = vmatprep.subr.bf16.mxu1 %v10983_v58  ;;  %v19444_v58 = vld [vmem:[#allocation417_spill] sm:$0xff] }
 0xb66   :  { %v10961_v44 = vcombine.high %v19444_v58, %v19443_v20  ;;  %v10960_v50 = vcombine.low %v19444_v58, %v19443_v20 }
 0xb68   :  { %9011 = vmatpush2.bf16.msra.mxu1 %v10982_v46  ;;  %v19445_v46 = vld [vmem:[#allocation422_spill] sm:$0xff] }
 0xb69   :  { %9012 = vmatprep.subr.bf16.mxu1 %v10975_v18  ;;  %v10963_v11 = vcombine.high %v19446_v36, %v19445_v46  ;;  %v10962_v1 = vcombine.low %v19446_v36, %v19445_v46  ;;  %v19456_v46 = vld [vmem:[#allocation393_spill] sm:$0xff] }
 0xb6c   :  { %9013 = vmatpush2.bf16.msra.mxu1 %v10974_v24  ;;  %v19447_v24 = vld [vmem:[#allocation413_spill] sm:$0xff] }
 0xb6d   :  { %9088 = vmatprep.subr.bf16.mxu1 %v10971_v43  ;;  %v10953_v27 = vcombine.high %v19448_v15, %v19447_v24 }
 0xbef   :  { %v8258_v31 = vpop.f32.mrf.mxu1 }
 0xbf0   :  { %v8277_v5 = vmax.f32 %v8258_v31, 0.0 }
 0xbf1   :  { %v8260_v10 = vpop.f32.mrf.mxu1 }
 0xbf2   :  { %v8278_v33 = vmax.f32 %v8260_v10, 0.0 }
 0xbf3   :  { %v8262_v21 = vpop.f32.mrf.mxu1 }
 0xbf4   :  { %v8279_v7 = vmax.f32 %v8262_v21, 0.0 }
 0xbf5   :  { %v8264_v63 = vpop.f32.mrf.mxu1 }
 0xbf6   :  { %v8280_v42 = vmax.f32 %v8264_v63, 0.0  ;;  %v17443_v32 = vpack.c.bf16 %v8279_v7, %v8277_v5  ;;  %v10952_v7 = vcombine.low %v19448_v15, %v19447_v24  ;;  %v10954_v63 = vcombine.low %v19450_v3, %v19449_v2  ;;  %v19452_v5 = vld [vmem:[#allocation401_spill] sm:$0xff]  ;;  %v19461_v15 = vld [vmem:[#allocation390_spill] sm:$0xff] }
 0xbf7   :  { %v8268_v30 = vpop.f32.mrf.mxu1 }
 0xbf8   :  { %v8286_v22 = vpack.c.bf16 %v8280_v42, %v8278_v33  ;;  %v8281_v10 = vmax.f32 %v8268_v30, 0.0  ;;  %v19451_v42 = vld [vmem:[#allocation405_spill] sm:$0xff] }
 0xbf9   :  { %v8270_v12 = vpop.f32.mrf.mxu1  ;;  %v10945_v30 = vcombine.high %v19452_v5, %v19451_v42  ;;  %v10944_v20 = vcombine.low %v19452_v5, %v19451_v42 }
 0xbfa   :  { %8961 = vmatprep.mubr.bf16.mxu0 %v8286_v22  ;;  %9014 = vmatprep.mubr.bf16.mxu1 %v8286_v22  ;;  %v8282_v43 = vmax.f32 %v8270_v12, 0.0 }
 0xbfb   :  { %v8272_v6 = vpop.f32.mrf.mxu1  ;;  %8962 = vmatmul.mubr.bf16.vlgmr.msra.gmra.mxu0 %v17443_v32  ;;  %9015 = vmatmul.mubr.bf16.vlgmr.msra.gmra.mxu1 %v17443_v32 }
 0xbfc   :  { %9036 = vmatpush1.bf16.msra.mxu0 %v10968_v40  ;;  %9089 = vmatpush1.bf16.msra.mxu1 %v10970_v39  ;;  %v8283_v18 = vmax.f32 %v8272_v6, 0.0  ;;  %v19453_v40 = vld [vmem:[#allocation406_spill] sm:$0xff] }
 0xbfd   :  { %v8274_v14 = vpop.f32.mrf.mxu1  ;;  %9037 = vmatprep.subr.bf16.mxu0 %v10961_v44  ;;  %9090 = vmatprep.subr.bf16.mxu1 %v10963_v11  ;;  %v19454_v39 = vld [vmem:[#allocation402_spill] sm:$0xff]  ;;  %v19455_v44 = vld [vmem:[#allocation397_spill] sm:$0xff] }
 0xbfe   :  { %v8284_v31 = vmax.f32 %v8274_v14, 0.0  ;;  %v17465_v33 = vpack.c.bf16 %v8283_v18, %v8281_v10  ;;  %v10947_v12 = vcombine.high %v19454_v39, %v19453_v40  ;;  %v10946_v58 = vcombine.low %v19454_v39, %v19453_v40  ;;  %v19457_v11 = vld [vmem:[#allocation398_spill] sm:$0xff]  ;;  %v19459_v14 = vld [vmem:[#allocation389_spill] sm:$0xff] }
 0xbff   :  { %v10937_v36 = vcombine.high %v19456_v46, %v19455_v44  ;;  %v19458_v6 = vld [vmem:[#allocation394_spill] sm:$0xff]  ;;  %v19467_v40 = vld [vmem:[#allocation373_spill] sm:$0xff] }
 0xc00   :  { %v17459_v21 = vpack.c.bf16 %v8284_v31, %v8282_v43  ;;  %9038 = vmatpush1.bf16.msra.mxu0 %v10960_v50  ;;  %9091 = vmatpush1.bf16.msra.mxu1 %v10962_v1  ;;  %v10939_v50 = vcombine.high %v19458_v6, %v19457_v11  ;;  %v10936_v1 = vcombine.low %v19456_v46, %v19455_v44  ;;  %v19463_v43 = vld [vmem:[#allocation381_spill] sm:$0xff] }
 0xc01   :  { %9039 = vmatprep.subr.bf16.mxu0 %v10953_v27  ;;  %9092 = vmatprep.subr.bf16.mxu1 %v10955_v54  ;;  %v10938_v18 = vcombine.low %v19458_v6, %v19457_v11  ;;  %v19462_v27 = vld [vmem:[#allocation386_spill] sm:$0xff]  ;;  %v19464_v31 = vld [vmem:[#allocation377_spill] sm:$0xff] }
 0xc02   :  { %8971 = vmatprep.mubr.bf16.mxu0 %v17459_v21  ;;  %9024 = vmatprep.mubr.bf16.mxu1 %v17459_v21  ;;  %v10931_v2 = vcombine.high %v19462_v27, %v19461_v15  ;;  %v10930_v54 = vcombine.low %v19462_v27, %v19461_v15  ;;  %v10921_v10 = vcombine.high %v19464_v31, %v19463_v43  ;;  %v19468_v39 = vld [vmem:[#allocation369_spill] sm:$0xff] }
 0xc03   :  { %8972 = vmatmul.mubr.bf16.gmra.mxu0 %v17465_v33  ;;  %9025 = vmatmul.mubr.bf16.gmra.mxu1 %v17465_v33  ;;  %v10920_v5 = vcombine.low %v19464_v31, %v19463_v43  ;;  %v10912_v46 = vcombine.low %v19468_v39, %v19467_v40  ;;  %v19471_v11 = vld [vmem:[#allocation493_spill] sm:$0xff] }
 0xc04   :  { %9040 = vmatpush1.bf16.msra.mxu0 %v10952_v7  ;;  %9093 = vmatpush1.bf16.msra.mxu1 %v10954_v63  ;;  %v19465_v7 = vld [vmem:[#allocation382_spill] sm:$0xff]  ;;  %v19472_v6 = vld [vmem:[#allocation489_spill] sm:$0xff] }
 0xc05   :  { %9067 = vmatprep.mubr.bf16.mxu0 %v8286_v22  ;;  %9120 = vmatprep.mubr.bf16.mxu1 %v8286_v22  ;;  %v19460_v22 = vld [vmem:[#allocation385_spill] sm:$0xff]  ;;  %v19466_v63 = vld [vmem:[#allocation378_spill] sm:$0xff] }
 0xc06   :  { %9041 = vmatprep.subr.bf16.mxu0 %v10945_v30  ;;  %9094 = vmatprep.subr.bf16.mxu1 %v10947_v12  ;;  %v10929_v24 = vcombine.high %v19460_v22, %v19459_v14  ;;  %v10928_v3 = vcombine.low %v19460_v22, %v19459_v14  ;;  %v10923_v42 = vcombine.high %v19466_v63, %v19465_v7  ;;  %v19475_v15 = vld [vmem:[#allocation485_spill] sm:$0xff] }
 0xc07   :  { %v10922_v30 = vcombine.low %v19466_v63, %v19465_v7  ;;  %v10913_v12 = vcombine.high %v19468_v39, %v19467_v40  ;;  %v11032_v22 = vcombine.low %v19472_v6, %v19471_v11  ;;  %v19476_v27 = vld [vmem:[#allocation481_spill] sm:$0xff] }
 0xc08   :  { %9042 = vmatpush1.bf16.msra.mxu0 %v10944_v20  ;;  %9095 = vmatpush1.bf16.msra.mxu1 %v10946_v58  ;;  %v19469_v20 = vld [vmem:[#allocation374_spill] sm:$0xff]  ;;  %v11024_v31 = vcombine.low %v19476_v27, %v19475_v15  ;;  %v19479_v7 = vld [vmem:[#allocation477_spill] sm:$0xff] }
 0xc09   :  { %9043 = vmatprep.subr.bf16.mxu0 %v10937_v36  ;;  %9096 = vmatprep.subr.bf16.mxu1 %v10939_v50  ;;  %v19470_v58 = vld [vmem:[#allocation370_spill] sm:$0xff]  ;;  %v11033_v50 = vcombine.high %v19472_v6, %v19471_v11  ;;  %v19480_v63 = vld [vmem:[#allocation473_spill] sm:$0xff] }
 0xc0a   :  { %v10915_v44 = vcombine.high %v19470_v58, %v19469_v20  ;;  %v10914_v36 = vcombine.low %v19470_v58, %v19469_v20  ;;  %v11016_v39 = vcombine.low %v19480_v63, %v19479_v7  ;;  %v19483_v20 = vld [vmem:[#allocation469_spill] sm:$0xff] }
 0xc0b   :  { %v19484_v58 = vld [vmem:[#allocation465_spill] sm:$0xff] }
 0xc0c   :  { %9044 = vmatpush1.bf16.msra.mxu0 %v10936_v1  ;;  %9097 = vmatpush1.bf16.msra.mxu1 %v10938_v18  ;;  %v19473_v1 = vld [vmem:[#allocation494_spill] sm:$0xff]  ;;  %v11008_v6 = vcombine.low %v19484_v58, %v19483_v20 }
 0xc0d   :  { %9045 = vmatprep.subr.bf16.mxu0 %v10929_v24  ;;  %9098 = vmatprep.subr.bf16.mxu1 %v10931_v2  ;;  %v19474_v18 = vld [vmem:[#allocation490_spill] sm:$0xff]  ;;  %v11025_v2 = vcombine.high %v19476_v27, %v19475_v15 }
 0xc0e   :  { %v11035_v14 = vcombine.high %v19474_v18, %v19473_v1  ;;  %v11034_v24 = vcombine.low %v19474_v18, %v19473_v1  ;;  %v19487_v1 = vld [vmem:[#allocation461_spill] sm:$0xff] }
 0xc0f   :  { %v19488_v18 = vld [vmem:[#allocation457_spill] sm:$0xff] }
 0xc10   :  { %9046 = vmatpush1.bf16.msra.mxu0 %v10928_v3  ;;  %9099 = vmatpush1.bf16.msra.mxu1 %v10930_v54  ;;  %v19477_v3 = vld [vmem:[#allocation486_spill] sm:$0xff]  ;;  %v11000_v27 = vcombine.low %v19488_v18, %v19487_v1 }
 0xc11   :  { %9047 = vmatprep.subr.bf16.mxu0 %v10921_v10  ;;  %9100 = vmatprep.subr.bf16.mxu1 %v10923_v42  ;;  %v19478_v54 = vld [vmem:[#allocation482_spill] sm:$0xff]  ;;  %v11017_v42 = vcombine.high %v19480_v63, %v19479_v7 }
 0xc12   :  { %v11027_v43 = vcombine.high %v19478_v54, %v19477_v3  ;;  %v11026_v10 = vcombine.low %v19478_v54, %v19477_v3  ;;  %v19491_v3 = vld [vmem:[#allocation453_spill] sm:$0xff] }
 0xc13   :  { %v19492_v54 = vld [vmem:[#allocation449_spill] sm:$0xff] }
 0xc14   :  { %9048 = vmatpush1.bf16.msra.mxu0 %v10920_v5  ;;  %9101 = vmatpush1.bf16.msra.mxu1 %v10922_v30  ;;  %v19481_v5 = vld [vmem:[#allocation478_spill] sm:$0xff]  ;;  %v10992_v63 = vcombine.low %v19492_v54, %v19491_v3 }
 0xc15   :  { %9049 = vmatprep.subr.bf16.mxu0 %v10913_v12  ;;  %9102 = vmatprep.subr.bf16.mxu1 %v10915_v44  ;;  %v19482_v30 = vld [vmem:[#allocation474_spill] sm:$0xff]  ;;  %v11009_v44 = vcombine.high %v19484_v58, %v19483_v20 }
 0xc16   :  { %v11019_v40 = vcombine.high %v19482_v30, %v19481_v5  ;;  %v11018_v12 = vcombine.low %v19482_v30, %v19481_v5  ;;  %v19495_v5 = vld [vmem:[#allocation445_spill] sm:$0xff] }
 0xc17   :  { %v19496_v30 = vld [vmem:[#allocation441_spill] sm:$0xff] }
 0xc18   :  { %9050 = vmatpush1.bf16.msra.mxu0 %v10912_v46  ;;  %9103 = vmatpush1.bf16.msra.mxu1 %v10914_v36  ;;  %v19485_v46 = vld [vmem:[#allocation470_spill] sm:$0xff]  ;;  %v10984_v58 = vcombine.low %v19496_v30, %v19495_v5 }
 0xc19   :  { %9051 = vmatprep.subr.bf16.mxu0 %v11033_v50  ;;  %9104 = vmatprep.subr.bf16.mxu1 %v11035_v14  ;;  %v19486_v36 = vld [vmem:[#allocation466_spill] sm:$0xff]  ;;  %v11001_v14 = vcombine.high %v19488_v18, %v19487_v1 }
 0xc1a   :  { %v11011_v11 = vcombine.high %v19486_v36, %v19485_v46  ;;  %v11010_v50 = vcombine.low %v19486_v36, %v19485_v46  ;;  %v19499_v46 = vld [vmem:[#allocation437_spill] sm:$0xff] }
 0xc1b   :  { %v19500_v36 = vld [vmem:[#allocation433_spill] sm:$0xff] }
 0xc1c   :  { %9052 = vmatpush2.bf16.msra.mxu0 %v11032_v22  ;;  %9105 = vmatpush2.bf16.msra.mxu1 %v11034_v24  ;;  %v19489_v22 = vld [vmem:[#allocation462_spill] sm:$0xff]  ;;  %v10976_v18 = vcombine.low %v19500_v36, %v19499_v46 }
 0xc1d   :  { %9053 = vmatprep.subr.bf16.mxu0 %v11025_v2  ;;  %9106 = vmatprep.subr.bf16.mxu1 %v11027_v43  ;;  %v19490_v24 = vld [vmem:[#allocation458_spill] sm:$0xff]  ;;  %v10993_v43 = vcombine.high %v19492_v54, %v19491_v3 }
 0xc1e   :  { %v11003_v15 = vcombine.high %v19490_v24, %v19489_v22  ;;  %v11002_v2 = vcombine.low %v19490_v24, %v19489_v22  ;;  %v19503_v22 = vmov 0.0   ;;  %v11991_v24 = vld [vmem:[%s17839_s13 + $0x78] sm:$0xff]   ;;  %v12002_v3 = vld [vmem:[%s17839_s13 + $0x20] sm:$0xff]  }
 0xc1f   :  { %v12005_v54 = vld [vmem:[%s17839_s13 + $0x58] sm:$0xff]  }
 0xc20   :  { %9054 = vmatpush2.bf16.msra.mxu0 %v11024_v31  ;;  %9107 = vmatpush2.bf16.msra.mxu1 %v11026_v10  ;;  %v19493_v31 = vld [vmem:[#allocation454_spill] sm:$0xff] }
 0xc21   :  { %9055 = vmatprep.subr.bf16.mxu0 %v11017_v42  ;;  %9108 = vmatprep.subr.bf16.mxu1 %v11019_v40  ;;  %v19494_v10 = vld [vmem:[#allocation450_spill] sm:$0xff]  ;;  %v10985_v40 = vcombine.high %v19496_v30, %v19495_v5 }
 0xc22   :  { %v10995_v7 = vcombine.high %v19494_v10, %v19493_v31  ;;  %v10994_v42 = vcombine.low %v19494_v10, %v19493_v31  ;;  %v12009_v31 = vld [vmem:[%s17839_s13 + $0x50] sm:$0xff]  }
 0xc23   :  { %v12010_v10 = vld [vmem:[%s17839_s13 + $0x10] sm:$0xff]  }
 0xc24   :  { %9056 = vmatpush2.bf16.msra.mxu0 %v11016_v39  ;;  %9109 = vmatpush2.bf16.msra.mxu1 %v11018_v12  ;;  %v19497_v39 = vld [vmem:[#allocation446_spill] sm:$0xff] }
 0xc25   :  { %9057 = vmatprep.subr.bf16.mxu0 %v11009_v44  ;;  %9110 = vmatprep.subr.bf16.mxu1 %v11011_v11  ;;  %v19498_v12 = vld [vmem:[#allocation442_spill] sm:$0xff]  ;;  %v10977_v11 = vcombine.high %v19500_v36, %v19499_v46 }
 0xc26   :  { %v10987_v20 = vcombine.high %v19498_v12, %v19497_v39  ;;  %v10986_v44 = vcombine.low %v19498_v12, %v19497_v39  ;;  %v9173_v39 = vlaneseq }
 0xc28   :  { %9058 = vmatpush2.bf16.msra.mxu0 %v11008_v6  ;;  %9111 = vmatpush2.bf16.msra.mxu1 %v11010_v50  ;;  %v19501_v6 = vld [vmem:[#allocation438_spill] sm:$0xff]  ;;  %v9174_v46 = vshrl.u32 %v9173_v39, 7 }
 0xc29   :  { %9059 = vmatprep.subr.bf16.mxu0 %v11001_v14  ;;  %9112 = vmatprep.subr.bf16.mxu1 %v11003_v15  ;;  %v19502_v50 = vld [vmem:[#allocation434_spill] sm:$0xff] }
 0xc2a   :  { %v10979_v1 = vcombine.high %v19502_v50, %v19501_v6  ;;  %v10978_v14 = vcombine.low %v19502_v50, %v19501_v6  ;;  %v11992_v15 = vld [vmem:[%s17839_s13 + $0x38] sm:$0xff]  }
 0xc2c   :  { %9060 = vmatpush2.bf16.msra.mxu0 %v11000_v27  ;;  %9113 = vmatpush2.bf16.msra.mxu1 %v11002_v2  ;;  %v11998_v27 = vld [vmem:[%s17839_s13 + $0x28] sm:$0xff]   ;;  %v12001_v2 = vld [vmem:[%s17839_s13 + $0x60] sm:$0xff]  }
 0xc2d   :  { %9061 = vmatprep.subr.bf16.mxu0 %v10993_v43  ;;  %9114 = vmatprep.subr.bf16.mxu1 %v10995_v7  ;;  %v12006_v43 = vld [vmem:[%s17839_s13 + $0x18] sm:$0xff]   ;;  %v12013_v7 = vld [vmem:[%s17839_s13 + $0x48] sm:$0xff]  }
 0xc30   :  { %9062 = vmatpush2.bf16.msra.mxu0 %v10992_v63  ;;  %9115 = vmatpush2.bf16.msra.mxu1 %v10994_v42  ;;  %v12014_v63 = vld [vmem:[%s17839_s13 + $0x8] sm:$0xff]  }
 0xc31   :  { %9063 = vmatprep.subr.bf16.mxu0 %v10985_v40  ;;  %9116 = vmatprep.subr.bf16.mxu1 %v10987_v20 }
 0xc34   :  { %9064 = vmatpush2.bf16.msra.mxu0 %v10984_v58  ;;  %9117 = vmatpush2.bf16.msra.mxu1 %v10986_v44 }
 0xc35   :  { %9065 = vmatprep.subr.bf16.mxu0 %v10977_v11  ;;  %9118 = vmatprep.subr.bf16.mxu1 %v10979_v1  ;;  %v9177_v1 = vmul.u32 16, %v9174_v46 }
 0xc38   :  { %9066 = vmatpush2.bf16.msra.mxu0 %v10976_v18  ;;  %9119 = vmatpush2.bf16.msra.mxu1 %v10978_v14 }
 0xc39   :  { %11266 = vmatprep.subr.bf16.mxu1 %v11991_v24 }
 0xc3b   :  { %9068 = vmatmul.mubr.bf16.vlgmr.msra.gmra.mxu0 %v17443_v32  ;;  %9121 = vmatmul.mubr.bf16.vlgmr.msra.gmra.mxu1 %v17443_v32  ;;  %v11993_v32 = vld [vmem:[%s17839_s13 + $0x70] sm:$0xff]  }
 0xc3c   :  { %9077 = vmatprep.mubr.bf16.mxu0 %v17459_v21  ;;  %9130 = vmatprep.mubr.bf16.mxu1 %v17459_v21  ;;  %v11994_v21 = vld [vmem:[%s17839_s13 + $0x30] sm:$0xff]  }
 0xc3d   :  { %11267 = vmatpush3.bf16.msra.mxu1 %v11992_v15 }
 0xc3e   :  { %11268 = vmatprep.subr.bf16.mxu1 %v11993_v32  ;;  %v9176_v32 = vand.u32 127, %v9173_v39 }
 0xc40   :  { %vm9178_vm6 = vcmp.ge.s32.totalorder %v9176_v32, %v9177_v1 }
 0xc41   :  { %11269 = vmatpush3.bf16.msra.mxu1 %v11994_v21  ;;  %v9179_v21 = vadd.s32 16, %v9177_v1 }
 0xc43   :  { %9078 = vmatmul.mubr.bf16.gmra.mxu0 %v17465_v33  ;;  %9131 = vmatmul.mubr.bf16.gmra.mxu1 %v17465_v33  ;;  %v11997_v33 = vld [vmem:[%s17839_s13 + $0x68] sm:$0xff]   ;;  %vm9180_vm7 = vcmp.lt.s32.totalorder %v9176_v32, %v9179_v21 }
 0xc44   :  { %9250 = vmatprep.mubr.f32.mxu0 %v19503_v22  ;;  %11270 = vmatprep.subr.bf16.mxu1 %v11997_v33  ;;  %vm9181_vm8 = vmand %vm9178_vm6, %vm9180_vm7 }
 0xc45   :  { %11271 = vmatpush3.bf16.msra.mxu1 %v11998_v27 }
 0xc46   :  { %11272 = vmatprep.subr.bf16.mxu1 %v12001_v2 }
 0xc49   :  { %11273 = vmatpush3.bf16.msra.mxu1 %v12002_v3 }
 0xc4a   :  { %11274 = vmatprep.subr.bf16.mxu1 %v12005_v54 }
 0xc4d   :  { %11275 = vmatpush3.bf16.msra.mxu1 %v12006_v43 }
 0xc4e   :  { %11276 = vmatprep.subr.bf16.mxu1 %v12009_v31 }
 0xc51   :  { %11277 = vmatpush3.bf16.msra.mxu1 %v12010_v10 }
 0xc52   :  { %11278 = vmatprep.subr.bf16.mxu1 %v12013_v7 }
 0xc55   :  { %11279 = vmatpush3.bf16.msra.mxu1 %v12014_v63 }
 0xcbb   :  { %v8963_v42 = vpop.f32.mrf.mxu0  ;;  %v9016_v5 = vpop.f32.mrf.mxu1 }
 0xcbc   :  { %v8964_v63 = vadd.f32 %v8963_v42, %v17082_v48  ;;  %v17637_v48 = vsel %vm9181_vm8, 0.0625, %v19503_v22 }
 0xcbd   :  { %v8965_v30 = vpop.f32.mrf.mxu0  ;;  %v9018_v40 = vpop.f32.mrf.mxu1 }
 0xcbf   :  { %v8967_v12 = vpop.f32.mrf.mxu0  ;;  %v9020_v20 = vpop.f32.mrf.mxu1 }
 0xcc0   :  { %v8968_v43 = vadd.f32 %v8967_v12, %v17095_v19 }
 0xcc1   :  { %v8969_v58 = vpop.f32.mrf.mxu0  ;;  %v9022_v44 = vpop.f32.mrf.mxu1 }
 0xcc2   :  { %v8970_v3 = vadd.f32 %v8969_v58, %v17103_v45  ;;  %v9149_v45 = vmax.f32 %v8968_v43, 0.0  ;;  %v9023_v42 = vadd.f32 %v9022_v44, %v17200_v29  ;;  %v9021_v58 = vadd.f32 %v9020_v20, %v17198_v38 }
 0xcc3   :  { %v8973_v36 = vpop.f32.mrf.mxu0  ;;  %v9026_v11 = vpop.f32.mrf.mxu1 }
 0xcc4   :  { %v8974_v2 = vadd.f32 %v8973_v36, %v17108_v23  ;;  %v9152_v29 = vmax.f32 %v9023_v42, 0.0  ;;  %v9151_v44 = vmax.f32 %v9021_v58, 0.0  ;;  %v12000_v58 = vld [vmem:[%s17839_s13 + $0xb0] sm:$0xff]  }
 0xcc5   :  { %v8975_v6 = vpop.f32.mrf.mxu0  ;;  %v9028_v50 = vpop.f32.mrf.mxu1 }
 0xcc6   :  { %v8976_v33 = vadd.f32 %v8975_v6, %v17117_v13  ;;  %v9157_v13 = vmax.f32 %v8974_v2, 0.0  ;;  %v9029_v12 = vadd.f32 %v9028_v50, %v17205_v0 }
 0xcc7   :  { %v8977_v18 = vpop.f32.mrf.mxu0  ;;  %v9030_v24 = vpop.f32.mrf.mxu1 }
 0xcc8   :  { %v8978_v14 = vadd.f32 %v8977_v18, %v17121_v52  ;;  %v8966_v52 = vadd.f32 %v8965_v30, %v17091_v62  ;;  %v9158_v7 = vmax.f32 %v8976_v33, 0.0  ;;  %v9031_v19 = vadd.f32 %v9030_v24, %v17207_v35 }
 0xcc9   :  { %v8979_v15 = vpop.f32.mrf.mxu0  ;;  %v9032_v10 = vpop.f32.mrf.mxu1  ;;  %v9141_v62 = vmax.f32 %v8964_v63, 0.0  ;;  %v9027_v30 = vadd.f32 %v9026_v11, %v17203_v8  ;;  %v9019_v35 = vadd.f32 %v9018_v40, %v17196_v37  ;;  %v9160_v36 = vmax.f32 %v9029_v12, 0.0 }
 0xcca   :  { %v8980_v27 = vadd.f32 %v8979_v15, %v17129_v47  ;;  %v9165_v31 = vmax.f32 %v8978_v14, 0.0  ;;  %v9150_v47 = vmax.f32 %v8970_v3, 0.0  ;;  %v9033_v23 = vadd.f32 %v9032_v10, %v17213_v34 }
 0xccb   :  { %v9142_v39 = vmax.f32 %v8966_v52, 0.0  ;;  %v9167_v46 = vmax.f32 %v9031_v19, 0.0  ;;  %v9017_v8 = vadd.f32 %v9016_v5, %v17193_v61  ;;  %v9159_v0 = vmax.f32 %v9027_v30, 0.0 }
 0xccc   :  { %v9166_v54 = vmax.f32 %v8980_v27, 0.0  ;;  %v9168_v34 = vmax.f32 %v9033_v23, 0.0  ;;  %v9144_v38 = vmax.f32 %v9019_v35, 0.0  ;;  %v12004_v35 = vld [vmem:[%s17839_s13 + $0xa8] sm:$0xff]  }
 0xccd   :  { %v9143_v20 = vmax.f32 %v9017_v8, 0.0  ;;  %v12008_v8 = vld [vmem:[%s17839_s13 + $0xa0] sm:$0xff]  }
 0xcce   :  { %9210 = vmatprep.subr.mxu0 %v9166_v54 }
 0xccf   :  { %9211 = vmatpush1.msra.mxu0 %v9165_v31 }
 0xcd0   :  { %9212 = vmatprep.subr.mxu0 %v9158_v7 }
 0xcd1   :  { %9213 = vmatpush1.msra.mxu0 %v9157_v13 }
 0xcd2   :  { %9214 = vmatprep.subr.mxu0 %v9150_v47 }
 0xcd3   :  { %9215 = vmatpush1.msra.mxu0 %v9149_v45 }
 0xcd4   :  { %9216 = vmatprep.subr.mxu0 %v9142_v39 }
 0xcd5   :  { %9217 = vmatpush1.msra.mxu0 %v9141_v62 }
 0xcd6   :  { %9281 = vmatprep.subr.mxu0 %v9168_v34  ;;  %11036 = vmatmul.mubr.msk.f32.vlgmr.msra.gmra.mxu0 %vm1323_vm1, %v17637_v48  ;;  %v11999_v34 = vld [vmem:[%s17839_s13 + $0xf0] sm:$0xff]  }
 0xcd7   :  { %9282 = vmatpush1.msra.mxu0 %v9167_v46  ;;  %9321 = vmatprep.mubr.f32.mxu0 %v19503_v22  ;;  %v12003_v46 = vld [vmem:[%s17839_s13 + $0xe8] sm:$0xff]  }
 0xcd8   :  { %9283 = vmatprep.subr.mxu0 %v9160_v36  ;;  %v12023_v36 = vld [vmem:[%s17839_s13 + $0x178] sm:$0xff]  }
 0xcd9   :  { %9284 = vmatpush1.msra.mxu0 %v9159_v0  ;;  %v12011_v0 = vld [vmem:[%s17839_s13 + $0xd8] sm:$0xff]  }
 0xcda   :  { %9285 = vmatprep.subr.mxu0 %v9152_v29  ;;  %v12012_v29 = vld [vmem:[%s17839_s13 + $0x98] sm:$0xff]  }
 0xcdb   :  { %9286 = vmatpush1.msra.mxu0 %v9151_v44  ;;  %v12015_v44 = vld [vmem:[%s17839_s13 + $0xd0] sm:$0xff]  }
 0xcdc   :  { %9287 = vmatprep.subr.mxu0 %v9144_v38  ;;  %v12016_v38 = vld [vmem:[%s17839_s13 + $0x90] sm:$0xff]  }
 0xcdd   :  { %9288 = vmatpush1.msra.mxu0 %v9143_v20  ;;  %v12019_v20 = vld [vmem:[%s17839_s13 + $0xc8] sm:$0xff]  }
 0xcde   :  { %11037 = vmatmul.mubr.msk.f32.vlgmr.msra.gmra.mxu0 %vm1323_vm1, %v17637_v48 }
 0xcdf   :  { %9392 = vmatprep.mubr.f32.mxu0 %v19503_v22 }
 0xcfb   :  { %v9069_v61 = vpop.f32.mrf.mxu0  ;;  %v9122_v37 = vpop.f32.mrf.mxu1 }
 0xcfd   :  { %v9071_v5 = vpop.f32.mrf.mxu0  ;;  %v9124_v40 = vpop.f32.mrf.mxu1 }
 0xcfe   :  { %v9072_v63 = vadd.f32 %v9071_v5, %v17269_v49  ;;  %v9125_v12 = vadd.f32 %v9124_v40, %v17345_v41  ;;  %v12018_v41 = vld [vmem:[%s17839_s13] sm:$0xff]   ;;  %v12028_v40 = vld [vmem:[%s17839_s13 + $0x1f8] sm:$0xff]  }
 0xcff   :  { %v9073_v11 = vpop.f32.mrf.mxu0  ;;  %v9126_v6 = vpop.f32.mrf.mxu1  ;;  %v12022_v5 = vld [vmem:[%s17839_s13 + $0x80] sm:$0xff]  }
 0xd00   :  { %v9074_v10 = vadd.f32 %v9073_v11, %v17271_v17  ;;  %v9146_v23 = vmax.f32 %v9072_v63, 0.0  ;;  %v9127_v39 = vadd.f32 %v9126_v6, %v17347_v26  ;;  %v12017_v26 = vld [vmem:[%s17839_s13 + $0x40] sm:$0xff]   ;;  %v9148_v30 = vmax.f32 %v9125_v12, 0.0  ;;  %v12037_v63 = vld [vmem:[%s17839_s13 + $0x118] sm:$0xff]  }
 0xd01   :  { %v9075_v50 = vpop.f32.mrf.mxu0  ;;  %v9128_v1 = vpop.f32.mrf.mxu1  ;;  %11280 = vmatprep.subr.bf16.mxu1 %v12017_v26  ;;  %v12053_v12 = vld [vmem:[%s17839_s13 + $0x1c0] sm:$0xff]  }
 0xd02   :  { %v9076_v43 = vadd.f32 %v9075_v50, %v17277_v59  ;;  %11281 = vmatpush3.bf16.msra.mxu1 %v12018_v41 }
 0xd03   :  { %v9079_v18 = vpop.f32.mrf.mxu0  ;;  %v9132_v14 = vpop.f32.mrf.mxu1  ;;  %11310 = vmatprep.subr.bf16.mxu1 %v12023_v36 }
 0xd04   :  { %v9080_v54 = vadd.f32 %v9079_v18, %v17279_v56  ;;  %v9153_v56 = vmax.f32 %v9074_v10, 0.0  ;;  %v9133_v49 = vadd.f32 %v9132_v14, %v17355_v9  ;;  %v9155_v9 = vmax.f32 %v9127_v39, 0.0  ;;  %v12024_v18 = vld [vmem:[%s17839_s13 + $0x138] sm:$0xff]   ;;  %v12025_v14 = vld [vmem:[%s17839_s13 + $0x170] sm:$0xff]   ;;  %v12051_v39 = vld [vmem:[%s17839_s13 + $0x1c8] sm:$0xff]  }
 0xd05   :  { %v9081_v24 = vpop.f32.mrf.mxu0  ;;  %v9134_v15 = vpop.f32.mrf.mxu1  ;;  %v12034_v10 = vld [vmem:[%s17839_s13 + $0x1b0] sm:$0xff]  }
 0xd06   :  { %v9082_v2 = vadd.f32 %v9081_v24, %v17285_v53  ;;  %v9161_v47 = vmax.f32 %v9080_v54, 0.0  ;;  %v9154_v53 = vmax.f32 %v9076_v43, 0.0  ;;  %v9135_v17 = vadd.f32 %v9134_v15, %v17357_v25  ;;  %v12026_v24 = vld [vmem:[%s17839_s13 + $0x130] sm:$0xff]   ;;  %v12031_v54 = vld [vmem:[%s17839_s13 + $0x160] sm:$0xff]  }
 0xd07   :  { %v9083_v32 = vpop.f32.mrf.mxu0  ;;  %v9136_v33 = vpop.f32.mrf.mxu1  ;;  %v9123_v25 = vadd.f32 %v9122_v37, %v17339_v55  ;;  %v9163_v62 = vmax.f32 %v9133_v49, 0.0  ;;  %v11995_v55 = vld [vmem:[%s17839_s13 + $0xf8] sm:$0xff]   ;;  %v12021_v37 = vld [vmem:[%s17839_s13 + $0xc0] sm:$0xff]   ;;  %v12032_v43 = vld [vmem:[%s17839_s13 + $0x1f0] sm:$0xff]  }
 0xd08   :  { %v9084_v21 = vadd.f32 %v9083_v32, %v17287_v28  ;;  %v9162_v13 = vmax.f32 %v9082_v2, 0.0  ;;  %v9070_v28 = vadd.f32 %v9069_v61, %v17263_v51  ;;  %v9137_v59 = vadd.f32 %v9136_v33, %v17359_v16  ;;  %v12020_v61 = vld [vmem:[%s17839_s13 + $0x88] sm:$0xff]   ;;  %v12048_v49 = vld [vmem:[%s17839_s13 + $0x1d0] sm:$0xff]  }
 0xd09   :  { %v9085_v27 = vpop.f32.mrf.mxu0  ;;  %v9138_v7 = vpop.f32.mrf.mxu1  ;;  %v9129_v51 = vadd.f32 %v9128_v1, %v17353_v57  ;;  %v9164_v16 = vmax.f32 %v9135_v17, 0.0  ;;  %v9147_v42 = vmax.f32 %v9123_v25, 0.0  ;;  %v12027_v32 = vld [vmem:[%s17839_s13 + $0x168] sm:$0xff]   ;;  %v12046_v17 = vld [vmem:[%s17839_s13 + $0x198] sm:$0xff]  }
 0xd0a   :  { %v9086_v3 = vadd.f32 %v9085_v27, %v17289_v4  ;;  %v9169_v52 = vmax.f32 %v9084_v21, 0.0  ;;  %v9139_v4 = vadd.f32 %v9138_v7, %v17361_v60  ;;  %v9145_v45 = vmax.f32 %v9070_v28, 0.0  ;;  %v12029_v2 = vld [vmem:[%s17839_s13 + $0x128] sm:$0xff]   ;;  %v12039_v28 = vld [vmem:[%s17839_s13 + $0x150] sm:$0xff]  }
 0xd0b   :  { %v9171_v60 = vmax.f32 %v9137_v59, 0.0  ;;  %v9156_v57 = vmax.f32 %v9129_v51, 0.0  ;;  %v12036_v7 = vld [vmem:[%s17839_s13 + $0x1e8] sm:$0xff]   ;;  %v12044_v59 = vld [vmem:[%s17839_s13 + $0x1d8] sm:$0xff]   ;;  %v12049_v51 = vld [vmem:[%s17839_s13 + $0x100] sm:$0xff]  }
 0xd0c   :  { %v9170_v31 = vmax.f32 %v9086_v3, 0.0  ;;  %v9172_v19 = vmax.f32 %v9139_v4, 0.0  ;;  %v12030_v3 = vld [vmem:[%s17839_s13 + $0x1b8] sm:$0xff]   ;;  %v12042_v4 = vld [vmem:[%s17839_s13 + $0x1a0] sm:$0xff]  }
 0xd0e   :  { %9352 = vmatprep.subr.mxu0 %v9170_v31  ;;  %v12033_v31 = vld [vmem:[%s17839_s13 + $0x120] sm:$0xff]  }
 0xd0f   :  { %9353 = vmatpush1.msra.mxu0 %v9169_v52  ;;  %v12035_v52 = vld [vmem:[%s17839_s13 + $0x158] sm:$0xff]  }
 0xd10   :  { %9354 = vmatprep.subr.mxu0 %v9162_v13  ;;  %v12038_v13 = vld [vmem:[%s17839_s13 + $0x1a8] sm:$0xff]  }
 0xd11   :  { %9355 = vmatpush1.msra.mxu0 %v9161_v47  ;;  %v12040_v47 = vld [vmem:[%s17839_s13 + $0x1e0] sm:$0xff]  }
 0xd12   :  { %9356 = vmatprep.subr.mxu0 %v9154_v53  ;;  %v12041_v53 = vld [vmem:[%s17839_s13 + $0x110] sm:$0xff]  }
 0xd13   :  { %9357 = vmatpush1.msra.mxu0 %v9153_v56  ;;  %v12043_v56 = vld [vmem:[%s17839_s13 + $0x148] sm:$0xff]  }
 0xd14   :  { %9358 = vmatprep.subr.mxu0 %v9146_v23  ;;  %v12045_v23 = vld [vmem:[%s17839_s13 + $0x108] sm:$0xff]  }
 0xd15   :  { %9359 = vmatpush1.msra.mxu0 %v9145_v45  ;;  %v12047_v45 = vld [vmem:[%s17839_s13 + $0x140] sm:$0xff]  }
 0xd16   :  { %11038 = vmatmul.mubr.msk.f32.vlgmr.msra.gmra.mxu0 %vm1323_vm1, %v17637_v48  ;;  %9423 = vmatprep.subr.mxu0 %v9172_v19  ;;  %v12050_v19 = vld [vmem:[%s17839_s13 + $0x190] sm:$0xff]  }
 0xd17   :  { %9424 = vmatpush1.msra.mxu0 %v9171_v60  ;;  %9463 = vmatprep.mubr.f32.mxu0 %v19503_v22  ;;  %v11996_v22 = vld [vmem:[%s17839_s13 + $0xb8] sm:$0xff]   ;;  %v12052_v60 = vld [vmem:[%s17839_s13 + $0x188] sm:$0xff]  }
 0xd18   :  { %9425 = vmatprep.subr.mxu0 %v9164_v16  ;;  %v12054_v16 = vld [vmem:[%s17839_s13 + $0x180] sm:$0xff]  }
 0xd19   :  { %9426 = vmatpush1.msra.mxu0 %v9163_v62 }
 0xd1a   :  { %9427 = vmatprep.subr.mxu0 %v9156_v57 }
 0xd1b   :  { %9428 = vmatpush1.msra.mxu0 %v9155_v9 }
 0xd1c   :  { %9429 = vmatprep.subr.mxu0 %v9148_v30 }
 0xd1d   :  { %9430 = vmatpush1.msra.mxu0 %v9147_v42 }
 0xd1e   :  { %11039 = vmatmul.mubr.msk.f32.vlgmr.msra.gmra.mxu0 %vm1323_vm1, %v17637_v48  ;;  %11288 = vmatprep.subr.bf16.mxu0 %v11995_v55  ;;  %v12007_v48 = vld [vmem:[%s17839_s13 + $0xe0] sm:$0xff]  }
 0xd1f   :  { %11289 = vmatpush3.bf16.msra.mxu0 %v11996_v22 }
 0xd20   :  { %11290 = vmatprep.subr.bf16.mxu0 %v11999_v34 }
 0xd23   :  { %11291 = vmatpush3.bf16.msra.mxu0 %v12000_v58 }
 0xd24   :  { %11292 = vmatprep.subr.bf16.mxu0 %v12003_v46 }
 0xd27   :  { %11293 = vmatpush3.bf16.msra.mxu0 %v12004_v35 }
 0xd28   :  { %11294 = vmatprep.subr.bf16.mxu0 %v12007_v48 }
 0xd2b   :  { %11295 = vmatpush3.bf16.msra.mxu0 %v12008_v8 }
 0xd2c   :  { %11296 = vmatprep.subr.bf16.mxu0 %v12011_v0 }
 0xd2f   :  { %11297 = vmatpush3.bf16.msra.mxu0 %v12012_v29  ;;  %v11040_v29 = vld [vmem:[%s17840_s14] ss:$0 sm:$0xff] }
 0xd30   :  { %11298 = vmatprep.subr.bf16.mxu0 %v12015_v44 }
 0xd33   :  { %11299 = vmatpush3.bf16.msra.mxu0 %v12016_v38 }
 0xd34   :  { %11300 = vmatprep.subr.bf16.mxu0 %v12019_v20 }
 0xd37   :  { %11301 = vmatpush3.bf16.msra.mxu0 %v12020_v61 }
 0xd38   :  { %11302 = vmatprep.subr.bf16.mxu0 %v12021_v37 }
 0xd3b   :  { %11303 = vmatpush3.bf16.msra.mxu0 %v12022_v5 }
 0xd3c   :  { %11332 = vmatprep.subr.bf16.mxu0 %v12028_v40 }
 0xd96   :  { %v9252_v11 = vpop.f32.mrf.mxu0 }
 0xd97   :  { %v9598_v6 = vpack.c.bf16 %v9252_v11, %v9252_v11 }
 0xd98   :  { %v9254_v50 = vpop.f32.mrf.mxu0 }
 0xd99   :  { %v9599_v1 = vpack.c.bf16 %v9254_v50, %v9254_v50 }
 0xd9b   :  { %10029 = vmatprep.mubr.bf16.mxu1 %v9599_v1 }
 0xd9c   :  { %10030 = vmatmul.mubr.bf16.vlgmr.msra.gmra.mxu1 %v9598_v6 }
 0xd9d   :  { %11311 = vmatpush3.bf16.msra.mxu1 %v12024_v18 }
 0xd9e   :  { %v9323_v15 = vpop.f32.mrf.mxu0  ;;  %11312 = vmatprep.subr.bf16.mxu1 %v12025_v14 }
 0xd9f   :  { %v9600_v21 = vpack.c.bf16 %v9323_v15, %v9323_v15 }
 0xda0   :  { %v9325_v33 = vpop.f32.mrf.mxu0 }
 0xda1   :  { %v9601_v27 = vpack.c.bf16 %v9325_v33, %v9325_v33  ;;  %11313 = vmatpush3.bf16.msra.mxu1 %v12026_v24 }
 0xda2   :  { %11314 = vmatprep.subr.bf16.mxu1 %v12027_v32 }
 0xda3   :  { %10069 = vmatprep.mubr.bf16.mxu0 %v9601_v27 }
 0xda4   :  { %10070 = vmatmul.mubr.bf16.vlgmr.msra.gmra.mxu0 %v9600_v21 }
 0xda5   :  { %11315 = vmatpush3.bf16.msra.mxu1 %v12029_v2  ;;  %11333 = vmatpush3.bf16.msra.mxu0 %v12030_v3 }
 0xda6   :  { %11316 = vmatprep.subr.bf16.mxu1 %v12031_v54  ;;  %11334 = vmatprep.subr.bf16.mxu0 %v12032_v43 }
 0xda9   :  { %11317 = vmatpush3.bf16.msra.mxu1 %v12033_v31  ;;  %11335 = vmatpush3.bf16.msra.mxu0 %v12034_v10 }
 0xdaa   :  { %11318 = vmatprep.subr.bf16.mxu1 %v12035_v52  ;;  %11336 = vmatprep.subr.bf16.mxu0 %v12036_v7 }
 0xdad   :  { %11319 = vmatpush3.bf16.msra.mxu1 %v12037_v63  ;;  %11337 = vmatpush3.bf16.msra.mxu0 %v12038_v13 }
 0xdae   :  { %11320 = vmatprep.subr.bf16.mxu1 %v12039_v28  ;;  %11338 = vmatprep.subr.bf16.mxu0 %v12040_v47 }
 0xdb1   :  { %11321 = vmatpush3.bf16.msra.mxu1 %v12041_v53  ;;  %11339 = vmatpush3.bf16.msra.mxu0 %v12042_v4 }
 0xdb2   :  { %11322 = vmatprep.subr.bf16.mxu1 %v12043_v56  ;;  %11340 = vmatprep.subr.bf16.mxu0 %v12044_v59 }
 0xdb5   :  { %11323 = vmatpush3.bf16.msra.mxu1 %v12045_v23  ;;  %11341 = vmatpush3.bf16.msra.mxu0 %v12046_v17 }
 0xdb6   :  { %11324 = vmatprep.subr.bf16.mxu1 %v12047_v45  ;;  %11342 = vmatprep.subr.bf16.mxu0 %v12048_v49 }
 0xdb9   :  { %11325 = vmatpush3.bf16.msra.mxu1 %v12049_v51  ;;  %11343 = vmatpush3.bf16.msra.mxu0 %v12050_v19 }
 0xdba   :  { %11344 = vmatprep.subr.bf16.mxu0 %v12051_v39 }
 0xdbd   :  { %11345 = vmatpush3.bf16.msra.mxu0 %v12052_v60 }
 0xdbe   :  { %11346 = vmatprep.subr.bf16.mxu0 %v12053_v12 }
 0xdc1   :  { %11347 = vmatpush3.bf16.msra.mxu0 %v12054_v16 }
 0xdd6   :  { %v9394_v25 = vpop.f32.mrf.mxu0 }
 0xdd7   :  { %v9602_v9 = vpack.c.bf16 %v9394_v25, %v9394_v25 }
 0xdd8   :  { %v9396_v62 = vpop.f32.mrf.mxu0 }
 0xdd9   :  { %v9603_v57 = vpack.c.bf16 %v9396_v62, %v9396_v62 }
 0xddb   :  { %10109 = vmatprep.mubr.bf16.mxu1 %v9603_v57 }
 0xddc   :  { %10110 = vmatmul.mubr.bf16.vlgmr.msra.gmra.mxu1 %v9602_v9 }
 0xdde   :  { %v9465_v26 = vpop.f32.mrf.mxu0 }
 0xddf   :  { %v9604_v55 = vpack.c.bf16 %v9465_v26, %v9465_v26 }
 0xde0   :  { %v9467_v41 = vpop.f32.mrf.mxu0 }
 0xde1   :  { %v9605_v30 = vpack.c.bf16 %v9467_v41, %v9467_v41 }
 0xde3   :  { %10149 = vmatprep.mubr.bf16.mxu0 %v9605_v30 }
 0xde4   :  { %10150 = vmatmul.mubr.bf16.vlgmr.msra.gmra.mxu0 %v9604_v55 }
 0xe5c   :  { %v11282_v42 = vpop.f32.mrf.mxu1 }
 0xe5e   :  { %v11283_v22 = vpop.f32.mrf.mxu1 }
 0xe5f   :  { %v11284_v34 = vadd.f32 %v11283_v22, %v11282_v42 }
 0xe60   :  { %v11285_v58 = vpop.f32.mrf.mxu1 }
 0xe61   :  { %v10032_v20 = vadd.f32 %v11284_v34, %v11040_v29 }
 0xe62   :  { %v11286_v46 = vpop.f32.mrf.mxu1 }
 0xe64   :  { %v11304_v35 = vpop.f32.mrf.mxu0 }
 0xe66   :  { %v11305_v48 = vpop.f32.mrf.mxu0 }
 0xe67   :  { %v11306_v61 = vadd.f32 %v11305_v48, %v11304_v35 }
 0xe68   :  { %v11307_v36 = vpop.f32.mrf.mxu0 }
 0xe69   :  { %v10072_v11 = vadd.f32 %v11306_v61, %v10032_v20 }
 0xe6a   :  { %v11308_v8 = vpop.f32.mrf.mxu0 }
 0xe9c   :  { %v11326_v0 = vpop.f32.mrf.mxu1 }
 0xe9e   :  { %v11327_v44 = vpop.f32.mrf.mxu1 }
 0xe9f   :  { %v11328_v5 = vadd.f32 %v11327_v44, %v11326_v0 }
 0xea0   :  { %v11329_v38 = vpop.f32.mrf.mxu1 }
 0xea1   :  { %v10112_v50 = vadd.f32 %v11328_v5, %v10072_v11 }
 0xea2   :  { %v11330_v37 = vpop.f32.mrf.mxu1 }
 0xea4   :  { %v11348_v40 = vpop.f32.mrf.mxu0 }
 0xea6   :  { %v11349_v6 = vpop.f32.mrf.mxu0 }
 0xea7   :  { %v11350_v1 = vadd.f32 %v11349_v6, %v11348_v40 }
 0xea8   :  { %v11351_v18 = vpop.f32.mrf.mxu0 }
 0xea9   :  { %v10152_v14 = vadd.f32 %v11350_v1, %v10112_v50 }
 0xeaa   :  { %v11352_v24 = vpop.f32.mrf.mxu0 }
 0xeab   :  { %10157 = vst [vmem:[#allocation6] sm:$0x3] %v10152_v14 }
 0xeac   :  { %12066 = shalt.err (!%p12063_p4)
}
 0xead   :  { %10167 = dma.vmem_to_hbm [thread:$0]  %s10165_s28, 32, %s17841_s15, [#allocation7]  }
 0xeae   :  { %12081 = dma.done.wait [#allocation7], 32  }
 0xeaf   :  { %12082 = vsyncadd [#allocation7], 4294967264 }
 0xeb0   :  { %10171 = vsyncpa [#allocation7], 1 }
 0xeb1   :  { %10172 = vsyncmov [#allocation5] }
 0xeb4   :  { %s10173_s30 = vpop.sfrf %10172 }
 0xeb5   :  { %p11105_p5 = scmp.ne.s32.totalorder %s10173_s30, 0 }
 0xeb7   :  { %10177 = shalt.err (%p11105_p5)  }
 0xeb8   :  { %10179 = vsyncmov [#allocation5 + $0x1] }
 0xebb   :  { %s10180_s4 = vpop.sfrf %10179 }
 0xebc   :  { %p11106_p6 = scmp.ne.s32.totalorder %s10180_s4, 0 }
 0xebe   :  { %10184 = shalt.err (%p11106_p6)  }
 0xebf   :  { %10186 = vsyncmov [#allocation5 + $0x2] }
 0xec2   :  { %s10187_s0 = vpop.sfrf %10186 }
 0xec3   :  { %p11107_p7 = scmp.ne.s32.totalorder %s10187_s0, 0 }
 0xec5   :  { %10191 = shalt.err (%p11107_p7)  }

</bundles_post_ra>
